<compile_context>
chip_gen: v7x
topology: tpu7x:2x2x1
jax: 0.10.0
libtpu: 0.0.40
codegen_flags: <defaults>
</compile_context>

<pallas_src>
import numpy as np
import jax
import jax.numpy as jnp
from jax import lax
from jax.experimental import pallas as pl
from jax.experimental.pallas import tpu as pltpu

# ---------------- synthetic CLIP config (small) ----------------
N_CLS = 4          # number of classnames
N_CTX = 4          # learned context tokens
SEQ = 16           # context length (77 in real CLIP)
D = 64             # ctx_dim / transformer width
HEADS = 4
DH = D // HEADS
LAYERS = 2
HIDDEN = 4 * D
FEAT = 512         # text_projection output dim == visual feature dim
BATCH = 2
EPS = 1e-5
T = N_CLS * SEQ    # all classes flattened into one token slab


def _ln(x, w, b):
    mu = jnp.mean(x, axis=-1, keepdims=True)
    xc = x - mu
    var = jnp.mean(xc * xc, axis=-1, keepdims=True)
    return xc * lax.rsqrt(var + EPS) * w + b


# ---------------- fused Pallas kernel: text encoder + logits epilogue ----------------
def clip_feat_kernel(prompts_ref, pos_ref, eot_ref,
                     ln1_w_ref, ln1_b_ref,
                     q_w_ref, q_b_ref, k_w_ref, k_b_ref, v_w_ref, v_b_ref,
                     po_w_ref, po_b_ref, ln2_w_ref, ln2_b_ref,
                     fc1_w_ref, fc1_b_ref, fc2_w_ref, fc2_b_ref,
                     lnf_w_ref, lnf_b_ref, tproj_ref, img_ref, scale_ref,
                     out_ref):
    f32, bf16 = jnp.float32, jnp.bfloat16

    # prompts + positional_embedding (TextEncoder.forward; the permutes are no-ops here)
    x = prompts_ref[...].reshape(N_CLS, SEQ, D) + pos_ref[...]
    x = x.reshape(T, D)

    # per-class causal mask, built ONCE (layer- and class-invariant)
    r = lax.broadcasted_iota(jnp.int32, (SEQ, SEQ), 0)
    c = lax.broadcasted_iota(jnp.int32, (SEQ, SEQ), 1)
    causal = jnp.where(c <= r, 0.0, -1e30).astype(f32)

    for l in range(LAYERS):   # static unroll; weights are fully VMEM-resident
        # ---- pre-LN multi-head self-attention, block-diagonal over classes ----
        h = _ln(x, ln1_w_ref[l], ln1_b_ref[l]).astype(bf16)
        q = jnp.dot(h, q_w_ref[l], preferred_element_type=f32) + q_b_ref[l]  # scale folded
        k = jnp.dot(h, k_w_ref[l], preferred_element_type=f32) + k_b_ref[l]
        v = jnp.dot(h, v_w_ref[l], preferred_element_type=f32) + v_b_ref[l]

        o_heads = []
        for hh in range(HEADS):
            lo = hh * DH
            qh = q[:, lo:lo + DH].reshape(N_CLS, SEQ, DH).astype(bf16)
            kh = k[:, lo:lo + DH].reshape(N_CLS, SEQ, DH).astype(bf16)
            vh = v[:, lo:lo + DH].reshape(N_CLS, SEQ, DH).astype(bf16)
            s = jnp.einsum('cqd,ckd->cqk', qh, kh,
                           preferred_element_type=f32) + causal            # (N_CLS,SEQ,SEQ)
            s = s - jnp.max(s, axis=-1, keepdims=True)
            p = jnp.exp(s)
            p = p * pl.reciprocal(jnp.sum(p, axis=-1, keepdims=True), approx=True)
            o_h = jnp.einsum('cqk,ckd->cqd', p.astype(bf16), vh,
                             preferred_element_type=f32)                   # (N_CLS,SEQ,DH)
            o_heads.append(o_h.reshape(T, DH))
        attn = jnp.concatenate(o_heads, axis=-1).astype(bf16)              # (T, D)
        x = x + jnp.dot(attn, po_w_ref[l], preferred_element_type=f32) + po_b_ref[l]

        # ---- MLP with QuickGELU ----
        h = _ln(x, ln2_w_ref[l], ln2_b_ref[l])
        h = jnp.dot(h.astype(bf16), fc1_w_ref[l],
                    preferred_element_type=f32) + fc1_b_ref[l]
        h = h * jax.nn.sigmoid(1.702 * h)
        x = x + jnp.dot(h.astype(bf16), fc2_w_ref[l],
                        preferred_element_type=f32) + fc2_b_ref[l]

    # ---- epilogue: EOT gather -> ln_final -> text_projection -> norms -> logits ----
    col = lax.broadcasted_iota(jnp.int32, (N_CLS, T), 1)
    row = lax.broadcasted_iota(jnp.int32, (N_CLS, T), 0)
    onehot = (col == row * SEQ + eot_ref[...]).astype(f32)                 # (N_CLS, T)
    feat = jnp.dot(onehot, x, preferred_element_type=f32)                  # (N_CLS, D)
    feat = _ln(feat, lnf_w_ref[...], lnf_b_ref[...])                       # LN on gathered rows only
    tf = jnp.dot(feat.astype(bf16), tproj_ref[...],
                 preferred_element_type=f32)                               # (N_CLS, FEAT)
    tf = tf * lax.rsqrt(jnp.sum(tf * tf, axis=-1, keepdims=True))
    img = img_ref[...]
    img = img * lax.rsqrt(jnp.sum(img * img, axis=-1, keepdims=True))
    logits = lax.dot_general(img.astype(bf16), tf.astype(bf16),
                             (((1,), (1,)), ((), ())),
                             preferred_element_type=f32)                   # (BATCH, N_CLS)
    out_ref[...] = logits * scale_ref[0, 0]


# ---------------- CustomCLIP_feat.forward (precomputed-feature branch) ----------------
def custom_clip_feat_forward(image, prompts, pos, eot_idx, w, logit_scale):
    assert image.shape[-1] == FEAT, "only the precomputed-feature branch is supported"
    batch = image.shape[0]
    f32, bf16 = jnp.float32, jnp.bfloat16
    attn_scale = jnp.float32(DH ** -0.5)

    # ---- one-time weight prep (amortized; split qkv, fold attn_scale into q) ----
    qkv_w = w['qkv_w'].astype(f32)
    qkv_b = w['qkv_b'].astype(f32)
    q_w = (qkv_w[:, :, :D] * attn_scale).astype(bf16)
    k_w = qkv_w[:, :, D:2 * D].astype(bf16)
    v_w = qkv_w[:, :, 2 * D:].astype(bf16)
    q_b = qkv_b[:, :, :D] * attn_scale
    k_b = qkv_b[:, :, D:2 * D]
    v_b = qkv_b[:, :, 2 * D:]

    args = [
        prompts.reshape(T, D).astype(f32),                 # prompt token slab
        pos.astype(f32),                                   # (SEQ, D) positional embedding
        eot_idx.reshape(N_CLS, 1).astype(jnp.int32),       # EOT positions (tokenized argmax)
        w['ln1_w'].astype(f32), w['ln1_b'].astype(f32),
        q_w, q_b, k_w, k_b, v_w, v_b,
        w['po_w'].astype(bf16), w['po_b'].astype(f32),
        w['ln2_w'].astype(f32), w['ln2_b'].astype(f32),
        w['fc1_w'].astype(bf16), w['fc1_b'].astype(f32),
        w['fc2_w'].astype(bf16), w['fc2_b'].astype(f32),
        w['lnf_w'].astype(f32), w['lnf_b'].astype(f32),
        w['tproj'].astype(bf16),
        image.astype(f32),
        jnp.exp(logit_scale).reshape(1, 1).astype(f32),    # logit_scale.exp(), SMEM scalar
    ]

    vmem = pl.BlockSpec(memory_space=pltpu.MemorySpace.VMEM)
    smem = pl.BlockSpec(memory_space=pltpu.MemorySpace.SMEM)
    in_specs = [vmem] * (len(args) - 1) + [smem]

    return pl.pallas_call(
        clip_feat_kernel,
        out_shape=jax.ShapeDtypeStruct((batch, N_CLS), jnp.float32),
        in_specs=in_specs,
        out_specs=vmem,
    )(*args)


# ---------------- pure-JAX reference (mirrors bf16-operand / f32-accumulate math) ----------------
def ref_forward(image, prompts, pos, eot_idx, w, logit_scale):
    f32, bf16 = jnp.float32, jnp.bfloat16
    x = prompts.astype(f32) + pos.astype(f32)[None]
    causal = jnp.where(jnp.triu(jnp.ones((SEQ, SEQ), f32), 1) > 0, -1e30, 0.0)
    for l in range(LAYERS):
        h = _ln(x, w['ln1_w'][l], w['ln1_b'][l])
        qkv = jnp.einsum('bsd,de->bse', h.astype(bf16), w['qkv_w'][l].astype(bf16),
                         preferred_element_type=f32) + w['qkv_b'][l]
        q, k, v = jnp.split(qkv, 3, axis=-1)
        q = q.reshape(N_CLS, SEQ, HEADS, DH)
        k = k.reshape(N_CLS, SEQ, HEADS, DH)
        v = v.reshape(N_CLS, SEQ, HEADS, DH)
        s = jnp.einsum('bqhd,bkhd->bhqk', q.astype(bf16), k.astype(bf16),
                       preferred_element_type=f32) * (DH ** -0.5) + causal
        s = s - jnp.max(s, axis=-1, keepdims=True)
        p = jnp.exp(s)
        p = p / jnp.sum(p, axis=-1, keepdims=True)
        o = jnp.einsum('bhqk,bkhd->bqhd', p.astype(bf16), v.astype(bf16),
                       preferred_element_type=f32).reshape(N_CLS, SEQ, D)
        x = x + jnp.einsum('bsd,de->bse', o.astype(bf16), w['po_w'][l].astype(bf16),
                           preferred_element_type=f32) + w['po_b'][l]
        h = _ln(x, w['ln2_w'][l], w['ln2_b'][l])
        h = jnp.einsum('bsd,de->bse', h.astype(bf16), w['fc1_w'][l].astype(bf16),
                       preferred_element_type=f32) + w['fc1_b'][l]
        h = h * jax.nn.sigmoid(1.702 * h)
        x = x + jnp.einsum('bse,ed->bsd', h.astype(bf16), w['fc2_w'][l].astype(bf16),
                           preferred_element_type=f32) + w['fc2_b'][l]
    x = _ln(x, w['lnf_w'], w['lnf_b'])
    feat = x[jnp.arange(N_CLS), eot_idx]                               # (N_CLS, D)
    tf = jnp.dot(feat.astype(bf16), w['tproj'].astype(bf16), preferred_element_type=f32)
    tf = tf * lax.rsqrt(jnp.sum(tf * tf, axis=-1, keepdims=True))
    img = image.astype(f32)
    img = img * lax.rsqrt(jnp.sum(img * img, axis=-1, keepdims=True))
    logits = jnp.einsum('bf,cf->bc', img.astype(bf16), tf.astype(bf16),
                        preferred_element_type=f32)
    return jnp.exp(logit_scale) * logits


if __name__ == "__main__":
    f32 = jnp.float32
    keys = iter(jax.random.split(jax.random.PRNGKey(0), 24))
    nk = lambda: next(keys)

    # ---- PromptLearner parameters/buffers (synthetic token embeddings) ----
    ctx = 0.02 * jax.random.normal(nk(), (N_CTX, D), f32)                       # generic context
    token_prefix = 0.02 * jax.random.normal(nk(), (N_CLS, 1, D), f32)           # SOS embedding
    token_suffix = 0.02 * jax.random.normal(nk(), (N_CLS, SEQ - 1 - N_CTX, D), f32)

    # ---- TextEncoder parameters (CLIP text transformer, stacked per layer) ----
    pos = 0.01 * jax.random.normal(nk(), (SEQ, D), f32)
    w = {
        'ln1_w': 1.0 + 0.1 * jax.random.normal(nk(), (LAYERS, 1, D), f32),
        'ln1_b': 0.02 * jax.random.normal(nk(), (LAYERS, 1, D), f32),
        'qkv_w': (D ** -0.5) * jax.random.normal(nk(), (LAYERS, D, 3 * D), f32),
        'qkv_b': 0.02 * jax.random.normal(nk(), (LAYERS, 1, 3 * D), f32),
        'po_w': (D ** -0.5) * jax.random.normal(nk(), (LAYERS, D, D), f32),
        'po_b': 0.02 * jax.random.normal(nk(), (LAYERS, 1, D), f32),
        'ln2_w': 1.0 + 0.1 * jax.random.normal(nk(), (LAYERS, 1, D), f32),
        'ln2_b': 0.02 * jax.random.normal(nk(), (LAYERS, 1, D), f32),
        'fc1_w': (D ** -0.5) * jax.random.normal(nk(), (LAYERS, D, HIDDEN), f32),
        'fc1_b': 0.02 * jax.random.normal(nk(), (LAYERS, 1, HIDDEN), f32),
        'fc2_w': (HIDDEN ** -0.5) * jax.random.normal(nk(), (LAYERS, HIDDEN, D), f32),
        'fc2_b': 0.02 * jax.random.normal(nk(), (LAYERS, 1, D), f32),
        'lnf_w': 1.0 + 0.1 * jax.random.normal(nk(), (1, D), f32),
        'lnf_b': 0.02 * jax.random.normal(nk(), (1, D), f32),
        'tproj': (D ** -0.5) * jax.random.normal(nk(), (D, FEAT), f32),
    }
    logit_scale = jnp.float32(np.log(1.0 / 0.07))

    # ---- PromptLearner.forward (class_token_position == 'end'): glue concat ----
    ctx_exp = jnp.broadcast_to(ctx[None], (N_CLS, N_CTX, D))
    prompts = jnp.concatenate([token_prefix, ctx_exp, token_suffix], axis=1)    # (N_CLS, SEQ, D)

    # tokenized_prompts.argmax(-1): EOT token position per class (synthetic name lengths)
    eot_idx = jnp.array([7, 9, 11, 14], jnp.int32)

    # "image" input: pre-extracted CLIP features (shape[-1] == 512 branch)
    image = jax.random.normal(nk(), (BATCH, FEAT), f32)

    logits = custom_clip_feat_forward(image, prompts, pos, eot_idx, w, logit_scale)
    logits = jax.block_until_ready(logits)

    ref = ref_forward(image, prompts, pos, eot_idx, w, logit_scale)
    np.testing.assert_allclose(np.asarray(logits), np.asarray(ref), rtol=3e-2, atol=3e-2)
    print("KERNEL_OK")
</pallas_src>

<mosaic_0001>
module attributes {stable_mosaic.version = 11 : i64} {
  func.func @clip_feat_kernel(%arg0: memref<64x64xf32, #tpu.memory_space<vmem>>, %arg1: memref<16x64xf32, #tpu.memory_space<vmem>>, %arg2: memref<4x1xi32, #tpu.memory_space<vmem>>, %arg3: memref<2x1x64xf32, #tpu.memory_space<vmem>>, %arg4: memref<2x1x64xf32, #tpu.memory_space<vmem>>, %arg5: memref<2x64x64xbf16, #tpu.memory_space<vmem>>, %arg6: memref<2x1x64xf32, #tpu.memory_space<vmem>>, %arg7: memref<2x64x64xbf16, #tpu.memory_space<vmem>>, %arg8: memref<2x1x64xf32, #tpu.memory_space<vmem>>, %arg9: memref<2x64x64xbf16, #tpu.memory_space<vmem>>, %arg10: memref<2x1x64xf32, #tpu.memory_space<vmem>>, %arg11: memref<2x64x64xbf16, #tpu.memory_space<vmem>>, %arg12: memref<2x1x64xf32, #tpu.memory_space<vmem>>, %arg13: memref<2x1x64xf32, #tpu.memory_space<vmem>>, %arg14: memref<2x1x64xf32, #tpu.memory_space<vmem>>, %arg15: memref<2x64x256xbf16, #tpu.memory_space<vmem>>, %arg16: memref<2x1x256xf32, #tpu.memory_space<vmem>>, %arg17: memref<2x256x64xbf16, #tpu.memory_space<vmem>>, %arg18: memref<2x1x64xf32, #tpu.memory_space<vmem>>, %arg19: memref<1x64xf32, #tpu.memory_space<vmem>>, %arg20: memref<1x64xf32, #tpu.memory_space<vmem>>, %arg21: memref<64x512xbf16, #tpu.memory_space<vmem>>, %arg22: memref<2x512xf32, #tpu.memory_space<vmem>>, %arg23: memref<1x1xf32, #tpu.memory_space<smem>>, %arg24: memref<2x4xf32, #tpu.memory_space<vmem>>) attributes {dimension_semantics = [], scalar_prefetch = 0 : i64, scratch_operands = 0 : i64, tpu.core_type = #tpu.core_type<tc>} {
    %c0 = arith.constant 0 : index
    %c0_0 = arith.constant 0 : index
    %0 = vector.load %arg0[%c0, %c0_0] : memref<64x64xf32, #tpu.memory_space<vmem>>, vector<64x64xf32>
    %1 = vector.shape_cast %0 : vector<64x64xf32> to vector<4x16x64xf32>
    %c0_1 = arith.constant 0 : index
    %c0_2 = arith.constant 0 : index
    %2 = vector.load %arg1[%c0_1, %c0_2] : memref<16x64xf32, #tpu.memory_space<vmem>>, vector<16x64xf32>
    %3 = vector.shape_cast %2 : vector<16x64xf32> to vector<1x16x64xf32>
    %4 = vector.broadcast %3 : vector<1x16x64xf32> to vector<4x16x64xf32>
    %5 = arith.addf %1, %4 : vector<4x16x64xf32>
    %6 = vector.shape_cast %5 : vector<4x16x64xf32> to vector<64x64xf32>
    %7 = tpu.iota {dimensions = array<i32: 0>} : vector<16x16xi32>
    %8 = tpu.iota {dimensions = array<i32: 1>} : vector<16x16xi32>
    %9 = arith.cmpi sle, %8, %7 : vector<16x16xi32>
    %cst = arith.constant 0.000000e+00 : f32
    %cst_3 = arith.constant -1.000000e+30 : f32
    %10 = vector.broadcast %cst : f32 to vector<16x16xf32>
    %11 = vector.broadcast %cst_3 : f32 to vector<16x16xf32>
    %12 = arith.select %9, %10, %11 : vector<16x16xi1>, vector<16x16xf32>
    %c0_4 = arith.constant 0 : index
    %c0_5 = arith.constant 0 : index
    %c0_6 = arith.constant 0 : index
    %13 = vector.load %arg3[%c0_4, %c0_5, %c0_6] : memref<2x1x64xf32, #tpu.memory_space<vmem>>, vector<1x1x64xf32>
    %14 = vector.shape_cast %13 : vector<1x1x64xf32> to vector<1x64xf32>
    %c0_7 = arith.constant 0 : index
    %c0_8 = arith.constant 0 : index
    %c0_9 = arith.constant 0 : index
    %15 = vector.load %arg4[%c0_7, %c0_8, %c0_9] : memref<2x1x64xf32, #tpu.memory_space<vmem>>, vector<1x1x64xf32>
    %16 = vector.shape_cast %15 : vector<1x1x64xf32> to vector<1x64xf32>
    %cst_10 = arith.constant dense<0.000000e+00> : vector<64xf32>
    %17 = vector.multi_reduction <add>, %6, %cst_10 [1] : vector<64x64xf32> to vector<64xf32>
    %18 = vector.shape_cast %17 : vector<64xf32> to vector<64x1xf32>
    %cst_11 = arith.constant 6.400000e+01 : f32
    %19 = vector.broadcast %cst_11 : f32 to vector<64x1xf32>
    %20 = arith.divf %18, %19 : vector<64x1xf32>
    %21 = vector.broadcast %20 : vector<64x1xf32> to vector<64x64xf32>
    %22 = arith.subf %6, %21 : vector<64x64xf32>
    %23 = arith.mulf %22, %22 : vector<64x64xf32>
    %cst_12 = arith.constant dense<0.000000e+00> : vector<64xf32>
    %24 = vector.multi_reduction <add>, %23, %cst_12 [1] : vector<64x64xf32> to vector<64xf32>
    %25 = vector.shape_cast %24 : vector<64xf32> to vector<64x1xf32>
    %cst_13 = arith.constant 6.400000e+01 : f32
    %26 = vector.broadcast %cst_13 : f32 to vector<64x1xf32>
    %27 = arith.divf %25, %26 : vector<64x1xf32>
    %cst_14 = arith.constant 9.99999974E-6 : f32
    %28 = vector.broadcast %cst_14 : f32 to vector<64x1xf32>
    %29 = arith.addf %27, %28 : vector<64x1xf32>
    %30 = math.rsqrt %29 : vector<64x1xf32>
    %31 = vector.broadcast %30 : vector<64x1xf32> to vector<64x64xf32>
    %32 = arith.mulf %22, %31 : vector<64x64xf32>
    %33 = vector.broadcast %14 : vector<1x64xf32> to vector<64x64xf32>
    %34 = arith.mulf %32, %33 : vector<64x64xf32>
    %35 = vector.broadcast %16 : vector<1x64xf32> to vector<64x64xf32>
    %36 = arith.addf %34, %35 : vector<64x64xf32>
    %37 = arith.truncf %36 : vector<64x64xf32> to vector<64x64xbf16>
    %c0_15 = arith.constant 0 : index
    %c0_16 = arith.constant 0 : index
    %c0_17 = arith.constant 0 : index
    %38 = vector.load %arg5[%c0_15, %c0_16, %c0_17] : memref<2x64x64xbf16, #tpu.memory_space<vmem>>, vector<1x64x64xbf16>
    %39 = vector.shape_cast %38 : vector<1x64x64xbf16> to vector<64x64xbf16>
    %cst_18 = arith.constant dense<0.000000e+00> : vector<64x64xf32>
    %40 = tpu.matmul %37, %39, %cst_18 {dimension_numbers = #tpu.dot_dimension_numbers<[1], [0], [0], [1], [0, 0, 1, 1], [], []>} : vector<64x64xbf16>, vector<64x64xbf16>, vector<64x64xf32> -> vector<64x64xf32>
    %c0_19 = arith.constant 0 : index
    %c0_20 = arith.constant 0 : index
    %c0_21 = arith.constant 0 : index
    %41 = vector.load %arg6[%c0_19, %c0_20, %c0_21] : memref<2x1x64xf32, #tpu.memory_space<vmem>>, vector<1x1x64xf32>
    %42 = vector.shape_cast %41 : vector<1x1x64xf32> to vector<1x64xf32>
    %43 = vector.broadcast %42 : vector<1x64xf32> to vector<64x64xf32>
    %44 = arith.addf %40, %43 : vector<64x64xf32>
    %c0_22 = arith.constant 0 : index
    %c0_23 = arith.constant 0 : index
    %c0_24 = arith.constant 0 : index
    %45 = vector.load %arg7[%c0_22, %c0_23, %c0_24] : memref<2x64x64xbf16, #tpu.memory_space<vmem>>, vector<1x64x64xbf16>
    %46 = vector.shape_cast %45 : vector<1x64x64xbf16> to vector<64x64xbf16>
    %cst_25 = arith.constant dense<0.000000e+00> : vector<64x64xf32>
    %47 = tpu.matmul %37, %46, %cst_25 {dimension_numbers = #tpu.dot_dimension_numbers<[1], [0], [0], [1], [0, 0, 1, 1], [], []>} : vector<64x64xbf16>, vector<64x64xbf16>, vector<64x64xf32> -> vector<64x64xf32>
    %c0_26 = arith.constant 0 : index
    %c0_27 = arith.constant 0 : index
    %c0_28 = arith.constant 0 : index
    %48 = vector.load %arg8[%c0_26, %c0_27, %c0_28] : memref<2x1x64xf32, #tpu.memory_space<vmem>>, vector<1x1x64xf32>
    %49 = vector.shape_cast %48 : vector<1x1x64xf32> to vector<1x64xf32>
    %50 = vector.broadcast %49 : vector<1x64xf32> to vector<64x64xf32>
    %51 = arith.addf %47, %50 : vector<64x64xf32>
    %c0_29 = arith.constant 0 : index
    %c0_30 = arith.constant 0 : index
    %c0_31 = arith.constant 0 : index
    %52 = vector.load %arg9[%c0_29, %c0_30, %c0_31] : memref<2x64x64xbf16, #tpu.memory_space<vmem>>, vector<1x64x64xbf16>
    %53 = vector.shape_cast %52 : vector<1x64x64xbf16> to vector<64x64xbf16>
    %cst_32 = arith.constant dense<0.000000e+00> : vector<64x64xf32>
    %54 = tpu.matmul %37, %53, %cst_32 {dimension_numbers = #tpu.dot_dimension_numbers<[1], [0], [0], [1], [0, 0, 1, 1], [], []>} : vector<64x64xbf16>, vector<64x64xbf16>, vector<64x64xf32> -> vector<64x64xf32>
    %c0_33 = arith.constant 0 : index
    %c0_34 = arith.constant 0 : index
    %c0_35 = arith.constant 0 : index
    %55 = vector.load %arg10[%c0_33, %c0_34, %c0_35] : memref<2x1x64xf32, #tpu.memory_space<vmem>>, vector<1x1x64xf32>
    %56 = vector.shape_cast %55 : vector<1x1x64xf32> to vector<1x64xf32>
    %57 = vector.broadcast %56 : vector<1x64xf32> to vector<64x64xf32>
    %58 = arith.addf %54, %57 : vector<64x64xf32>
    %59 = vector.extract_strided_slice %44 {offsets = [0, 0], sizes = [64, 16], strides = [1, 1]} : vector<64x64xf32> to vector<64x16xf32>
    %60 = vector.shape_cast %59 : vector<64x16xf32> to vector<4x16x16xf32>
    %61 = arith.truncf %60 : vector<4x16x16xf32> to vector<4x16x16xbf16>
    %62 = vector.extract_strided_slice %51 {offsets = [0, 0], sizes = [64, 16], strides = [1, 1]} : vector<64x64xf32> to vector<64x16xf32>
    %63 = vector.shape_cast %62 : vector<64x16xf32> to vector<4x16x16xf32>
    %64 = arith.truncf %63 : vector<4x16x16xf32> to vector<4x16x16xbf16>
    %65 = vector.extract_strided_slice %58 {offsets = [0, 0], sizes = [64, 16], strides = [1, 1]} : vector<64x64xf32> to vector<64x16xf32>
    %66 = vector.shape_cast %65 : vector<64x16xf32> to vector<4x16x16xf32>
    %67 = arith.truncf %66 : vector<4x16x16xf32> to vector<4x16x16xbf16>
    "tpu.trace_start"() <{level = 10 : i32, message = "cqd,ckd->cqk"}> : () -> ()
    %cst_36 = arith.constant dense<0.000000e+00> : vector<4x16x16xf32>
    %68 = tpu.matmul %61, %64, %cst_36 {dimension_numbers = #tpu.dot_dimension_numbers<[2], [2], [1], [1], [0, 0, 0, 1, 1, 1], [0], [0]>} : vector<4x16x16xbf16>, vector<4x16x16xbf16>, vector<4x16x16xf32> -> vector<4x16x16xf32>
    "tpu.trace_stop"() : () -> ()
    %69 = vector.shape_cast %12 : vector<16x16xf32> to vector<1x16x16xf32>
    %70 = vector.broadcast %69 : vector<1x16x16xf32> to vector<4x16x16xf32>
    %71 = arith.addf %68, %70 : vector<4x16x16xf32>
    %cst_37 = arith.constant dense<0xFF800000> : vector<4x16xf32>
    %72 = vector.multi_reduction <maximumf>, %71, %cst_37 [2] : vector<4x16x16xf32> to vector<4x16xf32>
    %73 = vector.shape_cast %72 : vector<4x16xf32> to vector<4x16x1xf32>
    %74 = vector.broadcast %73 : vector<4x16x1xf32> to vector<4x16x16xf32>
    %75 = arith.subf %71, %74 : vector<4x16x16xf32>
    %76 = math.exp %75 : vector<4x16x16xf32>
    %cst_38 = arith.constant dense<0.000000e+00> : vector<4x16xf32>
    %77 = vector.multi_reduction <add>, %76, %cst_38 [2] : vector<4x16x16xf32> to vector<4x16xf32>
    %78 = vector.shape_cast %77 : vector<4x16xf32> to vector<4x16x1xf32>
    %79 = tpu.reciprocal %78 {approx = true} : vector<4x16x1xf32> -> vector<4x16x1xf32>
    %80 = vector.broadcast %79 : vector<4x16x1xf32> to vector<4x16x16xf32>
    %81 = arith.mulf %76, %80 : vector<4x16x16xf32>
    %82 = arith.truncf %81 : vector<4x16x16xf32> to vector<4x16x16xbf16>
    "tpu.trace_start"() <{level = 10 : i32, message = "cqk,ckd->cqd"}> : () -> ()
    %cst_39 = arith.constant dense<0.000000e+00> : vector<4x16x16xf32>
    %83 = tpu.matmul %82, %67, %cst_39 {dimension_numbers = #tpu.dot_dimension_numbers<[2], [1], [1], [2], [0, 0, 0, 1, 1, 2], [0], [0]>} : vector<4x16x16xbf16>, vector<4x16x16xbf16>, vector<4x16x16xf32> -> vector<4x16x16xf32>
    "tpu.trace_stop"() : () -> ()
    %84 = vector.shape_cast %83 : vector<4x16x16xf32> to vector<64x16xf32>
    %85 = vector.extract_strided_slice %44 {offsets = [0, 16], sizes = [64, 16], strides = [1, 1]} : vector<64x64xf32> to vector<64x16xf32>
    %86 = vector.shape_cast %85 : vector<64x16xf32> to vector<4x16x16xf32>
    %87 = arith.truncf %86 : vector<4x16x16xf32> to vector<4x16x16xbf16>
    %88 = vector.extract_strided_slice %51 {offsets = [0, 16], sizes = [64, 16], strides = [1, 1]} : vector<64x64xf32> to vector<64x16xf32>
    %89 = vector.shape_cast %88 : vector<64x16xf32> to vector<4x16x16xf32>
    %90 = arith.truncf %89 : vector<4x16x16xf32> to vector<4x16x16xbf16>
    %91 = vector.extract_strided_slice %58 {offsets = [0, 16], sizes = [64, 16], strides = [1, 1]} : vector<64x64xf32> to vector<64x16xf32>
    %92 = vector.shape_cast %91 : vector<64x16xf32> to vector<4x16x16xf32>
    %93 = arith.truncf %92 : vector<4x16x16xf32> to vector<4x16x16xbf16>
    "tpu.trace_start"() <{level = 10 : i32, message = "cqd,ckd->cqk"}> : () -> ()
    %cst_40 = arith.constant dense<0.000000e+00> : vector<4x16x16xf32>
    %94 = tpu.matmul %87, %90, %cst_40 {dimension_numbers = #tpu.dot_dimension_numbers<[2], [2], [1], [1], [0, 0, 0, 1, 1, 1], [0], [0]>} : vector<4x16x16xbf16>, vector<4x16x16xbf16>, vector<4x16x16xf32> -> vector<4x16x16xf32>
    "tpu.trace_stop"() : () -> ()
    %95 = vector.shape_cast %12 : vector<16x16xf32> to vector<1x16x16xf32>
    %96 = vector.broadcast %95 : vector<1x16x16xf32> to vector<4x16x16xf32>
    %97 = arith.addf %94, %96 : vector<4x16x16xf32>
    %cst_41 = arith.constant dense<0xFF800000> : vector<4x16xf32>
    %98 = vector.multi_reduction <maximumf>, %97, %cst_41 [2] : vector<4x16x16xf32> to vector<4x16xf32>
    %99 = vector.shape_cast %98 : vector<4x16xf32> to vector<4x16x1xf32>
    %100 = vector.broadcast %99 : vector<4x16x1xf32> to vector<4x16x16xf32>
    %101 = arith.subf %97, %100 : vector<4x16x16xf32>
    %102 = math.exp %101 : vector<4x16x16xf32>
    %cst_42 = arith.constant dense<0.000000e+00> : vector<4x16xf32>
    %103 = vector.multi_reduction <add>, %102, %cst_42 [2] : vector<4x16x16xf32> to vector<4x16xf32>
    %104 = vector.shape_cast %103 : vector<4x16xf32> to vector<4x16x1xf32>
    %105 = tpu.reciprocal %104 {approx = true} : vector<4x16x1xf32> -> vector<4x16x1xf32>
    %106 = vector.broadcast %105 : vector<4x16x1xf32> to vector<4x16x16xf32>
    %107 = arith.mulf %102, %106 : vector<4x16x16xf32>
    %108 = arith.truncf %107 : vector<4x16x16xf32> to vector<4x16x16xbf16>
    "tpu.trace_start"() <{level = 10 : i32, message = "cqk,ckd->cqd"}> : () -> ()
    %cst_43 = arith.constant dense<0.000000e+00> : vector<4x16x16xf32>
    %109 = tpu.matmul %108, %93, %cst_43 {dimension_numbers = #tpu.dot_dimension_numbers<[2], [1], [1], [2], [0, 0, 0, 1, 1, 2], [0], [0]>} : vector<4x16x16xbf16>, vector<4x16x16xbf16>, vector<4x16x16xf32> -> vector<4x16x16xf32>
    "tpu.trace_stop"() : () -> ()
    %110 = vector.shape_cast %109 : vector<4x16x16xf32> to vector<64x16xf32>
    %111 = vector.extract_strided_slice %44 {offsets = [0, 32], sizes = [64, 16], strides = [1, 1]} : vector<64x64xf32> to vector<64x16xf32>
    %112 = vector.shape_cast %111 : vector<64x16xf32> to vector<4x16x16xf32>
    %113 = arith.truncf %112 : vector<4x16x16xf32> to vector<4x16x16xbf16>
    %114 = vector.extract_strided_slice %51 {offsets = [0, 32], sizes = [64, 16], strides = [1, 1]} : vector<64x64xf32> to vector<64x16xf32>
    %115 = vector.shape_cast %114 : vector<64x16xf32> to vector<4x16x16xf32>
    %116 = arith.truncf %115 : vector<4x16x16xf32> to vector<4x16x16xbf16>
    %117 = vector.extract_strided_slice %58 {offsets = [0, 32], sizes = [64, 16], strides = [1, 1]} : vector<64x64xf32> to vector<64x16xf32>
    %118 = vector.shape_cast %117 : vector<64x16xf32> to vector<4x16x16xf32>
    %119 = arith.truncf %118 : vector<4x16x16xf32> to vector<4x16x16xbf16>
    "tpu.trace_start"() <{level = 10 : i32, message = "cqd,ckd->cqk"}> : () -> ()
    %cst_44 = arith.constant dense<0.000000e+00> : vector<4x16x16xf32>
    %120 = tpu.matmul %113, %116, %cst_44 {dimension_numbers = #tpu.dot_dimension_numbers<[2], [2], [1], [1], [0, 0, 0, 1, 1, 1], [0], [0]>} : vector<4x16x16xbf16>, vector<4x16x16xbf16>, vector<4x16x16xf32> -> vector<4x16x16xf32>
    "tpu.trace_stop"() : () -> ()
    %121 = vector.shape_cast %12 : vector<16x16xf32> to vector<1x16x16xf32>
    %122 = vector.broadcast %121 : vector<1x16x16xf32> to vector<4x16x16xf32>
    %123 = arith.addf %120, %122 : vector<4x16x16xf32>
    %cst_45 = arith.constant dense<0xFF800000> : vector<4x16xf32>
    %124 = vector.multi_reduction <maximumf>, %123, %cst_45 [2] : vector<4x16x16xf32> to vector<4x16xf32>
    %125 = vector.shape_cast %124 : vector<4x16xf32> to vector<4x16x1xf32>
    %126 = vector.broadcast %125 : vector<4x16x1xf32> to vector<4x16x16xf32>
    %127 = arith.subf %123, %126 : vector<4x16x16xf32>
    %128 = math.exp %127 : vector<4x16x16xf32>
    %cst_46 = arith.constant dense<0.000000e+00> : vector<4x16xf32>
    %129 = vector.multi_reduction <add>, %128, %cst_46 [2] : vector<4x16x16xf32> to vector<4x16xf32>
    %130 = vector.shape_cast %129 : vector<4x16xf32> to vector<4x16x1xf32>
    %131 = tpu.reciprocal %130 {approx = true} : vector<4x16x1xf32> -> vector<4x16x1xf32>
    %132 = vector.broadcast %131 : vector<4x16x1xf32> to vector<4x16x16xf32>
    %133 = arith.mulf %128, %132 : vector<4x16x16xf32>
    %134 = arith.truncf %133 : vector<4x16x16xf32> to vector<4x16x16xbf16>
    "tpu.trace_start"() <{level = 10 : i32, message = "cqk,ckd->cqd"}> : () -> ()
    %cst_47 = arith.constant dense<0.000000e+00> : vector<4x16x16xf32>
    %135 = tpu.matmul %134, %119, %cst_47 {dimension_numbers = #tpu.dot_dimension_numbers<[2], [1], [1], [2], [0, 0, 0, 1, 1, 2], [0], [0]>} : vector<4x16x16xbf16>, vector<4x16x16xbf16>, vector<4x16x16xf32> -> vector<4x16x16xf32>
    "tpu.trace_stop"() : () -> ()
    %136 = vector.shape_cast %135 : vector<4x16x16xf32> to vector<64x16xf32>
    %137 = vector.extract_strided_slice %44 {offsets = [0, 48], sizes = [64, 16], strides = [1, 1]} : vector<64x64xf32> to vector<64x16xf32>
    %138 = vector.shape_cast %137 : vector<64x16xf32> to vector<4x16x16xf32>
    %139 = arith.truncf %138 : vector<4x16x16xf32> to vector<4x16x16xbf16>
    %140 = vector.extract_strided_slice %51 {offsets = [0, 48], sizes = [64, 16], strides = [1, 1]} : vector<64x64xf32> to vector<64x16xf32>
    %141 = vector.shape_cast %140 : vector<64x16xf32> to vector<4x16x16xf32>
    %142 = arith.truncf %141 : vector<4x16x16xf32> to vector<4x16x16xbf16>
    %143 = vector.extract_strided_slice %58 {offsets = [0, 48], sizes = [64, 16], strides = [1, 1]} : vector<64x64xf32> to vector<64x16xf32>
    %144 = vector.shape_cast %143 : vector<64x16xf32> to vector<4x16x16xf32>
    %145 = arith.truncf %144 : vector<4x16x16xf32> to vector<4x16x16xbf16>
    "tpu.trace_start"() <{level = 10 : i32, message = "cqd,ckd->cqk"}> : () -> ()
    %cst_48 = arith.constant dense<0.000000e+00> : vector<4x16x16xf32>
    %146 = tpu.matmul %139, %142, %cst_48 {dimension_numbers = #tpu.dot_dimension_numbers<[2], [2], [1], [1], [0, 0, 0, 1, 1, 1], [0], [0]>} : vector<4x16x16xbf16>, vector<4x16x16xbf16>, vector<4x16x16xf32> -> vector<4x16x16xf32>
    "tpu.trace_stop"() : () -> ()
    %147 = vector.shape_cast %12 : vector<16x16xf32> to vector<1x16x16xf32>
    %148 = vector.broadcast %147 : vector<1x16x16xf32> to vector<4x16x16xf32>
    %149 = arith.addf %146, %148 : vector<4x16x16xf32>
    %cst_49 = arith.constant dense<0xFF800000> : vector<4x16xf32>
    %150 = vector.multi_reduction <maximumf>, %149, %cst_49 [2] : vector<4x16x16xf32> to vector<4x16xf32>
    %151 = vector.shape_cast %150 : vector<4x16xf32> to vector<4x16x1xf32>
    %152 = vector.broadcast %151 : vector<4x16x1xf32> to vector<4x16x16xf32>
    %153 = arith.subf %149, %152 : vector<4x16x16xf32>
    %154 = math.exp %153 : vector<4x16x16xf32>
    %cst_50 = arith.constant dense<0.000000e+00> : vector<4x16xf32>
    %155 = vector.multi_reduction <add>, %154, %cst_50 [2] : vector<4x16x16xf32> to vector<4x16xf32>
    %156 = vector.shape_cast %155 : vector<4x16xf32> to vector<4x16x1xf32>
    %157 = tpu.reciprocal %156 {approx = true} : vector<4x16x1xf32> -> vector<4x16x1xf32>
    %158 = vector.broadcast %157 : vector<4x16x1xf32> to vector<4x16x16xf32>
    %159 = arith.mulf %154, %158 : vector<4x16x16xf32>
    %160 = arith.truncf %159 : vector<4x16x16xf32> to vector<4x16x16xbf16>
    "tpu.trace_start"() <{level = 10 : i32, message = "cqk,ckd->cqd"}> : () -> ()
    %cst_51 = arith.constant dense<0.000000e+00> : vector<4x16x16xf32>
    %161 = tpu.matmul %160, %145, %cst_51 {dimension_numbers = #tpu.dot_dimension_numbers<[2], [1], [1], [2], [0, 0, 0, 1, 1, 2], [0], [0]>} : vector<4x16x16xbf16>, vector<4x16x16xbf16>, vector<4x16x16xf32> -> vector<4x16x16xf32>
    "tpu.trace_stop"() : () -> ()
    %162 = vector.shape_cast %161 : vector<4x16x16xf32> to vector<64x16xf32>
    %163 = tpu.concatenate %84, %110, %136, %162 in 1 : vector<64x16xf32>, vector<64x16xf32>, vector<64x16xf32>, vector<64x16xf32> -> vector<64x64xf32>
    %164 = arith.truncf %163 : vector<64x64xf32> to vector<64x64xbf16>
    %c0_52 = arith.constant 0 : index
    %c0_53 = arith.constant 0 : index
    %c0_54 = arith.constant 0 : index
    %165 = vector.load %arg11[%c0_52, %c0_53, %c0_54] : memref<2x64x64xbf16, #tpu.memory_space<vmem>>, vector<1x64x64xbf16>
    %166 = vector.shape_cast %165 : vector<1x64x64xbf16> to vector<64x64xbf16>
    %cst_55 = arith.constant dense<0.000000e+00> : vector<64x64xf32>
    %167 = tpu.matmul %164, %166, %cst_55 {dimension_numbers = #tpu.dot_dimension_numbers<[1], [0], [0], [1], [0, 0, 1, 1], [], []>} : vector<64x64xbf16>, vector<64x64xbf16>, vector<64x64xf32> -> vector<64x64xf32>
    %168 = arith.addf %6, %167 : vector<64x64xf32>
    %c0_56 = arith.constant 0 : index
    %c0_57 = arith.constant 0 : index
    %c0_58 = arith.constant 0 : index
    %169 = vector.load %arg12[%c0_56, %c0_57, %c0_58] : memref<2x1x64xf32, #tpu.memory_space<vmem>>, vector<1x1x64xf32>
    %170 = vector.shape_cast %169 : vector<1x1x64xf32> to vector<1x64xf32>
    %171 = vector.broadcast %170 : vector<1x64xf32> to vector<64x64xf32>
    %172 = arith.addf %168, %171 : vector<64x64xf32>
    %c0_59 = arith.constant 0 : index
    %c0_60 = arith.constant 0 : index
    %c0_61 = arith.constant 0 : index
    %173 = vector.load %arg13[%c0_59, %c0_60, %c0_61] : memref<2x1x64xf32, #tpu.memory_space<vmem>>, vector<1x1x64xf32>
    %174 = vector.shape_cast %173 : vector<1x1x64xf32> to vector<1x64xf32>
    %c0_62 = arith.constant 0 : index
    %c0_63 = arith.constant 0 : index
    %c0_64 = arith.constant 0 : index
    %175 = vector.load %arg14[%c0_62, %c0_63, %c0_64] : memref<2x1x64xf32, #tpu.memory_space<vmem>>, vector<1x1x64xf32>
    %176 = vector.shape_cast %175 : vector<1x1x64xf32> to vector<1x64xf32>
    %cst_65 = arith.constant dense<0.000000e+00> : vector<64xf32>
    %177 = vector.multi_reduction <add>, %172, %cst_65 [1] : vector<64x64xf32> to vector<64xf32>
    %178 = vector.shape_cast %177 : vector<64xf32> to vector<64x1xf32>
    %cst_66 = arith.constant 6.400000e+01 : f32
    %179 = vector.broadcast %cst_66 : f32 to vector<64x1xf32>
    %180 = arith.divf %178, %179 : vector<64x1xf32>
    %181 = vector.broadcast %180 : vector<64x1xf32> to vector<64x64xf32>
    %182 = arith.subf %172, %181 : vector<64x64xf32>
    %183 = arith.mulf %182, %182 : vector<64x64xf32>
    %cst_67 = arith.constant dense<0.000000e+00> : vector<64xf32>
    %184 = vector.multi_reduction <add>, %183, %cst_67 [1] : vector<64x64xf32> to vector<64xf32>
    %185 = vector.shape_cast %184 : vector<64xf32> to vector<64x1xf32>
    %cst_68 = arith.constant 6.400000e+01 : f32
    %186 = vector.broadcast %cst_68 : f32 to vector<64x1xf32>
    %187 = arith.divf %185, %186 : vector<64x1xf32>
    %cst_69 = arith.constant 9.99999974E-6 : f32
    %188 = vector.broadcast %cst_69 : f32 to vector<64x1xf32>
    %189 = arith.addf %187, %188 : vector<64x1xf32>
    %190 = math.rsqrt %189 : vector<64x1xf32>
    %191 = vector.broadcast %190 : vector<64x1xf32> to vector<64x64xf32>
    %192 = arith.mulf %182, %191 : vector<64x64xf32>
    %193 = vector.broadcast %174 : vector<1x64xf32> to vector<64x64xf32>
    %194 = arith.mulf %192, %193 : vector<64x64xf32>
    %195 = vector.broadcast %176 : vector<1x64xf32> to vector<64x64xf32>
    %196 = arith.addf %194, %195 : vector<64x64xf32>
    %197 = arith.truncf %196 : vector<64x64xf32> to vector<64x64xbf16>
    %c0_70 = arith.constant 0 : index
    %c0_71 = arith.constant 0 : index
    %c0_72 = arith.constant 0 : index
    %198 = vector.load %arg15[%c0_70, %c0_71, %c0_72] : memref<2x64x256xbf16, #tpu.memory_space<vmem>>, vector<1x64x256xbf16>
    %199 = vector.shape_cast %198 : vector<1x64x256xbf16> to vector<64x256xbf16>
    %cst_73 = arith.constant dense<0.000000e+00> : vector<64x256xf32>
    %200 = tpu.matmul %197, %199, %cst_73 {dimension_numbers = #tpu.dot_dimension_numbers<[1], [0], [0], [1], [0, 0, 1, 1], [], []>} : vector<64x64xbf16>, vector<64x256xbf16>, vector<64x256xf32> -> vector<64x256xf32>
    %c0_74 = arith.constant 0 : index
    %c0_75 = arith.constant 0 : index
    %c0_76 = arith.constant 0 : index
    %201 = vector.load %arg16[%c0_74, %c0_75, %c0_76] : memref<2x1x256xf32, #tpu.memory_space<vmem>>, vector<1x1x256xf32>
    %202 = vector.shape_cast %201 : vector<1x1x256xf32> to vector<1x256xf32>
    %203 = vector.broadcast %202 : vector<1x256xf32> to vector<64x256xf32>
    %204 = arith.addf %200, %203 : vector<64x256xf32>
    %cst_77 = arith.constant 1.702000e+00 : f32
    %205 = vector.broadcast %cst_77 : f32 to vector<64x256xf32>
    %206 = arith.mulf %205, %204 : vector<64x256xf32>
    %207 = arith.negf %206 : vector<64x256xf32>
    %208 = math.exp %207 : vector<64x256xf32>
    %cst_78 = arith.constant 1.000000e+00 : f32
    %209 = vector.broadcast %cst_78 : f32 to vector<64x256xf32>
    %210 = arith.addf %209, %208 : vector<64x256xf32>
    %211 = arith.divf %209, %210 : vector<64x256xf32>
    %212 = arith.mulf %204, %211 : vector<64x256xf32>
    %213 = arith.truncf %212 : vector<64x256xf32> to vector<64x256xbf16>
    %c0_79 = arith.constant 0 : index
    %c0_80 = arith.constant 0 : index
    %c0_81 = arith.constant 0 : index
    %214 = vector.load %arg17[%c0_79, %c0_80, %c0_81] : memref<2x256x64xbf16, #tpu.memory_space<vmem>>, vector<1x256x64xbf16>
    %215 = vector.shape_cast %214 : vector<1x256x64xbf16> to vector<256x64xbf16>
    %cst_82 = arith.constant dense<0.000000e+00> : vector<64x64xf32>
    %216 = tpu.matmul %213, %215, %cst_82 {dimension_numbers = #tpu.dot_dimension_numbers<[1], [0], [0], [1], [0, 0, 1, 1], [], []>} : vector<64x256xbf16>, vector<256x64xbf16>, vector<64x64xf32> -> vector<64x64xf32>
    %217 = arith.addf %172, %216 : vector<64x64xf32>
    %c0_83 = arith.constant 0 : index
    %c0_84 = arith.constant 0 : index
    %c0_85 = arith.constant 0 : index
    %218 = vector.load %arg18[%c0_83, %c0_84, %c0_85] : memref<2x1x64xf32, #tpu.memory_space<vmem>>, vector<1x1x64xf32>
    %219 = vector.shape_cast %218 : vector<1x1x64xf32> to vector<1x64xf32>
    %220 = vector.broadcast %219 : vector<1x64xf32> to vector<64x64xf32>
    %221 = arith.addf %217, %220 : vector<64x64xf32>
    %c1 = arith.constant 1 : index
    %c0_86 = arith.constant 0 : index
    %c0_87 = arith.constant 0 : index
    %222 = vector.load %arg3[%c1, %c0_86, %c0_87] : memref<2x1x64xf32, #tpu.memory_space<vmem>>, vector<1x1x64xf32>
    %223 = vector.shape_cast %222 : vector<1x1x64xf32> to vector<1x64xf32>
    %c1_88 = arith.constant 1 : index
    %c0_89 = arith.constant 0 : index
    %c0_90 = arith.constant 0 : index
    %224 = vector.load %arg4[%c1_88, %c0_89, %c0_90] : memref<2x1x64xf32, #tpu.memory_space<vmem>>, vector<1x1x64xf32>
    %225 = vector.shape_cast %224 : vector<1x1x64xf32> to vector<1x64xf32>
    %cst_91 = arith.constant dense<0.000000e+00> : vector<64xf32>
    %226 = vector.multi_reduction <add>, %221, %cst_91 [1] : vector<64x64xf32> to vector<64xf32>
    %227 = vector.shape_cast %226 : vector<64xf32> to vector<64x1xf32>
    %cst_92 = arith.constant 6.400000e+01 : f32
    %228 = vector.broadcast %cst_92 : f32 to vector<64x1xf32>
    %229 = arith.divf %227, %228 : vector<64x1xf32>
    %230 = vector.broadcast %229 : vector<64x1xf32> to vector<64x64xf32>
    %231 = arith.subf %221, %230 : vector<64x64xf32>
    %232 = arith.mulf %231, %231 : vector<64x64xf32>
    %cst_93 = arith.constant dense<0.000000e+00> : vector<64xf32>
    %233 = vector.multi_reduction <add>, %232, %cst_93 [1] : vector<64x64xf32> to vector<64xf32>
    %234 = vector.shape_cast %233 : vector<64xf32> to vector<64x1xf32>
    %cst_94 = arith.constant 6.400000e+01 : f32
    %235 = vector.broadcast %cst_94 : f32 to vector<64x1xf32>
    %236 = arith.divf %234, %235 : vector<64x1xf32>
    %cst_95 = arith.constant 9.99999974E-6 : f32
    %237 = vector.broadcast %cst_95 : f32 to vector<64x1xf32>
    %238 = arith.addf %236, %237 : vector<64x1xf32>
    %239 = math.rsqrt %238 : vector<64x1xf32>
    %240 = vector.broadcast %239 : vector<64x1xf32> to vector<64x64xf32>
    %241 = arith.mulf %231, %240 : vector<64x64xf32>
    %242 = vector.broadcast %223 : vector<1x64xf32> to vector<64x64xf32>
    %243 = arith.mulf %241, %242 : vector<64x64xf32>
    %244 = vector.broadcast %225 : vector<1x64xf32> to vector<64x64xf32>
    %245 = arith.addf %243, %244 : vector<64x64xf32>
    %246 = arith.truncf %245 : vector<64x64xf32> to vector<64x64xbf16>
    %c1_96 = arith.constant 1 : index
    %c0_97 = arith.constant 0 : index
    %c0_98 = arith.constant 0 : index
    %247 = vector.load %arg5[%c1_96, %c0_97, %c0_98] : memref<2x64x64xbf16, #tpu.memory_space<vmem>>, vector<1x64x64xbf16>
    %248 = vector.shape_cast %247 : vector<1x64x64xbf16> to vector<64x64xbf16>
    %cst_99 = arith.constant dense<0.000000e+00> : vector<64x64xf32>
    %249 = tpu.matmul %246, %248, %cst_99 {dimension_numbers = #tpu.dot_dimension_numbers<[1], [0], [0], [1], [0, 0, 1, 1], [], []>} : vector<64x64xbf16>, vector<64x64xbf16>, vector<64x64xf32> -> vector<64x64xf32>
    %c1_100 = arith.constant 1 : index
    %c0_101 = arith.constant 0 : index
    %c0_102 = arith.constant 0 : index
    %250 = vector.load %arg6[%c1_100, %c0_101, %c0_102] : memref<2x1x64xf32, #tpu.memory_space<vmem>>, vector<1x1x64xf32>
    %251 = vector.shape_cast %250 : vector<1x1x64xf32> to vector<1x64xf32>
    %252 = vector.broadcast %251 : vector<1x64xf32> to vector<64x64xf32>
    %253 = arith.addf %249, %252 : vector<64x64xf32>
    %c1_103 = arith.constant 1 : index
    %c0_104 = arith.constant 0 : index
    %c0_105 = arith.constant 0 : index
    %254 = vector.load %arg7[%c1_103, %c0_104, %c0_105] : memref<2x64x64xbf16, #tpu.memory_space<vmem>>, vector<1x64x64xbf16>
    %255 = vector.shape_cast %254 : vector<1x64x64xbf16> to vector<64x64xbf16>
    %cst_106 = arith.constant dense<0.000000e+00> : vector<64x64xf32>
    %256 = tpu.matmul %246, %255, %cst_106 {dimension_numbers = #tpu.dot_dimension_numbers<[1], [0], [0], [1], [0, 0, 1, 1], [], []>} : vector<64x64xbf16>, vector<64x64xbf16>, vector<64x64xf32> -> vector<64x64xf32>
    %c1_107 = arith.constant 1 : index
    %c0_108 = arith.constant 0 : index
    %c0_109 = arith.constant 0 : index
    %257 = vector.load %arg8[%c1_107, %c0_108, %c0_109] : memref<2x1x64xf32, #tpu.memory_space<vmem>>, vector<1x1x64xf32>
    %258 = vector.shape_cast %257 : vector<1x1x64xf32> to vector<1x64xf32>
    %259 = vector.broadcast %258 : vector<1x64xf32> to vector<64x64xf32>
    %260 = arith.addf %256, %259 : vector<64x64xf32>
    %c1_110 = arith.constant 1 : index
    %c0_111 = arith.constant 0 : index
    %c0_112 = arith.constant 0 : index
    %261 = vector.load %arg9[%c1_110, %c0_111, %c0_112] : memref<2x64x64xbf16, #tpu.memory_space<vmem>>, vector<1x64x64xbf16>
    %262 = vector.shape_cast %261 : vector<1x64x64xbf16> to vector<64x64xbf16>
    %cst_113 = arith.constant dense<0.000000e+00> : vector<64x64xf32>
    %263 = tpu.matmul %246, %262, %cst_113 {dimension_numbers = #tpu.dot_dimension_numbers<[1], [0], [0], [1], [0, 0, 1, 1], [], []>} : vector<64x64xbf16>, vector<64x64xbf16>, vector<64x64xf32> -> vector<64x64xf32>
    %c1_114 = arith.constant 1 : index
    %c0_115 = arith.constant 0 : index
    %c0_116 = arith.constant 0 : index
    %264 = vector.load %arg10[%c1_114, %c0_115, %c0_116] : memref<2x1x64xf32, #tpu.memory_space<vmem>>, vector<1x1x64xf32>
    %265 = vector.shape_cast %264 : vector<1x1x64xf32> to vector<1x64xf32>
    %266 = vector.broadcast %265 : vector<1x64xf32> to vector<64x64xf32>
    %267 = arith.addf %263, %266 : vector<64x64xf32>
    %268 = vector.extract_strided_slice %253 {offsets = [0, 0], sizes = [64, 16], strides = [1, 1]} : vector<64x64xf32> to vector<64x16xf32>
    %269 = vector.shape_cast %268 : vector<64x16xf32> to vector<4x16x16xf32>
    %270 = arith.truncf %269 : vector<4x16x16xf32> to vector<4x16x16xbf16>
    %271 = vector.extract_strided_slice %260 {offsets = [0, 0], sizes = [64, 16], strides = [1, 1]} : vector<64x64xf32> to vector<64x16xf32>
    %272 = vector.shape_cast %271 : vector<64x16xf32> to vector<4x16x16xf32>
    %273 = arith.truncf %272 : vector<4x16x16xf32> to vector<4x16x16xbf16>
    %274 = vector.extract_strided_slice %267 {offsets = [0, 0], sizes = [64, 16], strides = [1, 1]} : vector<64x64xf32> to vector<64x16xf32>
    %275 = vector.shape_cast %274 : vector<64x16xf32> to vector<4x16x16xf32>
    %276 = arith.truncf %275 : vector<4x16x16xf32> to vector<4x16x16xbf16>
    "tpu.trace_start"() <{level = 10 : i32, message = "cqd,ckd->cqk"}> : () -> ()
    %cst_117 = arith.constant dense<0.000000e+00> : vector<4x16x16xf32>
    %277 = tpu.matmul %270, %273, %cst_117 {dimension_numbers = #tpu.dot_dimension_numbers<[2], [2], [1], [1], [0, 0, 0, 1, 1, 1], [0], [0]>} : vector<4x16x16xbf16>, vector<4x16x16xbf16>, vector<4x16x16xf32> -> vector<4x16x16xf32>
    "tpu.trace_stop"() : () -> ()
    %278 = vector.shape_cast %12 : vector<16x16xf32> to vector<1x16x16xf32>
    %279 = vector.broadcast %278 : vector<1x16x16xf32> to vector<4x16x16xf32>
    %280 = arith.addf %277, %279 : vector<4x16x16xf32>
    %cst_118 = arith.constant dense<0xFF800000> : vector<4x16xf32>
    %281 = vector.multi_reduction <maximumf>, %280, %cst_118 [2] : vector<4x16x16xf32> to vector<4x16xf32>
    %282 = vector.shape_cast %281 : vector<4x16xf32> to vector<4x16x1xf32>
    %283 = vector.broadcast %282 : vector<4x16x1xf32> to vector<4x16x16xf32>
    %284 = arith.subf %280, %283 : vector<4x16x16xf32>
    %285 = math.exp %284 : vector<4x16x16xf32>
    %cst_119 = arith.constant dense<0.000000e+00> : vector<4x16xf32>
    %286 = vector.multi_reduction <add>, %285, %cst_119 [2] : vector<4x16x16xf32> to vector<4x16xf32>
    %287 = vector.shape_cast %286 : vector<4x16xf32> to vector<4x16x1xf32>
    %288 = tpu.reciprocal %287 {approx = true} : vector<4x16x1xf32> -> vector<4x16x1xf32>
    %289 = vector.broadcast %288 : vector<4x16x1xf32> to vector<4x16x16xf32>
    %290 = arith.mulf %285, %289 : vector<4x16x16xf32>
    %291 = arith.truncf %290 : vector<4x16x16xf32> to vector<4x16x16xbf16>
    "tpu.trace_start"() <{level = 10 : i32, message = "cqk,ckd->cqd"}> : () -> ()
    %cst_120 = arith.constant dense<0.000000e+00> : vector<4x16x16xf32>
    %292 = tpu.matmul %291, %276, %cst_120 {dimension_numbers = #tpu.dot_dimension_numbers<[2], [1], [1], [2], [0, 0, 0, 1, 1, 2], [0], [0]>} : vector<4x16x16xbf16>, vector<4x16x16xbf16>, vector<4x16x16xf32> -> vector<4x16x16xf32>
    "tpu.trace_stop"() : () -> ()
    %293 = vector.shape_cast %292 : vector<4x16x16xf32> to vector<64x16xf32>
    %294 = vector.extract_strided_slice %253 {offsets = [0, 16], sizes = [64, 16], strides = [1, 1]} : vector<64x64xf32> to vector<64x16xf32>
    %295 = vector.shape_cast %294 : vector<64x16xf32> to vector<4x16x16xf32>
    %296 = arith.truncf %295 : vector<4x16x16xf32> to vector<4x16x16xbf16>
    %297 = vector.extract_strided_slice %260 {offsets = [0, 16], sizes = [64, 16], strides = [1, 1]} : vector<64x64xf32> to vector<64x16xf32>
    %298 = vector.shape_cast %297 : vector<64x16xf32> to vector<4x16x16xf32>
    %299 = arith.truncf %298 : vector<4x16x16xf32> to vector<4x16x16xbf16>
    %300 = vector.extract_strided_slice %267 {offsets = [0, 16], sizes = [64, 16], strides = [1, 1]} : vector<64x64xf32> to vector<64x16xf32>
    %301 = vector.shape_cast %300 : vector<64x16xf32> to vector<4x16x16xf32>
    %302 = arith.truncf %301 : vector<4x16x16xf32> to vector<4x16x16xbf16>
    "tpu.trace_start"() <{level = 10 : i32, message = "cqd,ckd->cqk"}> : () -> ()
    %cst_121 = arith.constant dense<0.000000e+00> : vector<4x16x16xf32>
    %303 = tpu.matmul %296, %299, %cst_121 {dimension_numbers = #tpu.dot_dimension_numbers<[2], [2], [1], [1], [0, 0, 0, 1, 1, 1], [0], [0]>} : vector<4x16x16xbf16>, vector<4x16x16xbf16>, vector<4x16x16xf32> -> vector<4x16x16xf32>
    "tpu.trace_stop"() : () -> ()
    %304 = vector.shape_cast %12 : vector<16x16xf32> to vector<1x16x16xf32>
    %305 = vector.broadcast %304 : vector<1x16x16xf32> to vector<4x16x16xf32>
    %306 = arith.addf %303, %305 : vector<4x16x16xf32>
    %cst_122 = arith.constant dense<0xFF800000> : vector<4x16xf32>
    %307 = vector.multi_reduction <maximumf>, %306, %cst_122 [2] : vector<4x16x16xf32> to vector<4x16xf32>
    %308 = vector.shape_cast %307 : vector<4x16xf32> to vector<4x16x1xf32>
    %309 = vector.broadcast %308 : vector<4x16x1xf32> to vector<4x16x16xf32>
    %310 = arith.subf %306, %309 : vector<4x16x16xf32>
    %311 = math.exp %310 : vector<4x16x16xf32>
    %cst_123 = arith.constant dense<0.000000e+00> : vector<4x16xf32>
    %312 = vector.multi_reduction <add>, %311, %cst_123 [2] : vector<4x16x16xf32> to vector<4x16xf32>
    %313 = vector.shape_cast %312 : vector<4x16xf32> to vector<4x16x1xf32>
    %314 = tpu.reciprocal %313 {approx = true} : vector<4x16x1xf32> -> vector<4x16x1xf32>
    %315 = vector.broadcast %314 : vector<4x16x1xf32> to vector<4x16x16xf32>
    %316 = arith.mulf %311, %315 : vector<4x16x16xf32>
    %317 = arith.truncf %316 : vector<4x16x16xf32> to vector<4x16x16xbf16>
    "tpu.trace_start"() <{level = 10 : i32, message = "cqk,ckd->cqd"}> : () -> ()
    %cst_124 = arith.constant dense<0.000000e+00> : vector<4x16x16xf32>
    %318 = tpu.matmul %317, %302, %cst_124 {dimension_numbers = #tpu.dot_dimension_numbers<[2], [1], [1], [2], [0, 0, 0, 1, 1, 2], [0], [0]>} : vector<4x16x16xbf16>, vector<4x16x16xbf16>, vector<4x16x16xf32> -> vector<4x16x16xf32>
    "tpu.trace_stop"() : () -> ()
    %319 = vector.shape_cast %318 : vector<4x16x16xf32> to vector<64x16xf32>
    %320 = vector.extract_strided_slice %253 {offsets = [0, 32], sizes = [64, 16], strides = [1, 1]} : vector<64x64xf32> to vector<64x16xf32>
    %321 = vector.shape_cast %320 : vector<64x16xf32> to vector<4x16x16xf32>
    %322 = arith.truncf %321 : vector<4x16x16xf32> to vector<4x16x16xbf16>
    %323 = vector.extract_strided_slice %260 {offsets = [0, 32], sizes = [64, 16], strides = [1, 1]} : vector<64x64xf32> to vector<64x16xf32>
    %324 = vector.shape_cast %323 : vector<64x16xf32> to vector<4x16x16xf32>
    %325 = arith.truncf %324 : vector<4x16x16xf32> to vector<4x16x16xbf16>
    %326 = vector.extract_strided_slice %267 {offsets = [0, 32], sizes = [64, 16], strides = [1, 1]} : vector<64x64xf32> to vector<64x16xf32>
    %327 = vector.shape_cast %326 : vector<64x16xf32> to vector<4x16x16xf32>
    %328 = arith.truncf %327 : vector<4x16x16xf32> to vector<4x16x16xbf16>
    "tpu.trace_start"() <{level = 10 : i32, message = "cqd,ckd->cqk"}> : () -> ()
    %cst_125 = arith.constant dense<0.000000e+00> : vector<4x16x16xf32>
    %329 = tpu.matmul %322, %325, %cst_125 {dimension_numbers = #tpu.dot_dimension_numbers<[2], [2], [1], [1], [0, 0, 0, 1, 1, 1], [0], [0]>} : vector<4x16x16xbf16>, vector<4x16x16xbf16>, vector<4x16x16xf32> -> vector<4x16x16xf32>
    "tpu.trace_stop"() : () -> ()
    %330 = vector.shape_cast %12 : vector<16x16xf32> to vector<1x16x16xf32>
    %331 = vector.broadcast %330 : vector<1x16x16xf32> to vector<4x16x16xf32>
    %332 = arith.addf %329, %331 : vector<4x16x16xf32>
    %cst_126 = arith.constant dense<0xFF800000> : vector<4x16xf32>
    %333 = vector.multi_reduction <maximumf>, %332, %cst_126 [2] : vector<4x16x16xf32> to vector<4x16xf32>
    %334 = vector.shape_cast %333 : vector<4x16xf32> to vector<4x16x1xf32>
    %335 = vector.broadcast %334 : vector<4x16x1xf32> to vector<4x16x16xf32>
    %336 = arith.subf %332, %335 : vector<4x16x16xf32>
    %337 = math.exp %336 : vector<4x16x16xf32>
    %cst_127 = arith.constant dense<0.000000e+00> : vector<4x16xf32>
    %338 = vector.multi_reduction <add>, %337, %cst_127 [2] : vector<4x16x16xf32> to vector<4x16xf32>
    %339 = vector.shape_cast %338 : vector<4x16xf32> to vector<4x16x1xf32>
    %340 = tpu.reciprocal %339 {approx = true} : vector<4x16x1xf32> -> vector<4x16x1xf32>
    %341 = vector.broadcast %340 : vector<4x16x1xf32> to vector<4x16x16xf32>
    %342 = arith.mulf %337, %341 : vector<4x16x16xf32>
    %343 = arith.truncf %342 : vector<4x16x16xf32> to vector<4x16x16xbf16>
    "tpu.trace_start"() <{level = 10 : i32, message = "cqk,ckd->cqd"}> : () -> ()
    %cst_128 = arith.constant dense<0.000000e+00> : vector<4x16x16xf32>
    %344 = tpu.matmul %343, %328, %cst_128 {dimension_numbers = #tpu.dot_dimension_numbers<[2], [1], [1], [2], [0, 0, 0, 1, 1, 2], [0], [0]>} : vector<4x16x16xbf16>, vector<4x16x16xbf16>, vector<4x16x16xf32> -> vector<4x16x16xf32>
    "tpu.trace_stop"() : () -> ()
    %345 = vector.shape_cast %344 : vector<4x16x16xf32> to vector<64x16xf32>
    %346 = vector.extract_strided_slice %253 {offsets = [0, 48], sizes = [64, 16], strides = [1, 1]} : vector<64x64xf32> to vector<64x16xf32>
    %347 = vector.shape_cast %346 : vector<64x16xf32> to vector<4x16x16xf32>
    %348 = arith.truncf %347 : vector<4x16x16xf32> to vector<4x16x16xbf16>
    %349 = vector.extract_strided_slice %260 {offsets = [0, 48], sizes = [64, 16], strides = [1, 1]} : vector<64x64xf32> to vector<64x16xf32>
    %350 = vector.shape_cast %349 : vector<64x16xf32> to vector<4x16x16xf32>
    %351 = arith.truncf %350 : vector<4x16x16xf32> to vector<4x16x16xbf16>
    %352 = vector.extract_strided_slice %267 {offsets = [0, 48], sizes = [64, 16], strides = [1, 1]} : vector<64x64xf32> to vector<64x16xf32>
    %353 = vector.shape_cast %352 : vector<64x16xf32> to vector<4x16x16xf32>
    %354 = arith.truncf %353 : vector<4x16x16xf32> to vector<4x16x16xbf16>
    "tpu.trace_start"() <{level = 10 : i32, message = "cqd,ckd->cqk"}> : () -> ()
    %cst_129 = arith.constant dense<0.000000e+00> : vector<4x16x16xf32>
    %355 = tpu.matmul %348, %351, %cst_129 {dimension_numbers = #tpu.dot_dimension_numbers<[2], [2], [1], [1], [0, 0, 0, 1, 1, 1], [0], [0]>} : vector<4x16x16xbf16>, vector<4x16x16xbf16>, vector<4x16x16xf32> -> vector<4x16x16xf32>
    "tpu.trace_stop"() : () -> ()
    %356 = vector.shape_cast %12 : vector<16x16xf32> to vector<1x16x16xf32>
    %357 = vector.broadcast %356 : vector<1x16x16xf32> to vector<4x16x16xf32>
    %358 = arith.addf %355, %357 : vector<4x16x16xf32>
    %cst_130 = arith.constant dense<0xFF800000> : vector<4x16xf32>
    %359 = vector.multi_reduction <maximumf>, %358, %cst_130 [2] : vector<4x16x16xf32> to vector<4x16xf32>
    %360 = vector.shape_cast %359 : vector<4x16xf32> to vector<4x16x1xf32>
    %361 = vector.broadcast %360 : vector<4x16x1xf32> to vector<4x16x16xf32>
    %362 = arith.subf %358, %361 : vector<4x16x16xf32>
    %363 = math.exp %362 : vector<4x16x16xf32>
    %cst_131 = arith.constant dense<0.000000e+00> : vector<4x16xf32>
    %364 = vector.multi_reduction <add>, %363, %cst_131 [2] : vector<4x16x16xf32> to vector<4x16xf32>
    %365 = vector.shape_cast %364 : vector<4x16xf32> to vector<4x16x1xf32>
    %366 = tpu.reciprocal %365 {approx = true} : vector<4x16x1xf32> -> vector<4x16x1xf32>
    %367 = vector.broadcast %366 : vector<4x16x1xf32> to vector<4x16x16xf32>
    %368 = arith.mulf %363, %367 : vector<4x16x16xf32>
    %369 = arith.truncf %368 : vector<4x16x16xf32> to vector<4x16x16xbf16>
    "tpu.trace_start"() <{level = 10 : i32, message = "cqk,ckd->cqd"}> : () -> ()
    %cst_132 = arith.constant dense<0.000000e+00> : vector<4x16x16xf32>
    %370 = tpu.matmul %369, %354, %cst_132 {dimension_numbers = #tpu.dot_dimension_numbers<[2], [1], [1], [2], [0, 0, 0, 1, 1, 2], [0], [0]>} : vector<4x16x16xbf16>, vector<4x16x16xbf16>, vector<4x16x16xf32> -> vector<4x16x16xf32>
    "tpu.trace_stop"() : () -> ()
    %371 = vector.shape_cast %370 : vector<4x16x16xf32> to vector<64x16xf32>
    %372 = tpu.concatenate %293, %319, %345, %371 in 1 : vector<64x16xf32>, vector<64x16xf32>, vector<64x16xf32>, vector<64x16xf32> -> vector<64x64xf32>
    %373 = arith.truncf %372 : vector<64x64xf32> to vector<64x64xbf16>
    %c1_133 = arith.constant 1 : index
    %c0_134 = arith.constant 0 : index
    %c0_135 = arith.constant 0 : index
    %374 = vector.load %arg11[%c1_133, %c0_134, %c0_135] : memref<2x64x64xbf16, #tpu.memory_space<vmem>>, vector<1x64x64xbf16>
    %375 = vector.shape_cast %374 : vector<1x64x64xbf16> to vector<64x64xbf16>
    %cst_136 = arith.constant dense<0.000000e+00> : vector<64x64xf32>
    %376 = tpu.matmul %373, %375, %cst_136 {dimension_numbers = #tpu.dot_dimension_numbers<[1], [0], [0], [1], [0, 0, 1, 1], [], []>} : vector<64x64xbf16>, vector<64x64xbf16>, vector<64x64xf32> -> vector<64x64xf32>
    %377 = arith.addf %221, %376 : vector<64x64xf32>
    %c1_137 = arith.constant 1 : index
    %c0_138 = arith.constant 0 : index
    %c0_139 = arith.constant 0 : index
    %378 = vector.load %arg12[%c1_137, %c0_138, %c0_139] : memref<2x1x64xf32, #tpu.memory_space<vmem>>, vector<1x1x64xf32>
    %379 = vector.shape_cast %378 : vector<1x1x64xf32> to vector<1x64xf32>
    %380 = vector.broadcast %379 : vector<1x64xf32> to vector<64x64xf32>
    %381 = arith.addf %377, %380 : vector<64x64xf32>
    %c1_140 = arith.constant 1 : index
    %c0_141 = arith.constant 0 : index
    %c0_142 = arith.constant 0 : index
    %382 = vector.load %arg13[%c1_140, %c0_141, %c0_142] : memref<2x1x64xf32, #tpu.memory_space<vmem>>, vector<1x1x64xf32>
    %383 = vector.shape_cast %382 : vector<1x1x64xf32> to vector<1x64xf32>
    %c1_143 = arith.constant 1 : index
    %c0_144 = arith.constant 0 : index
    %c0_145 = arith.constant 0 : index
    %384 = vector.load %arg14[%c1_143, %c0_144, %c0_145] : memref<2x1x64xf32, #tpu.memory_space<vmem>>, vector<1x1x64xf32>
    %385 = vector.shape_cast %384 : vector<1x1x64xf32> to vector<1x64xf32>
    %cst_146 = arith.constant dense<0.000000e+00> : vector<64xf32>
    %386 = vector.multi_reduction <add>, %381, %cst_146 [1] : vector<64x64xf32> to vector<64xf32>
    %387 = vector.shape_cast %386 : vector<64xf32> to vector<64x1xf32>
    %cst_147 = arith.constant 6.400000e+01 : f32
    %388 = vector.broadcast %cst_147 : f32 to vector<64x1xf32>
    %389 = arith.divf %387, %388 : vector<64x1xf32>
    %390 = vector.broadcast %389 : vector<64x1xf32> to vector<64x64xf32>
    %391 = arith.subf %381, %390 : vector<64x64xf32>
    %392 = arith.mulf %391, %391 : vector<64x64xf32>
    %cst_148 = arith.constant dense<0.000000e+00> : vector<64xf32>
    %393 = vector.multi_reduction <add>, %392, %cst_148 [1] : vector<64x64xf32> to vector<64xf32>
    %394 = vector.shape_cast %393 : vector<64xf32> to vector<64x1xf32>
    %cst_149 = arith.constant 6.400000e+01 : f32
    %395 = vector.broadcast %cst_149 : f32 to vector<64x1xf32>
    %396 = arith.divf %394, %395 : vector<64x1xf32>
    %cst_150 = arith.constant 9.99999974E-6 : f32
    %397 = vector.broadcast %cst_150 : f32 to vector<64x1xf32>
    %398 = arith.addf %396, %397 : vector<64x1xf32>
    %399 = math.rsqrt %398 : vector<64x1xf32>
    %400 = vector.broadcast %399 : vector<64x1xf32> to vector<64x64xf32>
    %401 = arith.mulf %391, %400 : vector<64x64xf32>
    %402 = vector.broadcast %383 : vector<1x64xf32> to vector<64x64xf32>
    %403 = arith.mulf %401, %402 : vector<64x64xf32>
    %404 = vector.broadcast %385 : vector<1x64xf32> to vector<64x64xf32>
    %405 = arith.addf %403, %404 : vector<64x64xf32>
    %406 = arith.truncf %405 : vector<64x64xf32> to vector<64x64xbf16>
    %c1_151 = arith.constant 1 : index
    %c0_152 = arith.constant 0 : index
    %c0_153 = arith.constant 0 : index
    %407 = vector.load %arg15[%c1_151, %c0_152, %c0_153] : memref<2x64x256xbf16, #tpu.memory_space<vmem>>, vector<1x64x256xbf16>
    %408 = vector.shape_cast %407 : vector<1x64x256xbf16> to vector<64x256xbf16>
    %cst_154 = arith.constant dense<0.000000e+00> : vector<64x256xf32>
    %409 = tpu.matmul %406, %408, %cst_154 {dimension_numbers = #tpu.dot_dimension_numbers<[1], [0], [0], [1], [0, 0, 1, 1], [], []>} : vector<64x64xbf16>, vector<64x256xbf16>, vector<64x256xf32> -> vector<64x256xf32>
    %c1_155 = arith.constant 1 : index
    %c0_156 = arith.constant 0 : index
    %c0_157 = arith.constant 0 : index
    %410 = vector.load %arg16[%c1_155, %c0_156, %c0_157] : memref<2x1x256xf32, #tpu.memory_space<vmem>>, vector<1x1x256xf32>
    %411 = vector.shape_cast %410 : vector<1x1x256xf32> to vector<1x256xf32>
    %412 = vector.broadcast %411 : vector<1x256xf32> to vector<64x256xf32>
    %413 = arith.addf %409, %412 : vector<64x256xf32>
    %cst_158 = arith.constant 1.702000e+00 : f32
    %414 = vector.broadcast %cst_158 : f32 to vector<64x256xf32>
    %415 = arith.mulf %414, %413 : vector<64x256xf32>
    %416 = arith.negf %415 : vector<64x256xf32>
    %417 = math.exp %416 : vector<64x256xf32>
    %cst_159 = arith.constant 1.000000e+00 : f32
    %418 = vector.broadcast %cst_159 : f32 to vector<64x256xf32>
    %419 = arith.addf %418, %417 : vector<64x256xf32>
    %420 = arith.divf %418, %419 : vector<64x256xf32>
    %421 = arith.mulf %413, %420 : vector<64x256xf32>
    %422 = arith.truncf %421 : vector<64x256xf32> to vector<64x256xbf16>
    %c1_160 = arith.constant 1 : index
    %c0_161 = arith.constant 0 : index
    %c0_162 = arith.constant 0 : index
    %423 = vector.load %arg17[%c1_160, %c0_161, %c0_162] : memref<2x256x64xbf16, #tpu.memory_space<vmem>>, vector<1x256x64xbf16>
    %424 = vector.shape_cast %423 : vector<1x256x64xbf16> to vector<256x64xbf16>
    %cst_163 = arith.constant dense<0.000000e+00> : vector<64x64xf32>
    %425 = tpu.matmul %422, %424, %cst_163 {dimension_numbers = #tpu.dot_dimension_numbers<[1], [0], [0], [1], [0, 0, 1, 1], [], []>} : vector<64x256xbf16>, vector<256x64xbf16>, vector<64x64xf32> -> vector<64x64xf32>
    %426 = arith.addf %381, %425 : vector<64x64xf32>
    %c1_164 = arith.constant 1 : index
    %c0_165 = arith.constant 0 : index
    %c0_166 = arith.constant 0 : index
    %427 = vector.load %arg18[%c1_164, %c0_165, %c0_166] : memref<2x1x64xf32, #tpu.memory_space<vmem>>, vector<1x1x64xf32>
    %428 = vector.shape_cast %427 : vector<1x1x64xf32> to vector<1x64xf32>
    %429 = vector.broadcast %428 : vector<1x64xf32> to vector<64x64xf32>
    %430 = arith.addf %426, %429 : vector<64x64xf32>
    %431 = tpu.iota {dimensions = array<i32: 1>} : vector<4x64xi32>
    %432 = tpu.iota {dimensions = array<i32: 0>} : vector<4x64xi32>
    %c16_i32 = arith.constant 16 : i32
    %433 = vector.broadcast %c16_i32 : i32 to vector<4x64xi32>
    %434 = arith.muli %432, %433 : vector<4x64xi32>
    %c0_167 = arith.constant 0 : index
    %c0_168 = arith.constant 0 : index
    %435 = vector.load %arg2[%c0_167, %c0_168] : memref<4x1xi32, #tpu.memory_space<vmem>>, vector<4x1xi32>
    %436 = vector.broadcast %435 : vector<4x1xi32> to vector<4x64xi32>
    %437 = arith.addi %434, %436 : vector<4x64xi32>
    %438 = arith.cmpi eq, %431, %437 : vector<4x64xi32>
    %439 = arith.extui %438 : vector<4x64xi1> to vector<4x64xi32>
    %440 = arith.sitofp %439 : vector<4x64xi32> to vector<4x64xf32>
    %cst_169 = arith.constant dense<0.000000e+00> : vector<4x64xf32>
    %441 = tpu.matmul %440, %430, %cst_169 {dimension_numbers = #tpu.dot_dimension_numbers<[1], [0], [0], [1], [0, 0, 1, 1], [], []>} : vector<4x64xf32>, vector<64x64xf32>, vector<4x64xf32> -> vector<4x64xf32>
    %c0_170 = arith.constant 0 : index
    %c0_171 = arith.constant 0 : index
    %442 = vector.load %arg19[%c0_170, %c0_171] : memref<1x64xf32, #tpu.memory_space<vmem>>, vector<1x64xf32>
    %c0_172 = arith.constant 0 : index
    %c0_173 = arith.constant 0 : index
    %443 = vector.load %arg20[%c0_172, %c0_173] : memref<1x64xf32, #tpu.memory_space<vmem>>, vector<1x64xf32>
    %cst_174 = arith.constant dense<0.000000e+00> : vector<4xf32>
    %444 = vector.multi_reduction <add>, %441, %cst_174 [1] : vector<4x64xf32> to vector<4xf32>
    %445 = vector.shape_cast %444 : vector<4xf32> to vector<4x1xf32>
    %cst_175 = arith.constant 6.400000e+01 : f32
    %446 = vector.broadcast %cst_175 : f32 to vector<4x1xf32>
    %447 = arith.divf %445, %446 : vector<4x1xf32>
    %448 = vector.broadcast %447 : vector<4x1xf32> to vector<4x64xf32>
    %449 = arith.subf %441, %448 : vector<4x64xf32>
    %450 = arith.mulf %449, %449 : vector<4x64xf32>
    %cst_176 = arith.constant dense<0.000000e+00> : vector<4xf32>
    %451 = vector.multi_reduction <add>, %450, %cst_176 [1] : vector<4x64xf32> to vector<4xf32>
    %452 = vector.shape_cast %451 : vector<4xf32> to vector<4x1xf32>
    %cst_177 = arith.constant 6.400000e+01 : f32
    %453 = vector.broadcast %cst_177 : f32 to vector<4x1xf32>
    %454 = arith.divf %452, %453 : vector<4x1xf32>
    %cst_178 = arith.constant 9.99999974E-6 : f32
    %455 = vector.broadcast %cst_178 : f32 to vector<4x1xf32>
    %456 = arith.addf %454, %455 : vector<4x1xf32>
    %457 = math.rsqrt %456 : vector<4x1xf32>
    %458 = vector.broadcast %457 : vector<4x1xf32> to vector<4x64xf32>
    %459 = arith.mulf %449, %458 : vector<4x64xf32>
    %460 = vector.broadcast %442 : vector<1x64xf32> to vector<4x64xf32>
    %461 = arith.mulf %459, %460 : vector<4x64xf32>
    %462 = vector.broadcast %443 : vector<1x64xf32> to vector<4x64xf32>
    %463 = arith.addf %461, %462 : vector<4x64xf32>
    %464 = arith.truncf %463 : vector<4x64xf32> to vector<4x64xbf16>
    %c0_179 = arith.constant 0 : index
    %c0_180 = arith.constant 0 : index
    %465 = vector.load %arg21[%c0_179, %c0_180] : memref<64x512xbf16, #tpu.memory_space<vmem>>, vector<64x512xbf16>
    %cst_181 = arith.constant dense<0.000000e+00> : vector<4x512xf32>
    %466 = tpu.matmul %464, %465, %cst_181 {dimension_numbers = #tpu.dot_dimension_numbers<[1], [0], [0], [1], [0, 0, 1, 1], [], []>} : vector<4x64xbf16>, vector<64x512xbf16>, vector<4x512xf32> -> vector<4x512xf32>
    %467 = arith.mulf %466, %466 : vector<4x512xf32>
    %cst_182 = arith.constant dense<0.000000e+00> : vector<4xf32>
    %468 = vector.multi_reduction <add>, %467, %cst_182 [1] : vector<4x512xf32> to vector<4xf32>
    %469 = vector.shape_cast %468 : vector<4xf32> to vector<4x1xf32>
    %470 = math.rsqrt %469 : vector<4x1xf32>
    %471 = vector.broadcast %470 : vector<4x1xf32> to vector<4x512xf32>
    %472 = arith.mulf %466, %471 : vector<4x512xf32>
    %c0_183 = arith.constant 0 : index
    %c0_184 = arith.constant 0 : index
    %473 = vector.load %arg22[%c0_183, %c0_184] : memref<2x512xf32, #tpu.memory_space<vmem>>, vector<2x512xf32>
    %474 = arith.mulf %473, %473 : vector<2x512xf32>
    %cst_185 = arith.constant dense<0.000000e+00> : vector<2xf32>
    %475 = vector.multi_reduction <add>, %474, %cst_185 [1] : vector<2x512xf32> to vector<2xf32>
    %476 = vector.shape_cast %475 : vector<2xf32> to vector<2x1xf32>
    %477 = math.rsqrt %476 : vector<2x1xf32>
    %478 = vector.broadcast %477 : vector<2x1xf32> to vector<2x512xf32>
    %479 = arith.mulf %473, %478 : vector<2x512xf32>
    %480 = arith.truncf %479 : vector<2x512xf32> to vector<2x512xbf16>
    %481 = arith.truncf %472 : vector<4x512xf32> to vector<4x512xbf16>
    %cst_186 = arith.constant dense<0.000000e+00> : vector<2x4xf32>
    %482 = tpu.matmul %480, %481, %cst_186 {dimension_numbers = #tpu.dot_dimension_numbers<[1], [1], [0], [0], [0, 0, 1, 0], [], []>} : vector<2x512xbf16>, vector<4x512xbf16>, vector<2x4xf32> -> vector<2x4xf32>
    %c0_187 = arith.constant 0 : index
    %c0_188 = arith.constant 0 : index
    %483 = memref.load %arg23[%c0_187, %c0_188] : memref<1x1xf32, #tpu.memory_space<smem>>
    %484 = vector.broadcast %483 : f32 to vector<2x4xf32>
    %485 = arith.mulf %482, %484 : vector<2x4xf32>
    %c0_189 = arith.constant 0 : index
    %c0_190 = arith.constant 0 : index
    %486 = vector.load %arg24[%c0_189, %c0_190] : memref<2x4xf32, #tpu.memory_space<vmem>>, vector<2x4xf32>
    tpu.vector_store %arg24[%c0_189, %c0_190], %485 {strides = array<i32>} : memref<2x4xf32, #tpu.memory_space<vmem>>, vector<2x4xf32>,
    return
  }
}

</mosaic_0001>

<bundles_post_ra>
// kernel: tpu_custom_call.1
= control target key start
LH: loop header
LB: loop body
LE: loop exit
PB: predicated region body
PF: predicated region fallthrough
CT: control target
= control target key end

     0   :  { %s11417_s0 = inlined_call_operand.vmem [shape: f32[64,64], index: 0, kind: input, shape index: {}]   ;;  %s11418_s1 = inlined_call_operand.hbm [shape: f32[16,64], index: 1, kind: input, shape index: {}]   ;;  %s11419_s2 = inlined_call_operand.vmem [shape: s32[4,1], index: 2, kind: input, shape index: {}]   ;;  %s11420_s3 = inlined_call_operand.vmem [shape: f32[2,1,64], index: 3, kind: input, shape index: {}]   ;;  %s11421_s4 = inlined_call_operand.vmem [shape: f32[2,1,64], index: 4, kind: input, shape index: {}]   ;;  %s11422_s5 = inlined_call_operand.vmem [shape: bf16[2,64,64], index: 5, kind: input, shape index: {}]   ;;  %s11423_s6 = inlined_call_operand.vmem [shape: f32[2,1,64], index: 6, kind: input, shape index: {}]   ;;  %s11424_s7 = inlined_call_operand.hbm [shape: bf16[2,64,64], index: 7, kind: input, shape index: {}]   ;;  %s11425_s8 = inlined_call_operand.vmem [shape: f32[2,1,64], index: 8, kind: input, shape index: {}]   ;;  %s11426_s9 = inlined_call_operand.hbm [shape: bf16[2,64,64], index: 9, kind: input, shape index: {}]   ;;  %s11427_s10 = inlined_call_operand.vmem [shape: f32[2,1,64], index: 10, kind: input, shape index: {}]   ;;  %s11428_s11 = inlined_call_operand.hbm [shape: bf16[2,64,64], index: 11, kind: input, shape index: {}]   ;;  %s11429_s12 = inlined_call_operand.vmem [shape: f32[2,1,64], index: 12, kind: input, shape index: {}]   ;;  %s11430_s13 = inlined_call_operand.vmem [shape: f32[2,1,64], index: 13, kind: input, shape index: {}]   ;;  %s11431_s14 = inlined_call_operand.vmem [shape: f32[2,1,64], index: 14, kind: input, shape index: {}]   ;;  %s11432_s15 = inlined_call_operand.vmem [shape: bf16[2,64,256], index: 15, kind: input, shape index: {}]   ;;  %s11433_s16 = inlined_call_operand.vmem [shape: f32[2,1,256], index: 16, kind: input, shape index: {}]   ;;  %s11434_s17 = inlined_call_operand.vmem [shape: bf16[2,256,64], index: 17, kind: input, shape index: {}]   ;;  %s11435_s18 = inlined_call_operand.vmem [shape: f32[2,1,64], index: 18, kind: input, shape index: {}]   ;;  %s11436_s19 = inlined_call_operand.vmem [shape: f32[1,64], index: 19, kind: input, shape index: {}]   ;;  %s11437_s20 = inlined_call_operand.vmem [shape: f32[1,64], index: 20, kind: input, shape index: {}]   ;;  %s11438_s21 = inlined_call_operand.vmem [shape: bf16[64,512], index: 21, kind: input, shape index: {}]   ;;  %s11439_s22 = inlined_call_operand.vmem [shape: f32[2,512], index: 22, kind: input, shape index: {}]   ;;  %s11440_s23 = inlined_call_operand.<no memory space> [shape: f32[1,1], index: 23, kind: input, shape index: {}]   ;;  %s11441_s24 = inlined_call_operand.hbm [shape: f32[2,4], index: 24, kind: output, shape index: {}]  }
   0x1   :  { %11470 = sst [smem:[#allocation19_spill]] %s11417_s0 }
   0x2   :  { %11471 = sst [smem:[#allocation20_spill]] %s11418_s1 }
   0x3   :  { %11472 = sst [smem:[#allocation21_spill]] %s11419_s2 }
   0x4   :  { %11473 = sst [smem:[#allocation22_spill]] %s11420_s3 }
   0x5   :  { %11474 = sst [smem:[#allocation23_spill]] %s11421_s4 }
   0x6   :  { %11475 = sst [smem:[#allocation24_spill]] %s11422_s5 }
   0x7   :  { %11476 = sst [smem:[#allocation25_spill]] %s11423_s6 }
   0x8   :  { %11477 = sst [smem:[#allocation26_spill]] %s11424_s7 }
   0x9   :  { %11478 = sst [smem:[#allocation27_spill]] %s11425_s8 }
   0xa   :  { %11479 = sst [smem:[#allocation28_spill]] %s11440_s23 }
   0xb   :  { %11480 = sst [smem:[#allocation29_spill]] %s11441_s24 }
   0xc   :  { %30 = vsyncpa [#allocation4], 0 }
   0xd   :  { %31 = vsyncpa [#allocation7], 0 }
   0xe   :  { %32 = vsyncpa [#allocation10], 0 }
   0xf   :  { %33 = vsyncpa [#allocation5], 0  ;;  %s9212_s5 = smov [#allocation6]   ;;  %s11481_s6 = sld [smem:[#allocation26_spill]] }
  0x10   :  { %s63_s26 = sshll.u32 %s9212_s5, 4  ;;  %s64_s26 = int_to_ptr.vmem [resolvable:$true] %s63_s26 }
  0x15   :  { %s9094_s2 = scalar_lea.hbm %s11481_s6, 1024 }
  0x16   :  { %p9095_p0 = scmp.ne.s32.totalorder %s11481_s6, %s9094_s2  ;;  %p9098_p1 = scmp.lt.u32.totalorder %s9094_s2, %s11481_s6 }
  0x18   :  { %p9100_p2 = pnand %p9098_p1, %p9095_p0 }
  0x1a   :  { %9103 = shalt.err (!%p9100_p2)
}
  0x1b   :  { %s9104_s3 = scalar_lea.vmem %s64_s26, 1024  ;;  %p9109_p4 = scmp.lt.s32.totalorder %s64_s26, %s64_s26 }
  0x1c   :  { %p9105_p3 = scmp.ne.s32.totalorder %s64_s26, %s9104_s3  ;;  %p9110_p5 = scmp.lt.s32.totalorder %s9104_s3, %s9104_s3 }
  0x1e   :  { %p9111_p6 = por %p9110_p5, %p9109_p4 }
  0x20   :  { %p9112_p7 = pnand %p9111_p6, %p9105_p3 }
  0x22   :  { %9115 = shalt.err (!%p9112_p7)
}
  0x23   :  { %s11451_s25 = smov 64   ;;  %s11453_s8 = smov 4  }
  0x24   :  { %69 = dma.hbm_to_vmem [thread:$0]  %s11481_s6, 1024, %s64_s26, [#allocation7], %s11451_s25, %s11451_s25, %s11453_s8  }
  0x25   :  { %s9215_s5 = smov [#allocation3]   ;;  %s11482_s29 = sld [smem:[#allocation20_spill]] }
  0x26   :  { %s41_s27 = sshll.u32 %s9215_s5, 4  ;;  %s42_s27 = int_to_ptr.vmem [resolvable:$true] %s41_s27 }
  0x2b   :  { %s9116_s0 = scalar_lea.hbm %s11482_s29, 256 }
  0x2c   :  { %p9117_p8 = scmp.ne.s32.totalorder %s11482_s29, %s9116_s0  ;;  %p9120_p9 = scmp.lt.u32.totalorder %s9116_s0, %s11482_s29 }
  0x2e   :  { %p9122_p10 = pnand %p9120_p9, %p9117_p8 }
  0x30   :  { %9125 = shalt.err (!%p9122_p10)
}
  0x31   :  { %s9126_s23 = scalar_lea.vmem %s42_s27, 256  ;;  %p9131_p12 = scmp.lt.s32.totalorder %s42_s27, %s42_s27 }
  0x32   :  { %p9127_p11 = scmp.ne.s32.totalorder %s42_s27, %s9126_s23  ;;  %p9132_p13 = scmp.lt.s32.totalorder %s9126_s23, %s9126_s23 }
  0x34   :  { %p9133_p0 = por %p9132_p13, %p9131_p12 }
  0x36   :  { %p9134_p1 = pnand %p9133_p0, %p9127_p11 }
  0x38   :  { %9137 = shalt.err (!%p9134_p1)
}
  0x39   :  { %s9216_s26 = smov 128   ;;  %s9217_s6 = smov 8  }
  0x3a   :  { %47 = dma.hbm_to_vmem [thread:$0]  %s11482_s29, 256, %s42_s27, [#allocation4], %s9216_s26, %s9216_s26, %s9217_s6  }
  0x3b   :  { %s9218_s5 = smov [#allocation8]   ;;  %s9219_s2 = smov [#allocation9]  }
  0x3c   :  { %s77_s28 = sshll.u32 %s9218_s5, 4  ;;  %s91_s24 = sshll.u32 %s9219_s2, 4  ;;  %s78_s28 = int_to_ptr.vmem [resolvable:$true] %s77_s28  ;;  %s9386_s24 = int_to_ptr.vmem [resolvable:$true] %s91_s24 }
  0x3d   :  { %s9138_s23 = scalar_lea.hbm %s11426_s9, 1024 }
  0x3e   :  { %p9139_p2 = scmp.ne.s32.totalorder %s11426_s9, %s9138_s23  ;;  %p9142_p3 = scmp.lt.u32.totalorder %s9138_s23, %s11426_s9 }
  0x40   :  { %p9144_p4 = pnand %p9142_p3, %p9139_p2 }
  0x42   :  { %9147 = shalt.err (!%p9144_p4)
}
  0x43   :  { %s9148_s27 = scalar_lea.vmem %s78_s28, 1024  ;;  %p9153_p6 = scmp.lt.s32.totalorder %s78_s28, %s78_s28 }
  0x44   :  { %p9149_p5 = scmp.ne.s32.totalorder %s78_s28, %s9148_s27  ;;  %p9154_p7 = scmp.lt.s32.totalorder %s9148_s27, %s9148_s27 }
  0x46   :  { %p9155_p8 = por %p9154_p7, %p9153_p6 }
  0x48   :  { %p9156_p9 = pnand %p9155_p8, %p9149_p5 }
  0x4a   :  { %9159 = shalt.err (!%p9156_p9)
}
  0x4b   :  { %s11483_s29 = smov 4   ;;  %s11484_s26 = smov 64  }
  0x4c   :  { %83 = dma.hbm_to_vmem [thread:$0]  %s11426_s9, 1024, %s78_s28, [#allocation7], %s11484_s26, %s11484_s26, %s11483_s29  }
  0x4d   :  { %s9160_s25 = scalar_lea.hbm %s11428_s11, 1024 }
  0x4e   :  { %p9161_p10 = scmp.ne.s32.totalorder %s11428_s11, %s9160_s25  ;;  %p9164_p11 = scmp.lt.u32.totalorder %s9160_s25, %s11428_s11 }
  0x50   :  { %p9166_p12 = pnand %p9164_p11, %p9161_p10 }
  0x52   :  { %9169 = shalt.err (!%p9166_p12)
}
  0x53   :  { %s9170_s23 = scalar_lea.vmem %s9386_s24, 1024  ;;  %p9175_p0 = scmp.lt.s32.totalorder %s9386_s24, %s9386_s24 }
  0x54   :  { %p9171_p13 = scmp.ne.s32.totalorder %s9386_s24, %s9170_s23  ;;  %p9176_p1 = scmp.lt.s32.totalorder %s9170_s23, %s9170_s23 }
  0x56   :  { %p9177_p2 = por %p9176_p1, %p9175_p0 }
  0x58   :  { %p9178_p3 = pnand %p9177_p2, %p9171_p13 }
  0x5a   :  { %9181 = shalt.err (!%p9178_p3)
}
  0x5b   :  { %97 = dma.hbm_to_vmem [thread:$0]  %s11428_s11, 1024, %s9386_s24, [#allocation10], %s11484_s26, %s11484_s26, %s11483_s29  }
  0x5c   :  { %9204 = dma.done.wait [#allocation4], 256  }
  0x5d   :  { %9205 = vsyncadd [#allocation4], 4294967040 }
  0x5e   :  { %9206 = dma.done.wait [#allocation7], 2048  }
  0x5f   :  { %9207 = vsyncadd [#allocation7], 4294965248 }
  0x60   :  { %9208 = dma.done.wait [#allocation10], 1024  }
  0x61   :  { %9209 = vsyncadd [#allocation10], 4294966272  ;;  %s11485_s27 = sld [smem:[#allocation19_spill]]  ;;  %v143_v1 = vld [vmem:[#allocation3] sm:$0xff]  ;;  %vm164_vm0 = vcmask 523264   ;;  %v144_v6 = vld [vmem:[#allocation3 + $0x8] sm:$0xff] }
  0x62   :  { %s11486_s30 = sld [smem:[#allocation24_spill]]  ;;  %s11487_s1 = sld [smem:[#allocation22_spill]]  ;;  %vm9221_vm1 = vmmov 0   ;;  %vm638_vm2 = vcmask 130048   ;;  %vm2663_vm5 = vcmask 261120   ;;  %vm2672_vm6 = vcmask 392192  }
  0x63   :  { %s11488_s8 = sld [smem:[#allocation23_spill]]  ;;  %s11489_s7 = sld [smem:[#allocation25_spill]]  ;;  %vm6837_vm8 = vcmask 519168   ;;  %vm7090_vm9 = vcmask 1041408   ;;  %vm7051_vm10 = vcmask 1043456   ;;  %vm7224_vm11 = vcmask 25600  }
  0x64   :  { %s11490_s28 = sld [smem:[#allocation27_spill]]  ;;  %s9223_s6 = smov 112  }
  0x65   :  { %s9224_s4 = smov 96   ;;  %s9225_s11 = smov 80  }
  0x66   :  { %s9226_s24 = smov 16   ;;  %s11462_s29 = smov 32  }
  0x67   :  { %v135_v0 = vld [vmem:[%s11485_s27] sm:$0xff]  ;;  %v137_v2 = vld [vmem:[%s11485_s27 + $0x10] sm:$0xff]  ;;  %v136_v5 = vld [vmem:[%s11485_s27 + $0x8] sm:$0xff]  ;;  %s11460_s26 = smov 48   ;;  %s11513_s9 = sld [smem:[#allocation21_spill]] }
  0x68   :  { %v9429_v3 = vadd.f32 %v143_v1, %v135_v0  ;;  %v9431_v4 = vadd.f32 %v143_v1, %v137_v2  ;;  %v138_v7 = vld [vmem:[%s11485_s27 + $0x18] sm:$0xff]  ;;  %v9439_v8 = vadd.f32 %v144_v6, %v136_v5  ;;  %v139_v10 = vld [vmem:[%s11485_s27 + $0x20] sm:$0xff]  ;;  %v140_v11 = vld [vmem:[%s11485_s27 + $0x28] sm:$0xff] }
  0x69   :  { %v9441_v9 = vadd.f32 %v144_v6, %v138_v7  ;;  %v141_v12 = vld [vmem:[%s11485_s27 + $0x30] sm:$0xff]  ;;  %v9456_v15 = vadd.f32 %v143_v1, %v139_v10  ;;  %v9458_v16 = vadd.f32 %v144_v6, %v140_v11  ;;  %v142_v17 = vld [vmem:[%s11485_s27 + $0x38] sm:$0xff]  ;;  %v8528_v2 = vld [vmem:[%s11486_s30] sm:$0xff]  }
  0x6a   :  { %v165_v13 = vsel %vm164_vm0, %v9429_v3, 0.0  ;;  %v171_v14 = vsel %vm164_vm0, %v9431_v4, 0.0  ;;  %v168_v18 = vsel %vm164_vm0, %v9439_v8, 0.0  ;;  %v9467_v20 = vadd.f32 %v143_v1, %v141_v12  ;;  %v8529_v5 = vld [vmem:[#allocation6] sm:$0xff]   ;;  %7838 = vmatprep.subr.bf16.mxu0 %v8528_v2  ;;  %v8531_v7 = vld [vmem:[#allocation6 + $0x8] sm:$0xff]   ;;  %v8533_v11 = vld [vmem:[#allocation6 + $0x10] sm:$0xff]  }
  0x6b   :  { %166 = vadd.xlane.f32.xlu0 %v165_v13  ;;  %172 = vadd.xlane.f32.xlu1 %v171_v14  ;;  %v174_v19 = vsel %vm164_vm0, %v9441_v9, 0.0  ;;  %v9469_v21 = vadd.f32 %v144_v6, %v142_v17  ;;  %v177_v22 = vsel %vm164_vm0, %v9456_v15, 0.0  ;;  %v180_v23 = vsel %vm164_vm0, %v9458_v16, 0.0  ;;  %v8530_v6 = vld [vmem:[%s11486_s30 + $0x8] sm:$0xff]   ;;  %v8532_v10 = vld [vmem:[%s11486_s30 + $0x10] sm:$0xff]   ;;  %v8534_v12 = vld [vmem:[%s11486_s30 + $0x18] sm:$0xff]  }
  0x6c   :  { %v183_v24 = vsel %vm164_vm0, %v9467_v20, 0.0  ;;  %7854 = vmatprep.subr.bf16.mxu1 %v8529_v5  ;;  %7839 = vmatpush3.bf16.msra.mxu0 %v8528_v2  ;;  %v8535_v13 = vld [vmem:[#allocation6 + $0x18] sm:$0xff]   ;;  %v9539_v14 = vld [vmem:[#allocation8] sm:$0xff]  }
  0x6d   :  { %v186_v25 = vsel %vm164_vm0, %v9469_v21, 0.0  ;;  %7855 = vmatpush3.bf16.msra.mxu1 %v8529_v5  ;;  %7840 = vmatprep.subr.bf16.mxu0 %v8530_v6 }
  0x6e   :  { %7856 = vmatprep.subr.bf16.mxu1 %v8531_v7 }
  0x6f   :  { %169 = vadd.xlane.f32.xlu0 %v168_v18  ;;  %175 = vadd.xlane.f32.xlu1 %v174_v19 }
  0x70   :  { %7841 = vmatpush3.bf16.msra.mxu0 %v8530_v6 }
  0x71   :  { %7857 = vmatpush3.bf16.msra.mxu1 %v8531_v7  ;;  %7842 = vmatprep.subr.bf16.mxu0 %v8532_v10 }
  0x72   :  { %7858 = vmatprep.subr.bf16.mxu1 %v8533_v11 }
  0x73   :  { %178 = vadd.xlane.f32.xlu0 %v177_v22  ;;  %181 = vadd.xlane.f32.xlu1 %v180_v23 }
  0x74   :  { %7843 = vmatpush3.bf16.msra.mxu0 %v8532_v10 }
  0x75   :  { %7859 = vmatpush3.bf16.msra.mxu1 %v8533_v11  ;;  %7844 = vmatprep.subr.bf16.mxu0 %v8534_v12 }
  0x76   :  { %7860 = vmatprep.subr.bf16.mxu1 %v8535_v13 }
  0x77   :  { %184 = vadd.xlane.f32.xlu0 %v183_v24  ;;  %187 = vadd.xlane.f32.xlu1 %v186_v25 }
  0x78   :  { %7845 = vmatpush3.bf16.msra.mxu0 %v8534_v12 }
  0x79   :  { %7861 = vmatpush3.bf16.msra.mxu1 %v8535_v13  ;;  %7870 = vmatprep.subr.bf16.mxu0 %v9539_v14 }
  0xf8   :  { %v167_v26 = vpop.xlane.xlu0 %166  ;;  %v173_v27 = vpop.xlane.xlu1 %172 }
  0xf9   :  { %v190_v28 = vmul.f32 0.015625, %v167_v26  ;;  %v192_v29 = vmul.f32 0.015625, %v173_v27 }
  0xfb   :  { %v9480_v30 = vsub.f32 %v9429_v3, %v190_v28  ;;  %v9483_v31 = vsub.f32 %v9431_v4, %v192_v29 }
  0xfc   :  { %v170_v32 = vpop.xlane.xlu0 %169  ;;  %v176_v33 = vpop.xlane.xlu1 %175 }
  0xfd   :  { %v191_v34 = vmul.f32 0.015625, %v170_v32  ;;  %v193_v35 = vmul.f32 0.015625, %v176_v33  ;;  %v206_v36 = vmul.f32 %v9480_v30, %v9480_v30  ;;  %v208_v37 = vmul.f32 %v9483_v31, %v9483_v31 }
  0xff   :  { %v9490_v38 = vsub.f32 %v9439_v8, %v191_v34  ;;  %v9493_v39 = vsub.f32 %v9441_v9, %v193_v35  ;;  %v214_v40 = vsel %vm164_vm0, %v206_v36, 0.0  ;;  %v220_v43 = vsel %vm164_vm0, %v208_v37, 0.0 }
 0x100   :  { %215 = vadd.xlane.f32.xlu0 %v214_v40  ;;  %v179_v41 = vpop.xlane.xlu0 %178  ;;  %v182_v42 = vpop.xlane.xlu1 %181 }
 0x101   :  { %v194_v44 = vmul.f32 0.015625, %v179_v41  ;;  %v195_v45 = vmul.f32 0.015625, %v182_v42  ;;  %v207_v46 = vmul.f32 %v9490_v38, %v9490_v38  ;;  %v209_v47 = vmul.f32 %v9493_v39, %v9493_v39 }
 0x103   :  { %v9502_v48 = vsub.f32 %v9456_v15, %v194_v44  ;;  %v9505_v49 = vsub.f32 %v9458_v16, %v195_v45  ;;  %v217_v50 = vsel %vm164_vm0, %v207_v46, 0.0  ;;  %v223_v53 = vsel %vm164_vm0, %v209_v47, 0.0 }
 0x104   :  { %221 = vadd.xlane.f32.xlu0 %v220_v43  ;;  %218 = vadd.xlane.f32.xlu1 %v217_v50  ;;  %v185_v51 = vpop.xlane.xlu0 %184  ;;  %v188_v52 = vpop.xlane.xlu1 %187  ;;  %v7243_v50 = vld [vmem:[%s11487_s1] ss:$0 sm:$0xff] }
 0x105   :  { %v196_v54 = vmul.f32 0.015625, %v185_v51  ;;  %v197_v55 = vmul.f32 0.015625, %v188_v52  ;;  %v210_v56 = vmul.f32 %v9502_v48, %v9502_v48  ;;  %v211_v57 = vmul.f32 %v9505_v49, %v9505_v49 }
 0x107   :  { %v9514_v58 = vsub.f32 %v9467_v20, %v196_v54  ;;  %v9517_v59 = vsub.f32 %v9469_v21, %v197_v55  ;;  %v226_v60 = vsel %vm164_vm0, %v210_v56, 0.0  ;;  %v229_v61 = vsel %vm164_vm0, %v211_v57, 0.0  ;;  %v7244_v56 = vld [vmem:[%s11488_s8] ss:$0 sm:$0xff] }
 0x108   :  { %224 = vadd.xlane.f32.xlu1 %v223_v53  ;;  %227 = vadd.xlane.f32.xlu0 %v226_v60 }
 0x109   :  { %v212_v62 = vmul.f32 %v9514_v58, %v9514_v58  ;;  %v213_v63 = vmul.f32 %v9517_v59, %v9517_v59 }
 0x10b   :  { %v232_v0 = vsel %vm164_vm0, %v212_v62, 0.0  ;;  %v235_v1 = vsel %vm164_vm0, %v213_v63, 0.0 }
 0x10c   :  { %230 = vadd.xlane.f32.xlu1 %v229_v61  ;;  %233 = vadd.xlane.f32.xlu0 %v232_v0 }
 0x110   :  { %236 = vadd.xlane.f32.xlu1 %v235_v1 }
 0x18d   :  { %v216_v17 = vpop.xlane.xlu0 %215 }
 0x18e   :  { %v238_v18 = vmul.f32 0.015625, %v216_v17 }
 0x190   :  { %v246_v19 = vadd.f32 1e-05, %v238_v18  ;;  %v8537_v18 = vld [vmem:[#allocation8 + $0x8] sm:$0xff]  }
 0x191   :  { %v219_v22 = vpop.xlane.xlu1 %218  ;;  %v222_v23 = vpop.xlane.xlu0 %221 }
 0x192   :  { %8640 = vrsqrt.f32 %v246_v19  ;;  %v239_v24 = vmul.f32 0.015625, %v219_v22  ;;  %v240_v25 = vmul.f32 0.015625, %v222_v23 }
 0x194   :  { %v247_v26 = vadd.f32 1e-05, %v239_v24  ;;  %v248_v27 = vadd.f32 1e-05, %v240_v25 }
 0x195   :  { %v225_v28 = vpop.xlane.xlu1 %224  ;;  %v228_v29 = vpop.xlane.xlu0 %227 }
 0x196   :  { %8642 = vrsqrt.f32 %v247_v26  ;;  %v241_v32 = vmul.f32 0.015625, %v225_v28  ;;  %v242_v33 = vmul.f32 0.015625, %v228_v29  ;;  %v8538_v26 = vld [vmem:[#allocation8 + $0x10] sm:$0xff]   ;;  %v8539_v29 = vld [vmem:[#allocation8 + $0x18] sm:$0xff]  }
 0x197   :  { %8644 = vrsqrt.f32 %v248_v27 }
 0x198   :  { %v249_v34 = vadd.f32 1e-05, %v241_v32  ;;  %v250_v35 = vadd.f32 1e-05, %v242_v33  ;;  %v7245_v32 = vld [vmem:[%s11489_s7] ss:$0 sm:$0xff] }
 0x199   :  { %v231_v36 = vpop.xlane.xlu1 %230  ;;  %v234_v37 = vpop.xlane.xlu0 %233 }
 0x19a   :  { %8646 = vrsqrt.f32 %v249_v34  ;;  %v243_v40 = vmul.f32 0.015625, %v231_v36  ;;  %v244_v41 = vmul.f32 0.015625, %v234_v37  ;;  %v7254_v34 = vld [vmem:[%s11490_s28] ss:$0 sm:$0xff] }
 0x19b   :  { %8648 = vrsqrt.f32 %v250_v35 }
 0x19c   :  { %v8641_v42 = vpop.eup %8640  ;;  %v251_v43 = vadd.f32 1e-05, %v243_v40  ;;  %v252_v44 = vadd.f32 1e-05, %v244_v41 }
 0x19d   :  { %v237_v45 = vpop.xlane.xlu1 %236  ;;  %v262_v46 = vmul.f32 %v8641_v42, %v9480_v30 }
 0x19e   :  { %8650 = vrsqrt.f32 %v251_v43  ;;  %v245_v47 = vmul.f32 0.015625, %v237_v45 }
 0x19f   :  { %8652 = vrsqrt.f32 %v252_v44  ;;  %v276_v55 = vmul.f32 %v7243_v50, %v262_v46 }
 0x1a0   :  { %v8643_v51 = vpop.eup %8642  ;;  %v253_v52 = vadd.f32 1e-05, %v245_v47 }
 0x1a1   :  { %v8645_v53 = vpop.eup %8644  ;;  %v263_v54 = vmul.f32 %v8643_v51, %v9490_v38  ;;  %v290_v62 = vadd.f32 %v7244_v56, %v276_v55 }
 0x1a2   :  { %8654 = vrsqrt.f32 %v253_v52  ;;  %v264_v30 = vmul.f32 %v8645_v53, %v9483_v31 }
 0x1a3   :  { %v277_v57 = vmul.f32 %v7243_v50, %v263_v54 }
 0x1a4   :  { %v8647_v60 = vpop.eup %8646  ;;  %v278_v1 = vmul.f32 %v7243_v50, %v264_v30 }
 0x1a5   :  { %v8649_v61 = vpop.eup %8648  ;;  %v291_v63 = vadd.f32 %v7244_v56, %v277_v57  ;;  %v265_v0 = vmul.f32 %v8647_v60, %v9493_v39 }
 0x1a6   :  { %v266_v2 = vmul.f32 %v8649_v61, %v9502_v48  ;;  %v292_v31 = vadd.f32 %v7244_v56, %v278_v1 }
 0x1a7   :  { %v298_v5 = vpack.c.bf16 %v291_v63, %v290_v62  ;;  %v279_v38 = vmul.f32 %v7243_v50, %v265_v0 }
 0x1a8   :  { %v8651_v6 = vpop.eup %8650  ;;  %v280_v7 = vmul.f32 %v7243_v50, %v266_v2 }
 0x1a9   :  { %v8653_v10 = vpop.eup %8652  ;;  %7846 = vmatprep.mubr.msk.bf16.mxu0 %vm164_vm0, %v298_v5  ;;  %7862 = vmatprep.mubr.msk.bf16.mxu1 %vm164_vm0, %v298_v5  ;;  %v293_v11 = vadd.f32 %v7244_v56, %v279_v38  ;;  %v267_v12 = vmul.f32 %v8651_v6, %v9505_v49 }
 0x1aa   :  { %v268_v13 = vmul.f32 %v8653_v10, %v9514_v58  ;;  %v294_v48 = vadd.f32 %v7244_v56, %v280_v7 }
 0x1ab   :  { %v299_v17 = vpack.c.bf16 %v293_v11, %v292_v31  ;;  %v281_v39 = vmul.f32 %v7243_v50, %v267_v12 }
 0x1ac   :  { %v8655_v19 = vpop.eup %8654  ;;  %v282_v24 = vmul.f32 %v7243_v50, %v268_v13 }
 0x1ad   :  { %7847 = vmatmul.mubr.msk.bf16.vlgmr.msra.gmra.mrb[0].mxu0 %vm164_vm0, %v299_v17  ;;  %7863 = vmatmul.mubr.msk.bf16.vlgmr.msra.gmra.mrb[0].mxu1 %vm164_vm0, %v299_v17  ;;  %v295_v22 = vadd.f32 %v7244_v56, %v281_v39  ;;  %v269_v23 = vmul.f32 %v8655_v19, %v9517_v59  ;;  %v11455_v59 = vmov 0.0  }
 0x1ae   :  { %7871 = vmatpush3.bf16.msra.mxu0 %v9539_v14  ;;  %v296_v58 = vadd.f32 %v7244_v56, %v282_v24  ;;  %7886 = vmatprep.subr.bf16.mxu1 %v11455_v59 }
 0x1af   :  { %v300_v25 = vpack.c.bf16 %v295_v22, %v294_v48  ;;  %7872 = vmatprep.subr.bf16.mxu0 %v8537_v18  ;;  %v283_v49 = vmul.f32 %v7243_v50, %v269_v23  ;;  %v7263_v48 = vld [vmem:[%s11427_s10] ss:$0 sm:$0xff] }
 0x1b1   :  { %7850 = vmatprep.mubr.msk.bf16.mxu0 %vm164_vm0, %v300_v25  ;;  %7866 = vmatprep.mubr.msk.bf16.mxu1 %vm164_vm0, %v300_v25  ;;  %v297_v27 = vadd.f32 %v7244_v56, %v283_v49 }
 0x1b2   :  { %7873 = vmatpush3.bf16.msra.mxu0 %v8537_v18 }
 0x1b3   :  { %v301_v28 = vpack.c.bf16 %v297_v27, %v296_v58  ;;  %7874 = vmatprep.subr.bf16.mxu0 %v8538_v26 }
 0x1b5   :  { %7851 = vmatmul.mubr.msk.bf16.gmra.mrb[4].mxu0 %vm164_vm0, %v301_v28  ;;  %7867 = vmatmul.mubr.msk.bf16.gmra.mrb[4].mxu1 %vm164_vm0, %v301_v28 }
 0x1b6   :  { %7875 = vmatpush3.bf16.msra.mxu0 %v8538_v26  ;;  %7878 = vmatprep.mubr.msk.bf16.mxu0 %vm164_vm0, %v298_v5 }
 0x1b7   :  { %7876 = vmatprep.subr.bf16.mxu0 %v8539_v29  ;;  %7888 = vmatprep.mubr.msk.bf16.mxu1 %vm9221_vm1, %v11455_v59 }
 0x1ba   :  { %7877 = vmatpush3.bf16.msra.mxu0 %v8539_v29 }
 0x1bb   :  { %7898 = vmatprep.subr.bf16.mxu0 %v11455_v59 }
 0x1bd   :  { %7879 = vmatmul.mubr.msk.bf16.vlgmr.msra.gmra.mrb[8].mxu0 %vm164_vm0, %v299_v17 }
 0x1be   :  { %7882 = vmatprep.mubr.msk.bf16.mxu0 %vm164_vm0, %v300_v25 }
 0x1c5   :  { %7883 = vmatmul.mubr.msk.bf16.gmra.mrb[12].mxu0 %vm164_vm0, %v301_v28 }
 0x1c6   :  { %7900 = vmatprep.mubr.msk.bf16.mxu0 %vm9221_vm1, %v11455_v59 }
 0x280   :  { %v7848_v14 = vpop.f32.mrb[0].mxu0  ;;  %v7864_v33 = vpop.f32.mrb[0].mxu1 }
 0x281   :  { %v387_v35 = vpop.f32.mrb[1].mxu0  ;;  %v491_v36 = vpop.f32.mrb[1].mxu1  ;;  %v396_v41 = vadd.f32 %v7848_v14, %v7245_v32  ;;  %v500_v42 = vadd.f32 %v7864_v33, %v7254_v34 }
 0x282   :  { %v7849_v37 = vpop.f32.mrb[2].mxu0  ;;  %v7865_v40 = vpop.f32.mrb[2].mxu1  ;;  %v388_v47 = vadd.f32 %v7245_v32, %v387_v35  ;;  %v492_v50 = vadd.f32 %v7254_v34, %v491_v36 }
 0x283   :  { %v399_v43 = vadd.f32 %v7849_v37, %v7245_v32  ;;  %v503_v44 = vadd.f32 %v7865_v40, %v7254_v34  ;;  %v390_v45 = vpop.f32.mrb[3].mxu0  ;;  %v494_v46 = vpop.f32.mrb[3].mxu1 }
 0x284   :  { %v391_v51 = vadd.f32 %v7245_v32, %v390_v45  ;;  %v495_v52 = vadd.f32 %v7254_v34, %v494_v46  ;;  %v153_v45 = vlaneseq }
 0x285   :  { %v9581_v53 = vpack.c.bf16 %v399_v43, %v396_v41  ;;  %v9583_v54 = vpack.c.bf16 %v503_v44, %v500_v42 }
 0x286   :  { %v9585_v55 = vpack.c.bf16 %v391_v51, %v388_v47  ;;  %v9587_v56 = vpack.c.bf16 %v495_v52, %v492_v50  ;;  %v9640_v46 = vshrl.u32 %v153_v45, 7  ;;  %v9642_v47 = vand.u32 127, %v153_v45 }
 0x287   :  { %v690_v22 = vsel %vm638_vm2, %v9583_v54, 0  ;;  %v9222_v51 = vmov -1e+30  }
 0x288   :  { %v7852_v30 = vpop.f32.mrb[4].mxu0  ;;  %v7868_v57 = vpop.f32.mrb[4].mxu1  ;;  %v643_v60 = vsel %vm638_vm2, %v9587_v56, 0  ;;  %11491 = vst [vmem:[#allocation16_spill] sm:$0xff] %v9640_v46  ;;  %11492 = vst [vmem:[#allocation17_spill] sm:$0xff] %v9642_v47  ;;  %v155_v50 = vadd.s32 8, %v9640_v46  ;;  %vm158_vm3 = vcmp.le.s32.totalorder %v9642_v47, %v9640_v46 }
 0x289   :  { %v403_v61 = vpop.f32.mrb[5].mxu0  ;;  %v507_v62 = vpop.f32.mrb[5].mxu1  ;;  %7887 = vmatpush3.bf16.xpose.msra.mxu1 %v643_v60  ;;  %v412_v1 = vadd.f32 %v7852_v30, %v7245_v32  ;;  %v516_v2 = vadd.f32 %v7868_v57, %v7254_v34  ;;  %v9648_v52 = vsel %vm158_vm3, 0.0, %v9222_v51 }
 0x28a   :  { %v7853_v63 = vpop.f32.mrb[6].mxu0  ;;  %v7869_v0 = vpop.f32.mrb[6].mxu1  ;;  %7892 = vmatprep.subr.bf16.mxu1 %v11455_v59  ;;  %v404_v10 = vadd.f32 %v7245_v32, %v403_v61  ;;  %v508_v31 = vadd.f32 %v7254_v34, %v507_v62  ;;  %vm159_vm4 = vcmp.le.s32.totalorder %v9642_v47, %v155_v50 }
 0x28b   :  { %v415_v5 = vadd.f32 %v7853_v63, %v7245_v32  ;;  %v519_v38 = vadd.f32 %v7869_v0, %v7254_v34  ;;  %v406_v6 = vpop.f32.mrb[7].mxu0  ;;  %v510_v7 = vpop.f32.mrb[7].mxu1  ;;  %v9650_v57 = vsel %vm159_vm4, 0.0, %v9222_v51 }
 0x28c   :  { %v407_v11 = vadd.f32 %v7245_v32, %v406_v6  ;;  %v511_v12 = vadd.f32 %v7254_v34, %v510_v7 }
 0x28d   :  { %v9592_v13 = vpack.c.bf16 %v415_v5, %v412_v1  ;;  %v9594_v17 = vpack.c.bf16 %v519_v38, %v516_v2 }
 0x28e   :  { %v9596_v39 = vpack.c.bf16 %v407_v11, %v404_v10  ;;  %v9598_v18 = vpack.c.bf16 %v511_v12, %v508_v31 }
 0x28f   :  { %v784_v33 = vsel %vm638_vm2, %v9594_v17, 0 }
 0x290   :  { %v7880_v19 = vpop.f32.mrb[8].mxu0  ;;  %7889 = vmatmul.mubr.msk.bf16.vlgmr.msra.gmra.mrb[8].mxu1 %vm638_vm2, %v9585_v55  ;;  %v737_v23 = vsel %vm638_vm2, %v9598_v18, 0 }
 0x291   :  { %v595_v24 = vpop.f32.mrb[9].mxu0  ;;  %7893 = vmatpush3.bf16.xpose.msra.mxu1 %v690_v22  ;;  %7899 = vmatpush3.bf16.xpose.msra.mxu0 %v737_v23  ;;  %v604_v49 = vadd.f32 %v7880_v19, %v7263_v48 }
 0x292   :  { %v7881_v25 = vpop.f32.mrb[10].mxu0  ;;  %7894 = vmatprep.mubr.msk.bf16.mxu1 %vm9221_vm1, %v11455_v59  ;;  %7904 = vmatprep.subr.bf16.mxu1 %v11455_v59  ;;  %v596_v27 = vadd.f32 %v7263_v48, %v595_v24 }
 0x293   :  { %v607_v26 = vadd.f32 %v7881_v25, %v7263_v48  ;;  %v598_v58 = vpop.f32.mrb[11].mxu0  ;;  %7910 = vmatprep.subr.bf16.mxu0 %v11455_v59 }
 0x294   :  { %v599_v28 = vadd.f32 %v7263_v48, %v598_v58 }
 0x295   :  { %v9613_v29 = vpack.c.bf16 %v607_v26, %v604_v49 }
 0x296   :  { %v9615_v14 = vpack.c.bf16 %v599_v28, %v596_v27 }
 0x298   :  { %v7884_v32 = vpop.f32.mrb[12].mxu0  ;;  %7895 = vmatmul.mubr.msk.bf16.vlgmr.msra.gmra.mrb[12].mxu1 %vm638_vm2, %v9581_v53  ;;  %7901 = vmatmul.mubr.msk.bf16.vlgmr.msra.gmra.mrb[16].mxu0 %vm638_vm2, %v9596_v39 }
 0x299   :  { %v620_v34 = vadd.f32 %v7884_v32, %v7263_v48  ;;  %v611_v35 = vpop.f32.mrb[13].mxu0  ;;  %7905 = vmatpush3.bf16.xpose.msra.mxu1 %v784_v33  ;;  %7911 = vmatpush3.bf16.msra.mxu0 %v9615_v14 }
 0x29a   :  { %v612_v36 = vadd.f32 %v7263_v48, %v611_v35  ;;  %v7885_v37 = vpop.f32.mrb[14].mxu0  ;;  %7906 = vmatprep.mubr.msk.bf16.mxu1 %vm9221_vm1, %v11455_v59  ;;  %7916 = vmatprep.subr.bf16.mxu1 %v11455_v59 }
 0x29b   :  { %v623_v40 = vadd.f32 %v7885_v37, %v7263_v48  ;;  %v614_v41 = vpop.f32.mrb[15].mxu0  ;;  %7912 = vmatprep.mubr.msk.bf16.mxu0 %vm9221_vm1, %v11455_v59  ;;  %7922 = vmatprep.subr.bf16.mxu0 %v11455_v59 }
 0x29c   :  { %v615_v42 = vadd.f32 %v7263_v48, %v614_v41 }
 0x29d   :  { %v9630_v43 = vpack.c.bf16 %v623_v40, %v620_v34 }
 0x29e   :  { %v9632_v44 = vpack.c.bf16 %v615_v42, %v612_v36 }
 0x2a0   :  { %7907 = vmatmul.mubr.msk.bf16.vlgmr.msra.gmra.mrb[16].mxu1 %vm638_vm2, %v9592_v13 }
 0x2a1   :  { %7917 = vmatpush3.bf16.msra.mxu1 %v9613_v29  ;;  %7918 = vmatprep.mubr.msk.bf16.mxu1 %vm9221_vm1, %v11455_v59 }
 0x2a2   :  { %7928 = vmatprep.subr.bf16.mxu1 %v11455_v59 }
 0x363   :  { %v679_v30 = vpop.f32.mrb[8].mxu1 }
 0x364   :  { %v680_v60 = vadd.f32 %v679_v30, %v9648_v52  ;;  %v7890_v61 = vpop.f32.mrb[9].mxu1 }
 0x365   :  { %v682_v62 = vpop.f32.mrb[10].mxu1 }
 0x366   :  { %v683_v63 = vadd.f32 %v682_v62, %v9650_v57  ;;  %v7891_v0 = vpop.f32.mrb[11].mxu1  ;;  %v827_v1 = vsel %vm638_vm2, %v680_v60, -inf }
 0x367   :  { %828 = vmax.xlane.f32.xlu0 %v827_v1 }
 0x368   :  { %v830_v2 = vsel %vm638_vm2, %v683_v63, -inf }
 0x369   :  { %831 = vmax.xlane.f32.xlu1 %v830_v2 }
 0x36b   :  { %v726_v5 = vpop.f32.mrb[12].mxu1  ;;  %v773_v38 = vpop.f32.mrb[16].mxu0 }
 0x36c   :  { %v727_v6 = vadd.f32 %v726_v5, %v9648_v52  ;;  %v7896_v7 = vpop.f32.mrb[13].mxu1  ;;  %v7902_v10 = vpop.f32.mrb[17].mxu0  ;;  %v774_v12 = vadd.f32 %v773_v38, %v9648_v52 }
 0x36d   :  { %v729_v31 = vpop.f32.mrb[14].mxu1  ;;  %v776_v11 = vpop.f32.mrb[18].mxu0 }
 0x36e   :  { %v730_v19 = vadd.f32 %v729_v31, %v9650_v57  ;;  %v7897_v48 = vpop.f32.mrb[15].mxu1  ;;  %v7903_v22 = vpop.f32.mrb[19].mxu0  ;;  %v833_v23 = vsel %vm638_vm2, %v727_v6, -inf  ;;  %v777_v24 = vadd.f32 %v776_v11, %v9650_v57  ;;  %v839_v49 = vsel %vm638_vm2, %v774_v12, -inf }
 0x36f   :  { %834 = vmax.xlane.f32.xlu0 %v833_v23 }
 0x370   :  { %v836_v25 = vsel %vm638_vm2, %v730_v19, -inf  ;;  %v842_v28 = vsel %vm638_vm2, %v777_v24, -inf }
 0x371   :  { %837 = vmax.xlane.f32.xlu1 %v836_v25 }
 0x373   :  { %v820_v26 = vpop.f32.mrb[16].mxu1  ;;  %840 = vmax.xlane.f32.xlu0 %v839_v49 }
 0x374   :  { %v821_v58 = vadd.f32 %v820_v26, %v9648_v52  ;;  %v7908_v27 = vpop.f32.mrb[17].mxu1 }
 0x375   :  { %v823_v32 = vpop.f32.mrb[18].mxu1  ;;  %843 = vmax.xlane.f32.xlu1 %v842_v28 }
 0x376   :  { %v9666_v33 = vadd.f32 %v823_v32, %v9650_v57  ;;  %v7909_v34 = vpop.f32.mrb[19].mxu1  ;;  %v845_v35 = vsel %vm638_vm2, %v821_v58, -inf }
 0x377   :  { %846 = vmax.xlane.f32.xlu0 %v845_v35 }
 0x378   :  { %v848_v36 = vsel %vm638_vm2, %v9666_v33, -inf }
 0x379   :  { %849 = vmax.xlane.f32.xlu1 %v848_v36 }
 0x3f4   :  { %v829_v37 = vpop.xlane.xlu0 %828 }
 0x3f5   :  { %v851_v40 = vsub.f32 %v680_v60, %v829_v37 }
 0x3f6   :  { %v832_v41 = vpop.xlane.xlu1 %831 }
 0x3f7   :  { %v859_v42 = vmul.f32 1.442695, %v851_v40  ;;  %v852_v45 = vsub.f32 %v683_v63, %v832_v41 }
 0x3f9   :  { %8656 = vpow2.f32 %v859_v42  ;;  %v861_v50 = vmul.f32 1.442695, %v852_v45 }
 0x3fb   :  { %8658 = vpow2.f32 %v861_v50 }
 0x3fc   :  { %v835_v51 = vpop.xlane.xlu0 %834 }
 0x3fd   :  { %v853_v30 = vsub.f32 %v727_v6, %v835_v51 }
 0x3fe   :  { %v838_v61 = vpop.xlane.xlu1 %837 }
 0x3ff   :  { %v863_v62 = vmul.f32 1.442695, %v853_v30  ;;  %v854_v0 = vsub.f32 %v730_v19, %v838_v61 }
 0x400   :  { %v841_v1 = vpop.xlane.xlu0 %840 }
 0x401   :  { %8660 = vpow2.f32 %v863_v62  ;;  %v865_v2 = vmul.f32 1.442695, %v854_v0  ;;  %v855_v5 = vsub.f32 %v774_v12, %v841_v1 }
 0x402   :  { %v844_v38 = vpop.xlane.xlu1 %843 }
 0x403   :  { %v8657_v7 = vpop.eup %8656  ;;  %8662 = vpow2.f32 %v865_v2  ;;  %v867_v10 = vmul.f32 1.442695, %v855_v5  ;;  %v856_v60 = vsub.f32 %v777_v24, %v844_v38 }
 0x404   :  { %v847_v31 = vpop.xlane.xlu0 %846  ;;  %v875_v63 = vsel %vm638_vm2, %v8657_v7, 0.0 }
 0x405   :  { %v8659_v11 = vpop.eup %8658  ;;  %8664 = vpow2.f32 %v867_v10  ;;  %v869_v48 = vmul.f32 1.442695, %v856_v60  ;;  %v857_v22 = vsub.f32 %v821_v58, %v847_v31  ;;  %876 = vadd.xlane.f32.xlu0 %v875_v63 }
 0x406   :  { %v878_v6 = vsel %vm638_vm2, %v8659_v11, 0.0  ;;  %v850_v34 = vpop.xlane.xlu1 %849 }
 0x407   :  { %8666 = vpow2.f32 %v869_v48  ;;  %v871_v19 = vmul.f32 1.442695, %v857_v22  ;;  %879 = vadd.xlane.f32.xlu1 %v878_v6  ;;  %v858_v35 = vsub.f32 %v9666_v33, %v850_v34 }
 0x409   :  { %8668 = vpow2.f32 %v871_v19  ;;  %v873_v36 = vmul.f32 1.442695, %v858_v35 }
 0x40b   :  { %v8661_v12 = vpop.eup %8660  ;;  %8670 = vpow2.f32 %v873_v36 }
 0x40c   :  { %v881_v23 = vsel %vm638_vm2, %v8661_v12, 0.0 }
 0x40d   :  { %v8663_v25 = vpop.eup %8662  ;;  %882 = vadd.xlane.f32.xlu0 %v881_v23 }
 0x40e   :  { %v884_v24 = vsel %vm638_vm2, %v8663_v25, 0.0 }
 0x40f   :  { %v8665_v49 = vpop.eup %8664  ;;  %885 = vadd.xlane.f32.xlu1 %v884_v24 }
 0x410   :  { %v887_v26 = vsel %vm638_vm2, %v8665_v49, 0.0 }
 0x411   :  { %v8667_v27 = vpop.eup %8666  ;;  %888 = vadd.xlane.f32.xlu0 %v887_v26 }
 0x412   :  { %v890_v58 = vsel %vm638_vm2, %v8667_v27, 0.0 }
 0x413   :  { %v9677_v28 = vpop.eup %8668  ;;  %891 = vadd.xlane.f32.xlu1 %v890_v58 }
 0x414   :  { %v893_v32 = vsel %vm638_vm2, %v9677_v28, 0.0 }
 0x415   :  { %894 = vadd.xlane.f32.xlu0 %v893_v32  ;;  %v9692_v37 = vpop.eup %8670 }
 0x416   :  { %v896_v40 = vsel %vm638_vm2, %v9692_v37, 0.0 }
 0x424   :  { %1152 = vrot.lane.b32.xlu1 %v9583_v54, %s9223_s6 }
 0x428   :  { %1096 = vrot.lane.b32.xlu1 %v9585_v55, %s9223_s6 }
 0x42b   :  { %1099 = vrot.lane.b32.xlu0 %v9587_v56, %s9223_s6 }
 0x42f   :  { %1149 = vrot.lane.b32.xlu0 %v9581_v53, %s9223_s6 }
 0x433   :  { %1202 = vrot.lane.b32.xlu0 %v9596_v39, %s9223_s6 }
 0x44c   :  { %897 = vadd.xlane.f32.xlu1 %v896_v40 }
 0x45d   :  { %1205 = vrot.lane.b32.xlu1 %v9598_v18, %s9223_s6 }
 0x461   :  { %1258 = vrot.lane.b32.xlu1 %v9594_v17, %s9223_s6 }
 0x465   :  { %1255 = vrot.lane.b32.xlu1 %v9592_v13, %s9223_s6 }
 0x492   :  { %v877_v41 = vpop.xlane.xlu0 %876 }
 0x493   :  { %8672 = vrcp.f32 %v877_v41 }
 0x494   :  { %v880_v33 = vpop.xlane.xlu1 %879 }
 0x495   :  { %8674 = vrcp.f32 %v880_v33 }
 0x49a   :  { %v883_v42 = vpop.xlane.xlu0 %882 }
 0x49b   :  { %8676 = vrcp.f32 %v883_v42 }
 0x49c   :  { %v886_v45 = vpop.xlane.xlu1 %885 }
 0x49d   :  { %v8673_v50 = vpop.eup %8672  ;;  %8678 = vrcp.f32 %v886_v45 }
 0x49e   :  { %v889_v51 = vpop.xlane.xlu0 %888  ;;  %v907_v61 = vmul.f32 %v8673_v50, %v8657_v7 }
 0x49f   :  { %v8675_v30 = vpop.eup %8674  ;;  %8680 = vrcp.f32 %v889_v51 }
 0x4a0   :  { %v908_v62 = vmul.f32 %v8675_v30, %v8659_v11  ;;  %v892_v0 = vpop.xlane.xlu1 %891 }
 0x4a1   :  { %8682 = vrcp.f32 %v892_v0 }
 0x4a2   :  { %v915_v1 = vpack.c.bf16 %v908_v62, %v907_v61  ;;  %v895_v38 = vpop.xlane.xlu0 %894 }
 0x4a3   :  { %8684 = vrcp.f32 %v895_v38 }
 0x4a4   :  { %7913 = vmatmul.mubr.msk.bf16.vlgmr.msra.gmra.mrb[20].mxu0 %vm638_vm2, %v915_v1 }
 0x4a5   :  { %v8677_v2 = vpop.eup %8676  ;;  %7923 = vmatpush3.bf16.msra.mxu0 %v9632_v44  ;;  %7924 = vmatprep.mubr.msk.bf16.mxu0 %vm9221_vm1, %v11455_v59 }
 0x4a6   :  { %7934 = vmatprep.subr.bf16.mxu0 %v11455_v59  ;;  %v909_v10 = vmul.f32 %v8677_v2, %v8661_v12  ;;  %v1100_v22 = vpop.permute.xlu0 %1099  ;;  %v1153_v12 = vpop.permute.xlu1 %1152 }
 0x4a7   :  { %v8679_v5 = vpop.eup %8678  ;;  %v1105_v19 = vsel %vm638_vm2, %v1100_v22, 0  ;;  %v1158_v40 = vsel %vm638_vm2, %v1153_v12, 0 }
 0x4a8   :  { %v910_v60 = vmul.f32 %v8679_v5, %v8663_v25 }
 0x4a9   :  { %v8681_v31 = vpop.eup %8680 }
 0x4aa   :  { %v916_v7 = vpack.c.bf16 %v910_v60, %v909_v10  ;;  %v911_v11 = vmul.f32 %v8681_v31, %v8665_v49  ;;  %v1097_v23 = vpop.permute.xlu1 %1096  ;;  %v1150_v26 = vpop.permute.xlu0 %1149 }
 0x4ab   :  { %v8683_v63 = vpop.eup %8682 }
 0x4ac   :  { %v912_v48 = vmul.f32 %v8683_v63, %v8667_v27  ;;  %7919 = vmatmul.mubr.msk.bf16.vlgmr.msra.gmra.mrb[20].mxu1 %vm638_vm2, %v916_v7 }
 0x4ad   :  { %7929 = vmatpush3.bf16.msra.mxu1 %v9630_v43  ;;  %7930 = vmatprep.mubr.msk.bf16.mxu1 %vm9221_vm1, %v11455_v59  ;;  %v8685_v27 = vpop.eup %8684 }
 0x4ae   :  { %v917_v6 = vpack.c.bf16 %v912_v48, %v911_v11  ;;  %7940 = vmatprep.subr.bf16.mxu1 %v11455_v59  ;;  %v913_v32 = vmul.f32 %v8685_v27, %v9677_v28  ;;  %v1203_v34 = vpop.permute.xlu0 %1202 }
 0x4b0   :  { %7925 = vmatmul.mubr.msk.bf16.vlgmr.msra.gmra.mrb[24].mxu0 %vm638_vm2, %v917_v6 }
 0x4b1   :  { %7935 = vmatpush3.bf16.xpose.msra.mxu0 %v1105_v19  ;;  %7936 = vmatprep.mubr.msk.bf16.mxu0 %vm9221_vm1, %v11455_v59 }
 0x4b2   :  { %7946 = vmatprep.subr.bf16.mxu0 %v11455_v59 }
 0x4b8   :  { %7937 = vmatmul.mubr.msk.bf16.vlgmr.msra.gmra.mrb[28].mxu0 %vm638_vm2, %v1097_v23 }
 0x4b9   :  { %7948 = vmatprep.mubr.msk.bf16.mxu0 %vm9221_vm1, %v11455_v59 }
 0x4d9   :  { %v898_v25 = vpop.xlane.xlu1 %897 }
 0x4da   :  { %8686 = vrcp.f32 %v898_v25 }
 0x4dd   :  { %v1206_v24 = vpop.permute.xlu1 %1205 }
 0x4de   :  { %v1211_v49 = vsel %vm638_vm2, %v1206_v24, 0 }
 0x4df   :  { %7947 = vmatpush3.bf16.xpose.msra.mxu0 %v1211_v49 }
 0x4e0   :  { %7958 = vmatprep.subr.bf16.mxu0 %v11455_v59 }
 0x4e1   :  { %v1259_v28 = vpop.permute.xlu1 %1258 }
 0x4e2   :  { %v1264_v41 = vsel %vm638_vm2, %v1259_v28, 0 }
 0x4e4   :  { %v8687_v58 = vpop.eup %8686 }
 0x4e5   :  { %v914_v35 = vmul.f32 %v8687_v58, %v9692_v37  ;;  %v1256_v37 = vpop.permute.xlu1 %1255 }
 0x4e6   :  { %7949 = vmatmul.mubr.msk.bf16.vlgmr.msra.gmra.mrb[32].mxu0 %vm638_vm2, %v1203_v34 }
 0x4e7   :  { %v918_v36 = vpack.c.bf16 %v914_v35, %v913_v32  ;;  %7960 = vmatprep.mubr.msk.bf16.mxu0 %vm9221_vm1, %v11455_v59 }
 0x4e9   :  { %7931 = vmatmul.mubr.msk.bf16.vlgmr.msra.gmra.mrb[24].mxu1 %vm638_vm2, %v918_v36 }
 0x4ea   :  { %7941 = vmatpush3.bf16.xpose.msra.mxu1 %v1158_v40  ;;  %7942 = vmatprep.mubr.msk.bf16.mxu1 %vm9221_vm1, %v11455_v59 }
 0x4eb   :  { %7952 = vmatprep.subr.bf16.mxu1 %v11455_v59 }
 0x4f1   :  { %7943 = vmatmul.mubr.msk.bf16.vlgmr.msra.gmra.mrb[28].mxu1 %vm638_vm2, %v1150_v26 }
 0x4f2   :  { %7953 = vmatpush3.bf16.xpose.msra.mxu1 %v1264_v41  ;;  %7954 = vmatprep.mubr.msk.bf16.mxu1 %vm9221_vm1, %v11455_v59 }
 0x4f3   :  { %7964 = vmatprep.subr.bf16.mxu1 %v11455_v59 }
 0x4f9   :  { %7955 = vmatmul.mubr.msk.bf16.vlgmr.msra.gmra.mrb[32].mxu1 %vm638_vm2, %v1256_v37 }
 0x4fa   :  { %7966 = vmatprep.mubr.msk.bf16.mxu1 %vm9221_vm1, %v11455_v59 }
 0x577   :  { %v9740_v33 = vpop.f32.mrb[20].mxu0 }
 0x578   :  { %v7914_v42 = vpop.f32.mrb[21].mxu0 }
 0x579   :  { %v9742_v45 = vpop.f32.mrb[22].mxu0 }
 0x57a   :  { %v7915_v50 = vpop.f32.mrb[23].mxu0 }
 0x57f   :  { %v9744_v51 = vpop.f32.mrb[20].mxu1 }
 0x580   :  { %v7920_v30 = vpop.f32.mrb[21].mxu1 }
 0x581   :  { %v9746_v61 = vpop.f32.mrb[22].mxu1 }
 0x582   :  { %v7921_v62 = vpop.f32.mrb[23].mxu1 }
 0x583   :  { %v9748_v0 = vpop.f32.mrb[24].mxu0 }
 0x584   :  { %v7926_v1 = vpop.f32.mrb[25].mxu0 }
 0x585   :  { %v9750_v2 = vpop.f32.mrb[26].mxu0 }
 0x586   :  { %v7927_v5 = vpop.f32.mrb[27].mxu0 }
 0x58b   :  { %v1141_v38 = vpop.f32.mrb[28].mxu0 }
 0x58c   :  { %v1142_v10 = vadd.f32 %v1141_v38, %v9648_v52  ;;  %v7938_v60 = vpop.f32.mrb[29].mxu0 }
 0x58d   :  { %v1144_v31 = vpop.f32.mrb[30].mxu0 }
 0x58e   :  { %v1145_v7 = vadd.f32 %v1144_v31, %v9650_v57  ;;  %v7939_v63 = vpop.f32.mrb[31].mxu0  ;;  %v1307_v11 = vsel %vm638_vm2, %v1142_v10, -inf }
 0x58f   :  { %1308 = vmax.xlane.f32.xlu0 %v1307_v11 }
 0x590   :  { %v1310_v48 = vsel %vm638_vm2, %v1145_v7, -inf }
 0x591   :  { %1311 = vmax.xlane.f32.xlu1 %v1310_v48 }
 0x5b9   :  { %v1247_v22 = vpop.f32.mrb[32].mxu0 }
 0x5ba   :  { %v7950_v6 = vpop.f32.mrb[33].mxu0  ;;  %v1248_v41 = vadd.f32 %v1247_v22, %v9648_v52 }
 0x5bb   :  { %v1250_v19 = vpop.f32.mrb[34].mxu0 }
 0x5bc   :  { %v1251_v12 = vadd.f32 %v1250_v19, %v9650_v57  ;;  %v9757_v23 = vpop.f32.mrb[24].mxu1  ;;  %v7951_v25 = vpop.f32.mrb[35].mxu0  ;;  %v1319_v5 = vsel %vm638_vm2, %v1248_v41, -inf }
 0x5bd   :  { %v7932_v24 = vpop.f32.mrb[25].mxu1 }
 0x5be   :  { %v9759_v49 = vpop.f32.mrb[26].mxu1  ;;  %v1322_v26 = vsel %vm638_vm2, %v1251_v12, -inf }
 0x5bf   :  { %v7933_v27 = vpop.f32.mrb[27].mxu1  ;;  %1323 = vmax.xlane.f32.xlu1 %v1322_v26 }
 0x5c4   :  { %v1194_v58 = vpop.f32.mrb[28].mxu1 }
 0x5c5   :  { %v1195_v32 = vadd.f32 %v1194_v58, %v9648_v52  ;;  %v7944_v34 = vpop.f32.mrb[29].mxu1 }
 0x5c6   :  { %v1197_v35 = vpop.f32.mrb[30].mxu1 }
 0x5c7   :  { %v1198_v36 = vadd.f32 %v1197_v35, %v9650_v57  ;;  %v7945_v40 = vpop.f32.mrb[31].mxu1  ;;  %v1313_v28 = vsel %vm638_vm2, %v1195_v32, -inf }
 0x5c8   :  { %1314 = vmax.xlane.f32.xlu0 %v1313_v28 }
 0x5c9   :  { %v1316_v37 = vsel %vm638_vm2, %v1198_v36, -inf }
 0x5cc   :  { %v1300_v42 = vpop.f32.mrb[32].mxu1  ;;  %1317 = vmax.xlane.f32.xlu0 %v1316_v37 }
 0x5cd   :  { %v7956_v50 = vpop.f32.mrb[33].mxu1  ;;  %v1301_v62 = vadd.f32 %v1300_v42, %v9648_v52 }
 0x5ce   :  { %v1303_v30 = vpop.f32.mrb[34].mxu1 }
 0x5cf   :  { %v7957_v1 = vpop.f32.mrb[35].mxu1  ;;  %v1325_v38 = vsel %vm638_vm2, %v1301_v62, -inf  ;;  %v9777_v60 = vadd.f32 %v1303_v30, %v9650_v57 }
 0x5d0   :  { %1320 = vmax.xlane.f32.xlu0 %v1319_v5  ;;  %1448 = vrot.lane.b32.xlu1 %v9613_v29, %s9223_s6 }
 0x5d1   :  { %v1328_v31 = vsel %vm638_vm2, %v9777_v60, -inf }
 0x5d4   :  { %1326 = vmax.xlane.f32.xlu0 %v1325_v38  ;;  %1496 = vrot.lane.b32.xlu1 %v9632_v44, %s9223_s6 }
 0x5ea   :  { %1400 = vrot.lane.b32.xlu0 %v9615_v14, %s9223_s6 }
 0x5f8   :  { %1329 = vmax.xlane.f32.xlu1 %v1328_v31 }
 0x609   :  { %1544 = vrot.lane.b32.xlu1 %v9630_v43, %s9223_s6 }
 0x61c   :  { %v1309_v63 = vpop.xlane.xlu0 %1308 }
 0x61d   :  { %v1331_v11 = vsub.f32 %v1142_v10, %v1309_v63 }
 0x61e   :  { %v1312_v48 = vpop.xlane.xlu1 %1311 }
 0x61f   :  { %v1339_v22 = vmul.f32 1.442695, %v1331_v11  ;;  %v1332_v6 = vsub.f32 %v1145_v7, %v1312_v48 }
 0x621   :  { %8688 = vpow2.f32 %v1339_v22  ;;  %v1341_v19 = vmul.f32 1.442695, %v1332_v6 }
 0x623   :  { %8690 = vpow2.f32 %v1341_v19 }
 0x62b   :  { %v9783_v25 = vpop.eup %8688 }
 0x62c   :  { %v1355_v24 = vsel %vm638_vm2, %v9783_v25, 0.0 }
 0x62d   :  { %v9787_v26 = vpop.eup %8690  ;;  %1356 = vadd.xlane.f32.xlu0 %v1355_v24 }
 0x62e   :  { %v1358_v27 = vsel %vm638_vm2, %v9787_v26, 0.0 }
 0x62f   :  { %1359 = vadd.xlane.f32.xlu1 %v1358_v27 }
 0x64c   :  { %v1324_v58 = vpop.xlane.xlu1 %1323 }
 0x64d   :  { %v1336_v35 = vsub.f32 %v1251_v12, %v1324_v58 }
 0x64f   :  { %v1349_v42 = vmul.f32 1.442695, %v1336_v35 }
 0x650   :  { %v1449_v10 = vpop.permute.xlu1 %1448 }
 0x651   :  { %7965 = vmatpush3.bf16.msra.mxu1 %v1449_v10 }
 0x652   :  { %7976 = vmatprep.subr.bf16.mxu1 %v11455_v59 }
 0x654   :  { %v1497_v27 = vpop.permute.xlu1 %1496 }
 0x655   :  { %v1315_v7 = vpop.xlane.xlu0 %1314 }
 0x656   :  { %v1333_v34 = vsub.f32 %v1195_v32, %v1315_v7 }
 0x658   :  { %v1343_v40 = vmul.f32 1.442695, %v1333_v34 }
 0x659   :  { %v1318_v28 = vpop.xlane.xlu0 %1317 }
 0x65a   :  { %8692 = vpow2.f32 %v1343_v40  ;;  %v1334_v37 = vsub.f32 %v1198_v36, %v1318_v28 }
 0x65c   :  { %v1345_v50 = vmul.f32 1.442695, %v1334_v37 }
 0x65d   :  { %v1321_v30 = vpop.xlane.xlu0 %1320 }
 0x65e   :  { %8694 = vpow2.f32 %v1345_v50  ;;  %v1335_v1 = vsub.f32 %v1248_v41, %v1321_v30 }
 0x65f   :  { %8696 = vpow2.f32 %v1349_v42 }
 0x660   :  { %v1347_v5 = vmul.f32 1.442695, %v1335_v1 }
 0x661   :  { %v1327_v38 = vpop.xlane.xlu0 %1326 }
 0x662   :  { %8698 = vpow2.f32 %v1347_v5  ;;  %v1337_v31 = vsub.f32 %v1301_v62, %v1327_v38 }
 0x664   :  { %v8693_v63 = vpop.eup %8692  ;;  %v1351_v11 = vmul.f32 1.442695, %v1337_v31 }
 0x665   :  { %v1401_v48 = vpop.permute.xlu0 %1400  ;;  %v1361_v32 = vsel %vm638_vm2, %v8693_v63, 0.0 }
 0x666   :  { %8700 = vpow2.f32 %v1351_v11  ;;  %1362 = vadd.xlane.f32.xlu0 %v1361_v32  ;;  %7959 = vmatpush3.bf16.msra.mxu0 %v1401_v48 }
 0x667   :  { %7970 = vmatprep.subr.bf16.mxu0 %v11455_v59 }
 0x668   :  { %v8695_v12 = vpop.eup %8694 }
 0x669   :  { %v1364_v36 = vsel %vm638_vm2, %v8695_v12, 0.0  ;;  %v8697_v22 = vpop.eup %8696 }
 0x66a   :  { %1365 = vadd.xlane.f32.xlu1 %v1364_v36  ;;  %v1370_v62 = vsel %vm638_vm2, %v8697_v22, 0.0 }
 0x66c   :  { %v8699_v41 = vpop.eup %8698 }
 0x66d   :  { %v1367_v6 = vsel %vm638_vm2, %v8699_v41, 0.0 }
 0x66e   :  { %1368 = vadd.xlane.f32.xlu0 %v1367_v6  ;;  %1371 = vadd.xlane.f32.xlu1 %v1370_v62 }
 0x670   :  { %v9797_v19 = vpop.eup %8700 }
 0x671   :  { %v1373_v24 = vsel %vm638_vm2, %v9797_v19, 0.0 }
 0x672   :  { %1374 = vadd.xlane.f32.xlu0 %v1373_v24 }
 0x67f   :  { %1644 = vrot.lane.b32.xlu1 %v9583_v54, %s9224_s4 }
 0x685   :  { %v1330_v58 = vpop.xlane.xlu1 %1329 }
 0x686   :  { %v1338_v10 = vsub.f32 %v9777_v60, %v1330_v58 }
 0x688   :  { %1593 = vrot.lane.b32.xlu0 %v9587_v56, %s9224_s4  ;;  %v1353_v7 = vmul.f32 1.442695, %v1338_v10 }
 0x689   :  { %v1545_v40 = vpop.permute.xlu1 %1544 }
 0x68a   :  { %8702 = vpow2.f32 %v1353_v7 }
 0x68c   :  { %1591 = vrot.lane.b32.xlu0 %v9585_v55, %s9224_s4 }
 0x690   :  { %1642 = vrot.lane.b32.xlu0 %v9581_v53, %s9224_s4 }
 0x694   :  { %1693 = vrot.lane.b32.xlu0 %v9596_v39, %s9224_s4  ;;  %v9812_v34 = vpop.eup %8702 }
 0x695   :  { %v1376_v35 = vsel %vm638_vm2, %v9812_v34, 0.0 }
 0x6a3   :  { %1377 = vadd.xlane.f32.xlu1 %v1376_v35 }
 0x6b4   :  { %1695 = vrot.lane.b32.xlu1 %v9598_v18, %s9224_s4 }
 0x6b8   :  { %1746 = vrot.lane.b32.xlu1 %v9594_v17, %s9224_s4 }
 0x6ba   :  { %v1357_v60 = vpop.xlane.xlu0 %1356 }
 0x6bb   :  { %8704 = vrcp.f32 %v1357_v60 }
 0x6bc   :  { %1744 = vrot.lane.b32.xlu1 %v9592_v13, %s9224_s4  ;;  %v1360_v28 = vpop.xlane.xlu1 %1359 }
 0x6bd   :  { %8706 = vrcp.f32 %v1360_v28 }
 0x6c5   :  { %v8705_v37 = vpop.eup %8704 }
 0x6c6   :  { %v1387_v50 = vmul.f32 %v8705_v37, %v9783_v25 }
 0x6c7   :  { %v8707_v42 = vpop.eup %8706 }
 0x6c8   :  { %v1388_v30 = vmul.f32 %v8707_v42, %v9787_v26 }
 0x6ca   :  { %v1395_v1 = vpack.c.bf16 %v1388_v30, %v1387_v50 }
 0x6cc   :  { %7961 = vmatmul.mubr.msk.bf16.vlgmr.msra.gmra.mrb[36].mxu0 %vm638_vm2, %v1395_v1 }
 0x6cd   :  { %7971 = vmatpush3.bf16.msra.mxu0 %v1497_v27  ;;  %7972 = vmatprep.mubr.msk.bf16.mxu0 %vm9221_vm1, %v11455_v59 }
 0x6ce   :  { %7982 = vmatprep.subr.bf16.mxu0 %v11455_v59 }
 0x6f3   :  { %v1363_v5 = vpop.xlane.xlu0 %1362 }
 0x6f4   :  { %8708 = vrcp.f32 %v1363_v5 }
 0x6f7   :  { %v1366_v38 = vpop.xlane.xlu1 %1365 }
 0x6f8   :  { %8710 = vrcp.f32 %v1366_v38 }
 0x6fb   :  { %v1369_v31 = vpop.xlane.xlu0 %1368  ;;  %v1372_v11 = vpop.xlane.xlu1 %1371 }
 0x6fc   :  { %8712 = vrcp.f32 %v1369_v31 }
 0x6fd   :  { %8714 = vrcp.f32 %v1372_v11 }
 0x6fe   :  { %v8709_v25 = vpop.eup %8708 }
 0x6ff   :  { %v1389_v26 = vmul.f32 %v8709_v25, %v8693_v63  ;;  %v1375_v36 = vpop.xlane.xlu0 %1374 }
 0x700   :  { %8716 = vrcp.f32 %v1375_v36 }
 0x702   :  { %v8711_v48 = vpop.eup %8710 }
 0x703   :  { %v1390_v32 = vmul.f32 %v8711_v48, %v8695_v12  ;;  %v1594_v10 = vpop.permute.xlu0 %1593  ;;  %v1645_v12 = vpop.permute.xlu1 %1644 }
 0x704   :  { %v1599_v35 = vsel %vm638_vm2, %v1594_v10, 0  ;;  %v1650_v5 = vsel %vm638_vm2, %v1645_v12, 0 }
 0x705   :  { %v1396_v6 = vpack.c.bf16 %v1390_v32, %v1389_v26 }
 0x706   :  { %v8713_v62 = vpop.eup %8712 }
 0x707   :  { %v8715_v24 = vpop.eup %8714  ;;  %v1391_v27 = vmul.f32 %v8713_v62, %v8699_v41  ;;  %7967 = vmatmul.mubr.msk.bf16.vlgmr.msra.gmra.mrb[36].mxu1 %vm638_vm2, %v1396_v6  ;;  %v1592_v63 = vpop.permute.xlu0 %1591 }
 0x708   :  { %v1392_v58 = vmul.f32 %v8715_v24, %v8697_v22  ;;  %7977 = vmatpush3.bf16.msra.mxu1 %v1545_v40  ;;  %7978 = vmatprep.mubr.msk.bf16.mxu1 %vm9221_vm1, %v11455_v59 }
 0x709   :  { %7988 = vmatprep.subr.bf16.mxu1 %v11455_v59 }
 0x70a   :  { %v1397_v7 = vpack.c.bf16 %v1392_v58, %v1391_v27  ;;  %v8717_v28 = vpop.eup %8716 }
 0x70b   :  { %v1643_v60 = vpop.permute.xlu0 %1642  ;;  %v1393_v42 = vmul.f32 %v8717_v28, %v9797_v19 }
 0x70c   :  { %7973 = vmatmul.mubr.msk.bf16.vlgmr.msra.gmra.mrb[40].mxu0 %vm638_vm2, %v1397_v7 }
 0x70d   :  { %7983 = vmatpush3.bf16.xpose.msra.mxu0 %v1599_v35  ;;  %7984 = vmatprep.mubr.msk.bf16.mxu0 %vm9221_vm1, %v11455_v59 }
 0x70e   :  { %7994 = vmatprep.subr.bf16.mxu0 %v11455_v59 }
 0x70f   :  { %v1694_v50 = vpop.permute.xlu0 %1693 }
 0x714   :  { %7985 = vmatmul.mubr.msk.bf16.vlgmr.msra.gmra.mrb[44].mxu0 %vm638_vm2, %v1592_v63 }
 0x715   :  { %7996 = vmatprep.mubr.msk.bf16.mxu0 %vm9221_vm1, %v11455_v59 }
 0x730   :  { %v1378_v22 = vpop.xlane.xlu1 %1377 }
 0x731   :  { %8718 = vrcp.f32 %v1378_v22 }
 0x734   :  { %v1696_v41 = vpop.permute.xlu1 %1695 }
 0x735   :  { %v1701_v40 = vsel %vm638_vm2, %v1696_v41, 0 }
 0x736   :  { %7995 = vmatpush3.bf16.xpose.msra.mxu0 %v1701_v40 }
 0x737   :  { %8006 = vmatprep.subr.bf16.mxu0 %v11455_v59 }
 0x738   :  { %v1747_v19 = vpop.permute.xlu1 %1746 }
 0x739   :  { %v1752_v38 = vsel %vm638_vm2, %v1747_v19, 0 }
 0x73b   :  { %v8719_v37 = vpop.eup %8718 }
 0x73c   :  { %v1394_v30 = vmul.f32 %v8719_v37, %v9812_v34  ;;  %v1745_v34 = vpop.permute.xlu1 %1744 }
 0x73d   :  { %7997 = vmatmul.mubr.msk.bf16.vlgmr.msra.gmra.mrb[48].mxu0 %vm638_vm2, %v1694_v50 }
 0x73e   :  { %v1398_v1 = vpack.c.bf16 %v1394_v30, %v1393_v42  ;;  %8008 = vmatprep.mubr.msk.bf16.mxu0 %vm9221_vm1, %v11455_v59 }
 0x740   :  { %7979 = vmatmul.mubr.msk.bf16.vlgmr.msra.gmra.mrb[40].mxu1 %vm638_vm2, %v1398_v1 }
 0x741   :  { %7989 = vmatpush3.bf16.xpose.msra.mxu1 %v1650_v5  ;;  %7990 = vmatprep.mubr.msk.bf16.mxu1 %vm9221_vm1, %v11455_v59 }
 0x742   :  { %8000 = vmatprep.subr.bf16.mxu1 %v11455_v59 }
 0x748   :  { %7991 = vmatmul.mubr.msk.bf16.vlgmr.msra.gmra.mrb[44].mxu1 %vm638_vm2, %v1643_v60 }
 0x749   :  { %8001 = vmatpush3.bf16.xpose.msra.mxu1 %v1752_v38  ;;  %8002 = vmatprep.mubr.msk.bf16.mxu1 %vm9221_vm1, %v11455_v59 }
 0x74a   :  { %8012 = vmatprep.subr.bf16.mxu1 %v11455_v59 }
 0x750   :  { %8003 = vmatmul.mubr.msk.bf16.vlgmr.msra.gmra.mrb[48].mxu1 %vm638_vm2, %v1745_v34 }
 0x751   :  { %8014 = vmatprep.mubr.msk.bf16.mxu1 %vm9221_vm1, %v11455_v59 }
 0x79f   :  { %v9860_v31 = vpop.f32.mrb[36].mxu0 }
 0x7a0   :  { %v7962_v11 = vpop.f32.mrb[37].mxu0 }
 0x7a1   :  { %v9862_v25 = vpop.f32.mrb[38].mxu0 }
 0x7a2   :  { %v7963_v26 = vpop.f32.mrb[39].mxu0 }
 0x7da   :  { %v9866_v32 = vpop.f32.mrb[36].mxu1 }
 0x7db   :  { %v7968_v36 = vpop.f32.mrb[37].mxu1 }
 0x7dc   :  { %v9868_v6 = vpop.f32.mrb[38].mxu1 }
 0x7dd   :  { %v7969_v24 = vpop.f32.mrb[39].mxu1 }
 0x7df   :  { %v9872_v27 = vpop.f32.mrb[40].mxu0 }
 0x7e0   :  { %v7974_v58 = vpop.f32.mrb[41].mxu0 }
 0x7e1   :  { %v9874_v10 = vpop.f32.mrb[42].mxu0 }
 0x7e2   :  { %v7975_v35 = vpop.f32.mrb[43].mxu0 }
 0x7e7   :  { %v1635_v63 = vpop.f32.mrb[44].mxu0 }
 0x7e8   :  { %v1636_v12 = vadd.f32 %v1635_v63, %v9648_v52  ;;  %v7986_v22 = vpop.f32.mrb[45].mxu0 }
 0x7e9   :  { %v1638_v41 = vpop.f32.mrb[46].mxu0 }
 0x7ea   :  { %v1639_v40 = vadd.f32 %v1638_v41, %v9650_v57  ;;  %v7987_v60 = vpop.f32.mrb[47].mxu0  ;;  %v1795_v28 = vsel %vm638_vm2, %v1636_v12, -inf }
 0x7eb   :  { %1796 = vmax.xlane.f32.xlu0 %v1795_v28 }
 0x7ec   :  { %v1798_v37 = vsel %vm638_vm2, %v1639_v40, -inf }
 0x7ed   :  { %1799 = vmax.xlane.f32.xlu1 %v1798_v37 }
 0x810   :  { %v1737_v42 = vpop.f32.mrb[48].mxu0 }
 0x811   :  { %v7998_v50 = vpop.f32.mrb[49].mxu0  ;;  %v1738_v28 = vadd.f32 %v1737_v42, %v9648_v52 }
 0x812   :  { %v1740_v30 = vpop.f32.mrb[50].mxu0 }
 0x813   :  { %v1741_v1 = vadd.f32 %v1740_v30, %v9650_v57  ;;  %v9883_v5 = vpop.f32.mrb[40].mxu1  ;;  %v7999_v19 = vpop.f32.mrb[51].mxu0 }
 0x814   :  { %v7980_v38 = vpop.f32.mrb[41].mxu1 }
 0x815   :  { %v9885_v34 = vpop.f32.mrb[42].mxu1  ;;  %v1810_v11 = vsel %vm638_vm2, %v1741_v1, -inf }
 0x816   :  { %v7981_v36 = vpop.f32.mrb[43].mxu1  ;;  %1811 = vmax.xlane.f32.xlu1 %v1810_v11 }
 0x81b   :  { %v1686_v24 = vpop.f32.mrb[44].mxu1 }
 0x81c   :  { %v1687_v58 = vadd.f32 %v1686_v24, %v9648_v52  ;;  %v7992_v35 = vpop.f32.mrb[45].mxu1  ;;  %v1807_v24 = vsel %vm638_vm2, %v1738_v28, -inf }
 0x81d   :  { %v1689_v63 = vpop.f32.mrb[46].mxu1 }
 0x81e   :  { %v1690_v22 = vadd.f32 %v1689_v63, %v9650_v57  ;;  %v7993_v41 = vpop.f32.mrb[47].mxu1  ;;  %v1801_v60 = vsel %vm638_vm2, %v1687_v58, -inf }
 0x81f   :  { %1802 = vmax.xlane.f32.xlu0 %v1801_v60 }
 0x820   :  { %v1804_v37 = vsel %vm638_vm2, %v1690_v22, -inf }
 0x823   :  { %v1788_v50 = vpop.f32.mrb[48].mxu1  ;;  %1805 = vmax.xlane.f32.xlu0 %v1804_v37 }
 0x824   :  { %v8004_v30 = vpop.f32.mrb[49].mxu1  ;;  %v1789_v38 = vadd.f32 %v1788_v50, %v9648_v52 }
 0x825   :  { %v1791_v19 = vpop.f32.mrb[50].mxu1 }
 0x826   :  { %v1792_v11 = vadd.f32 %v1791_v19, %v9650_v57  ;;  %v8005_v36 = vpop.f32.mrb[51].mxu1  ;;  %v1813_v63 = vsel %vm638_vm2, %v1789_v38, -inf }
 0x827   :  { %1808 = vmax.xlane.f32.xlu0 %v1807_v24 }
 0x828   :  { %v1816_v35 = vsel %vm638_vm2, %v1792_v11, -inf }
 0x829   :  { %1817 = vmax.xlane.f32.xlu1 %v1816_v35 }
 0x82b   :  { %1814 = vmax.xlane.f32.xlu0 %v1813_v63 }
 0x83a   :  { %1934 = vrot.lane.b32.xlu1 %v9613_v29, %s9224_s4 }
 0x83e   :  { %1981 = vrot.lane.b32.xlu1 %v9632_v44, %s9224_s4 }
 0x841   :  { %1887 = vrot.lane.b32.xlu0 %v9615_v14, %s9224_s4 }
 0x842   :  { %2028 = vrot.lane.b32.xlu1 %v9630_v43, %s9224_s4 }
 0x878   :  { %v1797_v42 = vpop.xlane.xlu0 %1796 }
 0x879   :  { %v1819_v41 = vsub.f32 %v1636_v12, %v1797_v42 }
 0x87a   :  { %v1800_v60 = vpop.xlane.xlu1 %1799 }
 0x87b   :  { %v1827_v37 = vmul.f32 1.442695, %v1819_v41  ;;  %v1820_v50 = vsub.f32 %v1639_v40, %v1800_v60 }
 0x87d   :  { %8720 = vpow2.f32 %v1827_v37  ;;  %v1829_v30 = vmul.f32 1.442695, %v1820_v50 }
 0x87f   :  { %8722 = vpow2.f32 %v1829_v30 }
 0x887   :  { %v9908_v19 = vpop.eup %8720 }
 0x888   :  { %v1843_v36 = vsel %vm638_vm2, %v9908_v19, 0.0 }
 0x889   :  { %v9912_v24 = vpop.eup %8722  ;;  %1844 = vadd.xlane.f32.xlu0 %v1843_v36 }
 0x88a   :  { %v1846_v35 = vsel %vm638_vm2, %v9912_v24, 0.0 }
 0x88b   :  { %1847 = vadd.xlane.f32.xlu1 %v1846_v35 }
 0x8a3   :  { %v1812_v63 = vpop.xlane.xlu1 %1811 }
 0x8a4   :  { %v1824_v41 = vsub.f32 %v1741_v1, %v1812_v63 }
 0x8a6   :  { %v1837_v50 = vmul.f32 1.442695, %v1824_v41 }
 0x8ac   :  { %v1803_v12 = vpop.xlane.xlu0 %1802 }
 0x8ad   :  { %v1821_v42 = vsub.f32 %v1687_v58, %v1803_v12  ;;  %v11493_v12 = vmov 0.0  }
 0x8af   :  { %v1831_v40 = vmul.f32 1.442695, %v1821_v42 }
 0x8b0   :  { %v1806_v60 = vpop.xlane.xlu0 %1805 }
 0x8b1   :  { %8724 = vpow2.f32 %v1831_v40  ;;  %v1822_v37 = vsub.f32 %v1690_v22, %v1806_v60 }
 0x8b3   :  { %v1833_v30 = vmul.f32 1.442695, %v1822_v37 }
 0x8b4   :  { %v1809_v7 = vpop.xlane.xlu0 %1808 }
 0x8b5   :  { %8726 = vpow2.f32 %v1833_v30  ;;  %v1823_v26 = vsub.f32 %v1738_v28, %v1809_v7 }
 0x8b6   :  { %v1818_v62 = vpop.xlane.xlu1 %1817  ;;  %8728 = vpow2.f32 %v1837_v50 }
 0x8b7   :  { %v1835_v36 = vmul.f32 1.442695, %v1823_v26  ;;  %v1826_v48 = vsub.f32 %v1792_v11, %v1818_v62 }
 0x8b8   :  { %v1815_v59 = vpop.xlane.xlu0 %1814 }
 0x8b9   :  { %8730 = vpow2.f32 %v1835_v36  ;;  %v1841_v35 = vmul.f32 1.442695, %v1826_v48  ;;  %v1825_v47 = vsub.f32 %v1789_v38, %v1815_v59 }
 0x8ba   :  { %v1935_v46 = vpop.permute.xlu1 %1934 }
 0x8bb   :  { %v9916_v58 = vpop.eup %8724  ;;  %8732 = vpow2.f32 %v1841_v35  ;;  %v1839_v1 = vmul.f32 1.442695, %v1825_v47  ;;  %8013 = vmatpush3.bf16.msra.mxu1 %v1935_v46 }
 0x8bc   :  { %v1888_v22 = vpop.permute.xlu0 %1887  ;;  %v1849_v63 = vsel %vm638_vm2, %v9916_v58, 0.0  ;;  %8024 = vmatprep.subr.bf16.mxu1 %v11493_v12 }
 0x8bd   :  { %8734 = vpow2.f32 %v1839_v1  ;;  %1850 = vadd.xlane.f32.xlu0 %v1849_v63  ;;  %8007 = vmatpush3.bf16.msra.mxu0 %v1888_v22 }
 0x8be   :  { %8018 = vmatprep.subr.bf16.mxu0 %v11493_v12 }
 0x8bf   :  { %v8727_v62 = vpop.eup %8726 }
 0x8c0   :  { %v1852_v59 = vsel %vm638_vm2, %v8727_v62, 0.0  ;;  %v8729_v48 = vpop.eup %8728 }
 0x8c1   :  { %1853 = vadd.xlane.f32.xlu1 %v1852_v59  ;;  %v1858_v46 = vsel %vm638_vm2, %v8729_v48, 0.0 }
 0x8c3   :  { %v8731_v7 = vpop.eup %8730 }
 0x8c4   :  { %v1855_v47 = vsel %vm638_vm2, %v8731_v7, 0.0 }
 0x8c5   :  { %v9925_v26 = vpop.eup %8732  ;;  %1856 = vadd.xlane.f32.xlu0 %v1855_v47  ;;  %1859 = vadd.xlane.f32.xlu1 %v1858_v46 }
 0x8c6   :  { %v1864_v11 = vsel %vm638_vm2, %v9925_v26, 0.0 }
 0x8c7   :  { %v8735_v28 = vpop.eup %8734 }
 0x8c8   :  { %v1861_v38 = vsel %vm638_vm2, %v8735_v28, 0.0 }
 0x8c9   :  { %1862 = vadd.xlane.f32.xlu0 %v1861_v38  ;;  %1865 = vadd.xlane.f32.xlu1 %v1864_v11 }
 0x8da   :  { %2128 = vrot.lane.b32.xlu1 %v9583_v54, %s9225_s11  ;;  %v1982_v54 = vpop.permute.xlu1 %1981 }
 0x8de   :  { %2126 = vrot.lane.b32.xlu1 %v9581_v53, %s9225_s11  ;;  %v2029_v53 = vpop.permute.xlu1 %2028 }
 0x8df   :  { %2077 = vrot.lane.b32.xlu0 %v9587_v56, %s9225_s11 }
 0x8e2   :  { %2230 = vrot.lane.b32.xlu1 %v9594_v17, %s9225_s11 }
 0x8e3   :  { %2075 = vrot.lane.b32.xlu0 %v9585_v55, %s9225_s11 }
 0x8e6   :  { %2228 = vrot.lane.b32.xlu1 %v9592_v13, %s9225_s11 }
 0x8e7   :  { %2179 = vrot.lane.b32.xlu0 %v9598_v18, %s9225_s11 }
 0x8eb   :  { %2177 = vrot.lane.b32.xlu0 %v9596_v39, %s9225_s11 }
 0x916   :  { %v1845_v42 = vpop.xlane.xlu0 %1844 }
 0x917   :  { %8736 = vrcp.f32 %v1845_v42 }
 0x918   :  { %v1848_v56 = vpop.xlane.xlu1 %1847 }
 0x919   :  { %8738 = vrcp.f32 %v1848_v56 }
 0x921   :  { %v8737_v41 = vpop.eup %8736 }
 0x922   :  { %v1875_v40 = vmul.f32 %v8737_v41, %v9908_v19 }
 0x923   :  { %v8739_v17 = vpop.eup %8738 }
 0x924   :  { %v1876_v55 = vmul.f32 %v8739_v17, %v9912_v24 }
 0x926   :  { %v1883_v60 = vpack.c.bf16 %v1876_v55, %v1875_v40 }
 0x928   :  { %8009 = vmatmul.mubr.msk.bf16.vlgmr.msra.gmra.mrb[52].mxu0 %vm638_vm2, %v1883_v60 }
 0x929   :  { %8019 = vmatpush3.bf16.msra.mxu0 %v1982_v54  ;;  %8020 = vmatprep.mubr.msk.bf16.mxu0 %vm9221_vm1, %v11493_v12 }
 0x92a   :  { %8030 = vmatprep.subr.bf16.mxu0 %v11493_v12 }
 0x94a   :  { %v1851_v13 = vpop.xlane.xlu0 %1850 }
 0x94b   :  { %8740 = vrcp.f32 %v1851_v13 }
 0x94e   :  { %v1854_v39 = vpop.xlane.xlu1 %1853 }
 0x94f   :  { %8742 = vrcp.f32 %v1854_v39 }
 0x952   :  { %v1857_v18 = vpop.xlane.xlu0 %1856  ;;  %v1860_v37 = vpop.xlane.xlu1 %1859 }
 0x953   :  { %8744 = vrcp.f32 %v1857_v18 }
 0x954   :  { %8746 = vrcp.f32 %v1860_v37 }
 0x955   :  { %v8741_v24 = vpop.eup %8740 }
 0x956   :  { %v1863_v19 = vpop.xlane.xlu0 %1862  ;;  %v1866_v50 = vpop.xlane.xlu1 %1865  ;;  %v1877_v36 = vmul.f32 %v8741_v24, %v9916_v58 }
 0x957   :  { %8748 = vrcp.f32 %v1863_v19 }
 0x958   :  { %8750 = vrcp.f32 %v1866_v50 }
 0x959   :  { %v8743_v30 = vpop.eup %8742 }
 0x95a   :  { %v1878_v35 = vmul.f32 %v8743_v30, %v8727_v62  ;;  %v2078_v1 = vpop.permute.xlu0 %2077  ;;  %v2129_v38 = vpop.permute.xlu1 %2128 }
 0x95b   :  { %v2083_v41 = vsel %vm638_vm2, %v2078_v1, 0 }
 0x95c   :  { %v1884_v22 = vpack.c.bf16 %v1878_v35, %v1877_v36 }
 0x95d   :  { %v8745_v63 = vpop.eup %8744 }
 0x95e   :  { %v8747_v59 = vpop.eup %8746  ;;  %v1879_v47 = vmul.f32 %v8745_v63, %v8731_v7  ;;  %8015 = vmatmul.mubr.msk.bf16.vlgmr.msra.gmra.mrb[52].mxu1 %vm638_vm2, %v1884_v22  ;;  %v2076_v62 = vpop.permute.xlu0 %2075 }
 0x95f   :  { %v1880_v46 = vmul.f32 %v8747_v59, %v8729_v48  ;;  %8025 = vmatpush3.bf16.msra.mxu1 %v2029_v53  ;;  %8026 = vmatprep.mubr.msk.bf16.mxu1 %vm9221_vm1, %v11493_v12  ;;  %v2127_v7 = vpop.permute.xlu1 %2126  ;;  %v2134_v53 = vsel %vm638_vm2, %v2129_v38, 0 }
 0x960   :  { %8036 = vmatprep.subr.bf16.mxu1 %v11493_v12 }
 0x961   :  { %v8749_v11 = vpop.eup %8748  ;;  %v1885_v54 = vpack.c.bf16 %v1880_v46, %v1879_v47 }
 0x962   :  { %v8751_v42 = vpop.eup %8750  ;;  %v1881_v58 = vmul.f32 %v8749_v11, %v8735_v28  ;;  %v2180_v28 = vpop.permute.xlu0 %2179 }
 0x963   :  { %v1882_v56 = vmul.f32 %v8751_v42, %v9925_v26  ;;  %8021 = vmatmul.mubr.msk.bf16.vlgmr.msra.gmra.mrb[56].mxu0 %vm638_vm2, %v1885_v54  ;;  %v2185_v26 = vsel %vm638_vm2, %v2180_v28, 0  ;;  %v2231_v17 = vpop.permute.xlu1 %2230 }
 0x964   :  { %8031 = vmatpush3.bf16.xpose.msra.mxu0 %v2083_v41  ;;  %8032 = vmatprep.mubr.msk.bf16.mxu0 %vm9221_vm1, %v11493_v12  ;;  %v2236_v40 = vsel %vm638_vm2, %v2231_v17, 0 }
 0x965   :  { %v1886_v48 = vpack.c.bf16 %v1882_v56, %v1881_v58  ;;  %8042 = vmatprep.subr.bf16.mxu0 %v11493_v12 }
 0x966   :  { %v2178_v55 = vpop.permute.xlu0 %2177 }
 0x967   :  { %8027 = vmatmul.mubr.msk.bf16.vlgmr.msra.gmra.mrb[56].mxu1 %vm638_vm2, %v1886_v48  ;;  %v2229_v60 = vpop.permute.xlu1 %2228 }
 0x968   :  { %8037 = vmatpush3.bf16.xpose.msra.mxu1 %v2134_v53  ;;  %8038 = vmatprep.mubr.msk.bf16.mxu1 %vm9221_vm1, %v11493_v12 }
 0x969   :  { %8048 = vmatprep.subr.bf16.mxu1 %v11493_v12 }
 0x96b   :  { %8033 = vmatmul.mubr.msk.bf16.vlgmr.msra.gmra.mrb[60].mxu0 %vm638_vm2, %v2076_v62 }
 0x96c   :  { %8043 = vmatpush3.bf16.xpose.msra.mxu0 %v2185_v26  ;;  %8044 = vmatprep.mubr.msk.bf16.mxu0 %vm9221_vm1, %v11493_v12 }
 0x96d   :  { %8054 = vmatprep.subr.bf16.mxu0 %v11493_v12 }
 0x96f   :  { %8039 = vmatmul.mubr.msk.bf16.vlgmr.msra.gmra.mrb[60].mxu1 %vm638_vm2, %v2127_v7 }
 0x970   :  { %8049 = vmatpush3.bf16.xpose.msra.mxu1 %v2236_v40  ;;  %8050 = vmatprep.mubr.msk.bf16.mxu1 %vm9221_vm1, %v11493_v12 }
 0x971   :  { %8060 = vmatprep.subr.bf16.mxu1 %v11493_v12 }
 0x973   :  { %8045 = vmatmul.mubr.msk.bf16.vlgmr.msra.gmra.mrb[64].mxu0 %vm638_vm2, %v2178_v55 }
 0x974   :  { %8056 = vmatprep.mubr.msk.bf16.mxu0 %vm9221_vm1, %v11493_v12 }
 0x977   :  { %8051 = vmatmul.mubr.msk.bf16.vlgmr.msra.gmra.mrb[64].mxu1 %vm638_vm2, %v2229_v60 }
 0x978   :  { %8062 = vmatprep.mubr.msk.bf16.mxu1 %vm9221_vm1, %v11493_v12 }
 0x9fb   :  { %v9984_v13 = vpop.f32.mrb[52].mxu0 }
 0x9fc   :  { %v8010_v39 = vpop.f32.mrb[53].mxu0 }
 0x9fd   :  { %v9986_v18 = vpop.f32.mrb[54].mxu0 }
 0x9fe   :  { %v8011_v19 = vpop.f32.mrb[55].mxu0 }
 0xa31   :  { %v9990_v50 = vpop.f32.mrb[52].mxu1 }
 0xa32   :  { %v8016_v24 = vpop.f32.mrb[53].mxu1 }
 0xa33   :  { %v9992_v30 = vpop.f32.mrb[54].mxu1 }
 0xa34   :  { %v8017_v35 = vpop.f32.mrb[55].mxu1 }
 0xa36   :  { %v9996_v1 = vpop.f32.mrb[56].mxu0 }
 0xa37   :  { %v8022_v22 = vpop.f32.mrb[57].mxu0 }
 0xa38   :  { %v9998_v63 = vpop.f32.mrb[58].mxu0 }
 0xa39   :  { %v8023_v47 = vpop.f32.mrb[59].mxu0 }
 0xa3a   :  { %v10002_v46 = vpop.f32.mrb[56].mxu1 }
 0xa3b   :  { %v8028_v38 = vpop.f32.mrb[57].mxu1 }
 0xa3c   :  { %v10004_v11 = vpop.f32.mrb[58].mxu1 }
 0xa3d   :  { %v8029_v42 = vpop.f32.mrb[59].mxu1 }
 0xa3e   :  { %v2119_v58 = vpop.f32.mrb[60].mxu0 }
 0xa3f   :  { %v2120_v62 = vadd.f32 %v2119_v58, %v9648_v52  ;;  %v8034_v56 = vpop.f32.mrb[61].mxu0 }
 0xa40   :  { %v2122_v41 = vpop.f32.mrb[62].mxu0 }
 0xa41   :  { %v2123_v48 = vadd.f32 %v2122_v41, %v9650_v57  ;;  %v8035_v7 = vpop.f32.mrb[63].mxu0  ;;  %v2279_v53 = vsel %vm638_vm2, %v2120_v62, -inf }
 0xa42   :  { %v2170_v28 = vpop.f32.mrb[60].mxu1  ;;  %2280 = vmax.xlane.f32.xlu0 %v2279_v53 }
 0xa43   :  { %v2171_v26 = vadd.f32 %v2170_v28, %v9648_v52  ;;  %v8040_v17 = vpop.f32.mrb[61].mxu1  ;;  %v2282_v40 = vsel %vm638_vm2, %v2123_v48, -inf }
 0xa44   :  { %v2173_v55 = vpop.f32.mrb[62].mxu1  ;;  %2283 = vmax.xlane.f32.xlu1 %v2282_v40 }
 0xa45   :  { %v2174_v60 = vadd.f32 %v2173_v55, %v9650_v57  ;;  %v8041_v39 = vpop.f32.mrb[63].mxu1  ;;  %v2285_v19 = vsel %vm638_vm2, %v2171_v26, -inf }
 0xa46   :  { %2286 = vmax.xlane.f32.xlu0 %v2285_v19  ;;  %v2221_v24 = vpop.f32.mrb[64].mxu0 }
 0xa47   :  { %v8046_v35 = vpop.f32.mrb[65].mxu0  ;;  %v2222_v47 = vadd.f32 %v2221_v24, %v9648_v52  ;;  %v2288_v58 = vsel %vm638_vm2, %v2174_v60, -inf }
 0xa48   :  { %v2224_v22 = vpop.f32.mrb[66].mxu0 }
 0xa49   :  { %v2225_v38 = vadd.f32 %v2224_v22, %v9650_v57  ;;  %v8047_v42 = vpop.f32.mrb[67].mxu0  ;;  %v2291_v55 = vsel %vm638_vm2, %v2222_v47, -inf }
 0xa4a   :  { %v2272_v56 = vpop.f32.mrb[64].mxu1  ;;  %2289 = vmax.xlane.f32.xlu0 %v2288_v58 }
 0xa4b   :  { %v8052_v41 = vpop.f32.mrb[65].mxu1  ;;  %v2294_v7 = vsel %vm638_vm2, %v2225_v38, -inf  ;;  %v2273_v28 = vadd.f32 %v2272_v56, %v9648_v52 }
 0xa4c   :  { %v2275_v53 = vpop.f32.mrb[66].mxu1  ;;  %2295 = vmax.xlane.f32.xlu1 %v2294_v7 }
 0xa4d   :  { %v10021_v17 = vadd.f32 %v2275_v53, %v9650_v57  ;;  %v8053_v40 = vpop.f32.mrb[67].mxu1  ;;  %v2297_v19 = vsel %vm638_vm2, %v2273_v28, -inf }
 0xa4e   :  { %2292 = vmax.xlane.f32.xlu0 %v2291_v55 }
 0xa4f   :  { %v2300_v39 = vsel %vm638_vm2, %v10021_v17, -inf }
 0xa50   :  { %2301 = vmax.xlane.f32.xlu1 %v2300_v39 }
 0xa52   :  { %2298 = vmax.xlane.f32.xlu0 %v2297_v19 }
 0xacf   :  { %v2281_v24 = vpop.xlane.xlu0 %2280 }
 0xad0   :  { %v2303_v35 = vsub.f32 %v2120_v62, %v2281_v24 }
 0xad1   :  { %v2284_v22 = vpop.xlane.xlu1 %2283 }
 0xad2   :  { %v2311_v42 = vmul.f32 1.442695, %v2303_v35  ;;  %v2304_v58 = vsub.f32 %v2123_v48, %v2284_v22 }
 0xad3   :  { %v2287_v56 = vpop.xlane.xlu0 %2286 }
 0xad4   :  { %8752 = vpow2.f32 %v2311_v42  ;;  %v2313_v41 = vmul.f32 1.442695, %v2304_v58  ;;  %v2305_v7 = vsub.f32 %v2171_v26, %v2287_v56 }
 0xad6   :  { %8754 = vpow2.f32 %v2313_v41  ;;  %v2315_v53 = vmul.f32 1.442695, %v2305_v7  ;;  %v11494_v7 = vpack.i.bf16 %v9862_v25, %v9860_v31  ;;  %v11496_v31 = vpack.i.bf16 %v9868_v6, %v9866_v32 }
 0xad7   :  { %v2290_v40 = vpop.xlane.xlu0 %2289  ;;  %v11497_v25 = vpack.i.bf16 %v9992_v30, %v9990_v50 }
 0xad8   :  { %8756 = vpow2.f32 %v2315_v53  ;;  %v2306_v55 = vsub.f32 %v2174_v60, %v2290_v40  ;;  %v11495_v40 = vpack.i.bf16 %v9986_v18, %v9984_v13 }
 0xad9   :  { %v2296_v59 = vpop.xlane.xlu1 %2295 }
 0xada   :  { %v2317_v54 = vmul.f32 1.442695, %v2306_v55  ;;  %v2308_v39 = vsub.f32 %v2225_v38, %v2296_v59 }
 0xadb   :  { %v2293_v36 = vpop.xlane.xlu0 %2292 }
 0xadc   :  { %8758 = vpow2.f32 %v2317_v54  ;;  %v2321_v19 = vmul.f32 1.442695, %v2308_v39  ;;  %v2307_v37 = vsub.f32 %v2222_v47, %v2293_v36 }
 0xadd   :  { %v2302_v53 = vpop.xlane.xlu1 %2301 }
 0xade   :  { %v10027_v62 = vpop.eup %8752  ;;  %8760 = vpow2.f32 %v2321_v19  ;;  %v2319_v48 = vmul.f32 1.442695, %v2307_v37 }
 0xadf   :  { %v2299_v24 = vpop.xlane.xlu0 %2298  ;;  %v2327_v26 = vsel %vm638_vm2, %v10027_v62, 0.0 }
 0xae0   :  { %v8755_v35 = vpop.eup %8754  ;;  %8762 = vpow2.f32 %v2319_v48  ;;  %v2309_v22 = vsub.f32 %v2273_v28, %v2299_v24  ;;  %2328 = vadd.xlane.f32.xlu0 %v2327_v26 }
 0xae1   :  { %v2330_v60 = vsel %vm638_vm2, %v8755_v35, 0.0 }
 0xae2   :  { %v8757_v42 = vpop.eup %8756  ;;  %v2323_v59 = vmul.f32 1.442695, %v2309_v22  ;;  %2331 = vadd.xlane.f32.xlu1 %v2330_v60 }
 0xae3   :  { %v2333_v54 = vsel %vm638_vm2, %v8757_v42, 0.0 }
 0xae4   :  { %8764 = vpow2.f32 %v2323_v59  ;;  %2334 = vadd.xlane.f32.xlu0 %v2333_v54 }
 0xae6   :  { %v8759_v36 = vpop.eup %8758 }
 0xae7   :  { %v2336_v37 = vsel %vm638_vm2, %v8759_v36, 0.0 }
 0xae8   :  { %v10034_v47 = vpop.eup %8760  ;;  %2337 = vadd.xlane.f32.xlu1 %v2336_v37 }
 0xae9   :  { %v2342_v28 = vsel %vm638_vm2, %v10034_v47, 0.0 }
 0xaea   :  { %v8763_v38 = vpop.eup %8762 }
 0xaeb   :  { %v2339_v58 = vsel %vm638_vm2, %v8763_v38, 0.0 }
 0xaec   :  { %2340 = vadd.xlane.f32.xlu0 %v2339_v58  ;;  %2343 = vadd.xlane.f32.xlu1 %v2342_v28 }
 0xaee   :  { %v10039_v56 = vpop.eup %8764 }
 0xaef   :  { %v2345_v41 = vsel %vm638_vm2, %v10039_v56, 0.0 }
 0xaf0   :  { %2346 = vadd.xlane.f32.xlu0 %v2345_v41 }
 0xafd   :  { %2418 = vrot.lane.b32.xlu1 %v9613_v29, %s9225_s11  ;;  %v2310_v29 = vsub.f32 %v10021_v17, %v2302_v53 }
 0xaff   :  { %v2325_v55 = vmul.f32 1.442695, %v2310_v29 }
 0xb01   :  { %2465 = vrot.lane.b32.xlu1 %v9632_v44, %s9225_s11  ;;  %8766 = vpow2.f32 %v2325_v55 }
 0xb06   :  { %2371 = vrot.lane.b32.xlu0 %v9615_v14, %s9225_s11 }
 0xb0a   :  { %8408 = vrot.lane.b32.xlu0 %v11494_v7, %s9226_s24 }
 0xb0b   :  { %v8767_v44 = vpop.eup %8766 }
 0xb0c   :  { %v2348_v14 = vsel %vm638_vm2, %v8767_v44, 0.0 }
 0xb0e   :  { %8418 = vrot.lane.b32.xlu0 %v11495_v40, %s11462_s29 }
 0xb25   :  { %2349 = vadd.xlane.f32.xlu1 %v2348_v14 }
 0xb36   :  { %2512 = vrot.lane.b32.xlu1 %v9630_v43, %s9225_s11 }
 0xb3a   :  { %8413 = vrot.lane.b32.xlu1 %v11496_v31, %s9226_s24 }
 0xb3e   :  { %8423 = vrot.lane.b32.xlu1 %v11497_v25, %s11462_s29  ;;  %v8542_v25 = vld [vmem:[#allocation9 + $0x10] sm:$0xff]  }
 0xb6d   :  { %v2329_v13 = vpop.xlane.xlu0 %2328 }
 0xb6f   :  { %v2332_v18 = vpop.xlane.xlu1 %2331 }
 0xb70   :  { %8768 = vrcp.f32 %v2332_v18 }
 0xb71   :  { %v2335_v17 = vpop.xlane.xlu0 %2334  ;;  %8770 = vrcp.f32 %v2329_v13  ;;  %v8543_v13 = vld [vmem:[#allocation9 + $0x18] sm:$0xff]  }
 0xb72   :  { %8772 = vrcp.f32 %v2335_v17 }
 0xb75   :  { %v2338_v39 = vpop.xlane.xlu1 %2337 }
 0xb76   :  { %8774 = vrcp.f32 %v2338_v39 }
 0xb79   :  { %v2341_v19 = vpop.xlane.xlu0 %2340  ;;  %v2344_v43 = vpop.xlane.xlu1 %2343 }
 0xb7a   :  { %8776 = vrcp.f32 %v2341_v19  ;;  %v8769_v48 = vpop.eup %8768 }
 0xb7b   :  { %8778 = vrcp.f32 %v2344_v43  ;;  %v8771_v32 = vpop.eup %8770  ;;  %v2360_v50 = vmul.f32 %v8769_v48, %v8755_v35 }
 0xb7c   :  { %v8773_v26 = vpop.eup %8772  ;;  %v2359_v22 = vmul.f32 %v8771_v32, %v10027_v62 }
 0xb7d   :  { %v2347_v6 = vpop.xlane.xlu0 %2346  ;;  %v2419_v24 = vpop.permute.xlu1 %2418  ;;  %v2361_v60 = vmul.f32 %v8773_v26, %v8757_v42  ;;  %v11498_v26 = vpack.i.bf16 %v9885_v34, %v9883_v5 }
 0xb7e   :  { %8061 = vmatpush3.bf16.msra.mxu1 %v2419_v24  ;;  %v2367_v37 = vpack.c.bf16 %v2360_v50, %v2359_v22  ;;  %8780 = vrcp.f32 %v2347_v6  ;;  %v11499_v50 = vpack.i.bf16 %v9874_v10, %v9872_v27 }
 0xb7f   :  { %8072 = vmatprep.subr.bf16.mxu1 %v11493_v12 }
 0xb80   :  { %v8775_v30 = vpop.eup %8774 }
 0xb81   :  { %v2362_v59 = vmul.f32 %v8775_v30, %v8759_v36  ;;  %v2372_v54 = vpop.permute.xlu0 %2371  ;;  %v2466_v7 = vpop.permute.xlu1 %2465 }
 0xb82   :  { %8055 = vmatpush3.bf16.msra.mxu0 %v2372_v54  ;;  %v11500_v54 = vpack.i.bf16 %v10004_v11, %v10002_v46 }
 0xb83   :  { %8066 = vmatprep.subr.bf16.mxu0 %v11493_v12  ;;  %v2368_v58 = vpack.c.bf16 %v2362_v59, %v2361_v60 }
 0xb84   :  { %v8777_v28 = vpop.eup %8776 }
 0xb85   :  { %v8779_v41 = vpop.eup %8778  ;;  %8057 = vmatmul.mubr.msk.bf16.vlgmr.msra.gmra.mrb[68].mxu0 %vm638_vm2, %v2367_v37  ;;  %8063 = vmatmul.mubr.msk.bf16.vlgmr.msra.gmra.mrb[68].mxu1 %vm638_vm2, %v2368_v58  ;;  %v2363_v62 = vmul.f32 %v8777_v28, %v8763_v38  ;;  %v8541_v38 = vld [vmem:[#allocation9 + $0x8] sm:$0xff]   ;;  %v11501_v37 = vpack.i.bf16 %v9998_v63, %v9996_v1  ;;  %v8409_v28 = vpop.permute.xlu0 %8408 }
 0xb86   :  { %8067 = vmatpush3.bf16.msra.mxu0 %v2466_v7  ;;  %8068 = vmatprep.mubr.msk.bf16.mxu0 %vm9221_vm1, %v11493_v12  ;;  %v2364_v35 = vmul.f32 %v8779_v41, %v10034_v47  ;;  %v8540_v47 = vld [vmem:[#allocation9] sm:$0xff]   ;;  %v8411_v7 = vunpack.i.h.bf16 %v8409_v28  ;;  %v8410_v11 = vunpack.i.l.bf16 %v8409_v28 }
 0xb87   :  { %8074 = vmatprep.mubr.msk.bf16.mxu1 %vm9221_vm1, %v11493_v12  ;;  %8078 = vmatprep.subr.bf16.mxu0 %v8540_v47 }
 0xb88   :  { %v2369_v42 = vpack.c.bf16 %v2364_v35, %v2363_v62  ;;  %v8781_v40 = vpop.eup %8780 }
 0xb89   :  { %v2365_v55 = vmul.f32 %v8781_v40, %v10039_v56  ;;  %v8419_v62 = vpop.permute.xlu0 %8418  ;;  %v2656_v40 = vsel %vm638_vm2, %v9742_v45, %v8411_v7 }
 0xb8a   :  { %v8420_v1 = vunpack.i.l.bf16 %v8419_v62 }
 0xb8d   :  { %8069 = vmatmul.mubr.msk.bf16.vlgmr.msra.gmra.mrb[72].mxu0 %vm638_vm2, %v2369_v42 }
 0xb8e   :  { %8079 = vmatpush3.bf16.msra.mxu0 %v8540_v47 }
 0xb8f   :  { %8080 = vmatprep.subr.bf16.mxu0 %v8541_v38 }
 0xb92   :  { %8081 = vmatpush3.bf16.msra.mxu0 %v8541_v38 }
 0xb93   :  { %8082 = vmatprep.subr.bf16.mxu0 %v8542_v25 }
 0xb96   :  { %8083 = vmatpush3.bf16.msra.mxu0 %v8542_v25 }
 0xb97   :  { %8084 = vmatprep.subr.bf16.mxu0 %v8543_v13 }
 0xb9a   :  { %8085 = vmatpush3.bf16.msra.mxu0 %v8543_v13 }
 0xbb2   :  { %v2350_v36 = vpop.xlane.xlu1 %2349 }
 0xbb3   :  { %8782 = vrcp.f32 %v2350_v36  ;;  %v8421_v36 = vunpack.i.h.bf16 %v8419_v62 }
 0xbb5   :  { %v2665_v45 = vsel %vm2663_vm5, %v2656_v40, %v8421_v36 }
 0xbb6   :  { %v2513_v53 = vpop.permute.xlu1 %2512 }
 0xbb7   :  { %8073 = vmatpush3.bf16.msra.mxu1 %v2513_v53 }
 0xbba   :  { %v8414_v41 = vpop.permute.xlu1 %8413 }
 0xbbb   :  { %v8416_v35 = vunpack.i.h.bf16 %v8414_v41  ;;  %v8415_v42 = vunpack.i.l.bf16 %v8414_v41 }
 0xbbd   :  { %v8783_v29 = vpop.eup %8782 }
 0xbbe   :  { %v2366_v14 = vmul.f32 %v8783_v29, %v8767_v44  ;;  %v8424_v46 = vpop.permute.xlu1 %8423  ;;  %v2655_v29 = vsel %vm638_vm2, %v9740_v33, %v8410_v11 }
 0xbbf   :  { %v8426_v63 = vunpack.i.h.bf16 %v8424_v46  ;;  %v8425_v53 = vunpack.i.l.bf16 %v8424_v46 }
 0xbc0   :  { %v2370_v31 = vpack.c.bf16 %v2366_v14, %v2365_v55  ;;  %v2658_v55 = vsel %vm638_vm2, %v9746_v61, %v8416_v35  ;;  %v2657_v14 = vsel %vm638_vm2, %v9744_v51, %v8415_v42 }
 0xbc1   :  { %v2667_v33 = vsel %vm2663_vm5, %v2658_v55, %v8426_v63 }
 0xbc2   :  { %8075 = vmatmul.mubr.msk.bf16.vlgmr.msra.gmra.mrb[72].mxu1 %vm638_vm2, %v2370_v31 }
 0xc58   :  { %v2411_v18 = vpop.f32.mrb[68].mxu0  ;;  %v2458_v17 = vpop.f32.mrb[68].mxu1 }
 0xc59   :  { %v8058_v39 = vpop.f32.mrb[69].mxu0  ;;  %v8064_v56 = vpop.f32.mrb[69].mxu1 }
 0xc5a   :  { %v2414_v44 = vpop.f32.mrb[70].mxu0  ;;  %v2461_v19 = vpop.f32.mrb[70].mxu1  ;;  %v2666_v39 = vsel %vm2663_vm5, %v2657_v14, %v8425_v53 }
 0xc5b   :  { %v8427_v43 = vpack.i.bf16 %v2414_v44, %v2411_v18  ;;  %v8432_v48 = vpack.i.bf16 %v2461_v19, %v2458_v17  ;;  %v8059_v32 = vpop.f32.mrb[71].mxu0  ;;  %v8065_v6 = vpop.f32.mrb[71].mxu1  ;;  %v2664_v17 = vsel %vm2663_vm5, %v2655_v29, %v8420_v1 }
 0xc5d   :  { %8433 = vrot.lane.b32.xlu1 %v8432_v48, %s11460_s26  ;;  %8428 = vrot.lane.b32.xlu0 %v8427_v43, %s11460_s26 }
 0xc60   :  { %v2505_v24 = vpop.f32.mrb[72].mxu0 }
 0xc61   :  { %8443 = vrot.lane.b32.xlu1 %v11498_v26, %s9226_s24  ;;  %8438 = vrot.lane.b32.xlu0 %v11499_v50, %s9226_s24  ;;  %v8070_v30 = vpop.f32.mrb[73].mxu0 }
 0xc62   :  { %v2508_v22 = vpop.f32.mrb[74].mxu0 }
 0xc63   :  { %v8457_v60 = vpack.i.bf16 %v2508_v22, %v2505_v24  ;;  %v8071_v59 = vpop.f32.mrb[75].mxu0 }
 0xc65   :  { %8453 = vrot.lane.b32.xlu1 %v11500_v54, %s11462_s29  ;;  %8448 = vrot.lane.b32.xlu0 %v11501_v37, %s11462_s29 }
 0xc69   :  { %8458 = vrot.lane.b32.xlu0 %v8457_v60, %s11460_s26 }
 0xc95   :  { %v2552_v5 = vpop.f32.mrb[72].mxu1 }
 0xc96   :  { %v8076_v34 = vpop.f32.mrb[73].mxu1 }
 0xc97   :  { %v2555_v27 = vpop.f32.mrb[74].mxu1 }
 0xc98   :  { %v8462_v10 = vpack.i.bf16 %v2555_v27, %v2552_v5  ;;  %v8077_v58 = vpop.f32.mrb[75].mxu1 }
 0xc9a   :  { %8463 = vrot.lane.b32.xlu1 %v8462_v10, %s11460_s26 }
 0xccf   :  { %v8434_v31 = vpop.permute.xlu1 %8433  ;;  %v8429_v47 = vpop.permute.xlu0 %8428 }
 0xcd0   :  { %v8436_v38 = vunpack.i.h.bf16 %v8434_v31  ;;  %v8435_v25 = vunpack.i.l.bf16 %v8434_v31  ;;  %v8431_v13 = vunpack.i.h.bf16 %v8429_v47  ;;  %v8430_v18 = vunpack.i.l.bf16 %v8429_v47 }
 0xcd2   :  { %v2675_v61 = vsel %vm2672_vm6, %v2666_v39, %v8435_v25  ;;  %v2676_v56 = vsel %vm2672_vm6, %v2667_v33, %v8436_v38  ;;  %v2674_v51 = vsel %vm2672_vm6, %v2665_v45, %v8431_v13  ;;  %v2673_v44 = vsel %vm2672_vm6, %v2664_v17, %v8430_v18 }
 0xcd3   :  { %v2682_v19 = vpack.c.bf16 %v2676_v56, %v2675_v61  ;;  %v8439_v43 = vpop.permute.xlu0 %8438  ;;  %v2681_v48 = vpack.c.bf16 %v2674_v51, %v2673_v44  ;;  %v8444_v58 = vpop.permute.xlu1 %8443 }
 0xcd4   :  { %v8441_v6 = vunpack.i.h.bf16 %v8439_v43  ;;  %v8440_v24 = vunpack.i.l.bf16 %v8439_v43  ;;  %v8446_v41 = vunpack.i.h.bf16 %v8444_v58 }
 0xcd5   :  { %8086 = vmatprep.mubr.msk.bf16.mxu0 %vm164_vm0, %v2681_v48 }
 0xcd6   :  { %8087 = vmatmul.mubr.msk.bf16.vlgmr.msra.gmra.mrb[76].mxu0 %vm164_vm0, %v2682_v19  ;;  %v2660_v22 = vsel %vm638_vm2, %v9750_v2, %v8441_v6  ;;  %v2659_v60 = vsel %vm638_vm2, %v9748_v0, %v8440_v24  ;;  %v8445_v2 = vunpack.i.l.bf16 %v8444_v58  ;;  %v2662_v46 = vsel %vm638_vm2, %v9759_v49, %v8446_v41  ;;  %v7312_v49 = vld [vmem:[%s11429_s12] ss:$0 sm:$0xff] }
 0xcd7   :  { %v8449_v32 = vpop.permute.xlu0 %8448  ;;  %v8454_v28 = vpop.permute.xlu1 %8453 }
 0xcd8   :  { %v8451_v26 = vunpack.i.h.bf16 %v8449_v32  ;;  %v8450_v50 = vunpack.i.l.bf16 %v8449_v32  ;;  %v8456_v7 = vunpack.i.h.bf16 %v8454_v28  ;;  %v8455_v62 = vunpack.i.l.bf16 %v8454_v28 }
 0xcd9   :  { %v2661_v11 = vsel %vm638_vm2, %v9757_v23, %v8445_v2 }
 0xcda   :  { %v2668_v37 = vsel %vm2663_vm5, %v2659_v60, %v8450_v50  ;;  %v2669_v5 = vsel %vm2663_vm5, %v2660_v22, %v8451_v26  ;;  %v2670_v36 = vsel %vm2663_vm5, %v2661_v11, %v8455_v62  ;;  %v2671_v1 = vsel %vm2663_vm5, %v2662_v46, %v8456_v7  ;;  %v8546_v11 = vld [vmem:[%s11432_s15 + $0x4] ss:$8 sps:$4 sm:$0xff]  }
 0xcdb   :  { %v8459_v30 = vpop.permute.xlu0 %8458  ;;  %3027 = vmatprep.subr.bf16.mxu1 %v8546_v11 }
 0xcdc   :  { %v8461_v59 = vunpack.i.h.bf16 %v8459_v30  ;;  %v8460_v54 = vunpack.i.l.bf16 %v8459_v30 }
 0xcde   :  { %v2678_v34 = vsel %vm2672_vm6, %v2669_v5, %v8461_v59  ;;  %v2677_v27 = vsel %vm2672_vm6, %v2668_v37, %v8460_v54 }
 0xcdf   :  { %v2683_v10 = vpack.c.bf16 %v2678_v34, %v2677_v27 }
 0xce1   :  { %8090 = vmatprep.mubr.msk.bf16.mxu0 %vm164_vm0, %v2683_v10 }
 0xd0c   :  { %v8464_v0 = vpop.permute.xlu1 %8463 }
 0xd0d   :  { %v8466_v35 = vunpack.i.h.bf16 %v8464_v0  ;;  %v8465_v42 = vunpack.i.l.bf16 %v8464_v0 }
 0xd0f   :  { %v2679_v63 = vsel %vm2672_vm6, %v2670_v36, %v8465_v42  ;;  %v2680_v53 = vsel %vm2672_vm6, %v2671_v1, %v8466_v35  ;;  %v8544_v35 = vld [vmem:[%s11432_s15] ss:$8 sps:$4 sm:$0xff]   ;;  %v8549_v42 = vld [vmem:[%s11432_s15 + $0x14] ss:$8 sps:$4 sm:$0xff]   ;;  %v8547_v36 = vld [vmem:[%s11432_s15 + $0x10] ss:$8 sps:$4 sm:$0xff]  }
 0xd10   :  { %v2684_v40 = vpack.c.bf16 %v2680_v53, %v2679_v63  ;;  %3028 = vmatpush1.bf16.msra.mxu1 %v8544_v35  ;;  %v8552_v1 = vld [vmem:[%s11432_s15 + $0x24] ss:$8 sps:$4 sm:$0xff]   ;;  %v8550_v63 = vld [vmem:[%s11432_s15 + $0x20] ss:$8 sps:$4 sm:$0xff]   ;;  %v8553_v53 = vld [vmem:[%s11432_s15 + $0x30] ss:$8 sps:$4 sm:$0xff]  }
 0xd11   :  { %3029 = vmatprep.subr.bf16.mxu1 %v8549_v42 }
 0xd12   :  { %8091 = vmatmul.mubr.msk.bf16.gmra.mrb[80].mxu0 %vm164_vm0, %v2684_v40  ;;  %v8555_v40 = vld [vmem:[%s11432_s15 + $0x34] ss:$8 sps:$4 sm:$0xff]  }
 0xd14   :  { %3030 = vmatpush1.bf16.msra.mxu1 %v8547_v36 }
 0xd15   :  { %3031 = vmatprep.subr.bf16.mxu1 %v8552_v1 }
 0xd18   :  { %3032 = vmatpush1.bf16.msra.mxu1 %v8550_v63 }
 0xd19   :  { %3033 = vmatprep.subr.bf16.mxu1 %v8555_v40 }
 0xd1c   :  { %3034 = vmatpush1.bf16.msra.mxu1 %v8553_v53 }
 0xda9   :  { %v8088_v29 = vpop.f32.mrb[76].mxu0 }
 0xdaa   :  { %v2763_v55 = vpop.f32.mrb[77].mxu0  ;;  %v2796_v23 = vadd.f32 %v8088_v29, %v9431_v4  ;;  %v11466_v29 = vmov 0  }
 0xdab   :  { %v2794_v14 = vadd.f32 %v2763_v55, %v9429_v3  ;;  %v8089_v31 = vpop.f32.mrb[78].mxu0  ;;  %3059 = vmatprep.mubr.bf16.mxu1 %v11466_v29  ;;  %8527 = vset.pattern.permute.xlu0 %v11466_v29 }
 0xdac   :  { %v2766_v47 = vpop.f32.mrb[79].mxu0  ;;  %v10146_v13 = vadd.f32 %v7312_v49, %v2796_v23  ;;  %v2797_v18 = vadd.f32 %v8089_v31, %v9441_v9 }
 0xdad   :  { %v10143_v38 = vadd.f32 %v7312_v49, %v2794_v14  ;;  %v2795_v25 = vadd.f32 %v2766_v47, %v9439_v8 }
 0xdae   :  { %v10155_v3 = vadd.f32 %v7312_v49, %v2797_v18  ;;  %v2825_v39 = vsel %vm164_vm0, %v10146_v13, 0.0 }
 0xdaf   :  { %v10149_v17 = vadd.f32 %v7312_v49, %v2795_v25  ;;  %v2819_v45 = vsel %vm164_vm0, %v10143_v38, 0.0 }
 0xdb0   :  { %2820 = vadd.xlane.f32.xlu0 %v2819_v45  ;;  %v2828_v8 = vsel %vm164_vm0, %v10155_v3, 0.0 }
 0xdb1   :  { %v2822_v4 = vsel %vm164_vm0, %v10149_v17, 0.0 }
 0xdb2   :  { %2823 = vadd.xlane.f32.xlu1 %v2822_v4 }
 0xdb4   :  { %2826 = vadd.xlane.f32.xlu0 %v2825_v39 }
 0xdb8   :  { %2829 = vadd.xlane.f32.xlu0 %v2828_v8 }
 0xde5   :  { %v8092_v9 = vpop.f32.mrb[80].mxu0 }
 0xde6   :  { %v2800_v33 = vadd.f32 %v8092_v9, %v9467_v20  ;;  %v2779_v61 = vpop.f32.mrb[81].mxu0 }
 0xde7   :  { %v2798_v56 = vadd.f32 %v2779_v61, %v9456_v15  ;;  %v8093_v51 = vpop.f32.mrb[82].mxu0 }
 0xde8   :  { %v10163_v44 = vadd.f32 %v7312_v49, %v2800_v33  ;;  %v2801_v19 = vadd.f32 %v8093_v51, %v9469_v21  ;;  %v2782_v43 = vpop.f32.mrb[83].mxu0 }
 0xde9   :  { %v10166_v48 = vadd.f32 %v7312_v49, %v2798_v56  ;;  %v2799_v32 = vadd.f32 %v2782_v43, %v9458_v16 }
 0xdea   :  { %v10169_v6 = vadd.f32 %v7312_v49, %v2801_v19  ;;  %v2837_v21 = vsel %vm164_vm0, %v10163_v44, 0.0 }
 0xdeb   :  { %v10171_v24 = vadd.f32 %v7312_v49, %v2799_v32  ;;  %v2831_v20 = vsel %vm164_vm0, %v10166_v48, 0.0 }
 0xdec   :  { %2832 = vadd.xlane.f32.xlu0 %v2831_v20  ;;  %v2840_v26 = vsel %vm164_vm0, %v10169_v6, 0.0 }
 0xded   :  { %v2834_v15 = vsel %vm164_vm0, %v10171_v24, 0.0 }
 0xdee   :  { %2835 = vadd.xlane.f32.xlu1 %v2834_v15 }
 0xdf0   :  { %2838 = vadd.xlane.f32.xlu0 %v2837_v21 }
 0xdf2   :  { %2841 = vadd.xlane.f32.xlu1 %v2840_v26 }
 0xe3d   :  { %v2821_v16 = vpop.xlane.xlu0 %2820 }
 0xe3e   :  { %v2843_v50 = vmul.f32 0.015625, %v2821_v16 }
 0xe3f   :  { %v2824_v30 = vpop.xlane.xlu1 %2823 }
 0xe40   :  { %v10182_v22 = vsub.f32 %v10143_v38, %v2843_v50  ;;  %v2844_v60 = vmul.f32 0.015625, %v2824_v30 }
 0xe41   :  { %v2827_v59 = vpop.xlane.xlu0 %2826 }
 0xe42   :  { %v10185_v54 = vsub.f32 %v10149_v17, %v2844_v60  ;;  %v2845_v37 = vmul.f32 0.015625, %v2827_v59  ;;  %v2859_v5 = vmul.f32 %v10182_v22, %v10182_v22 }
 0xe44   :  { %v10190_v34 = vsub.f32 %v10146_v13, %v2845_v37  ;;  %v2867_v27 = vsel %vm164_vm0, %v2859_v5, 0.0  ;;  %v2860_v10 = vmul.f32 %v10185_v54, %v10185_v54 }
 0xe45   :  { %v2830_v58 = vpop.xlane.xlu0 %2829  ;;  %2868 = vadd.xlane.f32.xlu0 %v2867_v27 }
 0xe46   :  { %v2846_v28 = vmul.f32 0.015625, %v2830_v58  ;;  %v2870_v41 = vsel %vm164_vm0, %v2860_v10, 0.0  ;;  %v2861_v2 = vmul.f32 %v10190_v34, %v10190_v34  ;;  %v7313_v58 = vld [vmem:[%s11430_s13] ss:$0 sm:$0xff] }
 0xe47   :  { %2871 = vadd.xlane.f32.xlu1 %v2870_v41 }
 0xe48   :  { %v10199_v7 = vsub.f32 %v10155_v3, %v2846_v28  ;;  %v2873_v62 = vsel %vm164_vm0, %v2861_v2, 0.0 }
 0xe49   :  { %2874 = vadd.xlane.f32.xlu0 %v2873_v62 }
 0xe4a   :  { %v2862_v0 = vmul.f32 %v10199_v7, %v10199_v7 }
 0xe4c   :  { %v2876_v46 = vsel %vm164_vm0, %v2862_v0, 0.0 }
 0xe4d   :  { %2877 = vadd.xlane.f32.xlu1 %v2876_v46  ;;  %v7314_v46 = vld [vmem:[%s11431_s14] ss:$0 sm:$0xff] }
 0xe79   :  { %v2833_v49 = vpop.xlane.xlu0 %2832 }
 0xe7a   :  { %v2847_v55 = vmul.f32 0.015625, %v2833_v49 }
 0xe7b   :  { %v2836_v23 = vpop.xlane.xlu1 %2835 }
 0xe7c   :  { %v10232_v14 = vsub.f32 %v10166_v48, %v2847_v55  ;;  %v2848_v31 = vmul.f32 0.015625, %v2836_v23 }
 0xe7d   :  { %v2839_v47 = vpop.xlane.xlu0 %2838 }
 0xe7e   :  { %v10235_v25 = vsub.f32 %v10171_v24, %v2848_v31  ;;  %v2849_v18 = vmul.f32 0.015625, %v2839_v47  ;;  %v2863_v45 = vmul.f32 %v10232_v14, %v10232_v14 }
 0xe7f   :  { %v2842_v4 = vpop.xlane.xlu1 %2841 }
 0xe80   :  { %v10240_v39 = vsub.f32 %v10163_v44, %v2849_v18  ;;  %v2850_v8 = vmul.f32 0.015625, %v2842_v4  ;;  %v2879_v9 = vsel %vm164_vm0, %v2863_v45, 0.0  ;;  %v2864_v33 = vmul.f32 %v10235_v25, %v10235_v25 }
 0xe81   :  { %2880 = vadd.xlane.f32.xlu0 %v2879_v9 }
 0xe82   :  { %v10246_v61 = vsub.f32 %v10169_v6, %v2850_v8  ;;  %v2882_v56 = vsel %vm164_vm0, %v2864_v33, 0.0  ;;  %v2865_v51 = vmul.f32 %v10240_v39, %v10240_v39 }
 0xe83   :  { %2883 = vadd.xlane.f32.xlu1 %v2882_v56 }
 0xe84   :  { %v2885_v19 = vsel %vm164_vm0, %v2865_v51, 0.0  ;;  %v2866_v43 = vmul.f32 %v10246_v61, %v10246_v61 }
 0xe85   :  { %2886 = vadd.xlane.f32.xlu0 %v2885_v19 }
 0xe86   :  { %v2888_v32 = vsel %vm164_vm0, %v2866_v43, 0.0 }
 0xe87   :  { %2889 = vadd.xlane.f32.xlu1 %v2888_v32 }
 0xed2   :  { %v2869_v20 = vpop.xlane.xlu0 %2868 }
 0xed3   :  { %v2891_v15 = vmul.f32 0.015625, %v2869_v20 }
 0xed4   :  { %v2872_v21 = vpop.xlane.xlu1 %2871 }
 0xed5   :  { %v2899_v26 = vadd.f32 1e-05, %v2891_v15  ;;  %v2892_v16 = vmul.f32 0.015625, %v2872_v21 }
 0xed6   :  { %v2875_v50 = vpop.xlane.xlu0 %2874 }
 0xed7   :  { %8784 = vrsqrt.f32 %v2899_v26  ;;  %v2900_v30 = vadd.f32 1e-05, %v2892_v16  ;;  %v2893_v60 = vmul.f32 0.015625, %v2875_v50 }
 0xed9   :  { %8786 = vrsqrt.f32 %v2900_v30  ;;  %v2901_v59 = vadd.f32 1e-05, %v2893_v60 }
 0xeda   :  { %v2878_v37 = vpop.xlane.xlu1 %2877 }
 0xedb   :  { %8788 = vrsqrt.f32 %v2901_v59  ;;  %v2894_v5 = vmul.f32 0.015625, %v2878_v37 }
 0xedd   :  { %v2902_v27 = vadd.f32 1e-05, %v2894_v5 }
 0xedf   :  { %8790 = vrsqrt.f32 %v2902_v27 }
 0xee1   :  { %v8785_v10 = vpop.eup %8784 }
 0xee2   :  { %v2915_v28 = vmul.f32 %v8785_v10, %v10182_v22  ;;  %v8556_v10 = vld [vmem:[%s11434_s17 + $0x40] sm:$0xff]  }
 0xee3   :  { %v8787_v41 = vpop.eup %8786  ;;  %7653 = vmatprep.subr.bf16.mxu0 %v8556_v10 }
 0xee4   :  { %v2929_v2 = vmul.f32 %v7313_v58, %v2915_v28  ;;  %v2916_v62 = vmul.f32 %v8787_v41, %v10185_v54  ;;  %v8560_v28 = vld [vmem:[%s11434_s17 + $0x50] sm:$0xff]  }
 0xee5   :  { %v8789_v0 = vpop.eup %8788  ;;  %v8561_v41 = vld [vmem:[%s11434_s17 + $0x10] sm:$0xff]  }
 0xee6   :  { %v2930_v11 = vmul.f32 %v7313_v58, %v2916_v62  ;;  %v2943_v35 = vadd.f32 %v7314_v46, %v2929_v2  ;;  %v2917_v36 = vmul.f32 %v8789_v0, %v10190_v34  ;;  %v8562_v2 = vld [vmem:[%s11434_s17 + $0x58] sm:$0xff]   ;;  %v8564_v0 = vld [vmem:[%s11434_s17 + $0x60] sm:$0xff]  }
 0xee7   :  { %v8563_v62 = vld [vmem:[%s11434_s17 + $0x18] sm:$0xff]  }
 0xee8   :  { %v2944_v42 = vadd.f32 %v7314_v46, %v2930_v11  ;;  %v2931_v22 = vmul.f32 %v7313_v58, %v2917_v36  ;;  %v8566_v11 = vld [vmem:[%s11434_s17 + $0x68] sm:$0xff]   ;;  %v8569_v36 = vld [vmem:[%s11434_s17 + $0x30] sm:$0xff]  }
 0xee9   :  { %v8791_v1 = vpop.eup %8790 }
 0xeea   :  { %v2951_v63 = vpack.c.bf16 %v2944_v42, %v2943_v35  ;;  %v2918_v53 = vmul.f32 %v8791_v1, %v10199_v7  ;;  %v2945_v49 = vadd.f32 %v7314_v46, %v2931_v22  ;;  %v8567_v35 = vld [vmem:[%s11434_s17 + $0x28] sm:$0xff]   ;;  %v8568_v42 = vld [vmem:[%s11434_s17 + $0x70] sm:$0xff]   ;;  %v8570_v1 = vld [vmem:[%s11434_s17 + $0x78] sm:$0xff]  }
 0xeec   :  { %7323 = vmatmul.mubr.msk.bf16.vlgmr.msra.gmra.mrb[76].mxu1 %vm164_vm0, %v2951_v63  ;;  %v2932_v40 = vmul.f32 %v7313_v58, %v2918_v53  ;;  %v8571_v63 = vld [vmem:[%s11434_s17 + $0x38] sm:$0xff]  }
 0xeed   :  { %3069 = vmatprep.mubr.bf16.mxu1 %v11466_v29  ;;  %v11502_v53 = vld [vmem:[#allocation16_spill] sm:$0xff] }
 0xeee   :  { %v2946_v54 = vadd.f32 %v7314_v46, %v2932_v40  ;;  %v11465_v22 = vsub.s32 0, %v11502_v53  ;;  %v2963_v40 = vld [vmem:[%s11433_s16] sm:$0x3] }
 0xef0   :  { %v2952_v55 = vpack.c.bf16 %v2946_v54, %v2945_v49  ;;  %v11464_v54 = vsub.s32 1, %v11502_v53  ;;  %v10331_v49 = vrot.slane %v2963_v40, %v11465_v22 }
 0xef4   :  { %7324 = vmatmul.mubr.msk.bf16.gmra.mrb[80].mxu1 %vm164_vm0, %v2952_v55  ;;  %v10335_v55 = vrot.slane %v2963_v40, %v11464_v54 }
 0xef5   :  { %3079 = vmatprep.mubr.bf16.mxu1 %v11466_v29 }
 0xf0e   :  { %v2881_v23 = vpop.xlane.xlu0 %2880 }
 0xf0f   :  { %v2895_v31 = vmul.f32 0.015625, %v2881_v23 }
 0xf10   :  { %v2884_v34 = vpop.xlane.xlu1 %2883 }
 0xf11   :  { %v2903_v47 = vadd.f32 1e-05, %v2895_v31  ;;  %v2896_v18 = vmul.f32 0.015625, %v2884_v34 }
 0xf12   :  { %v2887_v45 = vpop.xlane.xlu0 %2886 }
 0xf13   :  { %8792 = vrsqrt.f32 %v2903_v47  ;;  %v2904_v7 = vadd.f32 1e-05, %v2896_v18  ;;  %v2897_v4 = vmul.f32 0.015625, %v2887_v45 }
 0xf14   :  { %v2890_v8 = vpop.xlane.xlu1 %2889 }
 0xf15   :  { %8794 = vrsqrt.f32 %v2904_v7  ;;  %v2905_v9 = vadd.f32 1e-05, %v2897_v4  ;;  %v2898_v33 = vmul.f32 0.015625, %v2890_v8 }
 0xf17   :  { %8796 = vrsqrt.f32 %v2905_v9  ;;  %v2906_v56 = vadd.f32 1e-05, %v2898_v33 }
 0xf19   :  { %8798 = vrsqrt.f32 %v2906_v56 }
 0xf1d   :  { %v8793_v51 = vpop.eup %8792 }
 0xf1e   :  { %v2919_v19 = vmul.f32 %v8793_v51, %v10232_v14 }
 0xf1f   :  { %v8795_v43 = vpop.eup %8794 }
 0xf20   :  { %v2920_v32 = vmul.f32 %v8795_v43, %v10235_v25  ;;  %v2933_v20 = vmul.f32 %v7313_v58, %v2919_v19 }
 0xf21   :  { %v8797_v15 = vpop.eup %8796 }
 0xf22   :  { %v2934_v21 = vmul.f32 %v7313_v58, %v2920_v32  ;;  %v2947_v16 = vadd.f32 %v7314_v46, %v2933_v20  ;;  %v2921_v30 = vmul.f32 %v8797_v15, %v10240_v39  ;;  %v8557_v39 = vld [vmem:[%s11434_s17] sm:$0xff]  }
 0xf23   :  { %v8799_v26 = vpop.eup %8798  ;;  %7654 = vmatpush3.bf16.msra.mxu0 %v8557_v39 }
 0xf24   :  { %v2948_v50 = vadd.f32 %v7314_v46, %v2934_v21  ;;  %v2922_v60 = vmul.f32 %v8799_v26, %v10246_v61  ;;  %v2935_v5 = vmul.f32 %v7313_v58, %v2921_v30  ;;  %v8558_v61 = vld [vmem:[%s11434_s17 + $0x48] sm:$0xff]  }
 0xf25   :  { %7655 = vmatprep.subr.bf16.mxu0 %v8558_v61 }
 0xf26   :  { %v2953_v59 = vpack.c.bf16 %v2948_v50, %v2947_v16  ;;  %v2936_v37 = vmul.f32 %v7313_v58, %v2922_v60  ;;  %v2949_v27 = vadd.f32 %v7314_v46, %v2935_v5  ;;  %v8559_v58 = vld [vmem:[%s11434_s17 + $0x8] sm:$0xff]  }
 0xf27   :  { %7656 = vmatpush3.bf16.msra.mxu0 %v8559_v58 }
 0xf28   :  { %7325 = vmatmul.mubr.msk.bf16.gmra.mrb[84].mxu1 %vm164_vm0, %v2953_v59  ;;  %v2950_v14 = vadd.f32 %v7314_v46, %v2936_v37  ;;  %7657 = vmatprep.subr.bf16.mxu0 %v8560_v28  ;;  %v8565_v46 = vld [vmem:[%s11434_s17 + $0x20] sm:$0xff]  }
 0xf29   :  { %3089 = vmatprep.mubr.bf16.mxu1 %v11466_v29 }
 0xf2a   :  { %v2954_v25 = vpack.c.bf16 %v2950_v14, %v2949_v27 }
 0xf2b   :  { %7658 = vmatpush3.bf16.msra.mxu0 %v8561_v41 }
 0xf2c   :  { %7659 = vmatprep.subr.bf16.mxu0 %v8562_v2 }
 0xf2f   :  { %7660 = vmatpush3.bf16.msra.mxu0 %v8563_v62 }
 0xf30   :  { %7326 = vmatmul.mubr.msk.bf16.gmra.mrb[88].mxu1 %vm164_vm0, %v2954_v25  ;;  %7661 = vmatprep.subr.bf16.mxu0 %v8564_v0 }
 0xf33   :  { %7662 = vmatpush3.bf16.msra.mxu0 %v8565_v46 }
 0xf34   :  { %7663 = vmatprep.subr.bf16.mxu0 %v8566_v11 }
 0xf37   :  { %7664 = vmatpush3.bf16.msra.mxu0 %v8567_v35 }
 0xf38   :  { %7665 = vmatprep.subr.bf16.mxu0 %v8568_v42 }
 0xf3b   :  { %7666 = vmatpush3.bf16.msra.mxu0 %v8569_v36 }
 0xf3c   :  { %7667 = vmatprep.subr.bf16.mxu0 %v8570_v1 }
 0xf3f   :  { %7668 = vmatpush3.bf16.msra.mxu0 %v8571_v63 }
 0xfbf   :  { %v3061_v23 = vpop.f32.mrb[76].mxu1 }
 0xfc0   :  { %v10338_v31 = vadd.f32 %v3061_v23, %v10331_v49  ;;  %v3063_v34 = vpop.f32.mrb[77].mxu1 }
 0xfc1   :  { %v10341_v47 = vadd.f32 %v3063_v34, %v10335_v55  ;;  %v3065_v18 = vpop.f32.mrb[78].mxu1 }
 0xfc2   :  { %v7327_v45 = vmul.f32 -1.702, %v10338_v31  ;;  %v10345_v7 = vadd.f32 %v3065_v18, %v10331_v49  ;;  %v3067_v4 = vpop.f32.mrb[79].mxu1 }
 0xfc3   :  { %v7328_v8 = vmul.f32 -1.702, %v10341_v47  ;;  %v3068_v9 = vadd.f32 %v3067_v4, %v10335_v55 }
 0xfc4   :  { %v3132_v33 = vmul.f32 1.442695, %v7327_v45  ;;  %v7329_v56 = vmul.f32 -1.702, %v10345_v7 }
 0xfc5   :  { %v3134_v51 = vmul.f32 1.442695, %v7328_v8  ;;  %v7330_v19 = vmul.f32 -1.702, %v3068_v9 }
 0xfc6   :  { %8800 = vpow2.f32 %v3132_v33  ;;  %v3136_v43 = vmul.f32 1.442695, %v7329_v56 }
 0xfc7   :  { %8802 = vpow2.f32 %v3134_v51  ;;  %v3138_v32 = vmul.f32 1.442695, %v7330_v19  ;;  %v3071_v20 = vpop.f32.mrb[80].mxu1 }
 0xfc8   :  { %8804 = vpow2.f32 %v3136_v43  ;;  %v3072_v15 = vadd.f32 %v3071_v20, %v10331_v49  ;;  %v3073_v21 = vpop.f32.mrb[81].mxu1 }
 0xfc9   :  { %8806 = vpow2.f32 %v3138_v32  ;;  %v3074_v26 = vadd.f32 %v3073_v21, %v10335_v55  ;;  %v3075_v16 = vpop.f32.mrb[82].mxu1 }
 0xfca   :  { %v7331_v50 = vmul.f32 -1.702, %v3072_v15  ;;  %v3076_v30 = vadd.f32 %v3075_v16, %v10331_v49  ;;  %v3077_v60 = vpop.f32.mrb[83].mxu1 }
 0xfcb   :  { %v7332_v59 = vmul.f32 -1.702, %v3074_v26  ;;  %v3078_v37 = vadd.f32 %v3077_v60, %v10335_v55 }
 0xfcc   :  { %v3140_v5 = vmul.f32 1.442695, %v7331_v50  ;;  %v7333_v14 = vmul.f32 -1.702, %v3076_v30 }
 0xfcd   :  { %v3142_v27 = vmul.f32 1.442695, %v7332_v59  ;;  %v7334_v25 = vmul.f32 -1.702, %v3078_v37 }
 0xfce   :  { %8808 = vpow2.f32 %v3140_v5  ;;  %v3144_v10 = vmul.f32 1.442695, %v7333_v14 }
 0xfcf   :  { %8810 = vpow2.f32 %v3142_v27  ;;  %v3146_v39 = vmul.f32 1.442695, %v7334_v25 }
 0xfd0   :  { %v8801_v61 = vpop.eup %8800  ;;  %8812 = vpow2.f32 %v3144_v10 }
 0xfd1   :  { %v8803_v58 = vpop.eup %8802  ;;  %v3164_v28 = vadd.f32 1.0, %v8801_v61  ;;  %8814 = vpow2.f32 %v3146_v39 }
 0xfd2   :  { %v8805_v41 = vpop.eup %8804  ;;  %v3165_v2 = vadd.f32 1.0, %v8803_v58 }
 0xfd3   :  { %v8807_v62 = vpop.eup %8806  ;;  %8816 = vrcp.f32 %v3164_v28  ;;  %v3166_v0 = vadd.f32 1.0, %v8805_v41 }
 0xfd4   :  { %8818 = vrcp.f32 %v3165_v2  ;;  %v3167_v46 = vadd.f32 1.0, %v8807_v62 }
 0xfd5   :  { %8820 = vrcp.f32 %v3166_v0 }
 0xfd6   :  { %8822 = vrcp.f32 %v3167_v46 }
 0xfd8   :  { %v8809_v11 = vpop.eup %8808 }
 0xfd9   :  { %v8811_v35 = vpop.eup %8810  ;;  %v3168_v42 = vadd.f32 1.0, %v8809_v11 }
 0xfda   :  { %v8813_v36 = vpop.eup %8812  ;;  %v3169_v1 = vadd.f32 1.0, %v8811_v35 }
 0xfdb   :  { %v8815_v63 = vpop.eup %8814  ;;  %8824 = vrcp.f32 %v3168_v42  ;;  %v3170_v40 = vadd.f32 1.0, %v8813_v36 }
 0xfdc   :  { %8826 = vrcp.f32 %v3169_v1  ;;  %v3171_v23 = vadd.f32 1.0, %v8815_v63 }
 0xfdd   :  { %v8817_v34 = vpop.eup %8816  ;;  %8828 = vrcp.f32 %v3170_v40 }
 0xfde   :  { %v8819_v18 = vpop.eup %8818  ;;  %8830 = vrcp.f32 %v3171_v23  ;;  %v3212_v8 = vmul.f32 %v8817_v34, %v10338_v31 }
 0xfdf   :  { %v8821_v45 = vpop.eup %8820  ;;  %v3213_v56 = vmul.f32 %v8819_v18, %v10341_v47 }
 0xfe0   :  { %v8823_v4 = vpop.eup %8822  ;;  %v3214_v33 = vmul.f32 %v8821_v45, %v10345_v7 }
 0xfe1   :  { %v3215_v51 = vmul.f32 %v8823_v4, %v3068_v9 }
 0xfe2   :  { %v3228_v19 = vpack.c.bf16 %v3214_v33, %v3212_v8 }
 0xfe3   :  { %v3229_v43 = vpack.c.bf16 %v3215_v51, %v3213_v56 }
 0xfe5   :  { %v8825_v32 = vpop.eup %8824  ;;  %3396 = vmatprep.mubr.bf16.mxu0 %v3229_v43 }
 0xfe6   :  { %v8827_v20 = vpop.eup %8826  ;;  %3397 = vmatmul.mubr.bf16.vlgmr.msra.gmra.mrb[84].mxu0 %v3228_v19  ;;  %v3216_v50 = vmul.f32 %v8825_v32, %v3072_v15 }
 0xfe7   :  { %v8829_v21 = vpop.eup %8828  ;;  %v3217_v59 = vmul.f32 %v8827_v20, %v3074_v26 }
 0xfe8   :  { %v8831_v16 = vpop.eup %8830  ;;  %v3218_v60 = vmul.f32 %v8829_v21, %v3076_v30 }
 0xfe9   :  { %v3219_v5 = vmul.f32 %v8831_v16, %v3078_v37 }
 0xfea   :  { %v3230_v14 = vpack.c.bf16 %v3218_v60, %v3216_v50 }
 0xfeb   :  { %v3231_v27 = vpack.c.bf16 %v3219_v5, %v3217_v59 }
 0xfed   :  { %3404 = vmatprep.mubr.bf16.mxu0 %v3231_v27 }
 0xfee   :  { %3405 = vmatmul.mubr.bf16.gmra.mrb[88].mxu0 %v3230_v14 }
 0xffb   :  { %v3081_v31 = vpop.f32.mrb[84].mxu1 }
 0xffc   :  { %v10358_v47 = vadd.f32 %v3081_v31, %v10331_v49  ;;  %v3083_v7 = vpop.f32.mrb[85].mxu1 }
 0xffd   :  { %v10361_v9 = vadd.f32 %v3083_v7, %v10335_v55  ;;  %v3085_v25 = vpop.f32.mrb[86].mxu1 }
 0xffe   :  { %v7335_v10 = vmul.f32 -1.702, %v10358_v47  ;;  %v10365_v15 = vadd.f32 %v3085_v25, %v10331_v49  ;;  %v3087_v26 = vpop.f32.mrb[87].mxu1 }
 0xfff   :  { %v7336_v30 = vmul.f32 -1.702, %v10361_v9  ;;  %v3088_v37 = vadd.f32 %v3087_v26, %v10335_v55 }
0x1000   :  { %v3148_v39 = vmul.f32 1.442695, %v7335_v10  ;;  %v7337_v61 = vmul.f32 -1.702, %v10365_v15 }
0x1001   :  { %v3150_v58 = vmul.f32 1.442695, %v7336_v30  ;;  %v7338_v28 = vmul.f32 -1.702, %v3088_v37 }
0x1002   :  { %8832 = vpow2.f32 %v3148_v39  ;;  %v3152_v41 = vmul.f32 1.442695, %v7337_v61 }
0x1003   :  { %8834 = vpow2.f32 %v3150_v58  ;;  %v3154_v2 = vmul.f32 1.442695, %v7338_v28  ;;  %v3091_v62 = vpop.f32.mrb[88].mxu1 }
0x1004   :  { %8836 = vpow2.f32 %v3152_v41  ;;  %v3092_v0 = vadd.f32 %v3091_v62, %v10331_v49  ;;  %v3093_v46 = vpop.f32.mrb[89].mxu1 }
0x1005   :  { %8838 = vpow2.f32 %v3154_v2  ;;  %v3094_v11 = vadd.f32 %v3093_v46, %v10335_v55  ;;  %v3095_v35 = vpop.f32.mrb[90].mxu1 }
0x1006   :  { %v7339_v42 = vmul.f32 -1.702, %v3092_v0  ;;  %v3096_v36 = vadd.f32 %v3095_v35, %v10331_v49  ;;  %v3097_v1 = vpop.f32.mrb[91].mxu1 }
0x1007   :  { %v7340_v63 = vmul.f32 -1.702, %v3094_v11  ;;  %v3098_v40 = vadd.f32 %v3097_v1, %v10335_v55 }
0x1008   :  { %v3156_v23 = vmul.f32 1.442695, %v7339_v42  ;;  %v7341_v34 = vmul.f32 -1.702, %v3096_v36 }
0x1009   :  { %v3158_v18 = vmul.f32 1.442695, %v7340_v63  ;;  %v7342_v45 = vmul.f32 -1.702, %v3098_v40 }
0x100a   :  { %8840 = vpow2.f32 %v3156_v23  ;;  %v3160_v4 = vmul.f32 1.442695, %v7341_v34  ;;  %v7359_v34 = vld [vmem:[%s11435_s18] ss:$0 sm:$0xff] }
0x100b   :  { %8842 = vpow2.f32 %v3158_v18  ;;  %v3162_v8 = vmul.f32 1.442695, %v7342_v45 }
0x100c   :  { %v8833_v33 = vpop.eup %8832  ;;  %8844 = vpow2.f32 %v3160_v4 }
0x100d   :  { %v8835_v56 = vpop.eup %8834  ;;  %v3172_v51 = vadd.f32 1.0, %v8833_v33  ;;  %8846 = vpow2.f32 %v3162_v8 }
0x100e   :  { %v8837_v19 = vpop.eup %8836  ;;  %v3173_v43 = vadd.f32 1.0, %v8835_v56 }
0x100f   :  { %v8839_v49 = vpop.eup %8838  ;;  %8848 = vrcp.f32 %v3172_v51  ;;  %v3174_v32 = vadd.f32 1.0, %v8837_v19 }
0x1010   :  { %8850 = vrcp.f32 %v3173_v43  ;;  %v3175_v55 = vadd.f32 1.0, %v8839_v49 }
0x1011   :  { %8852 = vrcp.f32 %v3174_v32 }
0x1012   :  { %8854 = vrcp.f32 %v3175_v55 }
0x1014   :  { %v8841_v20 = vpop.eup %8840 }
0x1015   :  { %v8843_v21 = vpop.eup %8842  ;;  %v3176_v16 = vadd.f32 1.0, %v8841_v20 }
0x1016   :  { %v8845_v50 = vpop.eup %8844  ;;  %v3177_v60 = vadd.f32 1.0, %v8843_v21 }
0x1017   :  { %v8847_v59 = vpop.eup %8846  ;;  %8856 = vrcp.f32 %v3176_v16  ;;  %v3178_v5 = vadd.f32 1.0, %v8845_v50 }
0x1018   :  { %8858 = vrcp.f32 %v3177_v60  ;;  %v3179_v14 = vadd.f32 1.0, %v8847_v59 }
0x1019   :  { %v8849_v27 = vpop.eup %8848  ;;  %8860 = vrcp.f32 %v3178_v5 }
0x101a   :  { %v8851_v31 = vpop.eup %8850  ;;  %8862 = vrcp.f32 %v3179_v14  ;;  %v3220_v10 = vmul.f32 %v8849_v27, %v10358_v47 }
0x101b   :  { %v8853_v7 = vpop.eup %8852  ;;  %v3221_v30 = vmul.f32 %v8851_v31, %v10361_v9 }
0x101c   :  { %v8855_v25 = vpop.eup %8854  ;;  %v3222_v26 = vmul.f32 %v8853_v7, %v10365_v15 }
0x101d   :  { %v3223_v39 = vmul.f32 %v8855_v25, %v3088_v37 }
0x101e   :  { %v3232_v61 = vpack.c.bf16 %v3222_v26, %v3220_v10 }
0x101f   :  { %v3233_v58 = vpack.c.bf16 %v3223_v39, %v3221_v30 }
0x1021   :  { %v8857_v28 = vpop.eup %8856  ;;  %3412 = vmatprep.mubr.bf16.mxu0 %v3233_v58 }
0x1022   :  { %v8859_v41 = vpop.eup %8858  ;;  %3413 = vmatmul.mubr.bf16.gmra.mrb[92].mxu0 %v3232_v61  ;;  %v3224_v46 = vmul.f32 %v8857_v28, %v3092_v0 }
0x1023   :  { %v8861_v2 = vpop.eup %8860  ;;  %v3225_v42 = vmul.f32 %v8859_v41, %v3094_v11 }
0x1024   :  { %v8863_v62 = vpop.eup %8862  ;;  %v3226_v35 = vmul.f32 %v8861_v2, %v3096_v36 }
0x1025   :  { %v3227_v1 = vmul.f32 %v8863_v62, %v3098_v40 }
0x1026   :  { %v3234_v63 = vpack.c.bf16 %v3226_v35, %v3224_v46 }
0x1027   :  { %v3235_v23 = vpack.c.bf16 %v3227_v1, %v3225_v42 }
0x1029   :  { %3420 = vmatprep.mubr.bf16.mxu0 %v3235_v23 }
0x102a   :  { %3421 = vmatmul.mubr.bf16.gmra.mrb[96].mxu0 %v3234_v63 }
0x10b9   :  { %v7669_v47 = vpop.f32.mrb[84].mxu0 }
0x10ba   :  { %v7670_v15 = vpop.f32.mrb[85].mxu0 }
0x10bb   :  { %v7671_v9 = vadd.f32 %v7670_v15, %v7669_v47  ;;  %v7672_v37 = vpop.f32.mrb[86].mxu0 }
0x10bc   :  { %v7673_v18 = vpop.f32.mrb[87].mxu0 }
0x10bd   :  { %v3429_v45 = vadd.f32 %v7671_v9, %v10143_v38  ;;  %v7674_v4 = vadd.f32 %v7673_v18, %v7672_v37 }
0x10bf   :  { %v10381_v0 = vadd.f32 %v7359_v34, %v3429_v45  ;;  %v3430_v11 = vadd.f32 %v7674_v4, %v10149_v17 }
0x10c1   :  { %v10384_v36 = vadd.f32 %v7359_v34, %v3430_v11  ;;  %v7675_v40 = vpop.f32.mrb[88].mxu0  ;;  %v3456_v8 = vsel %vm164_vm0, %v10381_v0, 0.0 }
0x10c2   :  { %3457 = vadd.xlane.f32.xlu0 %v3456_v8  ;;  %v7676_v33 = vpop.f32.mrb[89].mxu0 }
0x10c3   :  { %v7677_v56 = vadd.f32 %v7676_v33, %v7675_v40  ;;  %v7678_v51 = vpop.f32.mrb[90].mxu0  ;;  %v3459_v19 = vsel %vm164_vm0, %v10384_v36, 0.0 }
0x10c4   :  { %3460 = vadd.xlane.f32.xlu1 %v3459_v19  ;;  %v7679_v38 = vpop.f32.mrb[91].mxu0  ;;  %v8574_v19 = vld [vmem:[%s11486_s30 + $0x28] sm:$0xff]  }
0x10c5   :  { %v3431_v43 = vadd.f32 %v7677_v56, %v10146_v13  ;;  %v7680_v49 = vadd.f32 %v7679_v38, %v7678_v51  ;;  %v8572_v56 = vld [vmem:[%s11486_s30 + $0x20] sm:$0xff]   ;;  %v8573_v51 = vld [vmem:[#allocation8 + $0x20] sm:$0xff]   ;;  %v8575_v38 = vld [vmem:[#allocation8 + $0x28] sm:$0xff]  }
0x10c6   :  { %8094 = vmatprep.subr.bf16.mxu1 %v8572_v56  ;;  %8126 = vmatprep.subr.bf16.mxu0 %v8573_v51 }
0x10c7   :  { %v10391_v32 = vadd.f32 %v7359_v34, %v3431_v43  ;;  %v3432_v17 = vadd.f32 %v7680_v49, %v10155_v3  ;;  %8095 = vmatpush3.bf16.msra.mxu1 %v8572_v56  ;;  %8127 = vmatpush3.bf16.msra.mxu0 %v8573_v51  ;;  %v8576_v43 = vld [vmem:[%s11486_s30 + $0x30] sm:$0xff]   ;;  %v8577_v49 = vld [vmem:[#allocation8 + $0x30] sm:$0xff]  }
0x10c8   :  { %8096 = vmatprep.subr.bf16.mxu1 %v8574_v19  ;;  %8128 = vmatprep.subr.bf16.mxu0 %v8575_v38 }
0x10c9   :  { %v10394_v55 = vadd.f32 %v7359_v34, %v3432_v17  ;;  %v3462_v20 = vsel %vm164_vm0, %v10391_v32, 0.0  ;;  %v8578_v17 = vld [vmem:[%s11486_s30 + $0x38] sm:$0xff]  }
0x10ca   :  { %3463 = vadd.xlane.f32.xlu0 %v3462_v20  ;;  %v8579_v20 = vld [vmem:[#allocation8 + $0x38] sm:$0xff]  }
0x10cb   :  { %v3465_v21 = vsel %vm164_vm0, %v10394_v55, 0.0  ;;  %8097 = vmatpush3.bf16.msra.mxu1 %v8574_v19  ;;  %8129 = vmatpush3.bf16.msra.mxu0 %v8575_v38  ;;  %v10492_v19 = vld [vmem:[%s11488_s8 + $0x1] ss:$0 sm:$0xff] }
0x10cc   :  { %3466 = vadd.xlane.f32.xlu1 %v3465_v21  ;;  %8098 = vmatprep.subr.bf16.mxu1 %v8576_v43 }
0x10cd   :  { %8130 = vmatprep.subr.bf16.mxu0 %v8577_v49 }
0x10cf   :  { %8099 = vmatpush3.bf16.msra.mxu1 %v8576_v43  ;;  %8131 = vmatpush3.bf16.msra.mxu0 %v8577_v49 }
0x10d0   :  { %8100 = vmatprep.subr.bf16.mxu1 %v8578_v17  ;;  %8132 = vmatprep.subr.bf16.mxu0 %v8579_v20 }
0x10d3   :  { %8101 = vmatpush3.bf16.msra.mxu1 %v8578_v17  ;;  %8133 = vmatpush3.bf16.msra.mxu0 %v8579_v20 }
0x10d4   :  { %8154 = vmatprep.subr.bf16.mxu0 %v11493_v12 }
0x10f5   :  { %v7681_v16 = vpop.f32.mrb[92].mxu0 }
0x10f6   :  { %v7682_v50 = vpop.f32.mrb[93].mxu0 }
0x10f7   :  { %v7683_v60 = vadd.f32 %v7682_v50, %v7681_v16  ;;  %v7684_v59 = vpop.f32.mrb[94].mxu0 }
0x10f8   :  { %v7685_v13 = vpop.f32.mrb[95].mxu0 }
0x10f9   :  { %v3433_v5 = vadd.f32 %v7683_v60, %v10166_v48  ;;  %v7686_v14 = vadd.f32 %v7685_v13, %v7684_v59 }
0x10fb   :  { %v10401_v27 = vadd.f32 %v7359_v34, %v3433_v5  ;;  %v3434_v3 = vadd.f32 %v7686_v14, %v10171_v24 }
0x10fd   :  { %v10404_v31 = vadd.f32 %v7359_v34, %v3434_v3  ;;  %v7687_v7 = vpop.f32.mrb[96].mxu0  ;;  %v3468_v25 = vsel %vm164_vm0, %v10401_v27, 0.0 }
0x10fe   :  { %3469 = vadd.xlane.f32.xlu0 %v3468_v25  ;;  %v7688_v10 = vpop.f32.mrb[97].mxu0 }
0x10ff   :  { %11503 = vst [vmem:[#allocation18_spill] sm:$0xff] %v10404_v31  ;;  %v7689_v26 = vadd.f32 %v7688_v10, %v7687_v7  ;;  %v7690_v30 = vpop.f32.mrb[98].mxu0  ;;  %v3471_v39 = vsel %vm164_vm0, %v10404_v31, 0.0 }
0x1100   :  { %3472 = vadd.xlane.f32.xlu1 %v3471_v39  ;;  %v7691_v48 = vpop.f32.mrb[99].mxu0 }
0x1101   :  { %v3435_v61 = vadd.f32 %v7689_v26, %v10163_v44  ;;  %v7692_v58 = vadd.f32 %v7691_v48, %v7690_v30 }
0x1103   :  { %v10411_v28 = vadd.f32 %v7359_v34, %v3435_v61  ;;  %v3436_v24 = vadd.f32 %v7692_v58, %v10169_v6 }
0x1105   :  { %v10414_v41 = vadd.f32 %v7359_v34, %v3436_v24  ;;  %v3474_v2 = vsel %vm164_vm0, %v10411_v28, 0.0 }
0x1106   :  { %3475 = vadd.xlane.f32.xlu0 %v3474_v2 }
0x1107   :  { %v3477_v62 = vsel %vm164_vm0, %v10414_v41, 0.0 }
0x1108   :  { %3478 = vadd.xlane.f32.xlu1 %v3477_v62  ;;  %v8580_v62 = vld [vmem:[#allocation6 + $0x20] sm:$0xff]  }
0x1109   :  { %8110 = vmatprep.subr.bf16.mxu1 %v8580_v62 }
0x114f   :  { %v3458_v46 = vpop.xlane.xlu0 %3457 }
0x1150   :  { %v3480_v35 = vmul.f32 0.015625, %v3458_v46 }
0x1151   :  { %v3461_v42 = vpop.xlane.xlu1 %3460 }
0x1152   :  { %v10421_v44 = vsub.f32 %v10381_v0, %v3480_v35  ;;  %v3481_v1 = vmul.f32 0.015625, %v3461_v42 }
0x1154   :  { %v10424_v63 = vsub.f32 %v10384_v36, %v3481_v1  ;;  %v3496_v6 = vmul.f32 %v10421_v44, %v10421_v44 }
0x1156   :  { %v3504_v23 = vsel %vm164_vm0, %v3496_v6, 0.0  ;;  %v3497_v47 = vmul.f32 %v10424_v63, %v10424_v63 }
0x1157   :  { %v3464_v15 = vpop.xlane.xlu0 %3463  ;;  %3505 = vadd.xlane.f32.xlu0 %v3504_v23 }
0x1158   :  { %v3482_v9 = vmul.f32 0.015625, %v3464_v15  ;;  %v3507_v37 = vsel %vm164_vm0, %v3497_v47, 0.0 }
0x1159   :  { %3508 = vadd.xlane.f32.xlu1 %v3507_v37  ;;  %v3467_v34 = vpop.xlane.xlu1 %3466 }
0x115a   :  { %v10433_v18 = vsub.f32 %v10391_v32, %v3482_v9  ;;  %v3483_v45 = vmul.f32 0.015625, %v3467_v34 }
0x115c   :  { %v10436_v4 = vsub.f32 %v10394_v55, %v3483_v45  ;;  %v3498_v11 = vmul.f32 %v10433_v18, %v10433_v18 }
0x115e   :  { %v3510_v40 = vsel %vm164_vm0, %v3498_v11, 0.0  ;;  %v3499_v8 = vmul.f32 %v10436_v4, %v10436_v4 }
0x115f   :  { %3511 = vadd.xlane.f32.xlu0 %v3510_v40  ;;  %v10484_v40 = vld [vmem:[%s11487_s1 + $0x1] ss:$0 sm:$0xff] }
0x1160   :  { %v3513_v33 = vsel %vm164_vm0, %v3499_v8, 0.0 }
0x1161   :  { %3514 = vadd.xlane.f32.xlu1 %v3513_v33 }
0x118b   :  { %v3470_v21 = vpop.xlane.xlu0 %3469 }
0x118c   :  { %v3484_v16 = vmul.f32 0.015625, %v3470_v21 }
0x118d   :  { %v3473_v50 = vpop.xlane.xlu1 %3472 }
0x118e   :  { %v10458_v60 = vsub.f32 %v10401_v27, %v3484_v16  ;;  %v3485_v59 = vmul.f32 0.015625, %v3473_v50 }
0x1190   :  { %v10461_v13 = vsub.f32 %v10404_v31, %v3485_v59  ;;  %v3500_v5 = vmul.f32 %v10458_v60, %v10458_v60 }
0x1192   :  { %v3516_v14 = vsel %vm164_vm0, %v3500_v5, 0.0  ;;  %v3501_v3 = vmul.f32 %v10461_v13, %v10461_v13 }
0x1193   :  { %3517 = vadd.xlane.f32.xlu0 %v3516_v14  ;;  %v3476_v7 = vpop.xlane.xlu0 %3475 }
0x1194   :  { %v3486_v25 = vmul.f32 0.015625, %v3476_v7  ;;  %v3519_v10 = vsel %vm164_vm0, %v3501_v3, 0.0  ;;  %v8581_v3 = vld [vmem:[#allocation6 + $0x28] sm:$0xff]  }
0x1195   :  { %3520 = vadd.xlane.f32.xlu1 %v3519_v10  ;;  %v3479_v26 = vpop.xlane.xlu1 %3478 }
0x1196   :  { %v10470_v30 = vsub.f32 %v10411_v28, %v3486_v25  ;;  %v3487_v39 = vmul.f32 0.015625, %v3479_v26 }
0x1198   :  { %v10473_v48 = vsub.f32 %v10414_v41, %v3487_v39  ;;  %v3502_v61 = vmul.f32 %v10470_v30, %v10470_v30 }
0x119a   :  { %v3522_v58 = vsel %vm164_vm0, %v3502_v61, 0.0  ;;  %v3503_v24 = vmul.f32 %v10473_v48, %v10473_v48 }
0x119b   :  { %3523 = vadd.xlane.f32.xlu0 %v3522_v58 }
0x119c   :  { %v3525_v2 = vsel %vm164_vm0, %v3503_v24, 0.0 }
0x119d   :  { %3526 = vadd.xlane.f32.xlu1 %v3525_v2 }
0x11e4   :  { %v3506_v46 = vpop.xlane.xlu0 %3505 }
0x11e5   :  { %v3528_v35 = vmul.f32 0.015625, %v3506_v46 }
0x11e6   :  { %v3509_v42 = vpop.xlane.xlu1 %3508 }
0x11e7   :  { %v3536_v1 = vadd.f32 1e-05, %v3528_v35  ;;  %v3529_v6 = vmul.f32 0.015625, %v3509_v42 }
0x11e9   :  { %8864 = vrsqrt.f32 %v3536_v1  ;;  %v3537_v23 = vadd.f32 1e-05, %v3529_v6 }
0x11eb   :  { %8866 = vrsqrt.f32 %v3537_v23 }
0x11ec   :  { %v3512_v47 = vpop.xlane.xlu0 %3511 }
0x11ed   :  { %v3530_v15 = vmul.f32 0.015625, %v3512_v47 }
0x11ee   :  { %v3515_v9 = vpop.xlane.xlu1 %3514 }
0x11ef   :  { %v3538_v37 = vadd.f32 1e-05, %v3530_v15  ;;  %v3531_v34 = vmul.f32 0.015625, %v3515_v9 }
0x11f1   :  { %8868 = vrsqrt.f32 %v3538_v37  ;;  %v3539_v45 = vadd.f32 1e-05, %v3531_v34 }
0x11f3   :  { %v8865_v11 = vpop.eup %8864  ;;  %8870 = vrsqrt.f32 %v3539_v45 }
0x11f4   :  { %v3552_v8 = vmul.f32 %v8865_v11, %v10421_v44 }
0x11f5   :  { %v8867_v33 = vpop.eup %8866 }
0x11f6   :  { %v3553_v56 = vmul.f32 %v8867_v33, %v10424_v63  ;;  %v3566_v51 = vmul.f32 %v10484_v40, %v3552_v8 }
0x11f8   :  { %v3567_v38 = vmul.f32 %v10484_v40, %v3553_v56  ;;  %v3580_v43 = vadd.f32 %v10492_v19, %v3566_v51 }
0x11fa   :  { %v3581_v49 = vadd.f32 %v10492_v19, %v3567_v38 }
0x11fb   :  { %v8869_v17 = vpop.eup %8868 }
0x11fc   :  { %v3554_v20 = vmul.f32 %v8869_v17, %v10433_v18  ;;  %v3588_v44 = vpack.c.bf16 %v3581_v49, %v3580_v43  ;;  %v8582_v18 = vld [vmem:[#allocation6 + $0x30] sm:$0xff]  }
0x11fd   :  { %v8871_v21 = vpop.eup %8870 }
0x11fe   :  { %v3568_v63 = vmul.f32 %v10484_v40, %v3554_v20  ;;  %v3555_v16 = vmul.f32 %v8871_v21, %v10436_v4  ;;  %8102 = vmatprep.mubr.msk.bf16.mxu1 %vm164_vm0, %v3588_v44  ;;  %8134 = vmatprep.mubr.msk.bf16.mxu0 %vm164_vm0, %v3588_v44  ;;  %v8583_v4 = vld [vmem:[#allocation6 + $0x38] sm:$0xff]  }
0x1200   :  { %v3569_v50 = vmul.f32 %v10484_v40, %v3555_v16  ;;  %v3582_v59 = vadd.f32 %v10492_v19, %v3568_v63 }
0x1202   :  { %v3583_v5 = vadd.f32 %v10492_v19, %v3569_v50 }
0x1204   :  { %v3589_v14 = vpack.c.bf16 %v3583_v5, %v3582_v59 }
0x1206   :  { %8103 = vmatmul.mubr.msk.bf16.vlgmr.msra.gmra.mrb[92].mxu1 %vm164_vm0, %v3589_v14  ;;  %8135 = vmatmul.mubr.msk.bf16.vlgmr.msra.gmra.mrb[100].mxu0 %vm164_vm0, %v3589_v14 }
0x1207   :  { %8111 = vmatpush3.bf16.msra.mxu1 %v8580_v62 }
0x1208   :  { %8112 = vmatprep.subr.bf16.mxu1 %v8581_v3 }
0x120b   :  { %8113 = vmatpush3.bf16.msra.mxu1 %v8581_v3 }
0x120c   :  { %8114 = vmatprep.subr.bf16.mxu1 %v8582_v18 }
0x120f   :  { %8115 = vmatpush3.bf16.msra.mxu1 %v8582_v18 }
0x1210   :  { %8116 = vmatprep.subr.bf16.mxu1 %v8583_v4 }
0x1213   :  { %8117 = vmatpush3.bf16.msra.mxu1 %v8583_v4 }
0x1214   :  { %8142 = vmatprep.subr.bf16.mxu1 %v11493_v12 }
0x1220   :  { %v3518_v7 = vpop.xlane.xlu0 %3517 }
0x1221   :  { %v3532_v25 = vmul.f32 0.015625, %v3518_v7 }
0x1222   :  { %v3521_v10 = vpop.xlane.xlu1 %3520 }
0x1223   :  { %v3540_v26 = vadd.f32 1e-05, %v3532_v25  ;;  %v3533_v39 = vmul.f32 0.015625, %v3521_v10 }
0x1225   :  { %8872 = vrsqrt.f32 %v3540_v26  ;;  %v3541_v61 = vadd.f32 1e-05, %v3533_v39 }
0x1227   :  { %8874 = vrsqrt.f32 %v3541_v61 }
0x1228   :  { %v3524_v58 = vpop.xlane.xlu0 %3523 }
0x1229   :  { %v3534_v24 = vmul.f32 0.015625, %v3524_v58 }
0x122a   :  { %v3527_v2 = vpop.xlane.xlu1 %3526 }
0x122b   :  { %v3542_v62 = vadd.f32 1e-05, %v3534_v24  ;;  %v3535_v46 = vmul.f32 0.015625, %v3527_v2 }
0x122d   :  { %8876 = vrsqrt.f32 %v3542_v62  ;;  %v3543_v35 = vadd.f32 1e-05, %v3535_v46 }
0x122f   :  { %v8873_v42 = vpop.eup %8872  ;;  %8878 = vrsqrt.f32 %v3543_v35 }
0x1230   :  { %v3556_v1 = vmul.f32 %v8873_v42, %v10458_v60 }
0x1231   :  { %v8875_v6 = vpop.eup %8874 }
0x1232   :  { %v3557_v23 = vmul.f32 %v8875_v6, %v10461_v13  ;;  %v3570_v47 = vmul.f32 %v10484_v40, %v3556_v1 }
0x1234   :  { %v3571_v15 = vmul.f32 %v10484_v40, %v3557_v23  ;;  %v3584_v9 = vadd.f32 %v10492_v19, %v3570_v47 }
0x1236   :  { %v3585_v37 = vadd.f32 %v10492_v19, %v3571_v15 }
0x1237   :  { %v8877_v34 = vpop.eup %8876 }
0x1238   :  { %v3590_v45 = vpack.c.bf16 %v3585_v37, %v3584_v9  ;;  %v3558_v11 = vmul.f32 %v8877_v34, %v10470_v30 }
0x1239   :  { %v8879_v8 = vpop.eup %8878 }
0x123a   :  { %8106 = vmatprep.mubr.msk.bf16.mxu1 %vm164_vm0, %v3590_v45  ;;  %8138 = vmatprep.mubr.msk.bf16.mxu0 %vm164_vm0, %v3590_v45  ;;  %v3559_v60 = vmul.f32 %v8879_v8, %v10473_v48  ;;  %v3572_v13 = vmul.f32 %v10484_v40, %v3558_v11  ;;  %v7373_v48 = vld [vmem:[%s11489_s7 + $0x1] ss:$0 sm:$0xff] }
0x123c   :  { %v3573_v33 = vmul.f32 %v10484_v40, %v3559_v60  ;;  %v3586_v56 = vadd.f32 %v10492_v19, %v3572_v13  ;;  %v7383_v60 = vld [vmem:[%s11490_s28 + $0x1] ss:$0 sm:$0xff]  ;;  %s11505_s28 = smov 32  }
0x123e   :  { %v3587_v51 = vadd.f32 %v10492_v19, %v3573_v33  ;;  %v7393_v19 = vld [vmem:[%s11427_s10 + $0x1] ss:$0 sm:$0xff] }
0x1240   :  { %v3591_v38 = vpack.c.bf16 %v3587_v51, %v3586_v56 }
0x1242   :  { %8107 = vmatmul.mubr.msk.bf16.gmra.mrb[96].mxu1 %vm164_vm0, %v3591_v38  ;;  %8139 = vmatmul.mubr.msk.bf16.gmra.mrb[104].mxu0 %vm164_vm0, %v3591_v38 }
0x1243   :  { %8118 = vmatprep.mubr.msk.bf16.mxu1 %vm164_vm0, %v3588_v44  ;;  %8156 = vmatprep.mubr.msk.bf16.mxu0 %vm9221_vm1, %v11493_v12 }
0x124a   :  { %8119 = vmatmul.mubr.msk.bf16.vlgmr.msra.gmra.mrb[100].mxu1 %vm164_vm0, %v3589_v14 }
0x124b   :  { %8122 = vmatprep.mubr.msk.bf16.mxu1 %vm164_vm0, %v3590_v45 }
0x1252   :  { %8123 = vmatmul.mubr.msk.bf16.gmra.mrb[104].mxu1 %vm164_vm0, %v3591_v38 }
0x1253   :  { %8144 = vmatprep.mubr.msk.bf16.mxu1 %vm9221_vm1, %v11493_v12 }
0x12d9   :  { %v8104_v30 = vpop.f32.mrb[92].mxu1  ;;  %v8136_v40 = vpop.f32.mrb[100].mxu0 }
0x12da   :  { %v3679_v43 = vpop.f32.mrb[93].mxu1  ;;  %v3891_v49 = vpop.f32.mrb[101].mxu0  ;;  %v3688_v44 = vadd.f32 %v8104_v30, %v7373_v48  ;;  %v3900_v21 = vadd.f32 %v8136_v40, %v7393_v19 }
0x12db   :  { %v8105_v17 = vpop.f32.mrb[94].mxu1  ;;  %v8137_v20 = vpop.f32.mrb[102].mxu0  ;;  %v3680_v5 = vadd.f32 %v7373_v48, %v3679_v43  ;;  %v3892_v14 = vadd.f32 %v7393_v19, %v3891_v49 }
0x12dc   :  { %v3691_v63 = vadd.f32 %v8105_v17, %v7373_v48  ;;  %v3903_v16 = vadd.f32 %v8137_v20, %v7393_v19  ;;  %v3682_v50 = vpop.f32.mrb[95].mxu1  ;;  %v3894_v59 = vpop.f32.mrb[103].mxu0 }
0x12dd   :  { %v3683_v3 = vadd.f32 %v7373_v48, %v3682_v50  ;;  %v3895_v18 = vadd.f32 %v7393_v19, %v3894_v59 }
0x12de   :  { %v10538_v4 = vpack.c.bf16 %v3691_v63, %v3688_v44  ;;  %v10540_v7 = vpack.c.bf16 %v3903_v16, %v3900_v21 }
0x12df   :  { %v10542_v25 = vpack.c.bf16 %v3683_v3, %v3680_v5  ;;  %v10544_v10 = vpack.c.bf16 %v3895_v18, %v3892_v14 }
0x1315   :  { %v8108_v26 = vpop.f32.mrb[96].mxu1  ;;  %v8140_v39 = vpop.f32.mrb[104].mxu0 }
0x1316   :  { %v3916_v61 = vadd.f32 %v8140_v39, %v7393_v19  ;;  %v3695_v58 = vpop.f32.mrb[97].mxu1  ;;  %v3907_v24 = vpop.f32.mrb[105].mxu0  ;;  %v3704_v35 = vadd.f32 %v8108_v26, %v7373_v48 }
0x1317   :  { %v3908_v2 = vadd.f32 %v7393_v19, %v3907_v24  ;;  %v8109_v62 = vpop.f32.mrb[98].mxu1  ;;  %v8141_v46 = vpop.f32.mrb[106].mxu0  ;;  %v3696_v47 = vadd.f32 %v7373_v48, %v3695_v58 }
0x1318   :  { %v3707_v42 = vadd.f32 %v8109_v62, %v7373_v48  ;;  %v3919_v1 = vadd.f32 %v8141_v46, %v7393_v19  ;;  %v3698_v6 = vpop.f32.mrb[99].mxu1  ;;  %v3910_v23 = vpop.f32.mrb[107].mxu0 }
0x1319   :  { %v3699_v15 = vadd.f32 %v7373_v48, %v3698_v6  ;;  %v3911_v9 = vadd.f32 %v7393_v19, %v3910_v23 }
0x131a   :  { %v10546_v37 = vpack.c.bf16 %v3707_v42, %v3704_v35  ;;  %v10548_v34 = vpack.c.bf16 %v3919_v1, %v3916_v61 }
0x131b   :  { %v10550_v45 = vpack.c.bf16 %v3699_v15, %v3696_v47  ;;  %v10552_v11 = vpack.c.bf16 %v3911_v9, %v3908_v2 }
0x131d   :  { %v8120_v8 = vpop.f32.mrb[100].mxu1 }
0x131e   :  { %v3785_v13 = vpop.f32.mrb[101].mxu1  ;;  %v3794_v56 = vadd.f32 %v8120_v8, %v7383_v60 }
0x131f   :  { %v8121_v33 = vpop.f32.mrb[102].mxu1  ;;  %v3786_v30 = vadd.f32 %v7383_v60, %v3785_v13 }
0x1320   :  { %v3797_v51 = vadd.f32 %v8121_v33, %v7383_v60  ;;  %v3788_v38 = vpop.f32.mrb[103].mxu1 }
0x1321   :  { %v3789_v48 = vadd.f32 %v7383_v60, %v3788_v38 }
0x1322   :  { %v10557_v40 = vpack.c.bf16 %v3797_v51, %v3794_v56 }
0x1323   :  { %v10559_v19 = vpack.c.bf16 %v3789_v48, %v3786_v30 }
0x1324   :  { %v3985_v14 = vsel %vm638_vm2, %v10557_v40, 0 }
0x1325   :  { %v8124_v43 = vpop.f32.mrb[104].mxu1  ;;  %v3938_v49 = vsel %vm638_vm2, %v10559_v19, 0 }
0x1326   :  { %v3801_v17 = vpop.f32.mrb[105].mxu1  ;;  %8143 = vmatpush3.bf16.xpose.msra.mxu1 %v3938_v49  ;;  %v3810_v44 = vadd.f32 %v8124_v43, %v7383_v60 }
0x1327   :  { %v8125_v20 = vpop.f32.mrb[106].mxu1  ;;  %8148 = vmatprep.subr.bf16.mxu1 %v11493_v12  ;;  %v3802_v16 = vadd.f32 %v7383_v60, %v3801_v17 }
0x1328   :  { %v3813_v21 = vadd.f32 %v8125_v20, %v7383_v60  ;;  %v3804_v63 = vpop.f32.mrb[107].mxu1 }
0x1329   :  { %v3805_v50 = vadd.f32 %v7383_v60, %v3804_v63 }
0x132a   :  { %v10564_v59 = vpack.c.bf16 %v3813_v21, %v3810_v44 }
0x132b   :  { %v10566_v5 = vpack.c.bf16 %v3805_v50, %v3802_v16 }
0x132c   :  { %v4079_v18 = vsel %vm638_vm2, %v10564_v59, 0 }
0x132d   :  { %8145 = vmatmul.mubr.msk.bf16.vlgmr.msra.gmra.mrb[108].mxu1 %vm638_vm2, %v10542_v25  ;;  %v4032_v3 = vsel %vm638_vm2, %v10566_v5, 0 }
0x132e   :  { %8149 = vmatpush3.bf16.xpose.msra.mxu1 %v3985_v14  ;;  %8155 = vmatpush3.bf16.xpose.msra.mxu0 %v4032_v3 }
0x132f   :  { %8150 = vmatprep.mubr.msk.bf16.mxu1 %vm9221_vm1, %v11493_v12  ;;  %8160 = vmatprep.subr.bf16.mxu1 %v11493_v12 }
0x1330   :  { %8166 = vmatprep.subr.bf16.mxu0 %v11493_v12 }
0x1335   :  { %8151 = vmatmul.mubr.msk.bf16.vlgmr.msra.gmra.mrb[112].mxu1 %vm638_vm2, %v10538_v4  ;;  %8157 = vmatmul.mubr.msk.bf16.vlgmr.msra.gmra.mrb[108].mxu0 %vm638_vm2, %v10550_v45 }
0x1336   :  { %8161 = vmatpush3.bf16.xpose.msra.mxu1 %v4079_v18  ;;  %8167 = vmatpush3.bf16.msra.mxu0 %v10544_v10 }
0x1337   :  { %8162 = vmatprep.mubr.msk.bf16.mxu1 %vm9221_vm1, %v11493_v12  ;;  %8172 = vmatprep.subr.bf16.mxu1 %v11493_v12 }
0x1338   :  { %8168 = vmatprep.mubr.msk.bf16.mxu0 %vm9221_vm1, %v11493_v12  ;;  %8178 = vmatprep.subr.bf16.mxu0 %v11493_v12 }
0x133d   :  { %8163 = vmatmul.mubr.msk.bf16.vlgmr.msra.gmra.mrb[116].mxu1 %vm638_vm2, %v10546_v37 }
0x133e   :  { %8173 = vmatpush3.bf16.msra.mxu1 %v10540_v7  ;;  %8174 = vmatprep.mubr.msk.bf16.mxu1 %vm9221_vm1, %v11493_v12 }
0x133f   :  { %8184 = vmatprep.subr.bf16.mxu1 %v11493_v12 }
0x1400   :  { %v3974_v26 = vpop.f32.mrb[108].mxu1 }
0x1401   :  { %v3975_v39 = vadd.f32 %v3974_v26, %v9648_v52  ;;  %v8146_v61 = vpop.f32.mrb[109].mxu1 }
0x1402   :  { %v3977_v58 = vpop.f32.mrb[110].mxu1 }
0x1403   :  { %v3978_v24 = vadd.f32 %v3977_v58, %v9650_v57  ;;  %v8147_v2 = vpop.f32.mrb[111].mxu1  ;;  %v4122_v62 = vsel %vm638_vm2, %v3975_v39, -inf }
0x1404   :  { %4123 = vmax.xlane.f32.xlu0 %v4122_v62 }
0x1405   :  { %v4125_v46 = vsel %vm638_vm2, %v3978_v24, -inf }
0x1406   :  { %4126 = vmax.xlane.f32.xlu1 %v4125_v46 }
0x1408   :  { %v4021_v35 = vpop.f32.mrb[112].mxu1  ;;  %v4068_v42 = vpop.f32.mrb[108].mxu0 }
0x1409   :  { %v4022_v1 = vadd.f32 %v4021_v35, %v9648_v52  ;;  %v8152_v6 = vpop.f32.mrb[113].mxu1  ;;  %v8158_v23 = vpop.f32.mrb[109].mxu0  ;;  %v4069_v9 = vadd.f32 %v4068_v42, %v9648_v52 }
0x140a   :  { %v4024_v47 = vpop.f32.mrb[114].mxu1  ;;  %v4071_v15 = vpop.f32.mrb[110].mxu0 }
0x140b   :  { %v4025_v8 = vadd.f32 %v4024_v47, %v9650_v57  ;;  %v8153_v60 = vpop.f32.mrb[115].mxu1  ;;  %v8159_v13 = vpop.f32.mrb[111].mxu0  ;;  %v4128_v33 = vsel %vm638_vm2, %v4022_v1, -inf  ;;  %v4072_v56 = vadd.f32 %v4071_v15, %v9650_v57  ;;  %v4134_v38 = vsel %vm638_vm2, %v4069_v9, -inf }
0x140c   :  { %4129 = vmax.xlane.f32.xlu0 %v4128_v33 }
0x140d   :  { %v4131_v51 = vsel %vm638_vm2, %v4025_v8, -inf  ;;  %v4137_v49 = vsel %vm638_vm2, %v4072_v56, -inf }
0x140e   :  { %4132 = vmax.xlane.f32.xlu1 %v4131_v51 }
0x1410   :  { %v4115_v30 = vpop.f32.mrb[116].mxu1  ;;  %4135 = vmax.xlane.f32.xlu0 %v4134_v38 }
0x1411   :  { %v4116_v48 = vadd.f32 %v4115_v30, %v9648_v52  ;;  %v8164_v43 = vpop.f32.mrb[117].mxu1 }
0x1412   :  { %v4118_v17 = vpop.f32.mrb[118].mxu1  ;;  %4138 = vmax.xlane.f32.xlu1 %v4137_v49 }
0x1413   :  { %v4119_v20 = vadd.f32 %v4118_v17, %v9650_v57  ;;  %v8165_v44 = vpop.f32.mrb[119].mxu1  ;;  %v4140_v21 = vsel %vm638_vm2, %v4116_v48, -inf }
0x1414   :  { %4141 = vmax.xlane.f32.xlu0 %v4140_v21 }
0x1415   :  { %v4143_v63 = vsel %vm638_vm2, %v4119_v20, -inf }
0x1416   :  { %4144 = vmax.xlane.f32.xlu1 %v4143_v63 }
0x1491   :  { %v4124_v16 = vpop.xlane.xlu0 %4123 }
0x1492   :  { %v4146_v50 = vsub.f32 %v3975_v39, %v4124_v16 }
0x1493   :  { %v4127_v14 = vpop.xlane.xlu1 %4126 }
0x1494   :  { %v4154_v3 = vmul.f32 1.442695, %v4146_v50  ;;  %v4147_v18 = vsub.f32 %v3978_v24, %v4127_v14 }
0x1496   :  { %8880 = vpow2.f32 %v4154_v3  ;;  %v4156_v26 = vmul.f32 1.442695, %v4147_v18 }
0x1498   :  { %8882 = vpow2.f32 %v4156_v26 }
0x1499   :  { %v4130_v61 = vpop.xlane.xlu0 %4129 }
0x149a   :  { %v4148_v58 = vsub.f32 %v4022_v1, %v4130_v61 }
0x149b   :  { %v4133_v2 = vpop.xlane.xlu1 %4132 }
0x149c   :  { %v4158_v62 = vmul.f32 1.442695, %v4148_v58  ;;  %v4149_v46 = vsub.f32 %v4025_v8, %v4133_v2 }
0x149d   :  { %v4136_v35 = vpop.xlane.xlu0 %4135 }
0x149e   :  { %8884 = vpow2.f32 %v4158_v62  ;;  %v4160_v42 = vmul.f32 1.442695, %v4149_v46  ;;  %v4150_v6 = vsub.f32 %v4069_v9, %v4136_v35 }
0x149f   :  { %v4139_v23 = vpop.xlane.xlu1 %4138 }
0x14a0   :  { %v8881_v47 = vpop.eup %8880  ;;  %8886 = vpow2.f32 %v4160_v42  ;;  %v4162_v15 = vmul.f32 1.442695, %v4150_v6  ;;  %v4151_v39 = vsub.f32 %v4072_v56, %v4139_v23 }
0x14a1   :  { %v4142_v60 = vpop.xlane.xlu0 %4141  ;;  %v4170_v24 = vsel %vm638_vm2, %v8881_v47, 0.0 }
0x14a2   :  { %v8883_v13 = vpop.eup %8882  ;;  %8888 = vpow2.f32 %v4162_v15  ;;  %v4164_v33 = vmul.f32 1.442695, %v4151_v39  ;;  %v4152_v51 = vsub.f32 %v4116_v48, %v4142_v60  ;;  %4171 = vadd.xlane.f32.xlu0 %v4170_v24 }
0x14a3   :  { %v4173_v1 = vsel %vm638_vm2, %v8883_v13, 0.0  ;;  %v4145_v63 = vpop.xlane.xlu1 %4144 }
0x14a4   :  { %8890 = vpow2.f32 %v4164_v33  ;;  %v4166_v8 = vmul.f32 1.442695, %v4152_v51  ;;  %4174 = vadd.xlane.f32.xlu1 %v4173_v1  ;;  %v4153_v16 = vsub.f32 %v4119_v20, %v4145_v63 }
0x14a6   :  { %8892 = vpow2.f32 %v4166_v8  ;;  %v4168_v50 = vmul.f32 1.442695, %v4153_v16 }
0x14a8   :  { %v8885_v9 = vpop.eup %8884  ;;  %8894 = vpow2.f32 %v4168_v50 }
0x14a9   :  { %v4176_v38 = vsel %vm638_vm2, %v8885_v9, 0.0 }
0x14aa   :  { %v8887_v30 = vpop.eup %8886  ;;  %4177 = vadd.xlane.f32.xlu0 %v4176_v38 }
0x14ab   :  { %v4179_v56 = vsel %vm638_vm2, %v8887_v30, 0.0 }
0x14ac   :  { %v8889_v43 = vpop.eup %8888  ;;  %4180 = vadd.xlane.f32.xlu1 %v4179_v56 }
0x14ad   :  { %v4182_v49 = vsel %vm638_vm2, %v8889_v43, 0.0 }
0x14ae   :  { %v8891_v17 = vpop.eup %8890  ;;  %4183 = vadd.xlane.f32.xlu0 %v4182_v49 }
0x14af   :  { %v4185_v48 = vsel %vm638_vm2, %v8891_v17, 0.0 }
0x14b0   :  { %v10619_v44 = vpop.eup %8892  ;;  %4186 = vadd.xlane.f32.xlu1 %v4185_v48 }
0x14b1   :  { %v4188_v21 = vsel %vm638_vm2, %v10619_v44, 0.0 }
0x14b2   :  { %4189 = vadd.xlane.f32.xlu0 %v4188_v21  ;;  %v10633_v14 = vpop.eup %8894 }
0x14b3   :  { %v4191_v3 = vsel %vm638_vm2, %v10633_v14, 0.0 }
0x14c1   :  { %4447 = vrot.lane.b32.xlu1 %v10557_v40, %s9223_s6 }
0x14c5   :  { %4391 = vrot.lane.b32.xlu1 %v10542_v25, %s9223_s6 }
0x14c8   :  { %4394 = vrot.lane.b32.xlu0 %v10559_v19, %s9223_s6 }
0x14cc   :  { %4444 = vrot.lane.b32.xlu0 %v10538_v4, %s9223_s6 }
0x14d0   :  { %4497 = vrot.lane.b32.xlu0 %v10550_v45, %s9223_s6 }
0x14e9   :  { %4192 = vadd.xlane.f32.xlu1 %v4191_v3 }
0x14fa   :  { %4500 = vrot.lane.b32.xlu1 %v10566_v5, %s9223_s6 }
0x14fe   :  { %4553 = vrot.lane.b32.xlu1 %v10564_v59, %s9223_s6 }
0x1502   :  { %4550 = vrot.lane.b32.xlu1 %v10546_v37, %s9223_s6 }
0x152f   :  { %v4172_v18 = vpop.xlane.xlu0 %4171 }
0x1530   :  { %8896 = vrcp.f32 %v4172_v18 }
0x1531   :  { %v4175_v20 = vpop.xlane.xlu1 %4174 }
0x1532   :  { %8898 = vrcp.f32 %v4175_v20 }
0x1537   :  { %v4178_v26 = vpop.xlane.xlu0 %4177 }
0x1538   :  { %8900 = vrcp.f32 %v4178_v26 }
0x1539   :  { %v4181_v61 = vpop.xlane.xlu1 %4180 }
0x153a   :  { %v8897_v58 = vpop.eup %8896  ;;  %8902 = vrcp.f32 %v4181_v61 }
0x153b   :  { %v4184_v2 = vpop.xlane.xlu0 %4183  ;;  %v4202_v46 = vmul.f32 %v8897_v58, %v8881_v47 }
0x153c   :  { %v8899_v62 = vpop.eup %8898  ;;  %8904 = vrcp.f32 %v4184_v2 }
0x153d   :  { %v4203_v35 = vmul.f32 %v8899_v62, %v8883_v13  ;;  %v4187_v42 = vpop.xlane.xlu1 %4186 }
0x153e   :  { %8906 = vrcp.f32 %v4187_v42 }
0x153f   :  { %v4210_v6 = vpack.c.bf16 %v4203_v35, %v4202_v46  ;;  %v4190_v39 = vpop.xlane.xlu0 %4189 }
0x1540   :  { %8908 = vrcp.f32 %v4190_v39 }
0x1541   :  { %8169 = vmatmul.mubr.msk.bf16.vlgmr.msra.gmra.mrb[112].mxu0 %vm638_vm2, %v4210_v6 }
0x1542   :  { %v8901_v23 = vpop.eup %8900  ;;  %8179 = vmatpush3.bf16.msra.mxu0 %v10552_v11  ;;  %8180 = vmatprep.mubr.msk.bf16.mxu0 %vm9221_vm1, %v11493_v12 }
0x1543   :  { %8190 = vmatprep.subr.bf16.mxu0 %v11493_v12  ;;  %v4204_v60 = vmul.f32 %v8901_v23, %v8885_v9  ;;  %v4395_v8 = vpop.permute.xlu0 %4394  ;;  %v4448_v9 = vpop.permute.xlu1 %4447 }
0x1544   :  { %v8903_v15 = vpop.eup %8902  ;;  %v4400_v56 = vsel %vm638_vm2, %v4395_v8, 0  ;;  %v4453_v20 = vsel %vm638_vm2, %v4448_v9, 0 }
0x1545   :  { %v4205_v24 = vmul.f32 %v8903_v15, %v8887_v30 }
0x1546   :  { %v8905_v33 = vpop.eup %8904 }
0x1547   :  { %v4211_v47 = vpack.c.bf16 %v4205_v24, %v4204_v60  ;;  %v4206_v51 = vmul.f32 %v8905_v33, %v8889_v43  ;;  %v4392_v30 = vpop.permute.xlu1 %4391  ;;  %v4445_v48 = vpop.permute.xlu0 %4444 }
0x1548   :  { %v8907_v13 = vpop.eup %8906 }
0x1549   :  { %v4207_v1 = vmul.f32 %v8907_v13, %v8891_v17  ;;  %8175 = vmatmul.mubr.msk.bf16.vlgmr.msra.gmra.mrb[120].mxu1 %vm638_vm2, %v4211_v47 }
0x154a   :  { %8185 = vmatpush3.bf16.msra.mxu1 %v10548_v34  ;;  %8186 = vmatprep.mubr.msk.bf16.mxu1 %vm9221_vm1, %v11493_v12  ;;  %v8909_v21 = vpop.eup %8908 }
0x154b   :  { %v4212_v38 = vpack.c.bf16 %v4207_v1, %v4206_v51  ;;  %8196 = vmatprep.subr.bf16.mxu1 %v11493_v12  ;;  %v4208_v16 = vmul.f32 %v8909_v21, %v10619_v44  ;;  %v4498_v50 = vpop.permute.xlu0 %4497 }
0x154d   :  { %8181 = vmatmul.mubr.msk.bf16.vlgmr.msra.gmra.mrb[116].mxu0 %vm638_vm2, %v4212_v38 }
0x154e   :  { %8191 = vmatpush3.bf16.xpose.msra.mxu0 %v4400_v56  ;;  %8192 = vmatprep.mubr.msk.bf16.mxu0 %vm9221_vm1, %v11493_v12 }
0x154f   :  { %8202 = vmatprep.subr.bf16.mxu0 %v11493_v12 }
0x1555   :  { %8193 = vmatmul.mubr.msk.bf16.vlgmr.msra.gmra.mrb[120].mxu0 %vm638_vm2, %v4392_v30 }
0x1556   :  { %8204 = vmatprep.mubr.msk.bf16.mxu0 %vm9221_vm1, %v11493_v12 }
0x1576   :  { %v4193_v43 = vpop.xlane.xlu1 %4192 }
0x1577   :  { %8910 = vrcp.f32 %v4193_v43 }
0x157a   :  { %v4501_v49 = vpop.permute.xlu1 %4500 }
0x157b   :  { %v4506_v17 = vsel %vm638_vm2, %v4501_v49, 0 }
0x157c   :  { %8203 = vmatpush3.bf16.xpose.msra.mxu0 %v4506_v17 }
0x157d   :  { %8214 = vmatprep.subr.bf16.mxu0 %v11493_v12 }
0x157e   :  { %v4554_v44 = vpop.permute.xlu1 %4553 }
0x157f   :  { %v4559_v26 = vsel %vm638_vm2, %v4554_v44, 0 }
0x1581   :  { %v8911_v63 = vpop.eup %8910 }
0x1582   :  { %v4209_v3 = vmul.f32 %v8911_v63, %v10633_v14  ;;  %v4551_v14 = vpop.permute.xlu1 %4550 }
0x1583   :  { %8205 = vmatmul.mubr.msk.bf16.vlgmr.msra.gmra.mrb[124].mxu0 %vm638_vm2, %v4498_v50 }
0x1584   :  { %v4213_v18 = vpack.c.bf16 %v4209_v3, %v4208_v16  ;;  %8216 = vmatprep.mubr.msk.bf16.mxu0 %vm9221_vm1, %v11493_v12 }
0x1586   :  { %8187 = vmatmul.mubr.msk.bf16.vlgmr.msra.gmra.mrb[124].mxu1 %vm638_vm2, %v4213_v18 }
0x1587   :  { %8197 = vmatpush3.bf16.xpose.msra.mxu1 %v4453_v20  ;;  %8198 = vmatprep.mubr.msk.bf16.mxu1 %vm9221_vm1, %v11493_v12 }
0x1588   :  { %8208 = vmatprep.subr.bf16.mxu1 %v11493_v12 }
0x158e   :  { %8199 = vmatmul.mubr.msk.bf16.vlgmr.msra.gmra.mrb[128].mxu1 %vm638_vm2, %v4445_v48 }
0x158f   :  { %8209 = vmatpush3.bf16.xpose.msra.mxu1 %v4559_v26  ;;  %8210 = vmatprep.mubr.msk.bf16.mxu1 %vm9221_vm1, %v11493_v12 }
0x1590   :  { %8220 = vmatprep.subr.bf16.mxu1 %v11493_v12 }
0x1596   :  { %8211 = vmatmul.mubr.msk.bf16.vlgmr.msra.gmra.mrb[132].mxu1 %vm638_vm2, %v4551_v14 }
0x1597   :  { %8222 = vmatprep.mubr.msk.bf16.mxu1 %vm9221_vm1, %v11493_v12 }
0x1614   :  { %v10681_v61 = vpop.f32.mrb[112].mxu0 }
0x1615   :  { %v8170_v58 = vpop.f32.mrb[113].mxu0 }
0x1616   :  { %v10683_v2 = vpop.f32.mrb[114].mxu0 }
0x1617   :  { %v8171_v62 = vpop.f32.mrb[115].mxu0 }
0x161c   :  { %v10685_v46 = vpop.f32.mrb[120].mxu1 }
0x161d   :  { %v8176_v35 = vpop.f32.mrb[121].mxu1 }
0x161e   :  { %v10687_v42 = vpop.f32.mrb[122].mxu1 }
0x161f   :  { %v8177_v6 = vpop.f32.mrb[123].mxu1 }
0x1620   :  { %v10689_v23 = vpop.f32.mrb[116].mxu0 }
0x1621   :  { %v8182_v15 = vpop.f32.mrb[117].mxu0 }
0x1622   :  { %v10691_v39 = vpop.f32.mrb[118].mxu0 }
0x1623   :  { %v8183_v60 = vpop.f32.mrb[119].mxu0 }
0x1628   :  { %v4436_v24 = vpop.f32.mrb[120].mxu0 }
0x1629   :  { %v4437_v33 = vadd.f32 %v4436_v24, %v9648_v52  ;;  %v8194_v47 = vpop.f32.mrb[121].mxu0 }
0x162a   :  { %v4439_v13 = vpop.f32.mrb[122].mxu0 }
0x162b   :  { %v4440_v51 = vadd.f32 %v4439_v13, %v9650_v57  ;;  %v8195_v1 = vpop.f32.mrb[123].mxu0  ;;  %v4602_v8 = vsel %vm638_vm2, %v4437_v33, -inf }
0x162c   :  { %4603 = vmax.xlane.f32.xlu0 %v4602_v8 }
0x162d   :  { %v4605_v38 = vsel %vm638_vm2, %v4440_v51, -inf }
0x162e   :  { %4606 = vmax.xlane.f32.xlu1 %v4605_v38 }
0x1656   :  { %v4542_v56 = vpop.f32.mrb[124].mxu0 }
0x1657   :  { %v8206_v9 = vpop.f32.mrb[125].mxu0  ;;  %v4543_v58 = vadd.f32 %v4542_v56, %v9648_v52 }
0x1658   :  { %v4545_v30 = vpop.f32.mrb[126].mxu0 }
0x1659   :  { %v4546_v43 = vadd.f32 %v4545_v30, %v9650_v57  ;;  %v10698_v49 = vpop.f32.mrb[124].mxu1  ;;  %v8207_v17 = vpop.f32.mrb[127].mxu0  ;;  %v4614_v47 = vsel %vm638_vm2, %v4543_v58, -inf }
0x165a   :  { %v8188_v48 = vpop.f32.mrb[125].mxu1 }
0x165b   :  { %v10700_v21 = vpop.f32.mrb[126].mxu1  ;;  %v4617_v63 = vsel %vm638_vm2, %v4546_v43, -inf }
0x165c   :  { %v8189_v16 = vpop.f32.mrb[127].mxu1  ;;  %4618 = vmax.xlane.f32.xlu1 %v4617_v63 }
0x1661   :  { %v4489_v50 = vpop.f32.mrb[128].mxu1 }
0x1662   :  { %v4490_v3 = vadd.f32 %v4489_v50, %v9648_v52  ;;  %v8200_v18 = vpop.f32.mrb[129].mxu1 }
0x1663   :  { %v4492_v20 = vpop.f32.mrb[130].mxu1 }
0x1664   :  { %v4493_v44 = vadd.f32 %v4492_v20, %v9650_v57  ;;  %v8201_v26 = vpop.f32.mrb[131].mxu1  ;;  %v4608_v14 = vsel %vm638_vm2, %v4490_v3, -inf }
0x1665   :  { %4609 = vmax.xlane.f32.xlu0 %v4608_v14 }
0x1666   :  { %v4611_v62 = vsel %vm638_vm2, %v4493_v44, -inf }
0x1669   :  { %v4595_v35 = vpop.f32.mrb[132].mxu1  ;;  %4612 = vmax.xlane.f32.xlu0 %v4611_v62 }
0x166a   :  { %v8212_v6 = vpop.f32.mrb[133].mxu1  ;;  %v4596_v60 = vadd.f32 %v4595_v35, %v9648_v52 }
0x166b   :  { %v4598_v15 = vpop.f32.mrb[134].mxu1 }
0x166c   :  { %v8213_v24 = vpop.f32.mrb[135].mxu1  ;;  %v4620_v13 = vsel %vm638_vm2, %v4596_v60, -inf  ;;  %v10718_v1 = vadd.f32 %v4598_v15, %v9650_v57 }
0x166d   :  { %4615 = vmax.xlane.f32.xlu0 %v4614_v47  ;;  %4743 = vrot.lane.b32.xlu1 %v10540_v7, %s9223_s6 }
0x166e   :  { %v4623_v8 = vsel %vm638_vm2, %v10718_v1, -inf }
0x1671   :  { %4621 = vmax.xlane.f32.xlu0 %v4620_v13  ;;  %4791 = vrot.lane.b32.xlu1 %v10552_v11, %s9223_s6 }
0x1687   :  { %4695 = vrot.lane.b32.xlu0 %v10544_v10, %s9223_s6 }
0x1695   :  { %4624 = vmax.xlane.f32.xlu1 %v4623_v8 }
0x16a6   :  { %4839 = vrot.lane.b32.xlu1 %v10548_v34, %s9223_s6  ;;  %s11508_s6 = smov 48  }
0x16b9   :  { %v4604_v38 = vpop.xlane.xlu0 %4603 }
0x16ba   :  { %v4626_v56 = vsub.f32 %v4437_v33, %v4604_v38 }
0x16bb   :  { %v4607_v9 = vpop.xlane.xlu1 %4606 }
0x16bc   :  { %v4634_v30 = vmul.f32 1.442695, %v4626_v56  ;;  %v4627_v17 = vsub.f32 %v4440_v51, %v4607_v9 }
0x16be   :  { %8912 = vpow2.f32 %v4634_v30  ;;  %v4636_v48 = vmul.f32 1.442695, %v4627_v17 }
0x16c0   :  { %8914 = vpow2.f32 %v4636_v48 }
0x16c8   :  { %v10724_v63 = vpop.eup %8912 }
0x16c9   :  { %v4650_v16 = vsel %vm638_vm2, %v10724_v63, 0.0 }
0x16ca   :  { %v10728_v50 = vpop.eup %8914  ;;  %4651 = vadd.xlane.f32.xlu0 %v4650_v16 }
0x16cb   :  { %v4653_v18 = vsel %vm638_vm2, %v10728_v50, 0.0 }
0x16cc   :  { %4654 = vadd.xlane.f32.xlu1 %v4653_v18 }
0x16e9   :  { %v4619_v20 = vpop.xlane.xlu1 %4618 }
0x16ea   :  { %v4631_v14 = vsub.f32 %v4546_v43, %v4619_v20 }
0x16ec   :  { %v4644_v15 = vmul.f32 1.442695, %v4631_v14 }
0x16ed   :  { %v4744_v33 = vpop.permute.xlu1 %4743 }
0x16ee   :  { %8221 = vmatpush3.bf16.msra.mxu1 %v4744_v33 }
0x16ef   :  { %8232 = vmatprep.subr.bf16.mxu1 %v11493_v12 }
0x16f1   :  { %v4792_v33 = vpop.permute.xlu1 %4791 }
0x16f2   :  { %v4610_v51 = vpop.xlane.xlu0 %4609 }
0x16f3   :  { %v4628_v26 = vsub.f32 %v4490_v3, %v4610_v51 }
0x16f5   :  { %v4638_v62 = vmul.f32 1.442695, %v4628_v26 }
0x16f6   :  { %v4613_v35 = vpop.xlane.xlu0 %4612 }
0x16f7   :  { %8916 = vpow2.f32 %v4638_v62  ;;  %v4629_v6 = vsub.f32 %v4493_v44, %v4613_v35 }
0x16f9   :  { %v4640_v24 = vmul.f32 1.442695, %v4629_v6 }
0x16fa   :  { %v4616_v47 = vpop.xlane.xlu0 %4615 }
0x16fb   :  { %8918 = vpow2.f32 %v4640_v24  ;;  %v4630_v13 = vsub.f32 %v4543_v58, %v4616_v47 }
0x16fc   :  { %8920 = vpow2.f32 %v4644_v15 }
0x16fd   :  { %v4642_v8 = vmul.f32 1.442695, %v4630_v13 }
0x16fe   :  { %v4622_v38 = vpop.xlane.xlu0 %4621 }
0x16ff   :  { %8922 = vpow2.f32 %v4642_v8  ;;  %v4632_v56 = vsub.f32 %v4596_v60, %v4622_v38 }
0x1701   :  { %v8917_v9 = vpop.eup %8916  ;;  %v4646_v30 = vmul.f32 1.442695, %v4632_v56 }
0x1702   :  { %v4696_v17 = vpop.permute.xlu0 %4695  ;;  %v4656_v3 = vsel %vm638_vm2, %v8917_v9, 0.0 }
0x1703   :  { %8924 = vpow2.f32 %v4646_v30  ;;  %4657 = vadd.xlane.f32.xlu0 %v4656_v3  ;;  %8215 = vmatpush3.bf16.msra.mxu0 %v4696_v17 }
0x1704   :  { %8226 = vmatprep.subr.bf16.mxu0 %v11493_v12 }
0x1705   :  { %v8919_v43 = vpop.eup %8918 }
0x1706   :  { %v4659_v44 = vsel %vm638_vm2, %v8919_v43, 0.0  ;;  %v8921_v48 = vpop.eup %8920 }
0x1707   :  { %4660 = vadd.xlane.f32.xlu1 %v4659_v44  ;;  %v4665_v60 = vsel %vm638_vm2, %v8921_v48, 0.0 }
0x1709   :  { %v8923_v58 = vpop.eup %8922 }
0x170a   :  { %v4662_v16 = vsel %vm638_vm2, %v8923_v58, 0.0 }
0x170b   :  { %4663 = vadd.xlane.f32.xlu0 %v4662_v16  ;;  %4666 = vadd.xlane.f32.xlu1 %v4665_v60 }
0x170d   :  { %v10738_v18 = vpop.eup %8924 }
0x170e   :  { %v4668_v20 = vsel %vm638_vm2, %v10738_v18, 0.0 }
0x170f   :  { %4669 = vadd.xlane.f32.xlu0 %v4668_v20 }
0x171c   :  { %4939 = vrot.lane.b32.xlu1 %v10557_v40, %s9224_s4 }
0x1722   :  { %v4625_v51 = vpop.xlane.xlu1 %4624 }
0x1723   :  { %v4633_v26 = vsub.f32 %v10718_v1, %v4625_v51 }
0x1725   :  { %4888 = vrot.lane.b32.xlu0 %v10559_v19, %s9224_s4  ;;  %v4648_v14 = vmul.f32 1.442695, %v4633_v26 }
0x1726   :  { %v4840_v6 = vpop.permute.xlu1 %4839 }
0x1727   :  { %8926 = vpow2.f32 %v4648_v14 }
0x1729   :  { %4886 = vrot.lane.b32.xlu0 %v10542_v25, %s9224_s4 }
0x172d   :  { %4937 = vrot.lane.b32.xlu0 %v10538_v4, %s9224_s4 }
0x1731   :  { %4988 = vrot.lane.b32.xlu0 %v10550_v45, %s9224_s4  ;;  %v10753_v62 = vpop.eup %8926 }
0x1732   :  { %v4671_v35 = vsel %vm638_vm2, %v10753_v62, 0.0 }
0x1740   :  { %4672 = vadd.xlane.f32.xlu1 %v4671_v35 }
0x1751   :  { %4990 = vrot.lane.b32.xlu1 %v10566_v5, %s9224_s4 }
0x1755   :  { %5041 = vrot.lane.b32.xlu1 %v10564_v59, %s9224_s4 }
0x1757   :  { %v4652_v1 = vpop.xlane.xlu0 %4651 }
0x1758   :  { %8928 = vrcp.f32 %v4652_v1 }
0x1759   :  { %5039 = vrot.lane.b32.xlu1 %v10546_v37, %s9224_s4  ;;  %v4655_v15 = vpop.xlane.xlu1 %4654 }
0x175a   :  { %8930 = vrcp.f32 %v4655_v15 }
0x1762   :  { %v8929_v24 = vpop.eup %8928 }
0x1763   :  { %v4682_v13 = vmul.f32 %v8929_v24, %v10724_v63 }
0x1764   :  { %v8931_v47 = vpop.eup %8930 }
0x1765   :  { %v4683_v8 = vmul.f32 %v8931_v47, %v10728_v50 }
0x1767   :  { %v4690_v38 = vpack.c.bf16 %v4683_v8, %v4682_v13 }
0x1769   :  { %8217 = vmatmul.mubr.msk.bf16.vlgmr.msra.gmra.mrb[128].mxu0 %vm638_vm2, %v4690_v38 }
0x176a   :  { %8227 = vmatpush3.bf16.msra.mxu0 %v4792_v33  ;;  %8228 = vmatprep.mubr.msk.bf16.mxu0 %vm9221_vm1, %v11493_v12 }
0x176b   :  { %8238 = vmatprep.subr.bf16.mxu0 %v11493_v12 }
0x1790   :  { %v4658_v56 = vpop.xlane.xlu0 %4657 }
0x1791   :  { %8932 = vrcp.f32 %v4658_v56 }
0x1794   :  { %v4661_v30 = vpop.xlane.xlu1 %4660 }
0x1795   :  { %8934 = vrcp.f32 %v4661_v30 }
0x1798   :  { %v4664_v17 = vpop.xlane.xlu0 %4663  ;;  %v4667_v3 = vpop.xlane.xlu1 %4666 }
0x1799   :  { %8936 = vrcp.f32 %v4664_v17 }
0x179a   :  { %8938 = vrcp.f32 %v4667_v3 }
0x179b   :  { %v8933_v63 = vpop.eup %8932 }
0x179c   :  { %v4684_v50 = vmul.f32 %v8933_v63, %v8917_v9  ;;  %v4670_v60 = vpop.xlane.xlu0 %4669 }
0x179d   :  { %8940 = vrcp.f32 %v4670_v60 }
0x179f   :  { %v8935_v44 = vpop.eup %8934 }
0x17a0   :  { %v4685_v16 = vmul.f32 %v8935_v44, %v8919_v43  ;;  %v4889_v35 = vpop.permute.xlu0 %4888  ;;  %v4940_v43 = vpop.permute.xlu1 %4939 }
0x17a1   :  { %v4894_v15 = vsel %vm638_vm2, %v4889_v35, 0  ;;  %v4945_v17 = vsel %vm638_vm2, %v4940_v43, 0 }
0x17a2   :  { %v4691_v20 = vpack.c.bf16 %v4685_v16, %v4684_v50 }
0x17a3   :  { %v8937_v33 = vpop.eup %8936 }
0x17a4   :  { %v8939_v51 = vpop.eup %8938  ;;  %v4686_v26 = vmul.f32 %v8937_v33, %v8923_v58  ;;  %8223 = vmatmul.mubr.msk.bf16.vlgmr.msra.gmra.mrb[136].mxu1 %vm638_vm2, %v4691_v20  ;;  %v4887_v9 = vpop.permute.xlu0 %4886 }
0x17a5   :  { %v4687_v14 = vmul.f32 %v8939_v51, %v8921_v48  ;;  %8233 = vmatpush3.bf16.msra.mxu1 %v4840_v6  ;;  %8234 = vmatprep.mubr.msk.bf16.mxu1 %vm9221_vm1, %v11493_v12 }
0x17a6   :  { %8244 = vmatprep.subr.bf16.mxu1 %v11493_v12 }
0x17a7   :  { %v4692_v1 = vpack.c.bf16 %v4687_v14, %v4686_v26  ;;  %v8941_v47 = vpop.eup %8940 }
0x17a8   :  { %v4938_v24 = vpop.permute.xlu0 %4937  ;;  %v4688_v8 = vmul.f32 %v8941_v47, %v10738_v18 }
0x17a9   :  { %8229 = vmatmul.mubr.msk.bf16.vlgmr.msra.gmra.mrb[132].mxu0 %vm638_vm2, %v4692_v1 }
0x17aa   :  { %8239 = vmatpush3.bf16.xpose.msra.mxu0 %v4894_v15  ;;  %8240 = vmatprep.mubr.msk.bf16.mxu0 %vm9221_vm1, %v11493_v12 }
0x17ab   :  { %8250 = vmatprep.subr.bf16.mxu0 %v11493_v12 }
0x17ac   :  { %v4989_v38 = vpop.permute.xlu0 %4988 }
0x17b1   :  { %8241 = vmatmul.mubr.msk.bf16.vlgmr.msra.gmra.mrb[136].mxu0 %vm638_vm2, %v4887_v9 }
0x17b2   :  { %8252 = vmatprep.mubr.msk.bf16.mxu0 %vm9221_vm1, %v11493_v12 }
0x17cd   :  { %v4673_v48 = vpop.xlane.xlu1 %4672 }
0x17ce   :  { %8942 = vrcp.f32 %v4673_v48 }
0x17d1   :  { %v4991_v58 = vpop.permute.xlu1 %4990 }
0x17d2   :  { %v4996_v6 = vsel %vm638_vm2, %v4991_v58, 0 }
0x17d3   :  { %8251 = vmatpush3.bf16.xpose.msra.mxu0 %v4996_v6 }
0x17d4   :  { %8262 = vmatprep.subr.bf16.mxu0 %v11493_v12 }
0x17d5   :  { %v5042_v18 = vpop.permute.xlu1 %5041 }
0x17d6   :  { %v5047_v3 = vsel %vm638_vm2, %v5042_v18, 0 }
0x17d8   :  { %v8943_v13 = vpop.eup %8942 }
0x17d9   :  { %v4689_v56 = vmul.f32 %v8943_v13, %v10753_v62  ;;  %v5040_v62 = vpop.permute.xlu1 %5039 }
0x17da   :  { %8253 = vmatmul.mubr.msk.bf16.vlgmr.msra.gmra.mrb[140].mxu0 %vm638_vm2, %v4989_v38 }
0x17db   :  { %v4693_v30 = vpack.c.bf16 %v4689_v56, %v4688_v8  ;;  %8264 = vmatprep.mubr.msk.bf16.mxu0 %vm9221_vm1, %v11493_v12 }
0x17dd   :  { %8235 = vmatmul.mubr.msk.bf16.vlgmr.msra.gmra.mrb[140].mxu1 %vm638_vm2, %v4693_v30 }
0x17de   :  { %8245 = vmatpush3.bf16.xpose.msra.mxu1 %v4945_v17  ;;  %8246 = vmatprep.mubr.msk.bf16.mxu1 %vm9221_vm1, %v11493_v12 }
0x17df   :  { %8256 = vmatprep.subr.bf16.mxu1 %v11493_v12 }
0x17e5   :  { %8247 = vmatmul.mubr.msk.bf16.vlgmr.msra.gmra.mrb[144].mxu1 %vm638_vm2, %v4938_v24 }
0x17e6   :  { %8257 = vmatpush3.bf16.xpose.msra.mxu1 %v5047_v3  ;;  %8258 = vmatprep.mubr.msk.bf16.mxu1 %vm9221_vm1, %v11493_v12 }
0x17e7   :  { %8268 = vmatprep.subr.bf16.mxu1 %v11493_v12 }
0x17ed   :  { %8259 = vmatmul.mubr.msk.bf16.vlgmr.msra.gmra.mrb[148].mxu1 %vm638_vm2, %v5040_v62 }
0x17ee   :  { %8270 = vmatprep.mubr.msk.bf16.mxu1 %vm9221_vm1, %v11493_v12 }
0x183c   :  { %v10801_v63 = vpop.f32.mrb[128].mxu0 }
0x183d   :  { %v8218_v44 = vpop.f32.mrb[129].mxu0 }
0x183e   :  { %v10803_v50 = vpop.f32.mrb[130].mxu0 }
0x183f   :  { %v8219_v60 = vpop.f32.mrb[131].mxu0 }
0x1877   :  { %v10807_v20 = vpop.f32.mrb[136].mxu1 }
0x1878   :  { %v8224_v33 = vpop.f32.mrb[137].mxu1 }
0x1879   :  { %v10809_v51 = vpop.f32.mrb[138].mxu1 }
0x187a   :  { %v8225_v14 = vpop.f32.mrb[139].mxu1 }
0x187c   :  { %v10813_v35 = vpop.f32.mrb[132].mxu0 }
0x187d   :  { %v8230_v1 = vpop.f32.mrb[133].mxu0 }
0x187e   :  { %v10815_v15 = vpop.f32.mrb[134].mxu0 }
0x187f   :  { %v8231_v43 = vpop.f32.mrb[135].mxu0 }
0x1884   :  { %v4930_v48 = vpop.f32.mrb[136].mxu0 }
0x1885   :  { %v4931_v58 = vadd.f32 %v4930_v48, %v9648_v52  ;;  %v8242_v6 = vpop.f32.mrb[137].mxu0 }
0x1886   :  { %v4933_v24 = vpop.f32.mrb[138].mxu0 }
0x1887   :  { %v4934_v47 = vadd.f32 %v4933_v24, %v9650_v57  ;;  %v8243_v13 = vpop.f32.mrb[139].mxu0  ;;  %v5090_v8 = vsel %vm638_vm2, %v4931_v58, -inf }
0x1888   :  { %5091 = vmax.xlane.f32.xlu0 %v5090_v8 }
0x1889   :  { %v5093_v38 = vsel %vm638_vm2, %v4934_v47, -inf }
0x188a   :  { %5094 = vmax.xlane.f32.xlu1 %v5093_v38 }
0x18ad   :  { %v5032_v56 = vpop.f32.mrb[140].mxu0 }
0x18ae   :  { %v8254_v30 = vpop.f32.mrb[141].mxu0 }
0x18af   :  { %v5035_v17 = vpop.f32.mrb[142].mxu0  ;;  %v5033_v30 = vadd.f32 %v5032_v56, %v9648_v52 }
0x18b0   :  { %v5036_v18 = vadd.f32 %v5035_v17, %v9650_v57  ;;  %v10824_v3 = vpop.f32.mrb[140].mxu1  ;;  %v8255_v62 = vpop.f32.mrb[143].mxu0 }
0x18b1   :  { %v8236_v44 = vpop.f32.mrb[141].mxu1  ;;  %v5102_v54 = vsel %vm638_vm2, %v5033_v30, -inf }
0x18b2   :  { %v10826_v60 = vpop.f32.mrb[142].mxu1  ;;  %v5105_v33 = vsel %vm638_vm2, %v5036_v18, -inf }
0x18b3   :  { %v8237_v1 = vpop.f32.mrb[143].mxu1  ;;  %5106 = vmax.xlane.f32.xlu1 %v5105_v33 }
0x18b8   :  { %v4981_v43 = vpop.f32.mrb[144].mxu1 }
0x18b9   :  { %v4982_v48 = vadd.f32 %v4981_v43, %v9648_v52  ;;  %v8248_v6 = vpop.f32.mrb[145].mxu1 }
0x18ba   :  { %v4984_v24 = vpop.f32.mrb[146].mxu1 }
0x18bb   :  { %v4985_v13 = vadd.f32 %v4984_v24, %v9650_v57  ;;  %v8249_v8 = vpop.f32.mrb[147].mxu1  ;;  %v5096_v38 = vsel %vm638_vm2, %v4982_v48, -inf }
0x18bc   :  { %5097 = vmax.xlane.f32.xlu0 %v5096_v38 }
0x18bd   :  { %v5099_v17 = vsel %vm638_vm2, %v4985_v13, -inf }
0x18c0   :  { %v5083_v62 = vpop.f32.mrb[148].mxu1  ;;  %5100 = vmax.xlane.f32.xlu0 %v5099_v17 }
0x18c1   :  { %v8260_v44 = vpop.f32.mrb[149].mxu1  ;;  %v5084_v33 = vadd.f32 %v5083_v62, %v9648_v52 }
0x18c2   :  { %v5086_v1 = vpop.f32.mrb[150].mxu1 }
0x18c3   :  { %v5087_v43 = vadd.f32 %v5086_v1, %v9650_v57  ;;  %v8261_v6 = vpop.f32.mrb[151].mxu1  ;;  %v5108_v8 = vsel %vm638_vm2, %v5084_v33, -inf }
0x18c4   :  { %5103 = vmax.xlane.f32.xlu0 %v5102_v54 }
0x18c5   :  { %v5111_v24 = vsel %vm638_vm2, %v5087_v43, -inf }
0x18c6   :  { %5112 = vmax.xlane.f32.xlu1 %v5111_v24 }
0x18c8   :  { %5109 = vmax.xlane.f32.xlu0 %v5108_v8 }
0x18d7   :  { %5229 = vrot.lane.b32.xlu1 %v10540_v7, %s9224_s4 }
0x18db   :  { %5276 = vrot.lane.b32.xlu1 %v10552_v11, %s9224_s4 }
0x18de   :  { %5182 = vrot.lane.b32.xlu0 %v10544_v10, %s9224_s4 }
0x18df   :  { %5323 = vrot.lane.b32.xlu1 %v10548_v34, %s9224_s4 }
0x1915   :  { %v5092_v56 = vpop.xlane.xlu0 %5091 }
0x1916   :  { %v5114_v54 = vsub.f32 %v4931_v58, %v5092_v56 }
0x1917   :  { %v5095_v38 = vpop.xlane.xlu1 %5094 }
0x1918   :  { %v5122_v17 = vmul.f32 1.442695, %v5114_v54  ;;  %v5115_v62 = vsub.f32 %v4934_v47, %v5095_v38 }
0x191a   :  { %8944 = vpow2.f32 %v5122_v17  ;;  %v5124_v44 = vmul.f32 1.442695, %v5115_v62 }
0x191c   :  { %8946 = vpow2.f32 %v5124_v44 }
0x1924   :  { %v10849_v1 = vpop.eup %8944 }
0x1925   :  { %v5138_v6 = vsel %vm638_vm2, %v10849_v1, 0.0 }
0x1926   :  { %v10853_v24 = vpop.eup %8946  ;;  %5139 = vadd.xlane.f32.xlu0 %v5138_v6 }
0x1927   :  { %v5141_v8 = vsel %vm638_vm2, %v10853_v24, 0.0 }
0x1928   :  { %5142 = vadd.xlane.f32.xlu1 %v5141_v8 }
0x1940   :  { %v5107_v22 = vpop.xlane.xlu1 %5106 }
0x1941   :  { %v5119_v54 = vsub.f32 %v5036_v18, %v5107_v22 }
0x1943   :  { %v5132_v62 = vmul.f32 1.442695, %v5119_v54 }
0x1949   :  { %v5098_v58 = vpop.xlane.xlu0 %5097 }
0x194a   :  { %v5116_v56 = vsub.f32 %v4982_v48, %v5098_v58 }
0x194c   :  { %v5126_v47 = vmul.f32 1.442695, %v5116_v56 }
0x194d   :  { %v5101_v38 = vpop.xlane.xlu0 %5100 }
0x194e   :  { %8948 = vpow2.f32 %v5126_v47  ;;  %v5117_v17 = vsub.f32 %v4985_v13, %v5101_v38 }
0x1950   :  { %v5128_v44 = vmul.f32 1.442695, %v5117_v17 }
0x1951   :  { %v5104_v9 = vpop.xlane.xlu0 %5103 }
0x1952   :  { %8950 = vpow2.f32 %v5128_v44  ;;  %v5118_v14 = vsub.f32 %v5033_v30, %v5104_v9 }
0x1953   :  { %v5113_v29 = vpop.xlane.xlu1 %5112  ;;  %8952 = vpow2.f32 %v5132_v62 }
0x1954   :  { %v5130_v6 = vmul.f32 1.442695, %v5118_v14  ;;  %v5121_v26 = vsub.f32 %v5087_v43, %v5113_v29 }
0x1955   :  { %v5110_v16 = vpop.xlane.xlu0 %5109 }
0x1956   :  { %8954 = vpow2.f32 %v5130_v6  ;;  %v5136_v8 = vmul.f32 1.442695, %v5121_v26  ;;  %v5120_v53 = vsub.f32 %v5084_v33, %v5110_v16 }
0x1957   :  { %v5230_v31 = vpop.permute.xlu1 %5229 }
0x1958   :  { %v10857_v48 = vpop.eup %8948  ;;  %8956 = vpow2.f32 %v5136_v8  ;;  %v5134_v22 = vmul.f32 1.442695, %v5120_v53  ;;  %8269 = vmatpush3.bf16.msra.mxu1 %v5230_v31 }
0x1959   :  { %v5183_v18 = vpop.permute.xlu0 %5182  ;;  %v5144_v13 = vsel %vm638_vm2, %v10857_v48, 0.0  ;;  %8280 = vmatprep.subr.bf16.mxu1 %v11493_v12 }
0x195a   :  { %8958 = vpow2.f32 %v5134_v22  ;;  %5145 = vadd.xlane.f32.xlu0 %v5144_v13  ;;  %8263 = vmatpush3.bf16.msra.mxu0 %v5183_v18 }
0x195b   :  { %8274 = vmatprep.subr.bf16.mxu0 %v11493_v12 }
0x195c   :  { %v8951_v29 = vpop.eup %8950 }
0x195d   :  { %v5147_v16 = vsel %vm638_vm2, %v8951_v29, 0.0  ;;  %v8953_v26 = vpop.eup %8952 }
0x195e   :  { %5148 = vadd.xlane.f32.xlu1 %v5147_v16  ;;  %v5153_v31 = vsel %vm638_vm2, %v8953_v26, 0.0 }
0x1960   :  { %v8955_v9 = vpop.eup %8954 }
0x1961   :  { %v5150_v53 = vsel %vm638_vm2, %v8955_v9, 0.0 }
0x1962   :  { %v10866_v14 = vpop.eup %8956  ;;  %5151 = vadd.xlane.f32.xlu0 %v5150_v53  ;;  %5154 = vadd.xlane.f32.xlu1 %v5153_v31 }
0x1963   :  { %v5159_v43 = vsel %vm638_vm2, %v10866_v14, 0.0 }
0x1964   :  { %v8959_v30 = vpop.eup %8958 }
0x1965   :  { %v5156_v33 = vsel %vm638_vm2, %v8959_v30, 0.0 }
0x1966   :  { %5157 = vadd.xlane.f32.xlu0 %v5156_v33  ;;  %5160 = vadd.xlane.f32.xlu1 %v5159_v43 }
0x1977   :  { %5423 = vrot.lane.b32.xlu1 %v10557_v40, %s9225_s11  ;;  %v5277_v40 = vpop.permute.xlu1 %5276 }
0x197b   :  { %5421 = vrot.lane.b32.xlu1 %v10538_v4, %s9225_s11  ;;  %v5324_v4 = vpop.permute.xlu1 %5323 }
0x197c   :  { %5372 = vrot.lane.b32.xlu0 %v10559_v19, %s9225_s11 }
0x197f   :  { %5525 = vrot.lane.b32.xlu1 %v10564_v59, %s9225_s11 }
0x1980   :  { %5370 = vrot.lane.b32.xlu0 %v10542_v25, %s9225_s11 }
0x1983   :  { %5523 = vrot.lane.b32.xlu1 %v10546_v37, %s9225_s11 }
0x1984   :  { %5474 = vrot.lane.b32.xlu0 %v10566_v5, %s9225_s11 }
0x1988   :  { %5472 = vrot.lane.b32.xlu0 %v10550_v45, %s9225_s11 }
0x19b3   :  { %v5140_v58 = vpop.xlane.xlu0 %5139 }
0x19b4   :  { %8960 = vrcp.f32 %v5140_v58 }
0x19b5   :  { %v5143_v19 = vpop.xlane.xlu1 %5142 }
0x19b6   :  { %8962 = vrcp.f32 %v5143_v19 }
0x19be   :  { %v8961_v56 = vpop.eup %8960 }
0x19bf   :  { %v5170_v54 = vmul.f32 %v8961_v56, %v10849_v1 }
0x19c0   :  { %v8963_v59 = vpop.eup %8962 }
0x19c1   :  { %v5171_v25 = vmul.f32 %v8963_v59, %v10853_v24 }
0x19c3   :  { %v5178_v47 = vpack.c.bf16 %v5171_v25, %v5170_v54 }
0x19c5   :  { %8265 = vmatmul.mubr.msk.bf16.vlgmr.msra.gmra.mrb[144].mxu0 %vm638_vm2, %v5178_v47 }
0x19c6   :  { %8275 = vmatpush3.bf16.msra.mxu0 %v5277_v40  ;;  %8276 = vmatprep.mubr.msk.bf16.mxu0 %vm9221_vm1, %v11493_v12 }
0x19c7   :  { %8286 = vmatprep.subr.bf16.mxu0 %v11493_v12 }
0x19e7   :  { %v5146_v37 = vpop.xlane.xlu0 %5145 }
0x19e8   :  { %8964 = vrcp.f32 %v5146_v37 }
0x19eb   :  { %v5149_v45 = vpop.xlane.xlu1 %5148 }
0x19ec   :  { %8966 = vrcp.f32 %v5149_v45 }
0x19ef   :  { %v5152_v5 = vpop.xlane.xlu0 %5151  ;;  %v5155_v38 = vpop.xlane.xlu1 %5154 }
0x19f0   :  { %8968 = vrcp.f32 %v5152_v5 }
0x19f1   :  { %8970 = vrcp.f32 %v5155_v38 }
0x19f2   :  { %v8965_v24 = vpop.eup %8964 }
0x19f3   :  { %v5158_v1 = vpop.xlane.xlu0 %5157  ;;  %v5161_v17 = vpop.xlane.xlu1 %5160  ;;  %v5172_v44 = vmul.f32 %v8965_v24, %v10857_v48 }
0x19f4   :  { %8972 = vrcp.f32 %v5158_v1 }
0x19f5   :  { %8974 = vrcp.f32 %v5161_v17 }
0x19f6   :  { %v8967_v62 = vpop.eup %8966 }
0x19f7   :  { %v5173_v6 = vmul.f32 %v8967_v62, %v8951_v29  ;;  %v5373_v8 = vpop.permute.xlu0 %5372  ;;  %v5424_v31 = vpop.permute.xlu1 %5423 }
0x19f8   :  { %v5378_v19 = vsel %vm638_vm2, %v5373_v8, 0 }
0x19f9   :  { %v5179_v22 = vpack.c.bf16 %v5173_v6, %v5172_v44 }
0x19fa   :  { %v8969_v18 = vpop.eup %8968 }
0x19fb   :  { %v8971_v13 = vpop.eup %8970  ;;  %v5174_v16 = vmul.f32 %v8969_v18, %v8955_v9  ;;  %8271 = vmatmul.mubr.msk.bf16.vlgmr.msra.gmra.mrb[152].mxu1 %vm638_vm2, %v5179_v22  ;;  %v5371_v29 = vpop.permute.xlu0 %5370 }
0x19fc   :  { %v5175_v53 = vmul.f32 %v8971_v13, %v8953_v26  ;;  %8281 = vmatpush3.bf16.msra.mxu1 %v5324_v4  ;;  %8282 = vmatprep.mubr.msk.bf16.mxu1 %vm9221_vm1, %v11493_v12  ;;  %v5422_v9 = vpop.permute.xlu1 %5421  ;;  %v5429_v4 = vsel %vm638_vm2, %v5424_v31, 0 }
0x19fd   :  { %8292 = vmatprep.subr.bf16.mxu1 %v11493_v12 }
0x19fe   :  { %v8973_v33 = vpop.eup %8972  ;;  %v5180_v43 = vpack.c.bf16 %v5175_v53, %v5174_v16 }
0x19ff   :  { %v8975_v40 = vpop.eup %8974  ;;  %v5176_v48 = vmul.f32 %v8973_v33, %v8959_v30  ;;  %v5475_v30 = vpop.permute.xlu0 %5474 }
0x1a00   :  { %v5177_v58 = vmul.f32 %v8975_v40, %v10866_v14  ;;  %8277 = vmatmul.mubr.msk.bf16.vlgmr.msra.gmra.mrb[148].mxu0 %vm638_vm2, %v5180_v43  ;;  %v5480_v14 = vsel %vm638_vm2, %v5475_v30, 0  ;;  %v5526_v56 = vpop.permute.xlu1 %5525 }
0x1a01   :  { %8287 = vmatpush3.bf16.xpose.msra.mxu0 %v5378_v19  ;;  %8288 = vmatprep.mubr.msk.bf16.mxu0 %vm9221_vm1, %v11493_v12  ;;  %v5531_v59 = vsel %vm638_vm2, %v5526_v56, 0 }
0x1a02   :  { %v5181_v26 = vpack.c.bf16 %v5177_v58, %v5176_v48  ;;  %8298 = vmatprep.subr.bf16.mxu0 %v11493_v12 }
0x1a03   :  { %v5473_v54 = vpop.permute.xlu0 %5472 }
0x1a04   :  { %8283 = vmatmul.mubr.msk.bf16.vlgmr.msra.gmra.mrb[156].mxu1 %vm638_vm2, %v5181_v26  ;;  %v5524_v25 = vpop.permute.xlu1 %5523 }
0x1a05   :  { %8293 = vmatpush3.bf16.xpose.msra.mxu1 %v5429_v4  ;;  %8294 = vmatprep.mubr.msk.bf16.mxu1 %vm9221_vm1, %v11493_v12 }
0x1a06   :  { %8304 = vmatprep.subr.bf16.mxu1 %v11493_v12 }
0x1a08   :  { %8289 = vmatmul.mubr.msk.bf16.vlgmr.msra.gmra.mrb[152].mxu0 %vm638_vm2, %v5371_v29 }
0x1a09   :  { %8299 = vmatpush3.bf16.xpose.msra.mxu0 %v5480_v14  ;;  %8300 = vmatprep.mubr.msk.bf16.mxu0 %vm9221_vm1, %v11493_v12 }
0x1a0a   :  { %8310 = vmatprep.subr.bf16.mxu0 %v11493_v12 }
0x1a0c   :  { %8295 = vmatmul.mubr.msk.bf16.vlgmr.msra.gmra.mrb[160].mxu1 %vm638_vm2, %v5422_v9 }
0x1a0d   :  { %8305 = vmatpush3.bf16.xpose.msra.mxu1 %v5531_v59  ;;  %8306 = vmatprep.mubr.msk.bf16.mxu1 %vm9221_vm1, %v11493_v12 }
0x1a0e   :  { %8316 = vmatprep.subr.bf16.mxu1 %v11493_v12 }
0x1a10   :  { %8301 = vmatmul.mubr.msk.bf16.vlgmr.msra.gmra.mrb[156].mxu0 %vm638_vm2, %v5473_v54 }
0x1a11   :  { %8312 = vmatprep.mubr.msk.bf16.mxu0 %vm9221_vm1, %v11493_v12 }
0x1a14   :  { %8307 = vmatmul.mubr.msk.bf16.vlgmr.msra.gmra.mrb[164].mxu1 %vm638_vm2, %v5524_v25 }
0x1a15   :  { %8318 = vmatprep.mubr.msk.bf16.mxu1 %vm9221_vm1, %v11493_v12 }
0x1a98   :  { %v10925_v47 = vpop.f32.mrb[144].mxu0 }
0x1a99   :  { %v8266_v37 = vpop.f32.mrb[145].mxu0 }
0x1a9a   :  { %v10927_v45 = vpop.f32.mrb[146].mxu0 }
0x1a9b   :  { %v8477_v5 = vpack.i.bf16 %v10927_v45, %v10925_v47  ;;  %v8267_v38 = vpop.f32.mrb[147].mxu0 }
0x1ace   :  { %v10931_v1 = vpop.f32.mrb[152].mxu1 }
0x1acf   :  { %v8272_v17 = vpop.f32.mrb[153].mxu1 }
0x1ad0   :  { %v10933_v24 = vpop.f32.mrb[154].mxu1 }
0x1ad1   :  { %v8482_v62 = vpack.i.bf16 %v10933_v24, %v10931_v1  ;;  %v8273_v44 = vpop.f32.mrb[155].mxu1 }
0x1ad3   :  { %v10937_v6 = vpop.f32.mrb[148].mxu0 }
0x1ad4   :  { %v8278_v8 = vpop.f32.mrb[149].mxu0 }
0x1ad5   :  { %v10939_v22 = vpop.f32.mrb[150].mxu0 }
0x1ad6   :  { %v8279_v13 = vpop.f32.mrb[151].mxu0 }
0x1ad7   :  { %v10943_v16 = vpop.f32.mrb[156].mxu1 }
0x1ad8   :  { %v8284_v53 = vpop.f32.mrb[157].mxu1 }
0x1ad9   :  { %v10945_v31 = vpop.f32.mrb[158].mxu1 }
0x1ada   :  { %v8512_v33 = vpack.i.bf16 %v10945_v31, %v10943_v16  ;;  %v8285_v43 = vpop.f32.mrb[159].mxu1 }
0x1adb   :  { %v5414_v40 = vpop.f32.mrb[152].mxu0 }
0x1adc   :  { %v5415_v48 = vadd.f32 %v5414_v40, %v9648_v52  ;;  %v8290_v29 = vpop.f32.mrb[153].mxu0 }
0x1add   :  { %v5417_v58 = vpop.f32.mrb[154].mxu0 }
0x1ade   :  { %v5418_v19 = vadd.f32 %v5417_v58, %v9650_v57  ;;  %v8291_v26 = vpop.f32.mrb[155].mxu0  ;;  %v5574_v9 = vsel %vm638_vm2, %v5415_v48, -inf }
0x1adf   :  { %v5465_v4 = vpop.f32.mrb[160].mxu1  ;;  %5575 = vmax.xlane.f32.xlu0 %v5574_v9 }
0x1ae0   :  { %v5466_v30 = vadd.f32 %v5465_v4, %v9648_v52  ;;  %v8296_v14 = vpop.f32.mrb[161].mxu1  ;;  %v5577_v56 = vsel %vm638_vm2, %v5418_v19, -inf }
0x1ae1   :  { %v5468_v59 = vpop.f32.mrb[162].mxu1  ;;  %5578 = vmax.xlane.f32.xlu1 %v5577_v56 }
0x1ae2   :  { %v5469_v54 = vadd.f32 %v5468_v59, %v9650_v57  ;;  %v8297_v25 = vpop.f32.mrb[163].mxu1  ;;  %v5580_v37 = vsel %vm638_vm2, %v5466_v30, -inf }
0x1ae3   :  { %5581 = vmax.xlane.f32.xlu0 %v5580_v37  ;;  %v5516_v38 = vpop.f32.mrb[156].mxu0 }
0x1ae4   :  { %v8302_v17 = vpop.f32.mrb[157].mxu0  ;;  %v5517_v8 = vadd.f32 %v5516_v38, %v9648_v52  ;;  %v5583_v43 = vsel %vm638_vm2, %v5469_v54, -inf }
0x1ae5   :  { %v5519_v44 = vpop.f32.mrb[158].mxu0 }
0x1ae6   :  { %v5520_v13 = vadd.f32 %v5519_v44, %v9650_v57  ;;  %v8303_v53 = vpop.f32.mrb[159].mxu0  ;;  %v5586_v56 = vsel %vm638_vm2, %v5517_v8, -inf }
0x1ae7   :  { %v5567_v40 = vpop.f32.mrb[164].mxu1  ;;  %5584 = vmax.xlane.f32.xlu0 %v5583_v43 }
0x1ae8   :  { %v8308_v29 = vpop.f32.mrb[165].mxu1  ;;  %v5589_v58 = vsel %vm638_vm2, %v5520_v13, -inf  ;;  %v5568_v9 = vadd.f32 %v5567_v40, %v9648_v52 }
0x1ae9   :  { %v5570_v26 = vpop.f32.mrb[166].mxu1  ;;  %5590 = vmax.xlane.f32.xlu1 %v5589_v58 }
0x1aea   :  { %v10962_v4 = vadd.f32 %v5570_v26, %v9650_v57  ;;  %v8309_v14 = vpop.f32.mrb[167].mxu1  ;;  %v5592_v25 = vsel %vm638_vm2, %v5568_v9, -inf }
0x1aeb   :  { %5587 = vmax.xlane.f32.xlu0 %v5586_v56 }
0x1aec   :  { %v5595_v59 = vsel %vm638_vm2, %v10962_v4, -inf }
0x1aed   :  { %5596 = vmax.xlane.f32.xlu1 %v5595_v59 }
0x1aef   :  { %5593 = vmax.xlane.f32.xlu0 %v5592_v25 }
0x1b6c   :  { %v5576_v37 = vpop.xlane.xlu0 %5575 }
0x1b6d   :  { %v5598_v38 = vsub.f32 %v5415_v48, %v5576_v37 }
0x1b6e   :  { %v5579_v17 = vpop.xlane.xlu1 %5578 }
0x1b6f   :  { %v5606_v44 = vmul.f32 1.442695, %v5598_v38  ;;  %v5599_v53 = vsub.f32 %v5418_v19, %v5579_v17 }
0x1b70   :  { %v5582_v52 = vpop.xlane.xlu0 %5581 }
0x1b71   :  { %8976 = vpow2.f32 %v5606_v44  ;;  %v5608_v57 = vmul.f32 1.442695, %v5599_v53  ;;  %v5600_v43 = vsub.f32 %v5466_v30, %v5582_v52 }
0x1b73   :  { %8978 = vpow2.f32 %v5608_v57  ;;  %v5610_v40 = vmul.f32 1.442695, %v5600_v43 }
0x1b74   :  { %v5585_v29 = vpop.xlane.xlu0 %5584 }
0x1b75   :  { %8980 = vpow2.f32 %v5610_v40  ;;  %v5601_v58 = vsub.f32 %v5469_v54, %v5585_v29 }
0x1b76   :  { %v5591_v26 = vpop.xlane.xlu1 %5590 }
0x1b77   :  { %v5612_v14 = vmul.f32 1.442695, %v5601_v58  ;;  %v5603_v56 = vsub.f32 %v5520_v13, %v5591_v26  ;;  %v11504_v58 = vpack.i.bf16 %v10803_v50, %v10801_v63 }
0x1b78   :  { %v5588_v59 = vpop.xlane.xlu0 %5587 }
0x1b79   :  { %8982 = vpow2.f32 %v5612_v14  ;;  %v5616_v25 = vmul.f32 1.442695, %v5603_v56  ;;  %v5602_v18 = vsub.f32 %v5517_v8, %v5588_v59 }
0x1b7a   :  { %v5597_v26 = vpop.xlane.xlu1 %5596 }
0x1b7b   :  { %v10968_v48 = vpop.eup %8976  ;;  %8984 = vpow2.f32 %v5616_v25  ;;  %v5614_v19 = vmul.f32 1.442695, %v5602_v18  ;;  %v5605_v14 = vsub.f32 %v10962_v4, %v5597_v26 }
0x1b7c   :  { %v5594_v37 = vpop.xlane.xlu0 %5593  ;;  %v5622_v30 = vsel %vm638_vm2, %v10968_v48, 0.0 }
0x1b7d   :  { %v8979_v38 = vpop.eup %8978  ;;  %8986 = vpow2.f32 %v5614_v19  ;;  %v5604_v17 = vsub.f32 %v5568_v9, %v5594_v37  ;;  %5623 = vadd.xlane.f32.xlu0 %v5622_v30 }
0x1b7e   :  { %v5625_v54 = vsel %vm638_vm2, %v8979_v38, 0.0 }
0x1b7f   :  { %v8981_v44 = vpop.eup %8980  ;;  %v5618_v13 = vmul.f32 1.442695, %v5604_v17  ;;  %5626 = vadd.xlane.f32.xlu1 %v5625_v54 }
0x1b80   :  { %v5628_v53 = vsel %vm638_vm2, %v8981_v44, 0.0 }
0x1b81   :  { %8988 = vpow2.f32 %v5618_v13  ;;  %5629 = vadd.xlane.f32.xlu0 %v5628_v53 }
0x1b83   :  { %v8983_v8 = vpop.eup %8982 }
0x1b84   :  { %v5631_v18 = vsel %vm638_vm2, %v8983_v8, 0.0 }
0x1b85   :  { %v8985_v52 = vpop.eup %8984  ;;  %5632 = vadd.xlane.f32.xlu1 %v5631_v18 }
0x1b86   :  { %v5637_v9 = vsel %vm638_vm2, %v8985_v52, 0.0 }
0x1b87   :  { %v8987_v57 = vpop.eup %8986 }
0x1b88   :  { %v5634_v43 = vsel %vm638_vm2, %v8987_v57, 0.0 }
0x1b89   :  { %5635 = vadd.xlane.f32.xlu0 %v5634_v43  ;;  %5638 = vadd.xlane.f32.xlu1 %v5637_v9 }
0x1b8b   :  { %v10977_v40 = vpop.eup %8988 }
0x1b8c   :  { %v5640_v29 = vsel %vm638_vm2, %v10977_v40, 0.0 }
0x1b8d   :  { %5641 = vadd.xlane.f32.xlu0 %v5640_v29 }
0x1b9a   :  { %5713 = vrot.lane.b32.xlu1 %v10540_v7, %s9225_s11  ;;  %v5620_v7 = vmul.f32 1.442695, %v5605_v14 }
0x1b9c   :  { %8990 = vpow2.f32 %v5620_v7  ;;  %v8585_v7 = vld [vmem:[#allocation9 + $0x28] sm:$0xff]  }
0x1b9e   :  { %5760 = vrot.lane.b32.xlu1 %v10552_v11, %s9225_s11 }
0x1ba3   :  { %5666 = vrot.lane.b32.xlu0 %v10544_v10, %s9225_s11  ;;  %v11506_v10 = vpack.i.bf16 %v10809_v51, %v10807_v20 }
0x1ba6   :  { %v8991_v56 = vpop.eup %8990 }
0x1ba7   :  { %8468 = vrot.lane.b32.xlu0 %v11504_v58, %s9226_s24  ;;  %v5643_v11 = vsel %vm638_vm2, %v8991_v56, 0.0 }
0x1bab   :  { %8478 = vrot.lane.b32.xlu0 %v8477_v5, %s11505_s28 }
0x1bc2   :  { %5644 = vadd.xlane.f32.xlu1 %v5643_v11  ;;  %v8586_v11 = vld [vmem:[#allocation9 + $0x30] sm:$0xff]  }
0x1bd3   :  { %5807 = vrot.lane.b32.xlu1 %v10548_v34, %s9225_s11 }
0x1bd7   :  { %8473 = vrot.lane.b32.xlu1 %v11506_v10, %s9226_s24  ;;  %v8587_v10 = vld [vmem:[#allocation9 + $0x38] sm:$0xff]  }
0x1bdb   :  { %8483 = vrot.lane.b32.xlu1 %v8482_v62, %s11505_s28 }
0x1c0a   :  { %v5624_v63 = vpop.xlane.xlu0 %5623 }
0x1c0c   :  { %v5627_v50 = vpop.xlane.xlu1 %5626 }
0x1c0d   :  { %8992 = vrcp.f32 %v5627_v50 }
0x1c0e   :  { %v5630_v47 = vpop.xlane.xlu0 %5629  ;;  %8994 = vrcp.f32 %v5624_v63 }
0x1c0f   :  { %8996 = vrcp.f32 %v5630_v47 }
0x1c12   :  { %v5633_v45 = vpop.xlane.xlu1 %5632 }
0x1c13   :  { %8998 = vrcp.f32 %v5633_v45 }
0x1c16   :  { %v5636_v5 = vpop.xlane.xlu0 %5635  ;;  %v5639_v34 = vpop.xlane.xlu1 %5638 }
0x1c17   :  { %9000 = vrcp.f32 %v5636_v5  ;;  %v8993_v4 = vpop.eup %8992 }
0x1c18   :  { %9002 = vrcp.f32 %v5639_v34  ;;  %v8995_v20 = vpop.eup %8994  ;;  %v5655_v1 = vmul.f32 %v8993_v4, %v8979_v38 }
0x1c19   :  { %v8997_v25 = vpop.eup %8996  ;;  %v5654_v62 = vmul.f32 %v8995_v20, %v10968_v48 }
0x1c1a   :  { %v5642_v51 = vpop.xlane.xlu0 %5641  ;;  %v5714_v59 = vpop.permute.xlu1 %5713  ;;  %v5656_v19 = vmul.f32 %v8997_v25, %v8981_v44  ;;  %v11510_v25 = vpack.i.bf16 %v10815_v15, %v10813_v35 }
0x1c1b   :  { %8317 = vmatpush3.bf16.msra.mxu1 %v5714_v59  ;;  %v5662_v17 = vpack.c.bf16 %v5655_v1, %v5654_v62  ;;  %9004 = vrcp.f32 %v5642_v51  ;;  %v11509_v59 = vpack.i.bf16 %v10826_v60, %v10824_v3 }
0x1c1c   :  { %8328 = vmatprep.subr.bf16.mxu1 %v11493_v12 }
0x1c1d   :  { %v8999_v24 = vpop.eup %8998 }
0x1c1e   :  { %v5657_v37 = vmul.f32 %v8999_v24, %v8983_v8  ;;  %v5667_v30 = vpop.permute.xlu0 %5666  ;;  %v5761_v18 = vpop.permute.xlu1 %5760 }
0x1c1f   :  { %8311 = vmatpush3.bf16.msra.mxu0 %v5667_v30 }
0x1c20   :  { %8322 = vmatprep.subr.bf16.mxu0 %v11493_v12  ;;  %v5663_v54 = vpack.c.bf16 %v5657_v37, %v5656_v19  ;;  %v11511_v37 = vpack.i.bf16 %v10939_v22, %v10937_v6 }
0x1c21   :  { %v9001_v13 = vpop.eup %9000 }
0x1c22   :  { %v9003_v53 = vpop.eup %9002  ;;  %8313 = vmatmul.mubr.msk.bf16.vlgmr.msra.gmra.mrb[160].mxu0 %vm638_vm2, %v5662_v17  ;;  %8319 = vmatmul.mubr.msk.bf16.vlgmr.msra.gmra.mrb[168].mxu1 %vm638_vm2, %v5663_v54  ;;  %v5658_v48 = vmul.f32 %v9001_v13, %v8987_v57  ;;  %v8584_v57 = vld [vmem:[#allocation9 + $0x20] sm:$0xff]   ;;  %v8469_v17 = vpop.permute.xlu0 %8468 }
0x1c23   :  { %8323 = vmatpush3.bf16.msra.mxu0 %v5761_v18  ;;  %8324 = vmatprep.mubr.msk.bf16.mxu0 %vm9221_vm1, %v11493_v12  ;;  %v5659_v38 = vmul.f32 %v9003_v53, %v8985_v52  ;;  %v11507_v52 = vmov 0   ;;  %v8471_v16 = vunpack.i.h.bf16 %v8469_v17  ;;  %v8470_v31 = vunpack.i.l.bf16 %v8469_v17 }
0x1c24   :  { %8330 = vmatprep.mubr.msk.bf16.mxu1 %vm9221_vm1, %v11493_v12  ;;  %8334 = vmatprep.subr.bf16.mxu0 %v8584_v57 }
0x1c25   :  { %v5664_v44 = vpack.c.bf16 %v5659_v38, %v5658_v48  ;;  %v9005_v9 = vpop.eup %9004 }
0x1c26   :  { %v5660_v58 = vmul.f32 %v9005_v9, %v10977_v40  ;;  %v8479_v13 = vpop.permute.xlu0 %8478 }
0x1c27   :  { %v8481_v48 = vunpack.i.h.bf16 %v8479_v13  ;;  %v8480_v6 = vunpack.i.l.bf16 %v8479_v13 }
0x1c2a   :  { %8325 = vmatmul.mubr.msk.bf16.vlgmr.msra.gmra.mrb[164].mxu0 %vm638_vm2, %v5664_v44  ;;  %v5951_v44 = vsel %vm638_vm2, %v10683_v2, %v8471_v16 }
0x1c2b   :  { %8335 = vmatpush3.bf16.msra.mxu0 %v8584_v57 }
0x1c2c   :  { %8336 = vmatprep.subr.bf16.mxu0 %v8585_v7 }
0x1c2f   :  { %8337 = vmatpush3.bf16.msra.mxu0 %v8585_v7 }
0x1c30   :  { %8338 = vmatprep.subr.bf16.mxu0 %v8586_v11 }
0x1c33   :  { %8339 = vmatpush3.bf16.msra.mxu0 %v8586_v11 }
0x1c34   :  { %8340 = vmatprep.subr.bf16.mxu0 %v8587_v10 }
0x1c37   :  { %8341 = vmatpush3.bf16.msra.mxu0 %v8587_v10  ;;  %v5959_v10 = vsel %vm2663_vm5, %v5951_v44, %v8481_v48 }
0x1c4f   :  { %v5645_v8 = vpop.xlane.xlu1 %5644 }
0x1c50   :  { %9006 = vrcp.f32 %v5645_v8  ;;  %v5950_v8 = vsel %vm638_vm2, %v10681_v61, %v8470_v31 }
0x1c51   :  { %v5958_v11 = vsel %vm2663_vm5, %v5950_v8, %v8480_v6 }
0x1c53   :  { %v5808_v43 = vpop.permute.xlu1 %5807 }
0x1c54   :  { %8329 = vmatpush3.bf16.msra.mxu1 %v5808_v43 }
0x1c57   :  { %v8474_v54 = vpop.permute.xlu1 %8473 }
0x1c58   :  { %v8475_v18 = vunpack.i.l.bf16 %v8474_v54 }
0x1c5a   :  { %v9007_v29 = vpop.eup %9006  ;;  %v5952_v9 = vsel %vm638_vm2, %v10685_v46, %v8475_v18 }
0x1c5b   :  { %v5661_v26 = vmul.f32 %v9007_v29, %v8991_v56  ;;  %v8484_v53 = vpop.permute.xlu1 %8483 }
0x1c5c   :  { %v8486_v22 = vunpack.i.h.bf16 %v8484_v53  ;;  %v8485_v38 = vunpack.i.l.bf16 %v8484_v53 }
0x1c5d   :  { %v5665_v14 = vpack.c.bf16 %v5661_v26, %v5660_v58 }
0x1c5e   :  { %v5960_v2 = vsel %vm2663_vm5, %v5952_v9, %v8485_v38 }
0x1c5f   :  { %8331 = vmatmul.mubr.msk.bf16.vlgmr.msra.gmra.mrb[172].mxu1 %vm638_vm2, %v5665_v14 }
0x1c60   :  { %6358 = vmatprep.mubr.bf16.mxu1 %v11507_v52 }
0x1cf5   :  { %v5706_v63 = vpop.f32.mrb[160].mxu0  ;;  %v5753_v40 = vpop.f32.mrb[168].mxu1 }
0x1cf6   :  { %v8314_v56 = vpop.f32.mrb[161].mxu0  ;;  %v8320_v50 = vpop.f32.mrb[169].mxu1 }
0x1cf7   :  { %v5709_v47 = vpop.f32.mrb[162].mxu0  ;;  %v5756_v45 = vpop.f32.mrb[170].mxu1 }
0x1cf8   :  { %v8487_v5 = vpack.i.bf16 %v5709_v47, %v5706_v63  ;;  %v8492_v34 = vpack.i.bf16 %v5756_v45, %v5753_v40  ;;  %v8315_v4 = vpop.f32.mrb[163].mxu0  ;;  %v8321_v20 = vpop.f32.mrb[171].mxu1 }
0x1cfa   :  { %8493 = vrot.lane.b32.xlu1 %v8492_v34, %s11508_s6  ;;  %8488 = vrot.lane.b32.xlu0 %v8487_v5, %s11508_s6 }
0x1cfd   :  { %v5800_v51 = vpop.f32.mrb[164].mxu0 }
0x1cfe   :  { %8503 = vrot.lane.b32.xlu1 %v11509_v59, %s9226_s24  ;;  %8498 = vrot.lane.b32.xlu0 %v11510_v25, %s9226_s24  ;;  %v8326_v1 = vpop.f32.mrb[165].mxu0 }
0x1cff   :  { %v5803_v24 = vpop.f32.mrb[166].mxu0 }
0x1d00   :  { %v8517_v62 = vpack.i.bf16 %v5803_v24, %v5800_v51  ;;  %v8327_v19 = vpop.f32.mrb[167].mxu0 }
0x1d02   :  { %8513 = vrot.lane.b32.xlu1 %v8512_v33, %s11505_s28  ;;  %8508 = vrot.lane.b32.xlu0 %v11511_v37, %s11505_s28  ;;  %v8476_v33 = vunpack.i.h.bf16 %v8474_v54  ;;  %s9233_s28 = smov [#allocation11]  }
0x1d04   :  { %v5953_v43 = vsel %vm638_vm2, %v10687_v42, %v8476_v33 }
0x1d05   :  { %v5961_v61 = vsel %vm2663_vm5, %v5953_v43, %v8486_v22 }
0x1d06   :  { %8518 = vrot.lane.b32.xlu0 %v8517_v62, %s11508_s6 }
0x1d32   :  { %v5847_v3 = vpop.f32.mrb[172].mxu1 }
0x1d33   :  { %v8332_v60 = vpop.f32.mrb[173].mxu1 }
0x1d34   :  { %v5850_v35 = vpop.f32.mrb[174].mxu1 }
0x1d35   :  { %v8522_v15 = vpack.i.bf16 %v5850_v35, %v5847_v3  ;;  %v8333_v30 = vpop.f32.mrb[175].mxu1 }
0x1d37   :  { %8523 = vrot.lane.b32.xlu1 %v8522_v15, %s11508_s6  ;;  %s7232_s6 = sshll.u32 %s9233_s28, 4  ;;  %s7233_s6 = int_to_ptr.vmem [resolvable:$true] %s7232_s6 }
0x1d38   :  { %p9187_p5 = scmp.lt.s32.totalorder %s7233_s6, %s7233_s6 }
0x1d6c   :  { %v8494_v29 = vpop.permute.xlu1 %8493  ;;  %v8489_v58 = vpop.permute.xlu0 %8488 }
0x1d6d   :  { %v8496_v26 = vunpack.i.h.bf16 %v8494_v29  ;;  %v8495_v14 = vunpack.i.l.bf16 %v8494_v29  ;;  %v8491_v57 = vunpack.i.h.bf16 %v8489_v58  ;;  %v8490_v7 = vunpack.i.l.bf16 %v8489_v58 }
0x1d6f   :  { %v5968_v63 = vsel %vm2672_vm6, %v5960_v2, %v8495_v14  ;;  %v5969_v42 = vsel %vm2672_vm6, %v5961_v61, %v8496_v26  ;;  %v5967_v46 = vsel %vm2672_vm6, %v5959_v10, %v8491_v57  ;;  %v5966_v40 = vsel %vm2672_vm6, %v5958_v11, %v8490_v7 }
0x1d70   :  { %v5975_v56 = vpack.c.bf16 %v5969_v42, %v5968_v63  ;;  %v5974_v50 = vpack.c.bf16 %v5967_v46, %v5966_v40  ;;  %v8499_v47 = vpop.permute.xlu0 %8498  ;;  %v8504_v35 = vpop.permute.xlu1 %8503 }
0x1d71   :  { %v8501_v5 = vunpack.i.h.bf16 %v8499_v47  ;;  %v8500_v34 = vunpack.i.l.bf16 %v8499_v47  ;;  %v8506_v30 = vunpack.i.h.bf16 %v8504_v35 }
0x1d72   :  { %8342 = vmatprep.mubr.msk.bf16.mxu0 %vm164_vm0, %v5974_v50  ;;  %v11512_v50 = vld [vmem:[#allocation18_spill] sm:$0xff] }
0x1d73   :  { %8343 = vmatmul.mubr.msk.bf16.vlgmr.msra.gmra.mrb[168].mxu0 %vm164_vm0, %v5975_v56  ;;  %v5955_v59 = vsel %vm638_vm2, %v10691_v39, %v8501_v5  ;;  %v5954_v25 = vsel %vm638_vm2, %v10689_v23, %v8500_v34  ;;  %v8505_v39 = vunpack.i.l.bf16 %v8504_v35  ;;  %v5957_v13 = vsel %vm638_vm2, %v10700_v21, %v8506_v30  ;;  %v7443_v21 = vld [vmem:[%s11429_s12 + $0x1] ss:$0 sm:$0xff] }
0x1d74   :  { %v8509_v45 = vpop.permute.xlu0 %8508  ;;  %v8514_v15 = vpop.permute.xlu1 %8513 }
0x1d75   :  { %v8511_v4 = vunpack.i.h.bf16 %v8509_v45  ;;  %v8510_v20 = vunpack.i.l.bf16 %v8509_v45  ;;  %v8516_v17 = vunpack.i.h.bf16 %v8514_v15  ;;  %v8515_v54 = vunpack.i.l.bf16 %v8514_v15 }
0x1d76   :  { %v5956_v53 = vsel %vm638_vm2, %v10698_v49, %v8505_v39 }
0x1d77   :  { %v5962_v62 = vsel %vm2663_vm5, %v5954_v25, %v8510_v20  ;;  %v5963_v19 = vsel %vm2663_vm5, %v5955_v59, %v8511_v4  ;;  %v5964_v33 = vsel %vm2663_vm5, %v5956_v53, %v8515_v54  ;;  %v5965_v18 = vsel %vm2663_vm5, %v5957_v13, %v8516_v17  ;;  %v8590_v53 = vld [vmem:[%s11432_s15 + $0x44] ss:$8 sps:$4 sm:$0xff]  }
0x1d78   :  { %v8519_v51 = vpop.permute.xlu0 %8518  ;;  %6326 = vmatprep.subr.bf16.mxu1 %v8590_v53 }
0x1d79   :  { %v8521_v1 = vunpack.i.h.bf16 %v8519_v51  ;;  %v8520_v24 = vunpack.i.l.bf16 %v8519_v51 }
0x1d7b   :  { %v5971_v37 = vsel %vm2672_vm6, %v5963_v19, %v8521_v1  ;;  %v5970_v3 = vsel %vm2672_vm6, %v5962_v62, %v8520_v24 }
0x1d7c   :  { %v5976_v60 = vpack.c.bf16 %v5971_v37, %v5970_v3 }
0x1d7e   :  { %8346 = vmatprep.mubr.msk.bf16.mxu0 %vm164_vm0, %v5976_v60 }
0x1da9   :  { %v8524_v23 = vpop.permute.xlu1 %8523 }
0x1daa   :  { %v8526_v16 = vunpack.i.h.bf16 %v8524_v23  ;;  %v8525_v31 = vunpack.i.l.bf16 %v8524_v23 }
0x1dac   :  { %v5972_v48 = vsel %vm2672_vm6, %v5964_v33, %v8525_v31  ;;  %v5973_v6 = vsel %vm2672_vm6, %v5965_v18, %v8526_v16  ;;  %v8588_v16 = vld [vmem:[%s11432_s15 + $0x40] ss:$8 sps:$4 sm:$0xff]   ;;  %v8593_v31 = vld [vmem:[%s11432_s15 + $0x54] ss:$8 sps:$4 sm:$0xff]   ;;  %v8591_v33 = vld [vmem:[%s11432_s15 + $0x50] ss:$8 sps:$4 sm:$0xff]  }
0x1dad   :  { %v5977_v22 = vpack.c.bf16 %v5973_v6, %v5972_v48  ;;  %6327 = vmatpush1.bf16.msra.mxu1 %v8588_v16  ;;  %v8596_v18 = vld [vmem:[%s11432_s15 + $0x64] ss:$8 sps:$4 sm:$0xff]   ;;  %v8594_v48 = vld [vmem:[%s11432_s15 + $0x60] ss:$8 sps:$4 sm:$0xff]   ;;  %v8599_v6 = vld [vmem:[%s11432_s15 + $0x74] ss:$8 sps:$4 sm:$0xff]  }
0x1dae   :  { %6328 = vmatprep.subr.bf16.mxu1 %v8593_v31 }
0x1daf   :  { %8347 = vmatmul.mubr.msk.bf16.gmra.mrb[172].mxu0 %vm164_vm0, %v5977_v22  ;;  %v8597_v22 = vld [vmem:[%s11432_s15 + $0x70] ss:$8 sps:$4 sm:$0xff]  }
0x1db1   :  { %6329 = vmatpush1.bf16.msra.mxu1 %v8591_v33 }
0x1db2   :  { %6330 = vmatprep.subr.bf16.mxu1 %v8596_v18 }
0x1db5   :  { %6331 = vmatpush1.bf16.msra.mxu1 %v8594_v48 }
0x1db6   :  { %6332 = vmatprep.subr.bf16.mxu1 %v8599_v6 }
0x1db9   :  { %6333 = vmatpush1.bf16.msra.mxu1 %v8597_v22 }
0x1e46   :  { %v8344_v38 = vpop.f32.mrb[168].mxu0 }
0x1e47   :  { %v6057_v44 = vpop.f32.mrb[169].mxu0  ;;  %v6090_v49 = vadd.f32 %v8344_v38, %v10391_v32 }
0x1e48   :  { %v6088_v8 = vadd.f32 %v6057_v44, %v10381_v0  ;;  %v8345_v43 = vpop.f32.mrb[170].mxu0 }
0x1e49   :  { %v6060_v9 = vpop.f32.mrb[171].mxu0  ;;  %v11084_v26 = vadd.f32 %v7443_v21, %v6090_v49  ;;  %v6091_v14 = vadd.f32 %v8345_v43, %v10394_v55 }
0x1e4a   :  { %v11081_v29 = vadd.f32 %v7443_v21, %v6088_v8  ;;  %v6089_v58 = vadd.f32 %v6060_v9, %v10384_v36 }
0x1e4b   :  { %v11093_v0 = vadd.f32 %v7443_v21, %v6091_v14  ;;  %v6122_v11 = vsel %vm164_vm0, %v11084_v26, 0.0 }
0x1e4c   :  { %v11087_v57 = vadd.f32 %v7443_v21, %v6089_v58  ;;  %v6116_v7 = vsel %vm164_vm0, %v11081_v29, 0.0 }
0x1e4d   :  { %6117 = vadd.xlane.f32.xlu0 %v6116_v7  ;;  %v6125_v36 = vsel %vm164_vm0, %v11093_v0, 0.0 }
0x1e4e   :  { %v6119_v32 = vsel %vm164_vm0, %v11087_v57, 0.0 }
0x1e4f   :  { %6120 = vadd.xlane.f32.xlu1 %v6119_v32 }
0x1e51   :  { %6123 = vadd.xlane.f32.xlu0 %v6122_v11 }
0x1e55   :  { %6126 = vadd.xlane.f32.xlu0 %v6125_v36 }
0x1e82   :  { %v8348_v55 = vpop.f32.mrb[172].mxu0 }
0x1e83   :  { %v6094_v10 = vadd.f32 %v8348_v55, %v10411_v28  ;;  %v6073_v2 = vpop.f32.mrb[173].mxu0 }
0x1e84   :  { %v6092_v61 = vadd.f32 %v6073_v2, %v10401_v27  ;;  %v8349_v63 = vpop.f32.mrb[174].mxu0 }
0x1e85   :  { %v11101_v42 = vadd.f32 %v7443_v21, %v6094_v10  ;;  %v6095_v46 = vadd.f32 %v8349_v63, %v10414_v41  ;;  %v6076_v40 = vpop.f32.mrb[175].mxu0 }
0x1e86   :  { %v11104_v56 = vadd.f32 %v7443_v21, %v6092_v61  ;;  %v6093_v47 = vadd.f32 %v6076_v40, %v11512_v50 }
0x1e87   :  { %v11107_v45 = vadd.f32 %v7443_v21, %v6095_v46  ;;  %v6134_v41 = vsel %vm164_vm0, %v11101_v42, 0.0 }
0x1e88   :  { %v11109_v5 = vadd.f32 %v7443_v21, %v6093_v47  ;;  %v6128_v28 = vsel %vm164_vm0, %v11104_v56, 0.0 }
0x1e89   :  { %6129 = vadd.xlane.f32.xlu0 %v6128_v28  ;;  %v6137_v34 = vsel %vm164_vm0, %v11107_v45, 0.0 }
0x1e8a   :  { %v6131_v27 = vsel %vm164_vm0, %v11109_v5, 0.0 }
0x1e8b   :  { %6132 = vadd.xlane.f32.xlu1 %v6131_v27 }
0x1e8d   :  { %6135 = vadd.xlane.f32.xlu0 %v6134_v41 }
0x1e8f   :  { %6138 = vadd.xlane.f32.xlu1 %v6137_v34 }
0x1eda   :  { %v6118_v4 = vpop.xlane.xlu0 %6117 }
0x1edb   :  { %v6140_v20 = vmul.f32 0.015625, %v6118_v4 }
0x1edc   :  { %v6121_v51 = vpop.xlane.xlu1 %6120 }
0x1edd   :  { %v11120_v59 = vsub.f32 %v11081_v29, %v6140_v20  ;;  %v6141_v25 = vmul.f32 0.015625, %v6121_v51 }
0x1ede   :  { %v6124_v1 = vpop.xlane.xlu0 %6123 }
0x1edf   :  { %v11123_v24 = vsub.f32 %v11087_v57, %v6141_v25  ;;  %v6142_v62 = vmul.f32 0.015625, %v6124_v1  ;;  %v6156_v19 = vmul.f32 %v11120_v59, %v11120_v59 }
0x1ee1   :  { %v11128_v37 = vsub.f32 %v11084_v26, %v6142_v62  ;;  %v6164_v3 = vsel %vm164_vm0, %v6156_v19, 0.0  ;;  %v6157_v60 = vmul.f32 %v11123_v24, %v11123_v24 }
0x1ee2   :  { %v6127_v35 = vpop.xlane.xlu0 %6126  ;;  %6165 = vadd.xlane.f32.xlu0 %v6164_v3  ;;  %v7446_v3 = vld [vmem:[%s11430_s13 + $0x1] ss:$0 sm:$0xff]  ;;  %s9182_s13 = scalar_lea.vmem %s7233_s6, 32 }
0x1ee3   :  { %v6143_v15 = vmul.f32 0.015625, %v6127_v35  ;;  %v6167_v30 = vsel %vm164_vm0, %v6157_v60, 0.0  ;;  %v6158_v39 = vmul.f32 %v11128_v37, %v11128_v37  ;;  %p9183_p4 = scmp.ne.s32.totalorder %s7233_s6, %s9182_s13  ;;  %p9188_p6 = scmp.lt.s32.totalorder %s9182_s13, %s9182_s13 }
0x1ee4   :  { %6168 = vadd.xlane.f32.xlu1 %v6167_v30 }
0x1ee5   :  { %v11137_v17 = vsub.f32 %v11093_v0, %v6143_v15  ;;  %v6170_v54 = vsel %vm164_vm0, %v6158_v39, 0.0  ;;  %p9189_p7 = por %p9188_p6, %p9187_p5 }
0x1ee6   :  { %6171 = vadd.xlane.f32.xlu0 %v6170_v54  ;;  %v7447_v54 = vld [vmem:[%s11431_s14 + $0x1] ss:$0 sm:$0xff] }
0x1ee7   :  { %v6159_v23 = vmul.f32 %v11137_v17, %v11137_v17  ;;  %p9190_p8 = pnand %p9189_p7, %p9183_p4 }
0x1ee9   :  { %v6173_v13 = vsel %vm164_vm0, %v6159_v23, 0.0 }
0x1eea   :  { %6174 = vadd.xlane.f32.xlu1 %v6173_v13 }
0x1f16   :  { %v6130_v38 = vpop.xlane.xlu0 %6129 }
0x1f17   :  { %v6144_v21 = vmul.f32 0.015625, %v6130_v38 }
0x1f18   :  { %v6133_v44 = vpop.xlane.xlu1 %6132 }
0x1f19   :  { %v11168_v49 = vsub.f32 %v11104_v56, %v6144_v21  ;;  %v6145_v8 = vmul.f32 0.015625, %v6133_v44 }
0x1f1a   :  { %v6136_v43 = vpop.xlane.xlu0 %6135 }
0x1f1b   :  { %v11171_v9 = vsub.f32 %v11109_v5, %v6145_v8  ;;  %v6146_v58 = vmul.f32 0.015625, %v6136_v43  ;;  %v6160_v14 = vmul.f32 %v11168_v49, %v11168_v49 }
0x1f1c   :  { %v6139_v7 = vpop.xlane.xlu1 %6138 }
0x1f1d   :  { %v11176_v32 = vsub.f32 %v11101_v42, %v6146_v58  ;;  %v6147_v11 = vmul.f32 0.015625, %v6139_v7  ;;  %v6176_v36 = vsel %vm164_vm0, %v6160_v14, 0.0  ;;  %v6161_v55 = vmul.f32 %v11171_v9, %v11171_v9 }
0x1f1e   :  { %6177 = vadd.xlane.f32.xlu0 %v6176_v36 }
0x1f1f   :  { %v11182_v10 = vsub.f32 %v11107_v45, %v6147_v11  ;;  %v6179_v2 = vsel %vm164_vm0, %v6161_v55, 0.0  ;;  %v6162_v61 = vmul.f32 %v11176_v32, %v11176_v32 }
0x1f20   :  { %6180 = vadd.xlane.f32.xlu1 %v6179_v2 }
0x1f21   :  { %v6182_v63 = vsel %vm164_vm0, %v6162_v61, 0.0  ;;  %v6163_v46 = vmul.f32 %v11182_v10, %v11182_v10 }
0x1f22   :  { %6183 = vadd.xlane.f32.xlu0 %v6182_v63 }
0x1f23   :  { %v6185_v40 = vsel %vm164_vm0, %v6163_v46, 0.0 }
0x1f24   :  { %6186 = vadd.xlane.f32.xlu1 %v6185_v40 }
0x1f6f   :  { %v6166_v50 = vpop.xlane.xlu0 %6165 }
0x1f70   :  { %v6188_v47 = vmul.f32 0.015625, %v6166_v50 }
0x1f71   :  { %v6169_v28 = vpop.xlane.xlu1 %6168 }
0x1f72   :  { %v6196_v27 = vadd.f32 1e-05, %v6188_v47  ;;  %v6189_v41 = vmul.f32 0.015625, %v6169_v28 }
0x1f73   :  { %v6172_v34 = vpop.xlane.xlu0 %6171 }
0x1f74   :  { %9008 = vrsqrt.f32 %v6196_v27  ;;  %v6197_v4 = vadd.f32 1e-05, %v6189_v41  ;;  %v6190_v20 = vmul.f32 0.015625, %v6172_v34 }
0x1f76   :  { %9010 = vrsqrt.f32 %v6197_v4  ;;  %v6198_v51 = vadd.f32 1e-05, %v6190_v20 }
0x1f77   :  { %v6175_v25 = vpop.xlane.xlu1 %6174 }
0x1f78   :  { %9012 = vrsqrt.f32 %v6198_v51  ;;  %v6191_v1 = vmul.f32 0.015625, %v6175_v25 }
0x1f7a   :  { %v6199_v62 = vadd.f32 1e-05, %v6191_v1  ;;  %v8602_v1 = vld [vmem:[%s11434_s17 + $0xc8] sm:$0xff]  }
0x1f7c   :  { %9014 = vrsqrt.f32 %v6199_v62  ;;  %v8603_v62 = vld [vmem:[%s11434_s17 + $0x88] sm:$0xff]  }
0x1f7e   :  { %v9009_v19 = vpop.eup %9008 }
0x1f7f   :  { %v6212_v60 = vmul.f32 %v9009_v19, %v11120_v59  ;;  %v8604_v19 = vld [vmem:[%s11434_s17 + $0xd0] sm:$0xff]  }
0x1f80   :  { %v9011_v35 = vpop.eup %9010 }
0x1f81   :  { %v6226_v15 = vmul.f32 %v7446_v3, %v6212_v60  ;;  %v6213_v30 = vmul.f32 %v9011_v35, %v11123_v24  ;;  %v8606_v60 = vld [vmem:[%s11434_s17 + $0xd8] sm:$0xff]  }
0x1f82   :  { %v9013_v39 = vpop.eup %9012  ;;  %v8607_v35 = vld [vmem:[%s11434_s17 + $0x98] sm:$0xff]  }
0x1f83   :  { %v6227_v23 = vmul.f32 %v7446_v3, %v6213_v30  ;;  %v6214_v13 = vmul.f32 %v9013_v39, %v11128_v37  ;;  %v6240_v53 = vadd.f32 %v7447_v54, %v6226_v15  ;;  %v8608_v15 = vld [vmem:[%s11434_s17 + $0xe0] sm:$0xff]   ;;  %v8610_v39 = vld [vmem:[%s11434_s17 + $0xe8] sm:$0xff]  }
0x1f84   :  { %v8609_v30 = vld [vmem:[%s11434_s17 + $0xa0] sm:$0xff]  }
0x1f85   :  { %v6241_v16 = vadd.f32 %v7447_v54, %v6227_v23  ;;  %v6228_v59 = vmul.f32 %v7446_v3, %v6214_v13  ;;  %v8612_v23 = vld [vmem:[%s11434_s17 + $0xf0] sm:$0xff]  }
0x1f86   :  { %v9015_v31 = vpop.eup %9014  ;;  %v8613_v13 = vld [vmem:[%s11434_s17 + $0xb0] sm:$0xff]  }
0x1f87   :  { %v6215_v33 = vmul.f32 %v9015_v31, %v11137_v17  ;;  %v6248_v18 = vpack.c.bf16 %v6241_v16, %v6240_v53  ;;  %v6242_v6 = vadd.f32 %v7447_v54, %v6228_v59  ;;  %v8614_v53 = vld [vmem:[%s11434_s17 + $0xf8] sm:$0xff]   ;;  %v6754_v31 = vld [vmem:[%s11513_s9] sm:$0xf] }
0x1f88   :  { %v8615_v16 = vld [vmem:[%s11434_s17 + $0xb8] sm:$0xff]   ;;  %6756 = vperm.xlu0 %8527, %v6754_v31  }
0x1f89   :  { %7465 = vmatmul.mubr.msk.bf16.vlgmr.msra.gmra.mrb[176].mxu1 %vm164_vm0, %v6248_v18  ;;  %v6229_v48 = vmul.f32 %v7446_v3, %v6215_v33  ;;  %v7456_v33 = vld [vmem:[%s11433_s16 + $0x2] sm:$0x3]  ;;  %v11514_v18 = vld [vmem:[#allocation16_spill] sm:$0xff] }
0x1f8a   :  { %6368 = vmatprep.mubr.bf16.mxu1 %v11507_v52  ;;  %v11515_v59 = vsub.s32 0, %v11514_v18 }
0x1f8b   :  { %v6243_v24 = vadd.f32 %v7447_v54, %v6229_v48 }
0x1f8c   :  { %v11270_v48 = vrot.slane %v7456_v33, %v11515_v59 }
0x1f8d   :  { %v6249_v22 = vpack.c.bf16 %v6243_v24, %v6242_v6  ;;  %v11516_v24 = vsub.s32 1, %v11514_v18 }
0x1f8f   :  { %v11274_v6 = vrot.slane %v7456_v33, %v11516_v24 }
0x1f91   :  { %7466 = vmatmul.mubr.msk.bf16.gmra.mrb[180].mxu1 %vm164_vm0, %v6249_v22 }
0x1f92   :  { %6378 = vmatprep.mubr.bf16.mxu1 %v11507_v52 }
0x1fab   :  { %v6178_v37 = vpop.xlane.xlu0 %6177 }
0x1fac   :  { %v6192_v38 = vmul.f32 0.015625, %v6178_v37 }
0x1fad   :  { %v6181_v21 = vpop.xlane.xlu1 %6180 }
0x1fae   :  { %v6200_v44 = vadd.f32 1e-05, %v6192_v38  ;;  %v6193_v8 = vmul.f32 0.015625, %v6181_v21 }
0x1faf   :  { %v6184_v17 = vpop.xlane.xlu0 %6183 }
0x1fb0   :  { %9016 = vrsqrt.f32 %v6200_v44  ;;  %v6201_v43 = vadd.f32 1e-05, %v6193_v8  ;;  %v6194_v58 = vmul.f32 0.015625, %v6184_v17 }
0x1fb1   :  { %v6187_v14 = vpop.xlane.xlu1 %6186 }
0x1fb2   :  { %9018 = vrsqrt.f32 %v6201_v43  ;;  %v6202_v7 = vadd.f32 1e-05, %v6194_v58  ;;  %v6195_v11 = vmul.f32 0.015625, %v6187_v14 }
0x1fb4   :  { %9020 = vrsqrt.f32 %v6202_v7  ;;  %v6203_v36 = vadd.f32 1e-05, %v6195_v11 }
0x1fb6   :  { %9022 = vrsqrt.f32 %v6203_v36 }
0x1fba   :  { %v9017_v55 = vpop.eup %9016 }
0x1fbb   :  { %v6216_v2 = vmul.f32 %v9017_v55, %v11168_v49 }
0x1fbc   :  { %v9019_v61 = vpop.eup %9018 }
0x1fbd   :  { %v6217_v63 = vmul.f32 %v9019_v61, %v11171_v9  ;;  %v6230_v46 = vmul.f32 %v7446_v3, %v6216_v2 }
0x1fbe   :  { %v9021_v40 = vpop.eup %9020 }
0x1fbf   :  { %v6231_v50 = vmul.f32 %v7446_v3, %v6217_v63  ;;  %v6218_v28 = vmul.f32 %v9021_v40, %v11176_v32  ;;  %v6244_v41 = vadd.f32 %v7447_v54, %v6230_v46  ;;  %v8600_v32 = vld [vmem:[%s11434_s17 + $0xc0] sm:$0xff]  }
0x1fc0   :  { %v9023_v47 = vpop.eup %9022  ;;  %7789 = vmatprep.subr.bf16.mxu0 %v8600_v32 }
0x1fc1   :  { %v6219_v27 = vmul.f32 %v9023_v47, %v11182_v10  ;;  %v6245_v34 = vadd.f32 %v7447_v54, %v6231_v50  ;;  %v6232_v51 = vmul.f32 %v7446_v3, %v6218_v28  ;;  %v8601_v10 = vld [vmem:[%s11434_s17 + $0x80] sm:$0xff]  }
0x1fc2   :  { %7790 = vmatpush3.bf16.msra.mxu0 %v8601_v10 }
0x1fc3   :  { %v6250_v4 = vpack.c.bf16 %v6245_v34, %v6244_v41  ;;  %v6233_v20 = vmul.f32 %v7446_v3, %v6219_v27  ;;  %v6246_v25 = vadd.f32 %v7447_v54, %v6232_v51  ;;  %7791 = vmatprep.subr.bf16.mxu0 %v8602_v1  ;;  %v8605_v3 = vld [vmem:[%s11434_s17 + $0x90] sm:$0xff]  }
0x1fc5   :  { %7467 = vmatmul.mubr.msk.bf16.gmra.mrb[184].mxu1 %vm164_vm0, %v6250_v4  ;;  %v6247_v49 = vadd.f32 %v7447_v54, %v6233_v20  ;;  %v8611_v54 = vld [vmem:[%s11434_s17 + $0xa8] sm:$0xff]  }
0x1fc6   :  { %6388 = vmatprep.mubr.bf16.mxu1 %v11507_v52  ;;  %7792 = vmatpush3.bf16.msra.mxu0 %v8603_v62 }
0x1fc7   :  { %v6251_v9 = vpack.c.bf16 %v6247_v49, %v6246_v25  ;;  %7793 = vmatprep.subr.bf16.mxu0 %v8604_v19 }
0x1fca   :  { %7794 = vmatpush3.bf16.msra.mxu0 %v8605_v3 }
0x1fcb   :  { %7795 = vmatprep.subr.bf16.mxu0 %v8606_v60 }
0x1fcd   :  { %7468 = vmatmul.mubr.msk.bf16.gmra.mrb[188].mxu1 %vm164_vm0, %v6251_v9 }
0x1fce   :  { %8366 = vmatprep.mubr.msk.f32.mxu1 %vm9221_vm1, %v11493_v12  ;;  %7796 = vmatpush3.bf16.msra.mxu0 %v8607_v35 }
0x1fcf   :  { %7797 = vmatprep.subr.bf16.mxu0 %v8608_v15 }
0x1fd2   :  { %7798 = vmatpush3.bf16.msra.mxu0 %v8609_v30 }
0x1fd3   :  { %7799 = vmatprep.subr.bf16.mxu0 %v8610_v39 }
0x1fd6   :  { %7800 = vmatpush3.bf16.msra.mxu0 %v8611_v54 }
0x1fd7   :  { %7801 = vmatprep.subr.bf16.mxu0 %v8612_v23 }
0x1fda   :  { %7802 = vmatpush3.bf16.msra.mxu0 %v8613_v13 }
0x1fdb   :  { %7803 = vmatprep.subr.bf16.mxu0 %v8614_v53 }
0x1fde   :  { %7804 = vmatpush3.bf16.msra.mxu0 %v8615_v16 }
0x205c   :  { %v6360_v22 = vpop.f32.mrb[176].mxu1 }
0x205d   :  { %v11277_v37 = vadd.f32 %v6360_v22, %v11270_v48  ;;  %v6362_v38 = vpop.f32.mrb[177].mxu1 }
0x205e   :  { %v11280_v21 = vadd.f32 %v6362_v38, %v11274_v6  ;;  %v6364_v44 = vpop.f32.mrb[178].mxu1 }
0x205f   :  { %v7469_v8 = vmul.f32 -1.702, %v11277_v37  ;;  %v11284_v17 = vadd.f32 %v6364_v44, %v11270_v48  ;;  %v6366_v43 = vpop.f32.mrb[179].mxu1 }
0x2060   :  { %v7470_v58 = vmul.f32 -1.702, %v11280_v21  ;;  %v6367_v14 = vadd.f32 %v6366_v43, %v11274_v6 }
0x2061   :  { %v6431_v7 = vmul.f32 1.442695, %v7469_v8  ;;  %v7471_v11 = vmul.f32 -1.702, %v11284_v17 }
0x2062   :  { %v6433_v36 = vmul.f32 1.442695, %v7470_v58  ;;  %v7472_v55 = vmul.f32 -1.702, %v6367_v14 }
0x2063   :  { %9024 = vpow2.f32 %v6431_v7  ;;  %v6435_v2 = vmul.f32 1.442695, %v7471_v11 }
0x2064   :  { %9026 = vpow2.f32 %v6433_v36  ;;  %v6437_v61 = vmul.f32 1.442695, %v7472_v55  ;;  %v6370_v63 = vpop.f32.mrb[180].mxu1 }
0x2065   :  { %9028 = vpow2.f32 %v6435_v2  ;;  %v6371_v46 = vadd.f32 %v6370_v63, %v11270_v48  ;;  %v6372_v40 = vpop.f32.mrb[181].mxu1 }
0x2066   :  { %9030 = vpow2.f32 %v6437_v61  ;;  %v6373_v50 = vadd.f32 %v6372_v40, %v11274_v6  ;;  %v6374_v47 = vpop.f32.mrb[182].mxu1 }
0x2067   :  { %v7473_v28 = vmul.f32 -1.702, %v6371_v46  ;;  %v6375_v27 = vadd.f32 %v6374_v47, %v11270_v48  ;;  %v6376_v41 = vpop.f32.mrb[183].mxu1 }
0x2068   :  { %v7474_v34 = vmul.f32 -1.702, %v6373_v50  ;;  %v6377_v4 = vadd.f32 %v6376_v41, %v11274_v6 }
0x2069   :  { %v6439_v20 = vmul.f32 1.442695, %v7473_v28  ;;  %v7475_v51 = vmul.f32 -1.702, %v6375_v27 }
0x206a   :  { %v6441_v49 = vmul.f32 1.442695, %v7474_v34  ;;  %v7476_v25 = vmul.f32 -1.702, %v6377_v4 }
0x206b   :  { %9032 = vpow2.f32 %v6439_v20  ;;  %v6443_v9 = vmul.f32 1.442695, %v7475_v51 }
0x206c   :  { %9034 = vpow2.f32 %v6441_v49  ;;  %v6445_v32 = vmul.f32 1.442695, %v7476_v25 }
0x206d   :  { %v9025_v10 = vpop.eup %9024  ;;  %9036 = vpow2.f32 %v6443_v9 }
0x206e   :  { %v9027_v1 = vpop.eup %9026  ;;  %v6463_v62 = vadd.f32 1.0, %v9025_v10  ;;  %9038 = vpow2.f32 %v6445_v32 }
0x206f   :  { %v9029_v19 = vpop.eup %9028  ;;  %v6464_v3 = vadd.f32 1.0, %v9027_v1 }
0x2070   :  { %v9031_v60 = vpop.eup %9030  ;;  %9040 = vrcp.f32 %v6463_v62  ;;  %v6465_v35 = vadd.f32 1.0, %v9029_v19 }
0x2071   :  { %9042 = vrcp.f32 %v6464_v3  ;;  %v6466_v15 = vadd.f32 1.0, %v9031_v60 }
0x2072   :  { %9044 = vrcp.f32 %v6465_v35 }
0x2073   :  { %9046 = vrcp.f32 %v6466_v15 }
0x2075   :  { %v9033_v30 = vpop.eup %9032 }
0x2076   :  { %v9035_v39 = vpop.eup %9034  ;;  %v6467_v54 = vadd.f32 1.0, %v9033_v30 }
0x2077   :  { %v9037_v23 = vpop.eup %9036  ;;  %v6468_v13 = vadd.f32 1.0, %v9035_v39 }
0x2078   :  { %v9039_v53 = vpop.eup %9038  ;;  %9048 = vrcp.f32 %v6467_v54  ;;  %v6469_v16 = vadd.f32 1.0, %v9037_v23 }
0x2079   :  { %9050 = vrcp.f32 %v6468_v13  ;;  %v6470_v31 = vadd.f32 1.0, %v9039_v53 }
0x207a   :  { %v9041_v33 = vpop.eup %9040  ;;  %9052 = vrcp.f32 %v6469_v16 }
0x207b   :  { %v9043_v59 = vpop.eup %9042  ;;  %9054 = vrcp.f32 %v6470_v31  ;;  %v6511_v38 = vmul.f32 %v9041_v33, %v11277_v37 }
0x207c   :  { %v9045_v24 = vpop.eup %9044  ;;  %v6512_v8 = vmul.f32 %v9043_v59, %v11280_v21 }
0x207d   :  { %v9047_v22 = vpop.eup %9046  ;;  %v6513_v44 = vmul.f32 %v9045_v24, %v11284_v17 }
0x207e   :  { %v6514_v43 = vmul.f32 %v9047_v22, %v6367_v14 }
0x207f   :  { %v6527_v58 = vpack.c.bf16 %v6513_v44, %v6511_v38 }
0x2080   :  { %v6528_v7 = vpack.c.bf16 %v6514_v43, %v6512_v8 }
0x2082   :  { %v9049_v11 = vpop.eup %9048  ;;  %6696 = vmatprep.mubr.bf16.mxu0 %v6528_v7 }
0x2083   :  { %v9051_v36 = vpop.eup %9050  ;;  %6697 = vmatmul.mubr.bf16.vlgmr.msra.gmra.mrb[176].mxu0 %v6527_v58  ;;  %v6515_v61 = vmul.f32 %v9049_v11, %v6371_v46 }
0x2084   :  { %v9053_v55 = vpop.eup %9052  ;;  %v6516_v40 = vmul.f32 %v9051_v36, %v6373_v50 }
0x2085   :  { %v9055_v2 = vpop.eup %9054  ;;  %v6517_v63 = vmul.f32 %v9053_v55, %v6375_v27 }
0x2086   :  { %v6518_v47 = vmul.f32 %v9055_v2, %v6377_v4 }
0x2087   :  { %v6529_v28 = vpack.c.bf16 %v6517_v63, %v6515_v61 }
0x2088   :  { %v6530_v41 = vpack.c.bf16 %v6518_v47, %v6516_v40 }
0x208a   :  { %6704 = vmatprep.mubr.bf16.mxu0 %v6530_v41 }
0x208b   :  { %6705 = vmatmul.mubr.bf16.gmra.mrb[180].mxu0 %v6529_v28 }
0x2098   :  { %v6380_v37 = vpop.f32.mrb[184].mxu1 }
0x2099   :  { %v11297_v21 = vadd.f32 %v6380_v37, %v11270_v48  ;;  %v6382_v17 = vpop.f32.mrb[185].mxu1 }
0x209a   :  { %v11300_v14 = vadd.f32 %v6382_v17, %v11274_v6  ;;  %v6384_v34 = vpop.f32.mrb[186].mxu1 }
0x209b   :  { %v7477_v20 = vmul.f32 -1.702, %v11297_v21  ;;  %v11304_v46 = vadd.f32 %v6384_v34, %v11270_v48  ;;  %v6386_v50 = vpop.f32.mrb[187].mxu1 }
0x209c   :  { %v7478_v27 = vmul.f32 -1.702, %v11300_v14  ;;  %v6387_v4 = vadd.f32 %v6386_v50, %v11274_v6 }
0x209d   :  { %v6447_v51 = vmul.f32 1.442695, %v7477_v20  ;;  %v7479_v49 = vmul.f32 -1.702, %v11304_v46 }
0x209e   :  { %v6449_v25 = vmul.f32 1.442695, %v7478_v27  ;;  %v7480_v9 = vmul.f32 -1.702, %v6387_v4 }
0x209f   :  { %9056 = vpow2.f32 %v6447_v51  ;;  %v6451_v32 = vmul.f32 1.442695, %v7479_v49 }
0x20a0   :  { %9058 = vpow2.f32 %v6449_v25  ;;  %v6453_v10 = vmul.f32 1.442695, %v7480_v9  ;;  %v6390_v1 = vpop.f32.mrb[188].mxu1 }
0x20a1   :  { %9060 = vpow2.f32 %v6451_v32  ;;  %v6391_v62 = vadd.f32 %v6390_v1, %v11270_v48  ;;  %v6392_v19 = vpop.f32.mrb[189].mxu1 }
0x20a2   :  { %9062 = vpow2.f32 %v6453_v10  ;;  %v6393_v3 = vadd.f32 %v6392_v19, %v11274_v6  ;;  %v6394_v60 = vpop.f32.mrb[190].mxu1 }
0x20a3   :  { %v7481_v35 = vmul.f32 -1.702, %v6391_v62  ;;  %v6395_v15 = vadd.f32 %v6394_v60, %v11270_v48  ;;  %v6396_v30 = vpop.f32.mrb[191].mxu1 }
0x20a4   :  { %v7482_v39 = vmul.f32 -1.702, %v6393_v3  ;;  %v6397_v54 = vadd.f32 %v6396_v30, %v11274_v6 }
0x20a5   :  { %v6455_v23 = vmul.f32 1.442695, %v7481_v35  ;;  %v7483_v13 = vmul.f32 -1.702, %v6395_v15 }
0x20a6   :  { %v6457_v53 = vmul.f32 1.442695, %v7482_v39  ;;  %v7484_v16 = vmul.f32 -1.702, %v6397_v54 }
0x20a7   :  { %9064 = vpow2.f32 %v6455_v23  ;;  %v6459_v31 = vmul.f32 1.442695, %v7483_v13 }
0x20a8   :  { %9066 = vpow2.f32 %v6457_v53  ;;  %v6461_v33 = vmul.f32 1.442695, %v7484_v16 }
0x20a9   :  { %v9057_v59 = vpop.eup %9056  ;;  %9068 = vpow2.f32 %v6459_v31 }
0x20aa   :  { %v9059_v24 = vpop.eup %9058  ;;  %v6471_v22 = vadd.f32 1.0, %v9057_v59  ;;  %9070 = vpow2.f32 %v6461_v33 }
0x20ab   :  { %v9061_v38 = vpop.eup %9060  ;;  %v6472_v44 = vadd.f32 1.0, %v9059_v24 }
0x20ac   :  { %v9063_v48 = vpop.eup %9062  ;;  %9072 = vrcp.f32 %v6471_v22  ;;  %v6473_v8 = vadd.f32 1.0, %v9061_v38 }
0x20ad   :  { %9074 = vrcp.f32 %v6472_v44  ;;  %v6474_v6 = vadd.f32 1.0, %v9063_v48 }
0x20ae   :  { %9076 = vrcp.f32 %v6473_v8 }
0x20af   :  { %9078 = vrcp.f32 %v6474_v6 }
0x20b1   :  { %v9065_v43 = vpop.eup %9064 }
0x20b2   :  { %v9067_v58 = vpop.eup %9066  ;;  %v6475_v7 = vadd.f32 1.0, %v9065_v43 }
0x20b3   :  { %v9069_v11 = vpop.eup %9068  ;;  %v6476_v36 = vadd.f32 1.0, %v9067_v58 }
0x20b4   :  { %v9071_v55 = vpop.eup %9070  ;;  %9080 = vrcp.f32 %v6475_v7  ;;  %v6477_v2 = vadd.f32 1.0, %v9069_v11 }
0x20b5   :  { %9082 = vrcp.f32 %v6476_v36  ;;  %v6478_v61 = vadd.f32 1.0, %v9071_v55 }
0x20b6   :  { %v9073_v63 = vpop.eup %9072  ;;  %9084 = vrcp.f32 %v6477_v2 }
0x20b7   :  { %v9075_v40 = vpop.eup %9074  ;;  %9086 = vrcp.f32 %v6478_v61  ;;  %v6519_v41 = vmul.f32 %v9073_v63, %v11297_v21  ;;  %v9230_v21 = vmov 0.0|0.0  }
0x20b8   :  { %v9077_v47 = vpop.eup %9076  ;;  %v6520_v17 = vmul.f32 %v9075_v40, %v11300_v14  ;;  %8369 = vmatprep.subr.bf16.mxu1 %v9230_v21 }
0x20b9   :  { %v9079_v28 = vpop.eup %9078  ;;  %v6521_v37 = vmul.f32 %v9077_v47, %v11304_v46 }
0x20ba   :  { %v6522_v34 = vmul.f32 %v9079_v28, %v6387_v4  ;;  %v6757_v28 = vpop.permute.xlu0 %6756 }
0x20bb   :  { %v6531_v20 = vpack.c.bf16 %v6521_v37, %v6519_v41 }
0x20bc   :  { %v6532_v50 = vpack.c.bf16 %v6522_v34, %v6520_v17 }
0x20be   :  { %v9081_v27 = vpop.eup %9080  ;;  %6712 = vmatprep.mubr.bf16.mxu0 %v6532_v50  ;;  %v11517_v50 = vld [vmem:[#allocation17_spill] sm:$0xff] }
0x20bf   :  { %v9083_v51 = vpop.eup %9082  ;;  %6713 = vmatmul.mubr.bf16.gmra.mrb[184].mxu0 %v6531_v20  ;;  %v6523_v9 = vmul.f32 %v9081_v27, %v6391_v62  ;;  %v7534_v62 = vld [vmem:[%s11435_s18 + $0x1] ss:$0 sm:$0xff] }
0x20c0   :  { %v9085_v49 = vpop.eup %9084  ;;  %v6524_v10 = vmul.f32 %v9083_v51, %v6393_v3 }
0x20c1   :  { %v9087_v25 = vpop.eup %9086  ;;  %v6525_v32 = vmul.f32 %v9085_v49, %v6395_v15 }
0x20c2   :  { %v6526_v1 = vmul.f32 %v9087_v25, %v6397_v54 }
0x20c3   :  { %v6533_v19 = vpack.c.bf16 %v6525_v32, %v6523_v9 }
0x20c4   :  { %v6534_v60 = vpack.c.bf16 %v6526_v1, %v6524_v10 }
0x20c6   :  { %6720 = vmatprep.mubr.bf16.mxu0 %v6534_v60  ;;  %v8619_v60 = vld [vmem:[%s11438_s21] ss:$16 sps:$4 sm:$0xff]  }
0x20c7   :  { %6721 = vmatmul.mubr.bf16.gmra.mrb[188].mxu0 %v6533_v19  ;;  %v8621_v19 = vld [vmem:[%s11438_s21 + $0x4] ss:$16 sps:$4 sm:$0xff]  }
0x20c8   :  { %7038 = vmatprep.mubr.bf16.mxu0 %v11507_v52 }
0x2156   :  { %v7805_v14 = vpop.f32.mrb[176].mxu0 }
0x2157   :  { %v7806_v46 = vpop.f32.mrb[177].mxu0 }
0x2158   :  { %v7807_v4 = vadd.f32 %v7806_v46, %v7805_v14  ;;  %v7808_v35 = vpop.f32.mrb[178].mxu0  ;;  %v8627_v14 = vld [vmem:[%s11438_s21 + $0x24] ss:$16 sps:$4 sm:$0xff]   ;;  %v8622_v46 = vld [vmem:[%s11438_s21 + $0x28] ss:$16 sps:$4 sm:$0xff]  }
0x2159   :  { %v7809_v30 = vpop.f32.mrb[179].mxu0 }
0x215a   :  { %v6729_v39 = vadd.f32 %v7807_v4, %v11081_v29  ;;  %v7810_v23 = vadd.f32 %v7809_v30, %v7808_v35  ;;  %v8625_v4 = vld [vmem:[%s11438_s21 + $0x20] ss:$16 sps:$4 sm:$0xff]   ;;  %v8630_v35 = vld [vmem:[%s11438_s21 + $0x44] ss:$16 sps:$4 sm:$0xff]   ;;  %v8633_v30 = vld [vmem:[%s11438_s21 + $0x4c] ss:$16 sps:$4 sm:$0xff]  }
0x215c   :  { %v6730_v3 = vadd.f32 %v7810_v23, %v11087_v57  ;;  %v6745_v15 = vadd.f32 %v7534_v62, %v6729_v39  ;;  %v8628_v39 = vld [vmem:[%s11438_s21 + $0x40] ss:$16 sps:$4 sm:$0xff]   ;;  %v8631_v23 = vld [vmem:[%s11438_s21 + $0x48] ss:$16 sps:$4 sm:$0xff]  }
0x215e   :  { %v6746_v54 = vadd.f32 %v7534_v62, %v6730_v3  ;;  %v7811_v13 = vpop.f32.mrb[180].mxu0  ;;  %v8639_v3 = vld [vmem:[%s11438_s21 + $0x6c] ss:$16 sps:$4 sm:$0xff]  }
0x215f   :  { %v7812_v53 = vpop.f32.mrb[181].mxu0 }
0x2160   :  { %v8370_v16 = vpack.c.bf16 %v6746_v54, %v6745_v15  ;;  %v7813_v31 = vadd.f32 %v7812_v53, %v7811_v13  ;;  %v7814_v33 = vpop.f32.mrb[182].mxu0  ;;  %v8634_v15 = vld [vmem:[%s11438_s21 + $0x60] ss:$16 sps:$4 sm:$0xff]   ;;  %v8637_v54 = vld [vmem:[%s11438_s21 + $0x68] ss:$16 sps:$4 sm:$0xff]  }
0x2161   :  { %v7815_v59 = vpop.f32.mrb[183].mxu0 }
0x2162   :  { %v6731_v24 = vadd.f32 %v7813_v31, %v11084_v26  ;;  %v7816_v22 = vadd.f32 %v7815_v59, %v7814_v33  ;;  %8371 = vmatpush3.bf16.msra.mxu1 %v8370_v16  ;;  %v7537_v33 = vld [vmem:[%s11436_s19] ss:$0 sm:$0xff] }
0x2163   :  { %8372 = vmatprep.subr.bf16.mxu1 %v9230_v21 }
0x2164   :  { %v6732_v29 = vadd.f32 %v7816_v22, %v11093_v0  ;;  %v6747_v38 = vadd.f32 %v7534_v62, %v6731_v24  ;;  %v6753_v0 = vmul.u32 16, %v11514_v18  ;;  %v7538_v24 = vld [vmem:[%s11437_s20] ss:$0 sm:$0xff] }
0x2166   :  { %v6748_v44 = vadd.f32 %v7534_v62, %v6732_v29  ;;  %v6758_v34 = vadd.s32 %v6757_v28, %v6753_v0 }
0x2168   :  { %v8373_v48 = vpack.c.bf16 %v6748_v44, %v6747_v38  ;;  %vm6759_vm7 = vcmp.eq.s32.totalorder %v11517_v50, %v6758_v34  ;;  %v9231_v44 = vmov 1983009808  }
0x2169   :  { %v7535_v51 = vsel %vm6759_vm7, 1.0, %v11493_v12  ;;  %v8618_v12 = vld [vmem:[%s11438_s21 + $0xc] ss:$16 sps:$4 sm:$0xff]  }
0x216a   :  { %8374 = vmatpush3.bf16.msra.mxu1 %v8373_v48  ;;  %7006 = vmatprep.subr.bf16.mxu0 %v8618_v12  ;;  %v7071_v48 = vunpack.c.l.s4 %v9231_v44 }
0x216b   :  { %8375 = vmatprep.subr.bf16.mxu1 %v9230_v21 }
0x2192   :  { %v7817_v57 = vpop.f32.mrb[184].mxu0 }
0x2193   :  { %v7818_v8 = vpop.f32.mrb[185].mxu0 }
0x2194   :  { %v7819_v6 = vadd.f32 %v7818_v8, %v7817_v57  ;;  %v7820_v43 = vpop.f32.mrb[186].mxu0  ;;  %v7072_v57 = vunpack.c.0.s8 %v7071_v48  ;;  %v7066_v8 = vld [vmem:[%s11439_s22] sm:$0xff]  ;;  %s11518_s22 = sld [smem:[#allocation28_spill]] }
0x2195   :  { %v7821_v58 = vpop.f32.mrb[187].mxu0 }
0x2196   :  { %v6733_v7 = vadd.f32 %v7819_v6, %v11104_v56  ;;  %v7822_v11 = vadd.f32 %v7821_v58, %v7820_v43  ;;  %v7067_v6 = vmul.f32 %v7066_v8, %v7066_v8  ;;  %v7075_v43 = vsub.s32 %v7072_v57, %v11514_v18 }
0x2198   :  { %v6734_v26 = vadd.f32 %v7822_v11, %v11109_v5  ;;  %v6749_v36 = vadd.f32 %v7534_v62, %v6733_v7  ;;  %v7076_v58 = vrot.slane %v7067_v6, %v7075_v43  ;;  %v7069_v7 = vcombine.high %v7067_v6, %v7067_v6 }
0x219a   :  { %v6750_v55 = vadd.f32 %v7534_v62, %v6734_v26  ;;  %v7823_v2 = vpop.f32.mrb[188].mxu0  ;;  %v7084_v11 = vcombine.high %v7076_v58, %v7076_v58  ;;  %v7222_v44 = vstv %s11518_s22 }
0x219b   :  { %v7824_v61 = vpop.f32.mrb[189].mxu0 }
0x219c   :  { %v8376_v63 = vpack.c.bf16 %v6750_v55, %v6749_v36  ;;  %v7825_v40 = vadd.f32 %v7824_v61, %v7823_v2  ;;  %v7826_v47 = vpop.f32.mrb[190].mxu0  ;;  %v7083_v55 = vrot.slane %v7069_v7, %v7075_v43  ;;  %v7091_v2 = vsel %vm7090_vm9, %v7076_v58, 0.0 }
0x219d   :  { %v7827_v41 = vpop.f32.mrb[191].mxu0  ;;  %v7092_v61 = vsel %vm7090_vm9, %v7084_v11, 0.0 }
0x219e   :  { %v6735_v37 = vadd.f32 %v7825_v40, %v11101_v42  ;;  %v7828_v17 = vadd.f32 %v7827_v41, %v7826_v47  ;;  %8377 = vmatpush3.bf16.msra.mxu1 %v8376_v63 }
0x219f   :  { %8378 = vmatprep.subr.bf16.mxu1 %v9230_v21  ;;  %v8624_v21 = vld [vmem:[%s11438_s21 + $0x2c] ss:$16 sps:$4 sm:$0xff]  }
0x21a0   :  { %v6736_v56 = vadd.f32 %v7828_v17, %v11107_v45  ;;  %v6751_v5 = vadd.f32 %v7534_v62, %v6735_v37 }
0x21a2   :  { %v6752_v20 = vadd.f32 %v7534_v62, %v6736_v56  ;;  %v8636_v62 = vld [vmem:[%s11438_s21 + $0x64] ss:$16 sps:$4 sm:$0xff]  }
0x21a4   :  { %v8379_v27 = vpack.c.bf16 %v6752_v20, %v6751_v5  ;;  %v7093_v5 = vadd.f32 %v7092_v61, %v7091_v2 }
0x21a6   :  { %8380 = vmatpush3.bf16.msra.mxu1 %v8379_v27  ;;  %v7085_v27 = vcombine.high %v7083_v55, %v7083_v55 }
0x21a7   :  { %6965 = vmatprep.subr.bf16.mxu1 %v8621_v19 }
0x21a9   :  { %8367 = vmatmul.mubr.msk.f32.vlgmr.msra.gmra.mrb[192].mxu1 %vm164_vm0, %v7535_v51  ;;  %v7094_v51 = vsel %vm7090_vm9, %v7083_v55, 0.0 }
0x21aa   :  { %6997 = vmatprep.mubr.bf16.mxu1 %v11507_v52  ;;  %v8616_v52 = vld [vmem:[%s11438_s21 + $0x8] ss:$16 sps:$4 sm:$0xff]   ;;  %6966 = vmatpush1.bf16.msra.mxu1 %v8619_v60 }
0x21ab   :  { %7007 = vmatpush1.bf16.msra.mxu0 %v8616_v52  ;;  %6967 = vmatprep.subr.bf16.mxu1 %v8627_v14  ;;  %v9232_v52 = vmov 269488144  }
0x21ac   :  { %7008 = vmatprep.subr.bf16.mxu0 %v8624_v21  ;;  %v7103_v60 = vunpack.c.l.s4 %v9232_v52 }
0x21ae   :  { %6968 = vmatpush1.bf16.msra.mxu1 %v8625_v4  ;;  %v7104_v21 = vunpack.c.0.s8 %v7103_v60 }
0x21af   :  { %7009 = vmatpush1.bf16.msra.mxu0 %v8622_v46  ;;  %6969 = vmatprep.subr.bf16.mxu1 %v8630_v35 }
0x21b0   :  { %7010 = vmatprep.subr.bf16.mxu0 %v8633_v30  ;;  %v7107_v30 = vsub.s32 %v7104_v21, %v11514_v18 }
0x21b2   :  { %6970 = vmatpush1.bf16.msra.mxu1 %v8628_v39 }
0x21b3   :  { %7011 = vmatpush1.bf16.msra.mxu0 %v8631_v23  ;;  %6971 = vmatprep.subr.bf16.mxu1 %v8636_v62 }
0x21b4   :  { %7012 = vmatprep.subr.bf16.mxu0 %v8639_v3 }
0x21b6   :  { %6972 = vmatpush1.bf16.msra.mxu1 %v8634_v15 }
0x21b7   :  { %7013 = vmatpush1.bf16.msra.mxu0 %v8637_v54 }
0x227c   :  { %v6831_v42 = vpop.f32.mrb[192].mxu1 }
0x227d   :  { %v6838_v49 = vsel %vm6837_vm8, %v6831_v42, 0.0  ;;  %v8368_v25 = vpop.f32.mrb[193].mxu1 }
0x227e   :  { %6839 = vadd.xlane.f32.xlu1 %v6838_v49 }
0x230b   :  { %v6840_v9 = vpop.xlane.xlu1 %6839 }
0x230c   :  { %v6841_v32 = vmul.f32 0.015625, %v6840_v9  ;;  %v7095_v9 = vadd.f32 %v7094_v51, %v7093_v5 }
0x230e   :  { %v6842_v45 = vsub.f32 %v6831_v42, %v6841_v32 }
0x2310   :  { %v6843_v10 = vmul.f32 %v6842_v45, %v6842_v45 }
0x2312   :  { %v6844_v1 = vsel %vm6837_vm8, %v6843_v10, 0.0 }
0x2313   :  { %6845 = vadd.xlane.f32.xlu1 %v6844_v1 }
0x23a0   :  { %v6846_v13 = vpop.xlane.xlu1 %6845 }
0x23a1   :  { %v6847_v53 = vmul.f32 0.015625, %v6846_v13 }
0x23a3   :  { %v6848_v16 = vadd.f32 1e-05, %v6847_v53 }
0x23a5   :  { %9088 = vrsqrt.f32 %v6848_v16 }
0x23af   :  { %v9089_v31 = vpop.eup %9088 }
0x23b0   :  { %v6850_v59 = vmul.f32 %v9089_v31, %v6842_v45  ;;  %v7096_v45 = vsel %vm7090_vm9, %v7085_v27, 0.0 }
0x23b1   :  { %v7097_v1 = vadd.f32 %v7096_v45, %v7095_v9 }
0x23b2   :  { %v6857_v22 = vmul.f32 %v7537_v33, %v6850_v59 }
0x23b4   :  { %v6864_v29 = vadd.f32 %v7538_v24, %v6857_v22 }
0x23b6   :  { %v6865_v38 = vpack.c.bf16 %v6864_v29, %v6864_v29 }
0x23b8   :  { %7555 = vmatmul.mubr.msk.bf16.vlgmr.msra.gmra.mrb[196].mxu1 %vm164_vm0, %v6865_v38  ;;  %7556 = vmatmul.mubr.msk.bf16.vlgmr.msra.gmra.mrb[192].mxu0 %vm164_vm0, %v6865_v38 }
0x248b   :  { %v6999_v26 = vpop.f32.mrb[196].mxu1  ;;  %v7040_v36 = vpop.f32.mrb[192].mxu0 }
0x248c   :  { %v7047_v0 = vmul.f32 %v6999_v26, %v6999_v26  ;;  %v7001_v63 = vpop.f32.mrb[197].mxu1  ;;  %v7042_v40 = vpop.f32.mrb[193].mxu0  ;;  %v7049_v47 = vmul.f32 %v7040_v36, %v7040_v36 }
0x248d   :  { %v7048_v28 = vmul.f32 %v7001_v63, %v7001_v63  ;;  %v7003_v41 = vpop.f32.mrb[198].mxu1  ;;  %v7044_v37 = vpop.f32.mrb[194].mxu0  ;;  %v7050_v50 = vmul.f32 %v7042_v40, %v7042_v40 }
0x248e   :  { %v7052_v17 = vsel %vm7051_vm10, %v7047_v0, 0.0  ;;  %v7004_v34 = vpop.f32.mrb[199].mxu1  ;;  %v7045_v56 = vpop.f32.mrb[195].mxu0  ;;  %v7055_v49 = vsel %vm7051_vm10, %v7049_v47, 0.0 }
0x248f   :  { %v7053_v20 = vsel %vm7051_vm10, %v7048_v28, 0.0  ;;  %v7057_v32 = vsel %vm7051_vm10, %v7050_v50, 0.0 }
0x2490   :  { %v7054_v42 = vadd.f32 %v7053_v20, %v7052_v17 }
0x2492   :  { %v7056_v25 = vadd.f32 %v7055_v49, %v7054_v42 }
0x2494   :  { %v7058_v10 = vadd.f32 %v7057_v32, %v7056_v25 }
0x2496   :  { %7059 = vadd.xlane.f32.xlu1 %v7058_v10 }
0x249a   :  { %7098 = vadd.xlane.f32.xlu1 %v7097_v1 }
0x2523   :  { %v7060_v12 = vpop.xlane.xlu1 %7059 }
0x2524   :  { %9090 = vrsqrt.f32 %v7060_v12 }
0x2527   :  { %v7099_v19 = vpop.xlane.xlu1 %7098 }
0x2528   :  { %9092 = vrsqrt.f32 %v7099_v19 }
0x252e   :  { %v9091_v14 = vpop.eup %9090 }
0x252f   :  { %v7063_v46 = vmul.f32 %v9091_v14, %v7001_v63  ;;  %v7062_v4 = vmul.f32 %v9091_v14, %v6999_v26  ;;  %v7065_v35 = vmul.f32 %v9091_v14, %v7042_v40  ;;  %v7064_v31 = vmul.f32 %v9091_v14, %v7040_v36 }
0x2531   :  { %v7138_v39 = vpack.c.bf16 %v7063_v46, %v7063_v46  ;;  %v7137_v23 = vpack.c.bf16 %v7062_v4, %v7062_v4  ;;  %v7140_v3 = vpack.c.bf16 %v7065_v35, %v7065_v35  ;;  %v7139_v29 = vpack.c.bf16 %v7064_v31, %v7064_v31 }
0x2532   :  { %v9093_v62 = vpop.eup %9092 }
0x2533   :  { %7141 = vmatprep.subr.bf16.mxu1 %v7138_v39  ;;  %v7108_v15 = vrot.slane %v9093_v62, %v7107_v30 }
0x2534   :  { %7142 = vmatpush1.bf16.xpose.msra.mxu1 %v7137_v23 }
0x2535   :  { %7181 = vmatprep.subr.bf16.mxu1 %v7140_v3  ;;  %v7110_v54 = vmul.f32 %v7108_v15, %v7066_v8 }
0x2537   :  { %v7119_v13 = vrot.slane %v7110_v54, %v7075_v43  ;;  %v7112_v53 = vcombine.high %v7110_v54, %v7110_v54 }
0x2539   :  { %v7127_v16 = vcombine.high %v7119_v13, %v7119_v13  ;;  %v7126_v33 = vrot.slane %v7112_v53, %v7075_v43  ;;  %v7133_v22 = vpack.c.bf16 %v7119_v13, %v7119_v13 }
0x253b   :  { %v7134_v59 = vpack.c.bf16 %v7127_v16, %v7127_v16  ;;  %v7128_v24 = vcombine.high %v7126_v33, %v7126_v33  ;;  %v7135_v38 = vpack.c.bf16 %v7126_v33, %v7126_v33 }
0x253d   :  { %7173 = vmatprep.mubr.bf16.mxu1 %v7134_v59  ;;  %v7136_v18 = vpack.c.bf16 %v7128_v24, %v7128_v24 }
0x253e   :  { %7174 = vmatmul.mubr.bf16.vlgmr.msra.gmra.mrb[200].mxu1 %v7133_v22 }
0x253f   :  { %7182 = vmatpush1.bf16.xpose.msra.mxu1 %v7139_v29  ;;  %7213 = vmatprep.mubr.bf16.mxu1 %v7136_v18 }
0x254a   :  { %7214 = vmatmul.mubr.bf16.vlgmr.msra.gmra.mrb[200].mxu1 %v7135_v38 }
0x261d   :  { %v7215_v48 = vpop.f32.mrb[200].mxu1 }
0x261e   :  { %v7223_v57 = vmul.f32 %v7222_v44, %v7215_v48  ;;  %v7217_v8 = vpop.f32.mrb[201].mxu1 }
0x261f   :  { %v7218_v6 = vpop.f32.mrb[202].mxu1 }
0x2620   :  { %v7219_v43 = vpop.f32.mrb[203].mxu1  ;;  %7225 = vst.msk [vmem:[#allocation11] sm:$0x3] %vm7224_vm11, %v7223_v57 }
0x2621   :  { %9193 = shalt.err (!%p9190_p8)
}
0x2622   :  { %s11519_s11 = sld [smem:[#allocation29_spill]] }
0x2628   :  { %s9194_s12 = scalar_lea.hbm %s11519_s11, 32 }
0x2629   :  { %p9195_p9 = scmp.ne.s32.totalorder %s11519_s11, %s9194_s12  ;;  %p9198_p10 = scmp.lt.u32.totalorder %s9194_s12, %s11519_s11 }
0x262b   :  { %p9200_p11 = pnand %p9198_p10, %p9195_p9 }
0x262d   :  { %9203 = shalt.err (!%p9200_p11)
}
0x262e   :  { %7235 = dma.vmem_to_hbm [thread:$0]  %s7233_s6, 32, %s11519_s11, [#allocation5]  }
0x262f   :  { %9210 = dma.done.wait [#allocation5], 32  }
0x2630   :  { %9211 = vsyncadd [#allocation5], 4294967264 }
0x2631   :  { %7239 = vsyncpa [#allocation4], 1 }
0x2632   :  { %7240 = vsyncpa [#allocation7], 1 }
0x2633   :  { %7241 = vsyncpa [#allocation10], 1 }
0x2634   :  { %7242 = vsyncpa [#allocation5], 1 }

</bundles_post_ra>
